<compile_context>
chip_gen: v6e
topology: v6e:2x2x1
jax: 0.10.0
libtpu: 0.0.40
codegen_flags: <defaults>
</compile_context>

<pallas_src>
import functools
import inspect

import jax
import jax.numpy as jnp
import numpy as np
from jax.experimental import pallas as pl
from jax.experimental.pallas import tpu as pltpu

SCALE_VALUE = 30.0      # TLModule.scale_value
ATTEN_SCALE = 50.0      # AEAModule.scale_value (atten_scale_value)
FROM_VALUE = 0.5
VALUE_INTERVAL = 0.3
LEAKY_SLOPE = 0.2
NORM_EPS = 1e-12        # F.normalize eps
BN_EPS = 1e-5

HP = jax.lax.Precision.HIGHEST


# ----------------------------------------------------------------------------------
# small helpers / feature probes
# ----------------------------------------------------------------------------------
def _supports_single_buffering():
    if not hasattr(pl, "Buffered"):
        return False
    try:
        return "pipeline_mode" in inspect.signature(pl.BlockSpec).parameters
    except (TypeError, ValueError):
        return False


_HAS_BUFFERED = _supports_single_buffering()


def _tpu_vmem_capacity_bytes():
    try:
        cap = getattr(pltpu.get_tpu_info(), "vmem_capacity_bytes", None)
        if cap:
            return int(cap)
    except Exception:
        pass
    return 64 * 1024 * 1024   # conservative default (v7x per-core VMEM)


def _vmem_limit_bytes(needed_bytes):
    cap = _tpu_vmem_capacity_bytes()
    return int(min(max(int(1.5 * needed_bytes), 32 * 1024 * 1024), int(0.9 * cap)))


def _round_up(x, m):
    return (x + m - 1) // m * m


def _pick_col_tile(n, candidates=(512, 256, 128)):
    for c in candidates:
        if n % c == 0:
            return c
    return n   # fall back to a full-extent block (always a legal block shape)


def _leaky(x):
    return jnp.where(x > 0, x, LEAKY_SLOPE * x)


def _l2norm_rows(x):
    # x / max(||x||, eps) == x * rsqrt(max(||x||^2, eps^2))  (EUP rsqrt, no divide)
    ss = jnp.sum(x * x, axis=-1, keepdims=True)
    return x * jax.lax.rsqrt(jnp.maximum(ss, NORM_EPS * NORM_EPS))


def _l2norm_cols(x):
    ss = jnp.sum(x * x, axis=0, keepdims=True)
    return x * jax.lax.rsqrt(jnp.maximum(ss, NORM_EPS * NORM_EPS))


# ----------------------------------------------------------------------------------
# Support preprocessing kernel (runs once per forward, tiled over S*HW columns,
# channel-major so the outputs are already the (C, S*HW) operands the main kernel wants).
# ----------------------------------------------------------------------------------
def support_prep_kernel(cf_ref, bnsh_ref, supT_ref, wsupT_ref, supnT_ref):
    supT = supT_ref[...]                                            # (CP, TILE_S)
    # W = Conv2d(1x1, BN scale folded into the weight) + BN shift + LeakyReLU(0.2)
    y = jnp.dot(cf_ref[...], supT, preferred_element_type=jnp.float32, precision=HP)
    y = _leaky(y + bnsh_ref[...])
    wsupT_ref[...] = _l2norm_cols(y)        # F.normalize(W(support), dim=channel)
    supnT_ref[...] = _l2norm_cols(supT)     # F.normalize(support,    dim=channel)


# ----------------------------------------------------------------------------------
# Main kernel: one row tile of the flattened (B*HW) query positions per grid step.
#   q     : (TILE_M, CP)          query rows, channel-last, channel zero-padded
#   rhs1  : (CP, CP + SHW)        [W_fold^T | supn^T]     (grid-invariant)
#   rhs2  : (CP, P16 + SHW)       [f_psi W1^T | wsup^T]   (grid-invariant)
#   b1/w2 : (1, P16)              f_psi params; b2 folded via a constant-1 hidden column
#   seg   : (SHW, SEGN)           zero-padded 0/1 block indicator
# Output:
#   local : (TILE_M, SEGN)        block-summed attention*match scores (lane-dense store)
# ----------------------------------------------------------------------------------
def tl_main_kernel(q_ref, rhs1_ref, bnsh_ref, rhs2_ref, b1_ref, w2_ref, seg_ref,
                   local_ref, *, cp, p16):
    q = q_ref[...]                                                  # (TM, CP)

    # Fused matmul #1: q @ [W_fold^T | supn^T]  (HIGHEST: the match half is part of the
    # accuracy-sensitive output path; the W half rides in the same MXU invocation).
    out1 = jnp.dot(q, rhs1_ref[...], preferred_element_type=jnp.float32, precision=HP)
    y = out1[:, :cp]                 # 128-lane-aligned splits: no relayout copies
    raw_match = out1[:, cp:]

    wq = _l2norm_rows(_leaky(y + bnsh_ref[...]))                    # normalized W(query)

    # match = l2norm(q) @ supn^T == (q @ supn^T) * rsqrt(||q||^2)   (exact per-row scale)
    qss = jnp.sum(q * q, axis=-1, keepdims=True)
    match = raw_match * jax.lax.rsqrt(jnp.maximum(qss, NORM_EPS * NORM_EPS))

    # Fused matmul #2: wq @ [f_psi W1^T (padded) | wsup^T]
    out2 = jnp.dot(wq, rhs2_ref[...], preferred_element_type=jnp.float32, precision=HP)
    h1_pre = out2[:, :p16]
    f_x = out2[:, p16:]                                             # (TM, SHW)

    # f_psi: LeakyReLU -> dot with W2 (b2 folded into the constant-1 hidden column)
    #        -> Sigmoid -> affine clamp value.
    h1 = _leaky(h1_pre + b1_ref[...])
    psi_logit = jnp.sum(h1 * w2_ref[...], axis=-1, keepdims=True)   # (TM, 1)
    clamp_value = jax.nn.sigmoid(psi_logit) * VALUE_INTERVAL + FROM_VALUE

    # AEA attention mask (p=1 normalized): EUP sigmoid + reciprocal.
    clamp_fx = jax.nn.sigmoid(ATTEN_SCALE * (f_x - clamp_value))
    denom = jnp.maximum(jnp.sum(jnp.abs(clamp_fx), axis=-1, keepdims=True), NORM_EPS)
    attn = clamp_fx * pl.reciprocal(denom, approx=False)

    am = attn * match                                               # (TM, SHW)

    # Per-support block sum via the zero-padded 0/1 indicator -> lane-dense 128-col store.
    local_ref[...] = jnp.dot(am, seg_ref[...],
                             preferred_element_type=jnp.float32, precision=HP)


# ----------------------------------------------------------------------------------
# Wrapper
# ----------------------------------------------------------------------------------
def tl_module_forward(query_data, support_data, params, *, tile_m=None,
                      single_buffer_invariants=True):
    """query_data: (B, C, H, W), support_data: (S, C, H, W), NCHW float32."""
    B, C, H, W = query_data.shape
    S = support_data.shape[0]
    HW = H * W
    SHW = S * HW
    M = B * HW
    C16 = C // 16
    f32 = jnp.float32

    # Padded sizes: channel -> full 128-lane density / MXU depth; f_psi hidden and the
    # block-sum output are padded to 128 lanes (b2 folded into one padded column).
    CP = _round_up(max(C, 128), 128)
    P16 = _round_up(max(C16 + 1, 128), 128)
    SEGN = _round_up(max(S, 128), 128)

    single_buffer = bool(single_buffer_invariants) and _HAS_BUFFERED

    def _invariant_spec(shape):
        # grid-invariant operand: constant index_map; single-buffer it when supported
        if single_buffer:
            return pl.BlockSpec(shape, lambda i: (0, 0), pipeline_mode=pl.Buffered(1))
        return pl.BlockSpec(shape, lambda i: (0, 0))

    # ---- fold Conv2d(1x1, bias=False) + BatchNorm2d (eval / running stats) ----
    conv_w = params["conv_w"].reshape(C, C).astype(f32)             # (out, in)
    inv_std = jax.lax.rsqrt(params["bn_var"].astype(f32) + BN_EPS)
    bn_scale = params["bn_gamma"].astype(f32) * inv_std             # per out-channel
    bn_shift = params["bn_beta"].astype(f32) - params["bn_mean"].astype(f32) * bn_scale
    conv_fold = conv_w * bn_scale[:, None]                          # BN scale folded in

    conv_fold_oi = jnp.zeros((CP, CP), f32).at[:C, :C].set(conv_fold)    # (out,in): prep
    conv_fold_io = jnp.zeros((CP, CP), f32).at[:C, :C].set(conv_fold.T)  # (in,out): main
    bn_shift_row = jnp.zeros((1, CP), f32).at[0, :C].set(bn_shift)
    bn_shift_col = jnp.zeros((CP, 1), f32).at[:C, 0].set(bn_shift)

    # f_psi params, 128-lane padded; b2 folded via a constant-1 hidden column.
    w1t_pad = jnp.zeros((CP, P16), f32).at[:C, :C16].set(params["w1"].astype(f32).T)
    b1_pad = (jnp.zeros((1, P16), f32)
              .at[0, :C16].set(params["b1"].astype(f32))
              .at[0, C16].set(1.0))
    w2_pad = (jnp.zeros((1, P16), f32)
              .at[0, :C16].set(params["w2"].astype(f32).reshape(C16))
              .at[0, C16].set(params["b2"].astype(f32)[0]))

    # zero-padded block indicator: seg[j, k] = 1 iff column j belongs to support item k.
    seg = (jnp.arange(SHW)[:, None] // HW
           == jnp.arange(SEGN)[None, :]).astype(f32)                # (SHW, SEGN)

    # ---- support side: channel-major, channel zero-padded ----
    supT = (support_data.astype(f32).reshape(S, C, HW)
            .transpose(1, 0, 2).reshape(C, SHW))
    supT = jnp.pad(supT, ((0, CP - C), (0, 0)))                     # (CP, SHW)

    TILE_S = _pick_col_tile(SHW)
    prep_needed = 4 * (2 * CP * CP + 2 * CP + 3 * 2 * CP * TILE_S)
    wsupT, supnT = pl.pallas_call(
        support_prep_kernel,
        out_shape=(jax.ShapeDtypeStruct((CP, SHW), f32),
                   jax.ShapeDtypeStruct((CP, SHW), f32)),
        grid_spec=pltpu.PrefetchScalarGridSpec(
            num_scalar_prefetch=0,
            grid=(SHW // TILE_S,),
            in_specs=[
                _invariant_spec((CP, CP)),                           # folded conv weight
                _invariant_spec((CP, 1)),                            # BN shift (column)
                pl.BlockSpec((CP, TILE_S), lambda i: (0, i)),        # support column tile
            ],
            out_specs=(pl.BlockSpec((CP, TILE_S), lambda i: (0, i)),
                       pl.BlockSpec((CP, TILE_S), lambda i: (0, i))),
        ),
        compiler_params=pltpu.CompilerParams(
            dimension_semantics=("parallel",),
            vmem_limit_bytes=_vmem_limit_bytes(prep_needed)),
    )(conv_fold_oi, bn_shift_col, supT)

    # fused RHS slabs (built once per forward; splits are 128-lane aligned in-kernel)
    rhs1 = jnp.concatenate([conv_fold_io, supnT], axis=1)            # (CP, CP + SHW)
    rhs2 = jnp.concatenate([w1t_pad, wsupT], axis=1)                 # (CP, P16 + SHW)

    # ---- query rows: channel-last, channel zero-padded, row-padded to the tile ----
    q = (query_data.astype(f32).reshape(B, C, HW)
         .transpose(0, 2, 1).reshape(M, C))
    q = jnp.pad(q, ((0, 0), (0, CP - C)))

    if tile_m is None:
        # 512-row tiles on 128-MiB-VMEM parts (v5e/v6e), 256 on v7x (64 MiB/core);
        # never fewer than 2 grid steps when M allows, so both v7x cores get work.
        tile_m = 512 if _tpu_vmem_capacity_bytes() >= (100 << 20) else 256
    TILE_M = int(min(tile_m, _round_up(max(pl.cdiv(M, 2), 8), 8)))
    M_pad = _round_up(M, TILE_M)
    if M_pad != M:
        q = jnp.pad(q, ((0, M_pad - M), (0, 0)))   # zero rows stay finite, sliced off later

    main_needed = 4 * (2 * TILE_M * CP + 2 * TILE_M * SEGN
                       + 2 * (CP * (CP + SHW) + CP * (P16 + SHW)
                              + SHW * SEGN + CP + 2 * P16))

    local_pad = pl.pallas_call(
        functools.partial(tl_main_kernel, cp=CP, p16=P16),
        out_shape=jax.ShapeDtypeStruct((M_pad, SEGN), f32),
        grid_spec=pltpu.PrefetchScalarGridSpec(
            num_scalar_prefetch=0,
            grid=(M_pad // TILE_M,),
            in_specs=[
                pl.BlockSpec((TILE_M, CP), lambda i: (i, 0)),        # query row tile
                _invariant_spec((CP, CP + SHW)),                     # [W^T | supn^T]
                _invariant_spec((1, CP)),                            # BN shift (row)
                _invariant_spec((CP, P16 + SHW)),                    # [W1^T | wsup^T]
                _invariant_spec((1, P16)),                           # b1 (+ const-1 col)
                _invariant_spec((1, P16)),                           # W2 (+ b2 col)
                _invariant_spec((SHW, SEGN)),                        # block indicator
            ],
            out_specs=pl.BlockSpec((TILE_M, SEGN), lambda i: (i, 0)),
        ),
        compiler_params=pltpu.CompilerParams(
            dimension_semantics=("parallel",),
            vmem_limit_bytes=_vmem_limit_bytes(main_needed)),
    )(q, rhs1, bn_shift_row, rhs2, b1_pad, w2_pad, seg)

    # tiny epilogue in XLA: slice padding, regroup batch, transpose, mean
    fl = local_pad[:M, :S].reshape(B, HW, S)
    final_local_score = jnp.transpose(fl, (0, 2, 1))                  # (B, S, HW)
    final_score = jnp.mean(final_local_score, axis=-1) * SCALE_VALUE  # (B, S)
    return final_score, final_local_score


# ----------------------------------------------------------------------------------
# Pure-jnp mirror of the PyTorch forward (validation)
# ----------------------------------------------------------------------------------
def tl_module_reference(query_data, support_data, params):
    B, C, H, W = query_data.shape
    S = support_data.shape[0]
    HW = H * W

    conv_w = params["conv_w"].reshape(C, C)
    inv_std = 1.0 / jnp.sqrt(params["bn_var"] + BN_EPS)
    bn_scale = params["bn_gamma"] * inv_std
    bn_shift = params["bn_beta"] - params["bn_mean"] * bn_scale

    def W_fn(x):  # NCHW
        y = jnp.einsum("oc,nchw->nohw", conv_w, x, precision=HP)
        y = y * bn_scale[None, :, None, None] + bn_shift[None, :, None, None]
        return jnp.where(y > 0, y, LEAKY_SLOPE * y)

    def l2n(x, axis):
        n = jnp.sqrt(jnp.sum(x * x, axis=axis, keepdims=True))
        return x / jnp.maximum(n, NORM_EPS)

    sup_exp = jnp.broadcast_to(support_data[None], (B, S, C, H, W)).reshape(B * S, C, H, W)
    w_query = W_fn(query_data).reshape(B, C, HW).transpose(0, 2, 1)
    w_support = W_fn(sup_exp).reshape(B, S, C, HW).transpose(0, 2, 1, 3).reshape(B, C, S * HW)
    w_query = l2n(w_query, 2)
    w_support = l2n(w_support, 1)
    f_x = jnp.matmul(w_query, w_support, precision=HP)

    x = w_query.reshape(B * HW, C)
    h1 = jnp.matmul(x, params["w1"].T, precision=HP) + params["b1"]
    h1 = jnp.where(h1 > 0, h1, LEAKY_SLOPE * h1)
    psi = jax.nn.sigmoid(jnp.matmul(h1, params["w2"].T, precision=HP) + params["b2"])
    clamp_value = (psi * VALUE_INTERVAL + FROM_VALUE).reshape(B, HW, 1)
    clamp_fx = jax.nn.sigmoid(ATTEN_SCALE * (f_x - clamp_value))
    attn = clamp_fx / jnp.maximum(jnp.sum(jnp.abs(clamp_fx), axis=-1, keepdims=True), NORM_EPS)

    qd = l2n(query_data.reshape(B, C, HW).transpose(0, 2, 1), 2)
    sd = l2n(sup_exp.reshape(B, S, C, HW).transpose(0, 2, 1, 3).reshape(B, C, S * HW), 1)
    match = jnp.matmul(qd, sd, precision=HP)

    ams = (attn * match).reshape(B, HW, S, HW).transpose(0, 2, 1, 3)
    final_local = jnp.sum(ams, axis=-1)
    final_score = jnp.mean(final_local, axis=-1) * SCALE_VALUE
    return final_score, final_local


if __name__ == "__main__":
    # small shapes consistent with the module: b=2 query items, s=3 support items,
    # inplanes=64 channels (>=16 for the c//16 bottleneck), 4x4 spatial.
    B, S, C, H, W = 2, 3, 64, 4, 4
    C16 = C // 16

    key = jax.random.PRNGKey(0)
    ks = jax.random.split(key, 11)
    query = jax.random.normal(ks[0], (B, C, H, W), jnp.float32)
    support = jax.random.normal(ks[1], (S, C, H, W), jnp.float32)

    params = {
        "conv_w": 0.1 * jax.random.normal(ks[2], (C, C, 1, 1), jnp.float32),
        "bn_gamma": 1.0 + 0.1 * jax.random.normal(ks[3], (C,), jnp.float32),
        "bn_beta": 0.1 * jax.random.normal(ks[4], (C,), jnp.float32),
        "bn_mean": 0.1 * jax.random.normal(ks[5], (C,), jnp.float32),
        "bn_var": 1.0 + 0.5 * jax.random.uniform(ks[6], (C,), jnp.float32),
        "w1": 0.1 * jax.random.normal(ks[7], (C16, C), jnp.float32),
        "b1": 0.1 * jax.random.normal(ks[8], (C16,), jnp.float32),
        "w2": 0.1 * jax.random.normal(ks[9], (1, C16), jnp.float32),
        "b2": 0.1 * jax.random.normal(ks[10], (1,), jnp.float32),
    }

    fwd = jax.jit(tl_module_forward)
    try:
        final_score, final_local = fwd(query, support, params)
        jax.block_until_ready((final_score, final_local))
    except Exception:
        # Defensive fallback: default double-buffering if per-BlockSpec buffer counts
        # (pl.Buffered(1)) are not supported by the installed jax / Mosaic version.
        fwd = jax.jit(functools.partial(tl_module_forward, single_buffer_invariants=False))
        final_score, final_local = fwd(query, support, params)
        jax.block_until_ready((final_score, final_local))

    ref_score, ref_local = tl_module_reference(query, support, params)
    np.testing.assert_allclose(np.asarray(final_score), np.asarray(ref_score),
                               rtol=1e-3, atol=2e-4)
    np.testing.assert_allclose(np.asarray(final_local), np.asarray(ref_local),
                               rtol=1e-3, atol=2e-4)

    assert final_score.shape == (B, S)
    assert final_local.shape == (B, S, H * W)
    print("KERNEL_OK")
</pallas_src>

<mosaic_0001>
module attributes {stable_mosaic.version = 11 : i64} {
  func.func @support_prep_kernel(%arg0: i32, %arg1: memref<128x128xf32, #tpu.memory_space<vmem>>, %arg2: memref<128x1xf32, #tpu.memory_space<vmem>>, %arg3: memref<128x48xf32, #tpu.memory_space<vmem>>, %arg4: memref<128x48xf32, #tpu.memory_space<vmem>>, %arg5: memref<128x48xf32, #tpu.memory_space<vmem>>) attributes {dimension_semantics = [#tpu.dimension_semantics<parallel>], iteration_bounds = array<i64: 1>, scalar_prefetch = 0 : i64, scratch_operands = 0 : i64, tpu.core_type = #tpu.core_type<tc>, window_params = [{pipeline_mode = #tpu.pipeline_mode<synchronous>, transform_indices = @transform_0, window_bounds = array<i64: 128, 128>}, {pipeline_mode = #tpu.pipeline_mode<synchronous>, transform_indices = @transform_1, window_bounds = array<i64: 128, 1>}, {transform_indices = @transform_2, window_bounds = array<i64: 128, 48>}, {transform_indices = @transform_3, window_bounds = array<i64: 128, 48>}, {transform_indices = @transform_4, window_bounds = array<i64: 128, 48>}]} {
    %c0 = arith.constant 0 : index
    %c0_0 = arith.constant 0 : index
    %0 = vector.load %arg3[%c0, %c0_0] : memref<128x48xf32, #tpu.memory_space<vmem>>, vector<128x48xf32>
    %c0_1 = arith.constant 0 : index
    %c0_2 = arith.constant 0 : index
    %1 = vector.load %arg1[%c0_1, %c0_2] : memref<128x128xf32, #tpu.memory_space<vmem>>, vector<128x128xf32>
    %cst = arith.constant dense<0.000000e+00> : vector<128x48xf32>
    %2 = tpu.matmul %1, %0, %cst {dimension_numbers = #tpu.dot_dimension_numbers<[1], [0], [0], [1], [0, 0, 1, 1], [], []>, precision = #tpu.contract_precision<fp32>} : vector<128x128xf32>, vector<128x48xf32>, vector<128x48xf32> -> vector<128x48xf32>
    %c0_3 = arith.constant 0 : index
    %c0_4 = arith.constant 0 : index
    %3 = vector.load %arg2[%c0_3, %c0_4] : memref<128x1xf32, #tpu.memory_space<vmem>>, vector<128x1xf32>
    %4 = vector.broadcast %3 : vector<128x1xf32> to vector<128x48xf32>
    %5 = arith.addf %2, %4 : vector<128x48xf32>
    %cst_5 = arith.constant 0.000000e+00 : f32
    %6 = vector.broadcast %cst_5 : f32 to vector<128x48xf32>
    %7 = arith.cmpf ogt, %5, %6 : vector<128x48xf32>
    %cst_6 = arith.constant 2.000000e-01 : f32
    %8 = vector.broadcast %cst_6 : f32 to vector<128x48xf32>
    %9 = arith.mulf %8, %5 : vector<128x48xf32>
    %10 = arith.select %7, %5, %9 : vector<128x48xi1>, vector<128x48xf32>
    %11 = arith.mulf %10, %10 : vector<128x48xf32>
    %cst_7 = arith.constant dense<0.000000e+00> : vector<48xf32>
    %12 = vector.multi_reduction <add>, %11, %cst_7 [0] : vector<128x48xf32> to vector<48xf32>
    %13 = vector.shape_cast %12 : vector<48xf32> to vector<1x48xf32>
    %cst_8 = arith.constant 1.000000e-24 : f32
    %14 = vector.broadcast %cst_8 : f32 to vector<1x48xf32>
    %15 = arith.maximumf %13, %14 : vector<1x48xf32>
    %16 = math.rsqrt %15 : vector<1x48xf32>
    %17 = vector.broadcast %16 : vector<1x48xf32> to vector<128x48xf32>
    %18 = arith.mulf %10, %17 : vector<128x48xf32>
    %c0_9 = arith.constant 0 : index
    %c0_10 = arith.constant 0 : index
    %19 = vector.load %arg4[%c0_9, %c0_10] : memref<128x48xf32, #tpu.memory_space<vmem>>, vector<128x48xf32>
    tpu.vector_store %arg4[%c0_9, %c0_10], %18 {strides = array<i32>} : memref<128x48xf32, #tpu.memory_space<vmem>>, vector<128x48xf32>,
    %20 = arith.mulf %0, %0 : vector<128x48xf32>
    %cst_11 = arith.constant dense<0.000000e+00> : vector<48xf32>
    %21 = vector.multi_reduction <add>, %20, %cst_11 [0] : vector<128x48xf32> to vector<48xf32>
    %22 = vector.shape_cast %21 : vector<48xf32> to vector<1x48xf32>
    %cst_12 = arith.constant 1.000000e-24 : f32
    %23 = vector.broadcast %cst_12 : f32 to vector<1x48xf32>
    %24 = arith.maximumf %22, %23 : vector<1x48xf32>
    %25 = math.rsqrt %24 : vector<1x48xf32>
    %26 = vector.broadcast %25 : vector<1x48xf32> to vector<128x48xf32>
    %27 = arith.mulf %0, %26 : vector<128x48xf32>
    %c0_13 = arith.constant 0 : index
    %c0_14 = arith.constant 0 : index
    %28 = vector.load %arg5[%c0_13, %c0_14] : memref<128x48xf32, #tpu.memory_space<vmem>>, vector<128x48xf32>
    tpu.vector_store %arg5[%c0_13, %c0_14], %27 {strides = array<i32>} : memref<128x48xf32, #tpu.memory_space<vmem>>, vector<128x48xf32>,
    return
  }
  func.func @transform_0(%arg0: i32) -> (i32, i32) {
    %c0_i32 = arith.constant 0 : i32
    %c0_i32_0 = arith.constant 0 : i32
    %c0_i32_1 = arith.constant 0 : i32
    return %c0_i32, %c0_i32_0 : i32, i32
  }
  func.func @transform_1(%arg0: i32) -> (i32, i32) {
    %c0_i32 = arith.constant 0 : i32
    %c0_i32_0 = arith.constant 0 : i32
    %c0_i32_1 = arith.constant 0 : i32
    return %c0_i32, %c0_i32_0 : i32, i32
  }
  func.func @transform_2(%arg0: i32) -> (i32, i32) {
    %c0_i32 = arith.constant 0 : i32
    %c0_i32_0 = arith.constant 0 : i32
    return %c0_i32, %arg0 : i32, i32
  }
  func.func @transform_3(%arg0: i32) -> (i32, i32) {
    %c0_i32 = arith.constant 0 : i32
    %c0_i32_0 = arith.constant 0 : i32
    return %c0_i32, %arg0 : i32, i32
  }
  func.func @transform_4(%arg0: i32) -> (i32, i32) {
    %c0_i32 = arith.constant 0 : i32
    %c0_i32_0 = arith.constant 0 : i32
    return %c0_i32, %arg0 : i32, i32
  }
}

module attributes {stable_mosaic.version = 11 : i64} {
  func.func @tl_main_kernel(%arg0: i32, %arg1: memref<16x128xf32, #tpu.memory_space<vmem>>, %arg2: memref<128x176xf32, #tpu.memory_space<vmem>>, %arg3: memref<1x128xf32, #tpu.memory_space<vmem>>, %arg4: memref<128x176xf32, #tpu.memory_space<vmem>>, %arg5: memref<1x128xf32, #tpu.memory_space<vmem>>, %arg6: memref<1x128xf32, #tpu.memory_space<vmem>>, %arg7: memref<48x128xf32, #tpu.memory_space<vmem>>, %arg8: memref<16x128xf32, #tpu.memory_space<vmem>>) attributes {dimension_semantics = [#tpu.dimension_semantics<parallel>], iteration_bounds = array<i64: 2>, scalar_prefetch = 0 : i64, scratch_operands = 0 : i64, tpu.core_type = #tpu.core_type<tc>, window_params = [{transform_indices = @transform_0, window_bounds = array<i64: 16, 128>}, {pipeline_mode = #tpu.pipeline_mode<synchronous>, transform_indices = @transform_1, window_bounds = array<i64: 128, 176>}, {pipeline_mode = #tpu.pipeline_mode<synchronous>, transform_indices = @transform_2, window_bounds = array<i64: 1, 128>}, {pipeline_mode = #tpu.pipeline_mode<synchronous>, transform_indices = @transform_3, window_bounds = array<i64: 128, 176>}, {pipeline_mode = #tpu.pipeline_mode<synchronous>, transform_indices = @transform_4, window_bounds = array<i64: 1, 128>}, {pipeline_mode = #tpu.pipeline_mode<synchronous>, transform_indices = @transform_5, window_bounds = array<i64: 1, 128>}, {pipeline_mode = #tpu.pipeline_mode<synchronous>, transform_indices = @transform_6, window_bounds = array<i64: 48, 128>}, {transform_indices = @transform_7, window_bounds = array<i64: 16, 128>}]} {
    %c0 = arith.constant 0 : index
    %c0_0 = arith.constant 0 : index
    %0 = vector.load %arg1[%c0, %c0_0] : memref<16x128xf32, #tpu.memory_space<vmem>>, vector<16x128xf32>
    %c0_1 = arith.constant 0 : index
    %c0_2 = arith.constant 0 : index
    %1 = vector.load %arg2[%c0_1, %c0_2] : memref<128x176xf32, #tpu.memory_space<vmem>>, vector<128x176xf32>
    %cst = arith.constant dense<0.000000e+00> : vector<16x176xf32>
    %2 = tpu.matmul %0, %1, %cst {dimension_numbers = #tpu.dot_dimension_numbers<[1], [0], [0], [1], [0, 0, 1, 1], [], []>, precision = #tpu.contract_precision<fp32>} : vector<16x128xf32>, vector<128x176xf32>, vector<16x176xf32> -> vector<16x176xf32>
    %3 = vector.extract_strided_slice %2 {offsets = [0, 0], sizes = [16, 128], strides = [1, 1]} : vector<16x176xf32> to vector<16x128xf32>
    %4 = vector.extract_strided_slice %2 {offsets = [0, 128], sizes = [16, 48], strides = [1, 1]} : vector<16x176xf32> to vector<16x48xf32>
    %c0_3 = arith.constant 0 : index
    %c0_4 = arith.constant 0 : index
    %5 = vector.load %arg3[%c0_3, %c0_4] : memref<1x128xf32, #tpu.memory_space<vmem>>, vector<1x128xf32>
    %6 = vector.broadcast %5 : vector<1x128xf32> to vector<16x128xf32>
    %7 = arith.addf %3, %6 : vector<16x128xf32>
    %cst_5 = arith.constant 0.000000e+00 : f32
    %8 = vector.broadcast %cst_5 : f32 to vector<16x128xf32>
    %9 = arith.cmpf ogt, %7, %8 : vector<16x128xf32>
    %cst_6 = arith.constant 2.000000e-01 : f32
    %10 = vector.broadcast %cst_6 : f32 to vector<16x128xf32>
    %11 = arith.mulf %10, %7 : vector<16x128xf32>
    %12 = arith.select %9, %7, %11 : vector<16x128xi1>, vector<16x128xf32>
    %13 = arith.mulf %12, %12 : vector<16x128xf32>
    %cst_7 = arith.constant dense<0.000000e+00> : vector<16xf32>
    %14 = vector.multi_reduction <add>, %13, %cst_7 [1] : vector<16x128xf32> to vector<16xf32>
    %15 = vector.shape_cast %14 : vector<16xf32> to vector<16x1xf32>
    %cst_8 = arith.constant 1.000000e-24 : f32
    %16 = vector.broadcast %cst_8 : f32 to vector<16x1xf32>
    %17 = arith.maximumf %15, %16 : vector<16x1xf32>
    %18 = math.rsqrt %17 : vector<16x1xf32>
    %19 = vector.broadcast %18 : vector<16x1xf32> to vector<16x128xf32>
    %20 = arith.mulf %12, %19 : vector<16x128xf32>
    %21 = arith.mulf %0, %0 : vector<16x128xf32>
    %cst_9 = arith.constant dense<0.000000e+00> : vector<16xf32>
    %22 = vector.multi_reduction <add>, %21, %cst_9 [1] : vector<16x128xf32> to vector<16xf32>
    %23 = vector.shape_cast %22 : vector<16xf32> to vector<16x1xf32>
    %cst_10 = arith.constant 1.000000e-24 : f32
    %24 = vector.broadcast %cst_10 : f32 to vector<16x1xf32>
    %25 = arith.maximumf %23, %24 : vector<16x1xf32>
    %26 = math.rsqrt %25 : vector<16x1xf32>
    %27 = vector.broadcast %26 : vector<16x1xf32> to vector<16x48xf32>
    %28 = arith.mulf %4, %27 : vector<16x48xf32>
    %c0_11 = arith.constant 0 : index
    %c0_12 = arith.constant 0 : index
    %29 = vector.load %arg4[%c0_11, %c0_12] : memref<128x176xf32, #tpu.memory_space<vmem>>, vector<128x176xf32>
    %cst_13 = arith.constant dense<0.000000e+00> : vector<16x176xf32>
    %30 = tpu.matmul %20, %29, %cst_13 {dimension_numbers = #tpu.dot_dimension_numbers<[1], [0], [0], [1], [0, 0, 1, 1], [], []>, precision = #tpu.contract_precision<fp32>} : vector<16x128xf32>, vector<128x176xf32>, vector<16x176xf32> -> vector<16x176xf32>
    %31 = vector.extract_strided_slice %30 {offsets = [0, 0], sizes = [16, 128], strides = [1, 1]} : vector<16x176xf32> to vector<16x128xf32>
    %32 = vector.extract_strided_slice %30 {offsets = [0, 128], sizes = [16, 48], strides = [1, 1]} : vector<16x176xf32> to vector<16x48xf32>
    %c0_14 = arith.constant 0 : index
    %c0_15 = arith.constant 0 : index
    %33 = vector.load %arg5[%c0_14, %c0_15] : memref<1x128xf32, #tpu.memory_space<vmem>>, vector<1x128xf32>
    %34 = vector.broadcast %33 : vector<1x128xf32> to vector<16x128xf32>
    %35 = arith.addf %31, %34 : vector<16x128xf32>
    %cst_16 = arith.constant 0.000000e+00 : f32
    %36 = vector.broadcast %cst_16 : f32 to vector<16x128xf32>
    %37 = arith.cmpf ogt, %35, %36 : vector<16x128xf32>
    %cst_17 = arith.constant 2.000000e-01 : f32
    %38 = vector.broadcast %cst_17 : f32 to vector<16x128xf32>
    %39 = arith.mulf %38, %35 : vector<16x128xf32>
    %40 = arith.select %37, %35, %39 : vector<16x128xi1>, vector<16x128xf32>
    %c0_18 = arith.constant 0 : index
    %c0_19 = arith.constant 0 : index
    %41 = vector.load %arg6[%c0_18, %c0_19] : memref<1x128xf32, #tpu.memory_space<vmem>>, vector<1x128xf32>
    %42 = vector.broadcast %41 : vector<1x128xf32> to vector<16x128xf32>
    %43 = arith.mulf %40, %42 : vector<16x128xf32>
    %cst_20 = arith.constant dense<0.000000e+00> : vector<16xf32>
    %44 = vector.multi_reduction <add>, %43, %cst_20 [1] : vector<16x128xf32> to vector<16xf32>
    %45 = vector.shape_cast %44 : vector<16xf32> to vector<16x1xf32>
    %46 = arith.negf %45 : vector<16x1xf32>
    %47 = math.exp %46 : vector<16x1xf32>
    %cst_21 = arith.constant 1.000000e+00 : f32
    %48 = vector.broadcast %cst_21 : f32 to vector<16x1xf32>
    %49 = arith.addf %48, %47 : vector<16x1xf32>
    %50 = arith.divf %48, %49 : vector<16x1xf32>
    %cst_22 = arith.constant 3.000000e-01 : f32
    %51 = vector.broadcast %cst_22 : f32 to vector<16x1xf32>
    %52 = arith.mulf %50, %51 : vector<16x1xf32>
    %cst_23 = arith.constant 5.000000e-01 : f32
    %53 = vector.broadcast %cst_23 : f32 to vector<16x1xf32>
    %54 = arith.addf %52, %53 : vector<16x1xf32>
    %55 = vector.broadcast %54 : vector<16x1xf32> to vector<16x48xf32>
    %56 = arith.subf %32, %55 : vector<16x48xf32>
    %cst_24 = arith.constant 5.000000e+01 : f32
    %57 = vector.broadcast %cst_24 : f32 to vector<16x48xf32>
    %58 = arith.mulf %57, %56 : vector<16x48xf32>
    %59 = arith.negf %58 : vector<16x48xf32>
    %60 = math.exp %59 : vector<16x48xf32>
    %cst_25 = arith.constant 1.000000e+00 : f32
    %61 = vector.broadcast %cst_25 : f32 to vector<16x48xf32>
    %62 = arith.addf %61, %60 : vector<16x48xf32>
    %63 = arith.divf %61, %62 : vector<16x48xf32>
    %64 = math.absf %63 : vector<16x48xf32>
    %cst_26 = arith.constant dense<0.000000e+00> : vector<16xf32>
    %65 = vector.multi_reduction <add>, %64, %cst_26 [1] : vector<16x48xf32> to vector<16xf32>
    %66 = vector.shape_cast %65 : vector<16xf32> to vector<16x1xf32>
    %cst_27 = arith.constant 9.99999996E-13 : f32
    %67 = vector.broadcast %cst_27 : f32 to vector<16x1xf32>
    %68 = arith.maximumf %66, %67 : vector<16x1xf32>
    %69 = tpu.reciprocal %68 : vector<16x1xf32> -> vector<16x1xf32>
    %70 = vector.broadcast %69 : vector<16x1xf32> to vector<16x48xf32>
    %71 = arith.mulf %63, %70 : vector<16x48xf32>
    %72 = arith.mulf %71, %28 : vector<16x48xf32>
    %c0_28 = arith.constant 0 : index
    %c0_29 = arith.constant 0 : index
    %73 = vector.load %arg7[%c0_28, %c0_29] : memref<48x128xf32, #tpu.memory_space<vmem>>, vector<48x128xf32>
    %cst_30 = arith.constant dense<0.000000e+00> : vector<16x128xf32>
    %74 = tpu.matmul %72, %73, %cst_30 {dimension_numbers = #tpu.dot_dimension_numbers<[1], [0], [0], [1], [0, 0, 1, 1], [], []>, precision = #tpu.contract_precision<fp32>} : vector<16x48xf32>, vector<48x128xf32>, vector<16x128xf32> -> vector<16x128xf32>
    %c0_31 = arith.constant 0 : index
    %c0_32 = arith.constant 0 : index
    %75 = vector.load %arg8[%c0_31, %c0_32] : memref<16x128xf32, #tpu.memory_space<vmem>>, vector<16x128xf32>
    tpu.vector_store %arg8[%c0_31, %c0_32], %74 {strides = array<i32>} : memref<16x128xf32, #tpu.memory_space<vmem>>, vector<16x128xf32>,
    return
  }
  func.func @transform_0(%arg0: i32) -> (i32, i32) {
    %c0_i32 = arith.constant 0 : i32
    %c0_i32_0 = arith.constant 0 : i32
    return %arg0, %c0_i32 : i32, i32
  }
  func.func @transform_1(%arg0: i32) -> (i32, i32) {
    %c0_i32 = arith.constant 0 : i32
    %c0_i32_0 = arith.constant 0 : i32
    %c0_i32_1 = arith.constant 0 : i32
    return %c0_i32, %c0_i32_0 : i32, i32
  }
  func.func @transform_2(%arg0: i32) -> (i32, i32) {
    %c0_i32 = arith.constant 0 : i32
    %c0_i32_0 = arith.constant 0 : i32
    %c0_i32_1 = arith.constant 0 : i32
    return %c0_i32, %c0_i32_0 : i32, i32
  }
  func.func @transform_3(%arg0: i32) -> (i32, i32) {
    %c0_i32 = arith.constant 0 : i32
    %c0_i32_0 = arith.constant 0 : i32
    %c0_i32_1 = arith.constant 0 : i32
    return %c0_i32, %c0_i32_0 : i32, i32
  }
  func.func @transform_4(%arg0: i32) -> (i32, i32) {
    %c0_i32 = arith.constant 0 : i32
    %c0_i32_0 = arith.constant 0 : i32
    %c0_i32_1 = arith.constant 0 : i32
    return %c0_i32, %c0_i32_0 : i32, i32
  }
  func.func @transform_5(%arg0: i32) -> (i32, i32) {
    %c0_i32 = arith.constant 0 : i32
    %c0_i32_0 = arith.constant 0 : i32
    %c0_i32_1 = arith.constant 0 : i32
    return %c0_i32, %c0_i32_0 : i32, i32
  }
  func.func @transform_6(%arg0: i32) -> (i32, i32) {
    %c0_i32 = arith.constant 0 : i32
    %c0_i32_0 = arith.constant 0 : i32
    %c0_i32_1 = arith.constant 0 : i32
    return %c0_i32, %c0_i32_0 : i32, i32
  }
  func.func @transform_7(%arg0: i32) -> (i32, i32) {
    %c0_i32 = arith.constant 0 : i32
    %c0_i32_0 = arith.constant 0 : i32
    return %arg0, %c0_i32 : i32, i32
  }
}

module attributes {stable_mosaic.version = 11 : i64} {
  func.func @support_prep_kernel(%arg0: i32, %arg1: memref<128x128xf32, #tpu.memory_space<vmem>>, %arg2: memref<128x1xf32, #tpu.memory_space<vmem>>, %arg3: memref<128x48xf32, #tpu.memory_space<vmem>>, %arg4: memref<128x48xf32, #tpu.memory_space<vmem>>, %arg5: memref<128x48xf32, #tpu.memory_space<vmem>>) attributes {dimension_semantics = [#tpu.dimension_semantics<parallel>], iteration_bounds = array<i64: 1>, scalar_prefetch = 0 : i64, scratch_operands = 0 : i64, tpu.core_type = #tpu.core_type<tc>, window_params = [{pipeline_mode = #tpu.pipeline_mode<synchronous>, transform_indices = @transform_0, window_bounds = array<i64: 128, 128>}, {pipeline_mode = #tpu.pipeline_mode<synchronous>, transform_indices = @transform_1, window_bounds = array<i64: 128, 1>}, {transform_indices = @transform_2, window_bounds = array<i64: 128, 48>}, {transform_indices = @transform_3, window_bounds = array<i64: 128, 48>}, {transform_indices = @transform_4, window_bounds = array<i64: 128, 48>}]} {
    %c0 = arith.constant 0 : index
    %c0_0 = arith.constant 0 : index
    %0 = vector.load %arg3[%c0, %c0_0] : memref<128x48xf32, #tpu.memory_space<vmem>>, vector<128x48xf32>
    %c0_1 = arith.constant 0 : index
    %c0_2 = arith.constant 0 : index
    %1 = vector.load %arg1[%c0_1, %c0_2] : memref<128x128xf32, #tpu.memory_space<vmem>>, vector<128x128xf32>
    %cst = arith.constant dense<0.000000e+00> : vector<128x48xf32>
    %2 = tpu.matmul %1, %0, %cst {dimension_numbers = #tpu.dot_dimension_numbers<[1], [0], [0], [1], [0, 0, 1, 1], [], []>, precision = #tpu.contract_precision<fp32>} : vector<128x128xf32>, vector<128x48xf32>, vector<128x48xf32> -> vector<128x48xf32>
    %c0_3 = arith.constant 0 : index
    %c0_4 = arith.constant 0 : index
    %3 = vector.load %arg2[%c0_3, %c0_4] : memref<128x1xf32, #tpu.memory_space<vmem>>, vector<128x1xf32>
    %4 = vector.broadcast %3 : vector<128x1xf32> to vector<128x48xf32>
    %5 = arith.addf %2, %4 : vector<128x48xf32>
    %cst_5 = arith.constant 0.000000e+00 : f32
    %6 = vector.broadcast %cst_5 : f32 to vector<128x48xf32>
    %7 = arith.cmpf ogt, %5, %6 : vector<128x48xf32>
    %cst_6 = arith.constant 2.000000e-01 : f32
    %8 = vector.broadcast %cst_6 : f32 to vector<128x48xf32>
    %9 = arith.mulf %8, %5 : vector<128x48xf32>
    %10 = arith.select %7, %5, %9 : vector<128x48xi1>, vector<128x48xf32>
    %11 = arith.mulf %10, %10 : vector<128x48xf32>
    %cst_7 = arith.constant dense<0.000000e+00> : vector<48xf32>
    %12 = vector.multi_reduction <add>, %11, %cst_7 [0] : vector<128x48xf32> to vector<48xf32>
    %13 = vector.shape_cast %12 : vector<48xf32> to vector<1x48xf32>
    %cst_8 = arith.constant 1.000000e-24 : f32
    %14 = vector.broadcast %cst_8 : f32 to vector<1x48xf32>
    %15 = arith.maximumf %13, %14 : vector<1x48xf32>
    %16 = math.rsqrt %15 : vector<1x48xf32>
    %17 = vector.broadcast %16 : vector<1x48xf32> to vector<128x48xf32>
    %18 = arith.mulf %10, %17 : vector<128x48xf32>
    %c0_9 = arith.constant 0 : index
    %c0_10 = arith.constant 0 : index
    %19 = vector.load %arg4[%c0_9, %c0_10] : memref<128x48xf32, #tpu.memory_space<vmem>>, vector<128x48xf32>
    tpu.vector_store %arg4[%c0_9, %c0_10], %18 {strides = array<i32>} : memref<128x48xf32, #tpu.memory_space<vmem>>, vector<128x48xf32>,
    %20 = arith.mulf %0, %0 : vector<128x48xf32>
    %cst_11 = arith.constant dense<0.000000e+00> : vector<48xf32>
    %21 = vector.multi_reduction <add>, %20, %cst_11 [0] : vector<128x48xf32> to vector<48xf32>
    %22 = vector.shape_cast %21 : vector<48xf32> to vector<1x48xf32>
    %cst_12 = arith.constant 1.000000e-24 : f32
    %23 = vector.broadcast %cst_12 : f32 to vector<1x48xf32>
    %24 = arith.maximumf %22, %23 : vector<1x48xf32>
    %25 = math.rsqrt %24 : vector<1x48xf32>
    %26 = vector.broadcast %25 : vector<1x48xf32> to vector<128x48xf32>
    %27 = arith.mulf %0, %26 : vector<128x48xf32>
    %c0_13 = arith.constant 0 : index
    %c0_14 = arith.constant 0 : index
    %28 = vector.load %arg5[%c0_13, %c0_14] : memref<128x48xf32, #tpu.memory_space<vmem>>, vector<128x48xf32>
    tpu.vector_store %arg5[%c0_13, %c0_14], %27 {strides = array<i32>} : memref<128x48xf32, #tpu.memory_space<vmem>>, vector<128x48xf32>,
    return
  }
  func.func @transform_0(%arg0: i32) -> (i32, i32) {
    %c0_i32 = arith.constant 0 : i32
    %c0_i32_0 = arith.constant 0 : i32
    %c0_i32_1 = arith.constant 0 : i32
    return %c0_i32, %c0_i32_0 : i32, i32
  }
  func.func @transform_1(%arg0: i32) -> (i32, i32) {
    %c0_i32 = arith.constant 0 : i32
    %c0_i32_0 = arith.constant 0 : i32
    %c0_i32_1 = arith.constant 0 : i32
    return %c0_i32, %c0_i32_0 : i32, i32
  }
  func.func @transform_2(%arg0: i32) -> (i32, i32) {
    %c0_i32 = arith.constant 0 : i32
    %c0_i32_0 = arith.constant 0 : i32
    return %c0_i32, %arg0 : i32, i32
  }
  func.func @transform_3(%arg0: i32) -> (i32, i32) {
    %c0_i32 = arith.constant 0 : i32
    %c0_i32_0 = arith.constant 0 : i32
    return %c0_i32, %arg0 : i32, i32
  }
  func.func @transform_4(%arg0: i32) -> (i32, i32) {
    %c0_i32 = arith.constant 0 : i32
    %c0_i32_0 = arith.constant 0 : i32
    return %c0_i32, %arg0 : i32, i32
  }
}

module attributes {stable_mosaic.version = 11 : i64} {
  func.func @tl_main_kernel(%arg0: i32, %arg1: memref<16x128xf32, #tpu.memory_space<vmem>>, %arg2: memref<128x176xf32, #tpu.memory_space<vmem>>, %arg3: memref<1x128xf32, #tpu.memory_space<vmem>>, %arg4: memref<128x176xf32, #tpu.memory_space<vmem>>, %arg5: memref<1x128xf32, #tpu.memory_space<vmem>>, %arg6: memref<1x128xf32, #tpu.memory_space<vmem>>, %arg7: memref<48x128xf32, #tpu.memory_space<vmem>>, %arg8: memref<16x128xf32, #tpu.memory_space<vmem>>) attributes {dimension_semantics = [#tpu.dimension_semantics<parallel>], iteration_bounds = array<i64: 2>, scalar_prefetch = 0 : i64, scratch_operands = 0 : i64, tpu.core_type = #tpu.core_type<tc>, window_params = [{transform_indices = @transform_0, window_bounds = array<i64: 16, 128>}, {pipeline_mode = #tpu.pipeline_mode<synchronous>, transform_indices = @transform_1, window_bounds = array<i64: 128, 176>}, {pipeline_mode = #tpu.pipeline_mode<synchronous>, transform_indices = @transform_2, window_bounds = array<i64: 1, 128>}, {pipeline_mode = #tpu.pipeline_mode<synchronous>, transform_indices = @transform_3, window_bounds = array<i64: 128, 176>}, {pipeline_mode = #tpu.pipeline_mode<synchronous>, transform_indices = @transform_4, window_bounds = array<i64: 1, 128>}, {pipeline_mode = #tpu.pipeline_mode<synchronous>, transform_indices = @transform_5, window_bounds = array<i64: 1, 128>}, {pipeline_mode = #tpu.pipeline_mode<synchronous>, transform_indices = @transform_6, window_bounds = array<i64: 48, 128>}, {transform_indices = @transform_7, window_bounds = array<i64: 16, 128>}]} {
    %c0 = arith.constant 0 : index
    %c0_0 = arith.constant 0 : index
    %0 = vector.load %arg1[%c0, %c0_0] : memref<16x128xf32, #tpu.memory_space<vmem>>, vector<16x128xf32>
    %c0_1 = arith.constant 0 : index
    %c0_2 = arith.constant 0 : index
    %1 = vector.load %arg2[%c0_1, %c0_2] : memref<128x176xf32, #tpu.memory_space<vmem>>, vector<128x176xf32>
    %cst = arith.constant dense<0.000000e+00> : vector<16x176xf32>
    %2 = tpu.matmul %0, %1, %cst {dimension_numbers = #tpu.dot_dimension_numbers<[1], [0], [0], [1], [0, 0, 1, 1], [], []>, precision = #tpu.contract_precision<fp32>} : vector<16x128xf32>, vector<128x176xf32>, vector<16x176xf32> -> vector<16x176xf32>
    %3 = vector.extract_strided_slice %2 {offsets = [0, 0], sizes = [16, 128], strides = [1, 1]} : vector<16x176xf32> to vector<16x128xf32>
    %4 = vector.extract_strided_slice %2 {offsets = [0, 128], sizes = [16, 48], strides = [1, 1]} : vector<16x176xf32> to vector<16x48xf32>
    %c0_3 = arith.constant 0 : index
    %c0_4 = arith.constant 0 : index
    %5 = vector.load %arg3[%c0_3, %c0_4] : memref<1x128xf32, #tpu.memory_space<vmem>>, vector<1x128xf32>
    %6 = vector.broadcast %5 : vector<1x128xf32> to vector<16x128xf32>
    %7 = arith.addf %3, %6 : vector<16x128xf32>
    %cst_5 = arith.constant 0.000000e+00 : f32
    %8 = vector.broadcast %cst_5 : f32 to vector<16x128xf32>
    %9 = arith.cmpf ogt, %7, %8 : vector<16x128xf32>
    %cst_6 = arith.constant 2.000000e-01 : f32
    %10 = vector.broadcast %cst_6 : f32 to vector<16x128xf32>
    %11 = arith.mulf %10, %7 : vector<16x128xf32>
    %12 = arith.select %9, %7, %11 : vector<16x128xi1>, vector<16x128xf32>
    %13 = arith.mulf %12, %12 : vector<16x128xf32>
    %cst_7 = arith.constant dense<0.000000e+00> : vector<16xf32>
    %14 = vector.multi_reduction <add>, %13, %cst_7 [1] : vector<16x128xf32> to vector<16xf32>
    %15 = vector.shape_cast %14 : vector<16xf32> to vector<16x1xf32>
    %cst_8 = arith.constant 1.000000e-24 : f32
    %16 = vector.broadcast %cst_8 : f32 to vector<16x1xf32>
    %17 = arith.maximumf %15, %16 : vector<16x1xf32>
    %18 = math.rsqrt %17 : vector<16x1xf32>
    %19 = vector.broadcast %18 : vector<16x1xf32> to vector<16x128xf32>
    %20 = arith.mulf %12, %19 : vector<16x128xf32>
    %21 = arith.mulf %0, %0 : vector<16x128xf32>
    %cst_9 = arith.constant dense<0.000000e+00> : vector<16xf32>
    %22 = vector.multi_reduction <add>, %21, %cst_9 [1] : vector<16x128xf32> to vector<16xf32>
    %23 = vector.shape_cast %22 : vector<16xf32> to vector<16x1xf32>
    %cst_10 = arith.constant 1.000000e-24 : f32
    %24 = vector.broadcast %cst_10 : f32 to vector<16x1xf32>
    %25 = arith.maximumf %23, %24 : vector<16x1xf32>
    %26 = math.rsqrt %25 : vector<16x1xf32>
    %27 = vector.broadcast %26 : vector<16x1xf32> to vector<16x48xf32>
    %28 = arith.mulf %4, %27 : vector<16x48xf32>
    %c0_11 = arith.constant 0 : index
    %c0_12 = arith.constant 0 : index
    %29 = vector.load %arg4[%c0_11, %c0_12] : memref<128x176xf32, #tpu.memory_space<vmem>>, vector<128x176xf32>
    %cst_13 = arith.constant dense<0.000000e+00> : vector<16x176xf32>
    %30 = tpu.matmul %20, %29, %cst_13 {dimension_numbers = #tpu.dot_dimension_numbers<[1], [0], [0], [1], [0, 0, 1, 1], [], []>, precision = #tpu.contract_precision<fp32>} : vector<16x128xf32>, vector<128x176xf32>, vector<16x176xf32> -> vector<16x176xf32>
    %31 = vector.extract_strided_slice %30 {offsets = [0, 0], sizes = [16, 128], strides = [1, 1]} : vector<16x176xf32> to vector<16x128xf32>
    %32 = vector.extract_strided_slice %30 {offsets = [0, 128], sizes = [16, 48], strides = [1, 1]} : vector<16x176xf32> to vector<16x48xf32>
    %c0_14 = arith.constant 0 : index
    %c0_15 = arith.constant 0 : index
    %33 = vector.load %arg5[%c0_14, %c0_15] : memref<1x128xf32, #tpu.memory_space<vmem>>, vector<1x128xf32>
    %34 = vector.broadcast %33 : vector<1x128xf32> to vector<16x128xf32>
    %35 = arith.addf %31, %34 : vector<16x128xf32>
    %cst_16 = arith.constant 0.000000e+00 : f32
    %36 = vector.broadcast %cst_16 : f32 to vector<16x128xf32>
    %37 = arith.cmpf ogt, %35, %36 : vector<16x128xf32>
    %cst_17 = arith.constant 2.000000e-01 : f32
    %38 = vector.broadcast %cst_17 : f32 to vector<16x128xf32>
    %39 = arith.mulf %38, %35 : vector<16x128xf32>
    %40 = arith.select %37, %35, %39 : vector<16x128xi1>, vector<16x128xf32>
    %c0_18 = arith.constant 0 : index
    %c0_19 = arith.constant 0 : index
    %41 = vector.load %arg6[%c0_18, %c0_19] : memref<1x128xf32, #tpu.memory_space<vmem>>, vector<1x128xf32>
    %42 = vector.broadcast %41 : vector<1x128xf32> to vector<16x128xf32>
    %43 = arith.mulf %40, %42 : vector<16x128xf32>
    %cst_20 = arith.constant dense<0.000000e+00> : vector<16xf32>
    %44 = vector.multi_reduction <add>, %43, %cst_20 [1] : vector<16x128xf32> to vector<16xf32>
    %45 = vector.shape_cast %44 : vector<16xf32> to vector<16x1xf32>
    %46 = arith.negf %45 : vector<16x1xf32>
    %47 = math.exp %46 : vector<16x1xf32>
    %cst_21 = arith.constant 1.000000e+00 : f32
    %48 = vector.broadcast %cst_21 : f32 to vector<16x1xf32>
    %49 = arith.addf %48, %47 : vector<16x1xf32>
    %50 = arith.divf %48, %49 : vector<16x1xf32>
    %cst_22 = arith.constant 3.000000e-01 : f32
    %51 = vector.broadcast %cst_22 : f32 to vector<16x1xf32>
    %52 = arith.mulf %50, %51 : vector<16x1xf32>
    %cst_23 = arith.constant 5.000000e-01 : f32
    %53 = vector.broadcast %cst_23 : f32 to vector<16x1xf32>
    %54 = arith.addf %52, %53 : vector<16x1xf32>
    %55 = vector.broadcast %54 : vector<16x1xf32> to vector<16x48xf32>
    %56 = arith.subf %32, %55 : vector<16x48xf32>
    %cst_24 = arith.constant 5.000000e+01 : f32
    %57 = vector.broadcast %cst_24 : f32 to vector<16x48xf32>
    %58 = arith.mulf %57, %56 : vector<16x48xf32>
    %59 = arith.negf %58 : vector<16x48xf32>
    %60 = math.exp %59 : vector<16x48xf32>
    %cst_25 = arith.constant 1.000000e+00 : f32
    %61 = vector.broadcast %cst_25 : f32 to vector<16x48xf32>
    %62 = arith.addf %61, %60 : vector<16x48xf32>
    %63 = arith.divf %61, %62 : vector<16x48xf32>
    %64 = math.absf %63 : vector<16x48xf32>
    %cst_26 = arith.constant dense<0.000000e+00> : vector<16xf32>
    %65 = vector.multi_reduction <add>, %64, %cst_26 [1] : vector<16x48xf32> to vector<16xf32>
    %66 = vector.shape_cast %65 : vector<16xf32> to vector<16x1xf32>
    %cst_27 = arith.constant 9.99999996E-13 : f32
    %67 = vector.broadcast %cst_27 : f32 to vector<16x1xf32>
    %68 = arith.maximumf %66, %67 : vector<16x1xf32>
    %69 = tpu.reciprocal %68 : vector<16x1xf32> -> vector<16x1xf32>
    %70 = vector.broadcast %69 : vector<16x1xf32> to vector<16x48xf32>
    %71 = arith.mulf %63, %70 : vector<16x48xf32>
    %72 = arith.mulf %71, %28 : vector<16x48xf32>
    %c0_28 = arith.constant 0 : index
    %c0_29 = arith.constant 0 : index
    %73 = vector.load %arg7[%c0_28, %c0_29] : memref<48x128xf32, #tpu.memory_space<vmem>>, vector<48x128xf32>
    %cst_30 = arith.constant dense<0.000000e+00> : vector<16x128xf32>
    %74 = tpu.matmul %72, %73, %cst_30 {dimension_numbers = #tpu.dot_dimension_numbers<[1], [0], [0], [1], [0, 0, 1, 1], [], []>, precision = #tpu.contract_precision<fp32>} : vector<16x48xf32>, vector<48x128xf32>, vector<16x128xf32> -> vector<16x128xf32>
    %c0_31 = arith.constant 0 : index
    %c0_32 = arith.constant 0 : index
    %75 = vector.load %arg8[%c0_31, %c0_32] : memref<16x128xf32, #tpu.memory_space<vmem>>, vector<16x128xf32>
    tpu.vector_store %arg8[%c0_31, %c0_32], %74 {strides = array<i32>} : memref<16x128xf32, #tpu.memory_space<vmem>>, vector<16x128xf32>,
    return
  }
  func.func @transform_0(%arg0: i32) -> (i32, i32) {
    %c0_i32 = arith.constant 0 : i32
    %c0_i32_0 = arith.constant 0 : i32
    return %arg0, %c0_i32 : i32, i32
  }
  func.func @transform_1(%arg0: i32) -> (i32, i32) {
    %c0_i32 = arith.constant 0 : i32
    %c0_i32_0 = arith.constant 0 : i32
    %c0_i32_1 = arith.constant 0 : i32
    return %c0_i32, %c0_i32_0 : i32, i32
  }
  func.func @transform_2(%arg0: i32) -> (i32, i32) {
    %c0_i32 = arith.constant 0 : i32
    %c0_i32_0 = arith.constant 0 : i32
    %c0_i32_1 = arith.constant 0 : i32
    return %c0_i32, %c0_i32_0 : i32, i32
  }
  func.func @transform_3(%arg0: i32) -> (i32, i32) {
    %c0_i32 = arith.constant 0 : i32
    %c0_i32_0 = arith.constant 0 : i32
    %c0_i32_1 = arith.constant 0 : i32
    return %c0_i32, %c0_i32_0 : i32, i32
  }
  func.func @transform_4(%arg0: i32) -> (i32, i32) {
    %c0_i32 = arith.constant 0 : i32
    %c0_i32_0 = arith.constant 0 : i32
    %c0_i32_1 = arith.constant 0 : i32
    return %c0_i32, %c0_i32_0 : i32, i32
  }
  func.func @transform_5(%arg0: i32) -> (i32, i32) {
    %c0_i32 = arith.constant 0 : i32
    %c0_i32_0 = arith.constant 0 : i32
    %c0_i32_1 = arith.constant 0 : i32
    return %c0_i32, %c0_i32_0 : i32, i32
  }
  func.func @transform_6(%arg0: i32) -> (i32, i32) {
    %c0_i32 = arith.constant 0 : i32
    %c0_i32_0 = arith.constant 0 : i32
    %c0_i32_1 = arith.constant 0 : i32
    return %c0_i32, %c0_i32_0 : i32, i32
  }
  func.func @transform_7(%arg0: i32) -> (i32, i32) {
    %c0_i32 = arith.constant 0 : i32
    %c0_i32_0 = arith.constant 0 : i32
    return %arg0, %c0_i32 : i32, i32
  }
}

</mosaic_0001>

<bundles_post_ra>
// kernel: tl_module_forward.2
= control target key start
LH: loop header
LB: loop body
LE: loop exit
PB: predicated region body
PF: predicated region fallthrough
CT: control target
= control target key end

     0   :  { %vm1494_vm0 = vcmask 392192   ;;  %s3481_s2 = inlined_call_operand.vmem [shape: f32[128,48], index: 2, kind: input, shape index: {}]   ;;  %s3482_s0 = inlined_call_operand.vmem [shape: f32[128,128], index: 0, kind: input, shape index: {}]   ;;  %s3483_s4 = inlined_call_operand.vmem [shape: f32[128,48], index: 4, kind: output, shape index: {1}]   ;;  %s3484_s1 = inlined_call_operand.vmem [shape: f32[128,1], index: 1, kind: input, shape index: {}]   ;;  %s3485_s3 = inlined_call_operand.vmem [shape: f32[128,48], index: 3, kind: output, shape index: {0}]  }
   0x1   :  { %v2225_v0 = vld [vmem:[%s3481_s2 + $0x78] sm:$0xff]  ;;  %v2230_v1 = vld [vmem:[%s3481_s2 + $0x70] sm:$0xff]  ;;  %v2235_v2 = vld [vmem:[%s3481_s2 + $0x68] sm:$0xff] }
   0x2   :  { %v2238_v3 = vand.u32 4294901760, %v2225_v0  ;;  %v2241_v4 = vand.u32 4294901760, %v2230_v1  ;;  %v2246_v5 = vld [vmem:[%s3481_s2 + $0x60] sm:$0xff]  ;;  %v2251_v6 = vld [vmem:[%s3481_s2 + $0x58] sm:$0xff]  ;;  %v2254_v7 = vand.u32 4294901760, %v2235_v2  ;;  %v2259_v8 = vld [vmem:[%s3481_s2 + $0x50] sm:$0xff] }
   0x3   :  { %3565 = vst [vmem:[#allocation2_spill] sm:$0xff] %v2246_v5  ;;  %3566 = vst [vmem:[#allocation3_spill] sm:$0xff] %v2251_v6  ;;  %v2263_v9 = vand.u32 4294901760, %v2246_v5  ;;  %v2268_v10 = vld [vmem:[%s3481_s2 + $0x48] sm:$0xff]  ;;  %v2273_v11 = vmul.f32 %v2246_v5, %v2246_v5  ;;  %v2276_v12 = vand.u32 4294901760, %v2251_v6  ;;  %v2285_v14 = vld [vmem:[%s3481_s2 + $0x40] sm:$0xff]  ;;  %v2290_v15 = vmul.f32 %v2251_v6, %v2251_v6 }
   0x4   :  { %3567 = vst [vmem:[#allocation4_spill] sm:$0xff] %v2259_v8  ;;  %1853 = vmatprep.subr.mxu0 %v2238_v3  ;;  %3568 = vst [vmem:[#allocation5_spill] sm:$0xff] %v2268_v10  ;;  %v2280_v13 = vsub.f32 %v2225_v0, %v2238_v3  ;;  %v2293_v16 = vand.u32 4294901760, %v2259_v8  ;;  %v2297_v17 = vmul.f32 %v2259_v8, %v2259_v8  ;;  %v2306_v19 = vld [vmem:[%s3481_s2 + $0x38] sm:$0xff]  ;;  %v2313_v21 = vand.u32 4294901760, %v2268_v10  ;;  %v2337_v28 = vld [vmem:[%s3481_s2 + $0x30] sm:$0xff] }
   0x5   :  { %1854 = vmatpush3.msra.mxu0 %v2238_v3  ;;  %3569 = vst [vmem:[#allocation6_spill] sm:$0xff] %v2285_v14  ;;  %v2301_v18 = vsub.f32 %v2230_v1, %v2241_v4  ;;  %3570 = vst [vmem:[#allocation7_spill] sm:$0xff] %v2306_v19  ;;  %v1575_v22 = vmul.f32 %v2268_v10, %v2268_v10  ;;  %v2319_v23 = vsub.f32 %v2235_v2, %v2254_v7  ;;  %v2365_v37 = vld [vmem:[%s3481_s2 + $0x28] sm:$0xff]  ;;  %v2388_v46 = vld [vmem:[%s3481_s2 + $0x20] sm:$0xff] }
   0x6   :  { %1855 = vmatprep.subr.mxu0 %v2241_v4  ;;  %v2310_v20 = vand.u32 4294901760, %v2280_v13  ;;  %v2326_v25 = vand.u32 4294901760, %v2285_v14  ;;  %v1574_v26 = vmul.f32 %v2285_v14, %v2285_v14  ;;  %v2332_v27 = vsub.f32 %v2246_v5, %v2263_v9  ;;  %3573 = vst [vmem:[#allocation10_spill] sm:$0xff] %v2337_v28  ;;  %3576 = vst [vmem:[#allocation13_spill] sm:$0xff] %v2365_v37  ;;  %v2404_v51 = vld [vmem:[%s3481_s2 + $0x18] sm:$0xff]  ;;  %v2430_v60 = vld [vmem:[%s3481_s2 + $0x10] sm:$0xff] }
   0x7   :  { %1856 = vmatpush3.msra.mxu0 %v2241_v4  ;;  %v2323_v24 = vand.u32 4294901760, %v2301_v18  ;;  %v2343_v30 = vsel %vm1494_vm0, %v1575_v22, 0.0  ;;  %v2346_v31 = vand.u32 4294901760, %v2319_v23  ;;  %v2349_v32 = vand.u32 4294901760, %v2306_v19  ;;  %3578 = vst [vmem:[#allocation15_spill] sm:$0xff] %v2388_v46  ;;  %3581 = vst [vmem:[#allocation18_spill] sm:$0xff] %v2404_v51 }
   0x8   :  { %3571 = vst [vmem:[#allocation8_spill] sm:$0xff] %v2310_v20  ;;  %1857 = vmatprep.subr.mxu0 %v2254_v7  ;;  %v389_v29 = vsub.f32 %v2280_v13, %v2310_v20  ;;  %v2355_v34 = vsel %vm1494_vm0, %v1574_v26, 0.0  ;;  %v2358_v35 = vand.u32 4294901760, %v2332_v27  ;;  %v1573_v36 = vmul.f32 %v2306_v19, %v2306_v19  ;;  %3584 = vst [vmem:[#allocation21_spill] sm:$0xff] %v2430_v60 }
   0x9   :  { %3572 = vst [vmem:[#allocation9_spill] sm:$0xff] %v2323_v24  ;;  %1858 = vmatpush3.msra.mxu0 %v2254_v7  ;;  %3574 = vst [vmem:[#allocation11_spill] sm:$0xff] %v2346_v31  ;;  %v396_v33 = vsub.f32 %v2301_v18, %v2323_v24  ;;  %v403_v39 = vsub.f32 %v2319_v23, %v2346_v31  ;;  %v2372_v40 = vsub.f32 %v2251_v6, %v2276_v12  ;;  %v33_v24 = vld [vmem:[%s3482_s0 + $0x8] sm:$0xff] }
   0xa   :  { %1859 = vmatprep.subr.mxu0 %v2263_v9  ;;  %3575 = vst [vmem:[#allocation12_spill] sm:$0xff] %v2358_v35  ;;  %v390_v38 = vand.u32 4294901760, %v389_v29  ;;  %v2375_v41 = vand.u32 4294901760, %v2337_v28  ;;  %v410_v43 = vsub.f32 %v2332_v27, %v2358_v35  ;;  %v2381_v44 = vsel %vm1494_vm0, %v1573_v36, 0.0 }
   0xb   :  { %1860 = vmatpush3.msra.mxu0 %v2263_v9  ;;  %v397_v42 = vand.u32 4294901760, %v396_v33  ;;  %v1572_v45 = vmul.f32 %v2337_v28, %v2337_v28  ;;  %v404_v47 = vand.u32 4294901760, %v403_v39  ;;  %v2392_v48 = vand.u32 4294901760, %v2372_v40 }
   0xc   :  { %3577 = vst [vmem:[#allocation14_spill] sm:$0xff] %v2375_v41  ;;  %1861 = vmatprep.subr.mxu0 %v2276_v12  ;;  %1909 = vmatprep.subr.mxu1 %v390_v38  ;;  %v2396_v49 = vsub.f32 %v2259_v8, %v2293_v16  ;;  %v2399_v50 = vand.u32 4294901760, %v2365_v37  ;;  %v411_v52 = vand.u32 4294901760, %v410_v43  ;;  %v1571_v54 = vmul.f32 %v2365_v37, %v2365_v37 }
   0xd   :  { %1862 = vmatpush3.msra.mxu0 %v2276_v12  ;;  %3579 = vst [vmem:[#allocation16_spill] sm:$0xff] %v2392_v48  ;;  %1910 = vmatpush3.msra.mxu1 %v390_v38  ;;  %v2408_v53 = vsel %vm1494_vm0, %v1572_v45, 0.0  ;;  %v2414_v55 = vsub.f32 %v2268_v10, %v2313_v21  ;;  %v417_v56 = vsub.f32 %v2372_v40, %v2392_v48  ;;  %v2423_v58 = vand.u32 4294901760, %v2388_v46  ;;  %v2457_v38 = vld [vmem:[%s3481_s2 + $0x8] sm:$0xff] }
   0xe   :  { %3580 = vst [vmem:[#allocation17_spill] sm:$0xff] %v2399_v50  ;;  %1863 = vmatprep.subr.mxu0 %v2293_v16  ;;  %1911 = vmatprep.subr.mxu1 %v397_v42  ;;  %v2420_v57 = vand.u32 4294901760, %v2396_v49  ;;  %v1570_v59 = vmul.f32 %v2388_v46, %v2388_v46  ;;  %v2434_v61 = vsel %vm1494_vm0, %v1571_v54, 0.0  ;;  %v2441_v63 = vsub.f32 %v2285_v14, %v2326_v25 }
   0xf   :  { %1864 = vmatpush3.msra.mxu0 %v2293_v16  ;;  %3583 = vst [vmem:[#allocation20_spill] sm:$0xff] %v2423_v58  ;;  %1912 = vmatpush3.msra.mxu1 %v397_v42  ;;  %v2437_v62 = vand.u32 4294901760, %v2414_v55  ;;  %v2444_v22 = vand.u32 4294901760, %v2404_v51  ;;  %v418_v26 = vand.u32 4294901760, %v417_v56  ;;  %v1569_v36 = vmul.f32 %v2404_v51, %v2404_v51  ;;  %3587 = vst [vmem:[#allocation24_spill] sm:$0xff] %v2457_v38 }
  0x10   :  { %3582 = vst [vmem:[#allocation19_spill] sm:$0xff] %v2420_v57  ;;  %1865 = vmatprep.subr.mxu0 %v2313_v21  ;;  %1913 = vmatprep.subr.mxu1 %v404_v47  ;;  %v424_v29 = vsub.f32 %v2396_v49, %v2420_v57  ;;  %v2450_v33 = vsel %vm1494_vm0, %v1570_v59, 0.0  ;;  %v2463_v42 = vand.u32 4294901760, %v2441_v63  ;;  %v2467_v43 = vsub.f32 %v2306_v19, %v2349_v32 }
  0x11   :  { %3585 = vst [vmem:[#allocation22_spill] sm:$0xff] %v2437_v62  ;;  %3586 = vst [vmem:[#allocation23_spill] sm:$0xff] %v2444_v22  ;;  %1866 = vmatpush3.msra.mxu0 %v2313_v21  ;;  %1914 = vmatpush3.msra.mxu1 %v404_v47  ;;  %v431_v39 = vsub.f32 %v2414_v55, %v2437_v62  ;;  %v2470_v45 = vand.u32 4294901760, %v2430_v60  ;;  %v2474_v47 = vsel %vm1494_vm0, %v1569_v36, 0.0  ;;  %v2485_v62 = vld [vmem:[%s3481_s2] sm:$0xff]  ;;  %v2494_v48 = vand.u32 4294901760, %v2457_v38 }
  0x12   :  { %1867 = vmatprep.subr.mxu0 %v2326_v25  ;;  %3588 = vst [vmem:[#allocation25_spill] sm:$0xff] %v2463_v42  ;;  %1915 = vmatprep.subr.mxu1 %v411_v52  ;;  %v425_v54 = vand.u32 4294901760, %v424_v29  ;;  %v1568_v56 = vmul.f32 %v2430_v60, %v2430_v60  ;;  %v2480_v59 = vsub.f32 %v2337_v28, %v2375_v41  ;;  %v2491_v36 = vand.u32 4294901760, %v2467_v43 }
  0x13   :  { %3589 = vst [vmem:[#allocation26_spill] sm:$0xff] %v2470_v45  ;;  %1868 = vmatpush3.msra.mxu0 %v2326_v25  ;;  %1916 = vmatpush3.msra.mxu1 %v411_v52  ;;  %v432_v57 = vand.u32 4294901760, %v431_v39  ;;  %v438_v29 = vsub.f32 %v2441_v63, %v2463_v42  ;;  %3591 = vst [vmem:[#allocation28_spill] sm:$0xff] %v2494_v48  ;;  %v1567_v52 = vmul.f32 %v2457_v38, %v2457_v38  ;;  %v32_v42 = vld [vmem:[%s3482_s0] sm:$0xff] }
  0x14   :  { %1869 = vmatprep.subr.mxu0 %v2349_v32  ;;  %3590 = vst [vmem:[#allocation27_spill] sm:$0xff] %v2491_v36  ;;  %1917 = vmatprep.subr.mxu1 %v418_v26  ;;  %v1585_v35 = vsel %vm1494_vm0, %v1568_v56, 0.0  ;;  %v2499_v31 = vand.u32 4294901760, %v2480_v59  ;;  %v2505_v39 = vsub.f32 %v2365_v37, %v2399_v50  ;;  %v445_v20 = vsub.f32 %v2467_v43, %v2491_v36  ;;  %v34_v36 = vld [vmem:[%s3482_s0 + $0x10] sm:$0xff] }
  0x15   :  { %1870 = vmatpush3.msra.mxu0 %v2349_v32  ;;  %1918 = vmatpush3.msra.mxu1 %v418_v26  ;;  %v439_v56 = vand.u32 4294901760, %v438_v29  ;;  %v2517_v5 = vand.u32 4294901760, %v2485_v62  ;;  %v1566_v6 = vmul.f32 %v2485_v62, %v2485_v62  ;;  %v1583_v26 = vsel %vm1494_vm0, %v1567_v52, 0.0 }
  0x16   :  { %3592 = vst [vmem:[#allocation29_spill] sm:$0xff] %v2499_v31  ;;  %1871 = vmatprep.subr.mxu0 %v2375_v41  ;;  %1919 = vmatprep.subr.mxu1 %v425_v54  ;;  %v452_v8 = vsub.f32 %v2480_v59, %v2499_v31  ;;  %v2526_v10 = vand.u32 4294901760, %v2505_v39  ;;  %v2530_v29 = vsub.f32 %v2388_v46, %v2423_v58  ;;  %v446_v14 = vand.u32 4294901760, %v445_v20 }
  0x17   :  { %3593 = vst [vmem:[#allocation30_spill] sm:$0xff] %v2517_v5  ;;  %1872 = vmatpush3.msra.mxu0 %v2375_v41  ;;  %1920 = vmatpush3.msra.mxu1 %v425_v54  ;;  %v1582_v19 = vsel %vm1494_vm0, %v1566_v6, 0.0  ;;  %v2537_v31 = vand.u32 4294901760, %v32_v42  ;;  %v2539_v52 = vand.u32 4294901760, %v33_v24  ;;  %v2556_v54 = vsub.f32 %v2404_v51, %v2444_v22 }
  0x18   :  { %3594 = vst [vmem:[#allocation31_spill] sm:$0xff] %v2526_v10  ;;  %1873 = vmatprep.subr.mxu0 %v2399_v50  ;;  %1921 = vmatprep.subr.mxu1 %v432_v57  ;;  %v453_v28 = vand.u32 4294901760, %v452_v8  ;;  %v459_v37 = vsub.f32 %v2505_v39, %v2526_v10  ;;  %v1584_v46 = vadd.f32 %v1583_v26, %v1582_v19  ;;  %v2545_v41 = vand.u32 4294901760, %v2530_v29  ;;  %v35_v19 = vld [vmem:[%s3482_s0 + $0x18] sm:$0xff] }
  0x19   :  { %1874 = vmatpush3.msra.mxu0 %v2399_v50  ;;  %1922 = vmatpush3.msra.mxu1 %v432_v57  ;;  %v2549_v6 = vsub.f32 %v32_v42, %v2537_v31  ;;  %v2552_v20 = vsub.f32 %v33_v24, %v2539_v52  ;;  %v2558_v8 = vand.u32 4294901760, %v34_v36  ;;  %v2568_v24 = vsub.f32 %v2430_v60, %v2470_v45 }
  0x1a   :  { %3595 = vst [vmem:[#allocation32_spill] sm:$0xff] %v2545_v41  ;;  %1875 = vmatprep.subr.mxu0 %v2423_v58  ;;  %1923 = vmatprep.subr.mxu1 %v439_v56  ;;  %v460_v57 = vand.u32 4294901760, %v459_v37  ;;  %v1586_v26 = vadd.f32 %v1585_v35, %v1584_v46  ;;  %v466_v42 = vsub.f32 %v2530_v29, %v2545_v41  ;;  %v2574_v50 = vand.u32 4294901760, %v2556_v54  ;;  %v36_v35 = vld [vmem:[%s3482_s0 + $0x20] sm:$0xff] }
  0x1b   :  { %3596 = vst [vmem:[#allocation33_spill] sm:$0xff] %v2552_v20  ;;  %1876 = vmatpush3.msra.mxu0 %v2423_v58  ;;  %1924 = vmatpush3.msra.mxu1 %v439_v56  ;;  %v2577_v37 = vsub.f32 %v34_v36, %v2558_v8  ;;  %v2585_v10 = vand.u32 4294901760, %v2568_v24  ;;  %v2587_v51 = vand.u32 4294901760, %v35_v19  ;;  %v3600_v36 = vand.u32 4294901760, %v2549_v6 }
  0x1c   :  { %1877 = vmatprep.subr.mxu0 %v2444_v22  ;;  %3597 = vst [vmem:[#allocation34_spill] sm:$0xff] %v2574_v50  ;;  %1925 = vmatprep.subr.mxu1 %v446_v14  ;;  %v1588_v46 = vadd.f32 %v2474_v47, %v1586_v26  ;;  %v467_v56 = vand.u32 4294901760, %v466_v42  ;;  %v3601_v60 = vand.u32 4294901760, %v2552_v20  ;;  %v473_v47 = vsub.f32 %v2556_v54, %v2574_v50 }
  0x1d   :  { %3598 = vst [vmem:[#allocation35_spill] sm:$0xff] %v2577_v37  ;;  %1878 = vmatpush3.msra.mxu0 %v2444_v22  ;;  %3599 = vst [vmem:[#allocation36_spill] sm:$0xff] %v2585_v10  ;;  %1926 = vmatpush3.msra.mxu1 %v446_v14  ;;  %v228_v41 = vsub.f32 %v2549_v6, %v3600_v36  ;;  %v480_v42 = vsub.f32 %v2568_v24, %v2585_v10  ;;  %v2606_v36 = vand.u32 4294901760, %v36_v35 }
  0x1e   :  { %1879 = vmatprep.subr.mxu0 %v2470_v45  ;;  %v238_v58 = vsub.f32 %v2552_v20, %v3601_v60  ;;  %1927 = vmatprep.subr.mxu1 %v453_v28  ;;  %v1590_v14 = vadd.f32 %v2450_v33, %v1588_v46  ;;  %v2604_v22 = vsub.f32 %v35_v19, %v2587_v51  ;;  %v37_v60 = vld [vmem:[%s3482_s0 + $0x28] sm:$0xff]  ;;  %v3603_v33 = vand.u32 4294901760, %v2577_v37  ;;  %v38_v19 = vld [vmem:[%s3482_s0 + $0x30] sm:$0xff] }
  0x1f   :  { %1880 = vmatpush3.msra.mxu0 %v2470_v45  ;;  %1928 = vmatpush3.msra.mxu1 %v453_v28  ;;  %v229_v26 = vand.u32 4294901760, %v228_v41  ;;  %v474_v45 = vand.u32 4294901760, %v473_v47  ;;  %v481_v20 = vand.u32 4294901760, %v480_v42  ;;  %v2623_v41 = vsub.f32 %v2457_v38, %v2494_v48 }
  0x20   :  { %3602 = vst [vmem:[#allocation37_spill] sm:$0xff] %v2604_v22  ;;  %1881 = vmatprep.subr.mxu0 %v2494_v48  ;;  %v239_v50 = vand.u32 4294901760, %v238_v58  ;;  %v248_v46 = vsub.f32 %v2577_v37, %v3603_v33  ;;  %1929 = vmatprep.subr.mxu1 %v460_v57  ;;  %v1592_v10 = vadd.f32 %v2434_v61, %v1590_v14  ;;  %v3541_v28 = vand.u32 4294901760, %v2604_v22  ;;  %v39_v58 = vld [vmem:[%s3482_s0 + $0x38] sm:$0xff] }
  0x21   :  { %1882 = vmatpush3.msra.mxu0 %v2494_v48  ;;  %1930 = vmatpush3.msra.mxu1 %v460_v57  ;;  %v2631_v33 = vsub.f32 %v2485_v62, %v2517_v5  ;;  %v2634_v61 = vsub.f32 %v36_v35, %v2606_v36  ;;  %v2636_v14 = vand.u32 4294901760, %v37_v60  ;;  %v2646_v48 = vand.u32 4294901760, %v38_v19 }
  0x22   :  { %1883 = vmatprep.subr.mxu0 %v2517_v5  ;;  %v249_v47 = vand.u32 4294901760, %v248_v46  ;;  %v1594_v42 = vadd.f32 %v2408_v53, %v1592_v10  ;;  %1931 = vmatprep.subr.mxu1 %v467_v56  ;;  %v258_v57 = vsub.f32 %v2604_v22, %v3541_v28  ;;  %v2644_v46 = vand.u32 4294901760, %v2623_v41  ;;  %v40_v28 = vld [vmem:[%s3482_s0 + $0x40] sm:$0xff] }
  0x23   :  { %1884 = vmatpush3.msra.mxu0 %v2517_v5  ;;  %1885 = vmatprep.mubr.f32.mxu0 %v229_v26  ;;  %v2649_v35 = vand.u32 4294901760, %v2631_v33  ;;  %v3549_v37 = vand.u32 4294901760, %v2634_v61  ;;  %v2653_v10 = vsub.f32 %v37_v60, %v2636_v14  ;;  %v2655_v53 = vand.u32 4294901760, %v39_v58 }
  0x24   :  { %3604 = vst [vmem:[#allocation38_spill] sm:$0xff] %v2644_v46  ;;  %1932 = vmatpush3.msra.mxu1 %v467_v56  ;;  %v1596_v5 = vadd.f32 %v2381_v44, %v1594_v42  ;;  %1886 = vmatmul.mubr.f32.vlgmr.msra.gmra.mxu0 %v239_v50  ;;  %v259_v26 = vand.u32 4294901760, %v258_v57  ;;  %v487_v56 = vsub.f32 %v2623_v41, %v2644_v46 }
  0x25   :  { %3605 = vst [vmem:[#allocation39_spill] sm:$0xff] %v2649_v35  ;;  %1933 = vmatprep.subr.mxu1 %v474_v45  ;;  %v2664_v22 = vsub.f32 %v38_v19, %v2646_v48  ;;  %1965 = vmatprep.subr.mxu0 %v2280_v13  ;;  %v494_v60 = vsub.f32 %v2631_v33, %v2649_v35  ;;  %v3552_v44 = vand.u32 4294901760, %v2653_v10  ;;  %v41_v19 = vld [vmem:[%s3482_s0 + $0x48] sm:$0xff]  ;;  %v2682_v35 = vand.u32 4294901760, %v40_v28 }
  0x26   :  { %1934 = vmatpush3.msra.mxu1 %v474_v45  ;;  %v268_v38 = vsub.f32 %v2634_v61, %v3549_v37  ;;  %v2674_v50 = vsub.f32 %v39_v58, %v2655_v53  ;;  %v1598_v42 = vadd.f32 %v2355_v34, %v1596_v5  ;;  %1966 = vmatpush3.msra.mxu0 %v2280_v13  ;;  %v488_v45 = vand.u32 4294901760, %v487_v56  ;;  %v42_v13 = vld [vmem:[%s3482_s0 + $0x50] sm:$0xff] }
  0x27   :  { %1935 = vmatprep.subr.mxu1 %v481_v20  ;;  %v3553_v57 = vand.u32 4294901760, %v2664_v22  ;;  %v1601_v37 = vsel %vm1494_vm0, %v2297_v17, 0.0  ;;  %1967 = vmatprep.subr.mxu0 %v2301_v18  ;;  %v495_v58 = vand.u32 4294901760, %v494_v60  ;;  %v278_v46 = vsub.f32 %v2653_v10, %v3552_v44 }
  0x28   :  { %1888 = vmatprep.mubr.f32.mxu0 %v249_v47  ;;  %v3562_v5 = vand.u32 4294901760, %v2674_v50  ;;  %v1600_v34 = vadd.f32 %v2343_v30, %v1598_v42  ;;  %1936 = vmatpush3.msra.mxu1 %v481_v20  ;;  %v269_v17 = vand.u32 4294901760, %v268_v38  ;;  %v2697_v56 = vsub.f32 %v40_v28, %v2682_v35  ;;  %v43_v30 = vld [vmem:[%s3482_s0 + $0x58] sm:$0xff] }
  0x29   :  { %1968 = vmatpush3.msra.mxu0 %v2301_v18  ;;  %v2699_v47 = vand.u32 4294901760, %v41_v19  ;;  %v1579_v60 = vmul.f32 %v2235_v2, %v2235_v2  ;;  %v1603_v44 = vsel %vm1494_vm0, %v2290_v15, 0.0  ;;  %1937 = vmatprep.subr.mxu1 %v488_v45  ;;  %v288_v18 = vsub.f32 %v2664_v22, %v3553_v57 }
  0x2a   :  { %1889 = vmatmul.mubr.f32.gmra.mxu0 %v259_v26  ;;  %v1602_v20 = vadd.f32 %v1601_v37, %v1600_v34  ;;  %1969 = vmatprep.subr.mxu0 %v2319_v23  ;;  %v2715_v28 = vand.u32 4294901760, %v42_v13  ;;  %v1580_v15 = vmul.f32 %v2230_v1, %v2230_v1  ;;  %v1605_v26 = vsel %vm1494_vm0, %v2273_v11, 0.0 }
  0x2b   :  { %1938 = vmatpush3.msra.mxu1 %v488_v45  ;;  %v2713_v38 = vsub.f32 %v41_v19, %v2699_v47  ;;  %1970 = vmatpush3.msra.mxu0 %v2319_v23  ;;  %v279_v37 = vand.u32 4294901760, %v278_v46  ;;  %v298_v42 = vsub.f32 %v2674_v50, %v3562_v5  ;;  %v3561_v19 = vand.u32 4294901760, %v2697_v56  ;;  %v44_v23 = vld [vmem:[%s3482_s0 + $0x60] sm:$0xff]  ;;  %v3619_v5 = vld [vmem:[#allocation4_spill] sm:$0xff] }
  0x2c   :  { %1939 = vmatprep.subr.mxu1 %v495_v58  ;;  %v1604_v45 = vadd.f32 %v1603_v44, %v1602_v20  ;;  %1971 = vmatprep.subr.mxu0 %v2332_v27  ;;  %v2727_v34 = vand.u32 4294901760, %v43_v30  ;;  %v1581_v57 = vmul.f32 %v2225_v0, %v2225_v0  ;;  %v1607_v11 = vsel %vm1494_vm0, %v1579_v60, 0.0 }
  0x2d   :  { %1891 = vmatprep.mubr.f32.mxu0 %v269_v17  ;;  %1940 = vmatpush3.msra.mxu1 %v495_v58  ;;  %v289_v44 = vand.u32 4294901760, %v288_v18  ;;  %v3554_v17 = vand.u32 4294901760, %v2713_v38  ;;  %v2740_v20 = vsub.f32 %v42_v13, %v2715_v28  ;;  %v1609_v60 = vsel %vm1494_vm0, %v1580_v15, 0.0 }
  0x2e   :  { %1941 = vmatprep.mubr.f32.mxu1 %v2537_v31  ;;  %v1606_v46 = vadd.f32 %v1605_v26, %v1604_v45  ;;  %1972 = vmatpush3.msra.mxu0 %v2332_v27  ;;  %v299_v58 = vand.u32 4294901760, %v298_v42  ;;  %v45_v26 = vld [vmem:[%s3482_s0 + $0x68] sm:$0xff]  ;;  %v308_v27 = vsub.f32 %v2697_v56, %v3561_v19  ;;  %v2753_v13 = vsub.f32 %v43_v30, %v2727_v34  ;;  %v3618_v19 = vld [vmem:[#allocation5_spill] sm:$0xff] }
  0x2f   :  { %1942 = vmatmul.mubr.f32.vlgmr.msra.gmra.mxu1 %v2539_v52  ;;  %1892 = vmatmul.mubr.f32.gmra.mxu0 %v279_v37  ;;  %v2755_v18 = vand.u32 4294901760, %v44_v23  ;;  %v1611_v15 = vsel %vm1494_vm0, %v1581_v57, 0.0  ;;  %v3560_v42 = vand.u32 4294901760, %v2740_v20  ;;  %v2765_v30 = vand.u32 4294901760, %v45_v26  ;;  %v46_v57 = vld [vmem:[%s3482_s0 + $0x70] sm:$0xff] }
  0x30   :  { %1973 = vmatprep.subr.mxu0 %v2372_v40  ;;  %v1608_v45 = vadd.f32 %v1607_v11, %v1606_v46  ;;  %2021 = vmatprep.subr.mxu1 %v2238_v3  ;;  %v309_v46 = vand.u32 4294901760, %v308_v27 }
  0x31   :  { %1974 = vmatpush3.msra.mxu0 %v2372_v40  ;;  %3606 = vst [vmem:[#allocation40_spill] sm:$0xff] %v2755_v18  ;;  %2022 = vmatpush3.msra.mxu1 %v2238_v3  ;;  %v318_v40 = vsub.f32 %v2713_v38, %v3554_v17  ;;  %v2790_v27 = vsub.f32 %v45_v26, %v2765_v30 }
  0x32   :  { %1975 = vmatprep.subr.mxu0 %v2396_v49  ;;  %v1610_v37 = vadd.f32 %v1609_v60, %v1608_v45  ;;  %2023 = vmatprep.subr.mxu1 %v2241_v4  ;;  %v2775_v60 = vsub.f32 %v44_v23, %v2755_v18  ;;  %v2779_v45 = vand.u32 4294901760, %v46_v57  ;;  %v328_v23 = vsub.f32 %v2740_v20, %v3560_v42  ;;  %v3617_v42 = vld [vmem:[#allocation6_spill] sm:$0xff] }
  0x33   :  { %1894 = vmatprep.mubr.f32.mxu0 %v289_v44  ;;  %1944 = vmatprep.mubr.f32.mxu1 %v2558_v8  ;;  %v3555_v44 = vand.u32 4294901760, %v2753_v13 }
  0x34   :  { %1976 = vmatpush3.msra.mxu0 %v2396_v49  ;;  %v1612_v11 = vadd.f32 %v1611_v15, %v1610_v37  ;;  %2024 = vmatpush3.msra.mxu1 %v2241_v4  ;;  %v47_v49 = vld [vmem:[%s3482_s0 + $0x78] sm:$0xff] }
  0x35   :  { %1895 = vmatmul.mubr.f32.gmra.mxu0 %v299_v58  ;;  %1945 = vmatmul.mubr.f32.gmra.mxu1 %v2587_v51  ;;  %v319_v58 = vand.u32 4294901760, %v318_v40  ;;  %v3559_v40 = vand.u32 4294901760, %v2775_v60  ;;  %v2799_v17 = vand.u32 4294901760, %v47_v49 }
  0x36   :  { %1977 = vmatprep.subr.mxu0 %v2414_v55  ;;  %v1613_v15 = vrot.slane %v1612_v11, 4  ;;  %2025 = vmatprep.subr.mxu1 %v2254_v7 }
  0x37   :  { %1978 = vmatpush3.msra.mxu0 %v2414_v55  ;;  %2026 = vmatpush3.msra.mxu1 %v2254_v7  ;;  %v338_v55 = vsub.f32 %v2753_v13, %v3555_v44 }
  0x38   :  { %1979 = vmatprep.subr.mxu0 %v2441_v63  ;;  %v1614_v37 = vadd.f32 %v1613_v15, %v1612_v11  ;;  %2027 = vmatprep.subr.mxu1 %v2263_v9  ;;  %v329_v11 = vand.u32 4294901760, %v328_v23  ;;  %v3556_v15 = vand.u32 4294901760, %v2790_v27  ;;  %v2816_v23 = vsub.f32 %v47_v49, %v2799_v17 }
  0x39   :  { %1897 = vmatprep.mubr.f32.mxu0 %v309_v46  ;;  %1947 = vmatprep.mubr.f32.mxu1 %v2606_v36  ;;  %v2806_v46 = vsub.f32 %v46_v57, %v2779_v45 }
  0x3a   :  { %1980 = vmatpush3.msra.mxu0 %v2441_v63  ;;  %v1615_v26 = vrot.slane %v1614_v37, 2  ;;  %2028 = vmatpush3.msra.mxu1 %v2263_v9  ;;  %v339_v63 = vand.u32 4294901760, %v338_v55 }
  0x3b   :  { %1898 = vmatmul.mubr.f32.gmra.mxu0 %v319_v58  ;;  %1948 = vmatmul.mubr.f32.gmra.mxu1 %v2636_v14  ;;  %v348_v58 = vsub.f32 %v2775_v60, %v3559_v40  ;;  %v3616_v40 = vld [vmem:[#allocation7_spill] sm:$0xff] }
  0x3c   :  { %1981 = vmatprep.subr.mxu0 %v2467_v43  ;;  %v1616_v44 = vadd.f32 %v1615_v26, %v1614_v37  ;;  %2029 = vmatprep.subr.mxu1 %v2276_v12  ;;  %v3558_v37 = vand.u32 4294901760, %v2806_v46  ;;  %v3557_v26 = vand.u32 4294901760, %v2816_v23 }
  0x3d   :  { %1982 = vmatpush3.msra.mxu0 %v2467_v43  ;;  %2030 = vmatpush3.msra.mxu1 %v2276_v12  ;;  %v358_v43 = vsub.f32 %v2790_v27, %v3556_v15  ;;  %v349_v55 = vand.u32 4294901760, %v348_v58  ;;  %v3607_v58 = vld [vmem:[#allocation14_spill] sm:$0xff] }
  0x3e   :  { %1983 = vmatprep.subr.mxu0 %v2480_v59  ;;  %v1617_v57 = vrot.slane %v1616_v44, 1  ;;  %2031 = vmatprep.subr.mxu1 %v2293_v16 }
  0x3f   :  { %1900 = vmatprep.mubr.f32.mxu0 %v329_v11  ;;  %1950 = vmatprep.mubr.f32.mxu1 %v2646_v48  ;;  %v359_v15 = vand.u32 4294901760, %v358_v43 }
  0x40   :  { %1984 = vmatpush3.msra.mxu0 %v2480_v59  ;;  %v1618_v49 = vadd.f32 %v1617_v57, %v1616_v44  ;;  %2032 = vmatpush3.msra.mxu1 %v2293_v16  ;;  %v368_v59 = vsub.f32 %v2806_v46, %v3558_v37  ;;  %v378_v44 = vsub.f32 %v2816_v23, %v3557_v26  ;;  %v3610_v57 = vld [vmem:[#allocation24_spill] sm:$0xff]  ;;  %v3615_v26 = vld [vmem:[#allocation10_spill] sm:$0xff] }
  0x41   :  { %1901 = vmatmul.mubr.f32.gmra.mxu0 %v339_v63  ;;  %1951 = vmatmul.mubr.f32.gmra.mxu1 %v2655_v53 }
  0x42   :  { %1985 = vmatprep.subr.mxu0 %v2505_v39  ;;  %v1619_v11 = vmax.f32 %v1618_v49, 1e-24  ;;  %2033 = vmatprep.subr.mxu1 %v2313_v21  ;;  %v379_v63 = vand.u32 4294901760, %v378_v44  ;;  %v3611_v49 = vld [vmem:[#allocation21_spill] sm:$0xff] }
  0x43   :  { %1986 = vmatpush3.msra.mxu0 %v2505_v39  ;;  %2034 = vmatpush3.msra.mxu1 %v2313_v21  ;;  %v369_v39 = vand.u32 4294901760, %v368_v59  ;;  %v3613_v59 = vld [vmem:[#allocation15_spill] sm:$0xff] }
  0x44   :  { %1987 = vmatprep.subr.mxu0 %v2530_v29  ;;  %2192 = vrsqrt.f32 %v1619_v11  ;;  %2035 = vmatprep.subr.mxu1 %v2326_v25 }
  0x45   :  { %1903 = vmatprep.mubr.f32.mxu0 %v349_v55  ;;  %1953 = vmatprep.mubr.f32.mxu1 %v2682_v35 }
  0x46   :  { %1988 = vmatpush3.msra.mxu0 %v2530_v29  ;;  %2036 = vmatpush3.msra.mxu1 %v2326_v25  ;;  %v3608_v29 = vld [vmem:[#allocation17_spill] sm:$0xff] }
  0x47   :  { %1904 = vmatmul.mubr.f32.gmra.mxu0 %v359_v15  ;;  %1954 = vmatmul.mubr.f32.gmra.mxu1 %v2699_v47 }
  0x48   :  { %1989 = vmatprep.subr.mxu0 %v2556_v54  ;;  %2037 = vmatprep.subr.mxu1 %v2349_v32 }
  0x49   :  { %1990 = vmatpush3.msra.mxu0 %v2556_v54  ;;  %2038 = vmatpush3.msra.mxu1 %v2349_v32  ;;  %v3609_v54 = vld [vmem:[#allocation20_spill] sm:$0xff] }
  0x4a   :  { %1991 = vmatprep.subr.mxu0 %v2568_v24  ;;  %2039 = vmatprep.subr.mxu1 %v3607_v58 }
  0x4b   :  { %1906 = vmatprep.mubr.f32.mxu0 %v369_v39  ;;  %1956 = vmatprep.mubr.f32.mxu1 %v2715_v28  ;;  %v3614_v39 = vld [vmem:[#allocation13_spill] sm:$0xff] }
  0x4c   :  { %1992 = vmatpush3.msra.mxu0 %v2568_v24  ;;  %2040 = vmatpush3.msra.mxu1 %v3607_v58 }
  0x4d   :  { %1907 = vmatmul.mubr.f32.gmra.mxu0 %v379_v63  ;;  %1957 = vmatmul.mubr.f32.gmra.mxu1 %v2727_v34 }
  0x4e   :  { %1993 = vmatprep.subr.mxu0 %v2623_v41  ;;  %2041 = vmatprep.subr.mxu1 %v3608_v29 }
  0x4f   :  { %1994 = vmatpush3.msra.mxu0 %v2623_v41  ;;  %2042 = vmatpush3.msra.mxu1 %v3608_v29  ;;  %v3612_v41 = vld [vmem:[#allocation18_spill] sm:$0xff] }
  0x50   :  { %1995 = vmatprep.subr.mxu0 %v2631_v33  ;;  %2043 = vmatprep.subr.mxu1 %v3609_v54 }
  0x51   :  { %1959 = vmatprep.mubr.f32.mxu1 %v2755_v18  ;;  %v2193_v24 = vpop.eup %2192  ;;  %1996 = vmatpush3.msra.mxu0 %v2631_v33  ;;  %v3620_v18 = vld [vmem:[#allocation3_spill] sm:$0xff] }
  0x52   :  { %1997 = vmatprep.mubr.f32.mxu0 %v2549_v6  ;;  %v1621_v15 = vmul.f32 %v2193_v24, %v2485_v62  ;;  %v1622_v43 = vmul.f32 %v2193_v24, %v3610_v57  ;;  %v1623_v55 = vmul.f32 %v2193_v24, %v3611_v49  ;;  %v1624_v11 = vmul.f32 %v2193_v24, %v3612_v41 }
  0x53   :  { %2044 = vmatpush3.msra.mxu1 %v3609_v54  ;;  %v1625_v44 = vmul.f32 %v2193_v24, %v3613_v59  ;;  %v1626_v63 = vmul.f32 %v2193_v24, %v3614_v39  ;;  %v1627_v37 = vmul.f32 %v2193_v24, %v3615_v26  ;;  %v1628_v33 = vmul.f32 %v2193_v24, %v3616_v40  ;;  %v3632_v59 = vld [vmem:[#allocation12_spill] sm:$0xff] }
  0x54   :  { %1960 = vmatmul.mubr.f32.gmra.mxu1 %v2765_v30  ;;  %v1629_v62 = vmul.f32 %v2193_v24, %v3617_v42  ;;  %v1630_v57 = vmul.f32 %v2193_v24, %v3618_v19  ;;  %v1631_v49 = vmul.f32 %v2193_v24, %v3619_v5  ;;  %v1632_v41 = vmul.f32 %v2193_v24, %v3620_v18  ;;  %v3621_v5 = vld [vmem:[#allocation33_spill] sm:$0xff]  ;;  %v3622_v19 = vld [vmem:[#allocation2_spill] sm:$0xff] }
  0x55   :  { %1637 = vst.msk [vmem:[%s3483_s4] sm:$0xff] %vm1494_vm0, %v1621_v15  ;;  %1638 = vst.msk [vmem:[%s3483_s4 + $0x8] sm:$0xff] %vm1494_vm0, %v1622_v43  ;;  %1998 = vmatmul.mubr.f32.vlgmr.msra.gmra.mxu0 %v3621_v5  ;;  %v1633_v18 = vmul.f32 %v2193_v24, %v3622_v19  ;;  %v1634_v42 = vmul.f32 %v2193_v24, %v2235_v2  ;;  %v1635_v40 = vmul.f32 %v2193_v24, %v2230_v1  ;;  %v3624_v1 = vld [vmem:[#allocation8_spill] sm:$0xff]  ;;  %v3625_v2 = vld [vmem:[#allocation26_spill] sm:$0xff] }
  0x56   :  { %1639 = vst.msk [vmem:[%s3483_s4 + $0x10] sm:$0xff] %vm1494_vm0, %v1623_v55  ;;  %1640 = vst.msk [vmem:[%s3483_s4 + $0x18] sm:$0xff] %vm1494_vm0, %v1624_v11  ;;  %v1636_v26 = vmul.f32 %v2193_v24, %v2225_v0  ;;  %v3623_v0 = vld [vmem:[#allocation23_spill] sm:$0xff]  ;;  %2077 = vmatprep.subr.mxu0 %v3624_v1  ;;  %1962 = vmatprep.mubr.f32.mxu1 %v2779_v45  ;;  %v3628_v15 = vld [vmem:[#allocation37_spill] sm:$0xff]  ;;  %v3634_v39 = vand.u32 4294901760, %v3621_v5 }
  0x57   :  { %1641 = vst.msk [vmem:[%s3483_s4 + $0x20] sm:$0xff] %vm1494_vm0, %v1625_v44  ;;  %1642 = vst.msk [vmem:[%s3483_s4 + $0x28] sm:$0xff] %vm1494_vm0, %v1626_v63  ;;  %2045 = vmatprep.subr.mxu1 %v3623_v0  ;;  %2078 = vmatpush3.msra.mxu0 %v3624_v1  ;;  %v3627_v24 = vld [vmem:[#allocation35_spill] sm:$0xff]  ;;  %v3629_v43 = vld [vmem:[#allocation28_spill] sm:$0xff]  ;;  %v3633_v44 = vand.u32 4294901760, %v2549_v6 }
  0x58   :  { %1643 = vst.msk [vmem:[%s3483_s4 + $0x30] sm:$0xff] %vm1494_vm0, %v1627_v37  ;;  %1644 = vst.msk [vmem:[%s3483_s4 + $0x38] sm:$0xff] %vm1494_vm0, %v1628_v33  ;;  %2046 = vmatpush3.msra.mxu1 %v3623_v0  ;;  %v3626_v37 = vld [vmem:[#allocation9_spill] sm:$0xff]  ;;  %2000 = vmatprep.mubr.f32.mxu0 %v3627_v24  ;;  %v3630_v55 = vld [vmem:[#allocation11_spill] sm:$0xff]  ;;  %v3637_v6 = vand.u32 4294901760, %v3627_v24 }
  0x59   :  { %1645 = vst.msk [vmem:[%s3483_s4 + $0x40] sm:$0xff] %vm1494_vm0, %v1629_v62  ;;  %1646 = vst.msk [vmem:[%s3483_s4 + $0x48] sm:$0xff] %vm1494_vm0, %v1630_v57  ;;  %2047 = vmatprep.subr.mxu1 %v3625_v2  ;;  %2079 = vmatprep.subr.mxu0 %v3626_v37  ;;  %v3631_v11 = vld [vmem:[#allocation30_spill] sm:$0xff]  ;;  %v3635_v63 = vld [vmem:[#allocation16_spill] sm:$0xff]  ;;  %v3638_v62 = vand.u32 4294901760, %v3628_v15 }
  0x5a   :  { %1647 = vst.msk [vmem:[%s3483_s4 + $0x50] sm:$0xff] %vm1494_vm0, %v1631_v49  ;;  %1648 = vst.msk [vmem:[%s3483_s4 + $0x58] sm:$0xff] %vm1494_vm0, %v1632_v41  ;;  %2048 = vmatpush3.msra.mxu1 %v3625_v2  ;;  %2080 = vmatpush3.msra.mxu0 %v3626_v37  ;;  %v3636_v33 = vld [vmem:[#allocation19_spill] sm:$0xff]  ;;  %v3639_v57 = vld [vmem:[#allocation22_spill] sm:$0xff]  ;;  %v3642_v49 = vand.u32 4294901760, %v2653_v10 }
  0x5b   :  { %1649 = vst.msk [vmem:[%s3483_s4 + $0x60] sm:$0xff] %vm1494_vm0, %v1633_v18  ;;  %1650 = vst.msk [vmem:[%s3483_s4 + $0x68] sm:$0xff] %vm1494_vm0, %v1634_v42  ;;  %1963 = vmatmul.mubr.f32.gmra.mxu1 %v2799_v17  ;;  %2001 = vmatmul.mubr.f32.gmra.mxu0 %v3628_v15  ;;  %v3643_v41 = vld [vmem:[#allocation27_spill] sm:$0xff]  ;;  %v62_v5 = vld [vmem:[%s3484_s1 + $0x70] sm:$0xff] }
  0x5c   :  { %1651 = vst.msk [vmem:[%s3483_s4 + $0x70] sm:$0xff] %vm1494_vm0, %v1635_v40  ;;  %1652 = vst.msk [vmem:[%s3483_s4 + $0x78] sm:$0xff] %vm1494_vm0, %v1636_v26  ;;  %2049 = vmatprep.subr.mxu1 %v3629_v43  ;;  %2081 = vmatprep.subr.mxu0 %v3630_v55 }
  0x5d   :  { %2050 = vmatpush3.msra.mxu1 %v3629_v43  ;;  %2082 = vmatpush3.msra.mxu0 %v3630_v55 }
  0x5e   :  { %2051 = vmatprep.subr.mxu1 %v3631_v11  ;;  %2083 = vmatprep.subr.mxu0 %v3632_v59 }
  0x5f   :  { %2003 = vmatprep.mubr.f32.mxu0 %v2634_v61  ;;  %2052 = vmatpush3.msra.mxu1 %v3631_v11 }
  0x60   :  { %2053 = vmatprep.mubr.f32.mxu1 %v3633_v44  ;;  %2084 = vmatpush3.msra.mxu0 %v3632_v59 }
  0x61   :  { %2054 = vmatmul.mubr.f32.vlgmr.msra.gmra.mxu1 %v3634_v39  ;;  %2004 = vmatmul.mubr.f32.gmra.mxu0 %v2653_v10  ;;  %v3647_v10 = vld [vmem:[#allocation31_spill] sm:$0xff] }
  0x62   :  { %2085 = vmatprep.subr.mxu0 %v3635_v63  ;;  %2133 = vmatprep.subr.mxu1 %v2238_v3 }
  0x63   :  { %2086 = vmatpush3.msra.mxu0 %v3635_v63  ;;  %2134 = vmatpush3.msra.mxu1 %v2238_v3  ;;  %v3640_v3 = vld [vmem:[#allocation25_spill] sm:$0xff] }
  0x64   :  { %2087 = vmatprep.subr.mxu0 %v3636_v33  ;;  %2135 = vmatprep.subr.mxu1 %v2241_v4 }
  0x65   :  { %2006 = vmatprep.mubr.f32.mxu0 %v2664_v22  ;;  %2056 = vmatprep.mubr.f32.mxu1 %v3637_v6 }
  0x66   :  { %2088 = vmatpush3.msra.mxu0 %v3636_v33  ;;  %2136 = vmatpush3.msra.mxu1 %v2241_v4  ;;  %v3641_v4 = vand.u32 4294901760, %v2634_v61  ;;  %v3646_v61 = vand.u32 4294901760, %v2674_v50 }
  0x67   :  { %2007 = vmatmul.mubr.f32.gmra.mxu0 %v2674_v50  ;;  %2057 = vmatmul.mubr.f32.gmra.mxu1 %v3638_v62  ;;  %v3651_v50 = vld [vmem:[#allocation34_spill] sm:$0xff] }
  0x68   :  { %2089 = vmatprep.subr.mxu0 %v3639_v57  ;;  %2137 = vmatprep.subr.mxu1 %v2254_v7 }
  0x69   :  { %2090 = vmatpush3.msra.mxu0 %v3639_v57  ;;  %2138 = vmatpush3.msra.mxu1 %v2254_v7  ;;  %v3644_v7 = vld [vmem:[#allocation29_spill] sm:$0xff] }
  0x6a   :  { %2091 = vmatprep.subr.mxu0 %v3640_v3  ;;  %2139 = vmatprep.subr.mxu1 %v2263_v9 }
  0x6b   :  { %2009 = vmatprep.mubr.f32.mxu0 %v2697_v56  ;;  %2059 = vmatprep.mubr.f32.mxu1 %v3641_v4 }
  0x6c   :  { %2092 = vmatpush3.msra.mxu0 %v3640_v3  ;;  %2140 = vmatpush3.msra.mxu1 %v2263_v9  ;;  %v3645_v9 = vand.u32 4294901760, %v2664_v22  ;;  %v3650_v22 = vand.u32 4294901760, %v2713_v38 }
  0x6d   :  { %2010 = vmatmul.mubr.f32.gmra.mxu0 %v2713_v38  ;;  %2060 = vmatmul.mubr.f32.gmra.mxu1 %v3642_v49  ;;  %v3655_v38 = vld [vmem:[#allocation38_spill] sm:$0xff] }
  0x6e   :  { %2093 = vmatprep.subr.mxu0 %v3643_v41  ;;  %2141 = vmatprep.subr.mxu1 %v2276_v12 }
  0x6f   :  { %2094 = vmatpush3.msra.mxu0 %v3643_v41  ;;  %2142 = vmatpush3.msra.mxu1 %v2276_v12  ;;  %v3648_v12 = vld [vmem:[#allocation32_spill] sm:$0xff] }
  0x70   :  { %2095 = vmatprep.subr.mxu0 %v3644_v7  ;;  %2143 = vmatprep.subr.mxu1 %v2293_v16 }
  0x71   :  { %2012 = vmatprep.mubr.f32.mxu0 %v2740_v20  ;;  %2062 = vmatprep.mubr.f32.mxu1 %v3645_v9 }
  0x72   :  { %2096 = vmatpush3.msra.mxu0 %v3644_v7  ;;  %2144 = vmatpush3.msra.mxu1 %v2293_v16  ;;  %v3649_v16 = vand.u32 4294901760, %v2697_v56  ;;  %v3654_v56 = vand.u32 4294901760, %v2753_v13 }
  0x73   :  { %2013 = vmatmul.mubr.f32.gmra.mxu0 %v2753_v13  ;;  %2063 = vmatmul.mubr.f32.gmra.mxu1 %v3646_v61  ;;  %v3658_v13 = vand.u32 4294901760, %v2790_v27 }
  0x74   :  { %2097 = vmatprep.subr.mxu0 %v3647_v10  ;;  %2145 = vmatprep.subr.mxu1 %v2313_v21 }
  0x75   :  { %2098 = vmatpush3.msra.mxu0 %v3647_v10  ;;  %2146 = vmatpush3.msra.mxu1 %v2313_v21  ;;  %v3652_v21 = vld [vmem:[#allocation36_spill] sm:$0xff] }
  0x76   :  { %2099 = vmatprep.subr.mxu0 %v3648_v12  ;;  %2147 = vmatprep.subr.mxu1 %v2326_v25 }
  0x77   :  { %2015 = vmatprep.mubr.f32.mxu0 %v2775_v60  ;;  %2065 = vmatprep.mubr.f32.mxu1 %v3649_v16 }
  0x78   :  { %2100 = vmatpush3.msra.mxu0 %v3648_v12  ;;  %2148 = vmatpush3.msra.mxu1 %v2326_v25  ;;  %v3653_v25 = vand.u32 4294901760, %v2740_v20  ;;  %v3657_v20 = vand.u32 4294901760, %v2775_v60  ;;  %v3660_v60 = vand.u32 4294901760, %v2816_v23 }
  0x79   :  { %2016 = vmatmul.mubr.f32.gmra.mxu0 %v2790_v27  ;;  %2066 = vmatmul.mubr.f32.gmra.mxu1 %v3650_v22  ;;  %v2196_v27 = vmov 0  }
  0x7a   :  { %2101 = vmatprep.subr.mxu0 %v3651_v50  ;;  %2149 = vmatprep.subr.mxu1 %v2349_v32 }
  0x7b   :  { %2102 = vmatpush3.msra.mxu0 %v3651_v50  ;;  %2150 = vmatpush3.msra.mxu1 %v2349_v32  ;;  %v3656_v32 = vld [vmem:[#allocation39_spill] sm:$0xff] }
  0x7c   :  { %2103 = vmatprep.subr.mxu0 %v3652_v21  ;;  %2151 = vmatprep.subr.mxu1 %v3607_v58 }
  0x7d   :  { %2018 = vmatprep.mubr.f32.mxu0 %v2806_v46  ;;  %2068 = vmatprep.mubr.f32.mxu1 %v3653_v25 }
  0x7e   :  { %2104 = vmatpush3.msra.mxu0 %v3652_v21  ;;  %2152 = vmatpush3.msra.mxu1 %v3607_v58  ;;  %v3659_v58 = vand.u32 4294901760, %v2806_v46  ;;  %v48_v46 = vld [vmem:[%s3484_s1] sm:$0xff] }
  0x7f   :  { %2019 = vmatmul.mubr.f32.gmra.mxu0 %v2816_v23  ;;  %2069 = vmatmul.mubr.f32.gmra.mxu1 %v3654_v56  ;;  %v50_v23 = vld [vmem:[%s3484_s1 + $0x10] sm:$0xff] }
  0x80   :  { %2105 = vmatprep.subr.mxu0 %v3655_v38  ;;  %2153 = vmatprep.subr.mxu1 %v3608_v29 }
  0x81   :  { %2106 = vmatpush3.msra.mxu0 %v3655_v38  ;;  %2154 = vmatpush3.msra.mxu1 %v3608_v29  ;;  %v49_v29 = vld [vmem:[%s3484_s1 + $0x8] sm:$0xff] }
  0x82   :  { %2107 = vmatprep.subr.mxu0 %v3656_v32  ;;  %2155 = vmatprep.subr.mxu1 %v3609_v54 }
  0x83   :  { %2071 = vmatprep.mubr.f32.mxu1 %v3657_v20  ;;  %2108 = vmatpush3.msra.mxu0 %v3656_v32 }
  0x84   :  { %2109 = vmatprep.mubr.f32.mxu0 %v2537_v31  ;;  %2156 = vmatpush3.msra.mxu1 %v3609_v54  ;;  %v3661_v54 = vld [vmem:[#allocation40_spill] sm:$0xff] }
  0x85   :  { %2110 = vmatmul.mubr.f32.vlgmr.msra.gmra.mxu0 %v2539_v52  ;;  %2072 = vmatmul.mubr.f32.gmra.mxu1 %v3658_v13 }
  0x86   :  { %2157 = vmatprep.subr.mxu1 %v3623_v0  ;;  %2074 = vmatprep.mubr.f32.mxu1 %v3659_v58 }
  0x87   :  { %2158 = vmatpush3.msra.mxu1 %v3623_v0  ;;  %2112 = vmatprep.mubr.f32.mxu0 %v2558_v8 }
  0x88   :  { %2159 = vmatprep.subr.mxu1 %v3625_v2  ;;  %2190 = vset.pattern.permute.xlu0 %v2196_v27 }
  0x89   :  { %2160 = vmatpush3.msra.mxu1 %v3625_v2  ;;  %2113 = vmatmul.mubr.f32.gmra.mxu0 %v2587_v51 }
  0x8a   :  { %2075 = vmatmul.mubr.f32.gmra.mxu1 %v3660_v60  ;;  %2161 = vmatprep.subr.mxu1 %v3629_v43 }
  0x8b   :  { %2162 = vmatpush3.msra.mxu1 %v3629_v43  ;;  %2115 = vmatprep.mubr.f32.mxu0 %v2606_v36 }
  0x8c   :  { %2163 = vmatprep.subr.mxu1 %v3631_v11  ;;  %2165 = vmatprep.mubr.f32.mxu1 %v2537_v31  ;;  %v51_v31 = vld [vmem:[%s3484_s1 + $0x18] sm:$0xff] }
  0x8d   :  { %2164 = vmatpush3.msra.mxu1 %v3631_v11  ;;  %66 = vperm.xlu0 %2190, %v48_v46  }
  0x8e   :  { %2116 = vmatmul.mubr.f32.gmra.mxu0 %v2636_v14  ;;  %2166 = vmatmul.mubr.f32.vlgmr.msra.gmra.mxu1 %v2539_v52  ;;  %v52_v52 = vld [vmem:[%s3484_s1 + $0x20] sm:$0xff] }
  0x8f   :  { %2191 = vset.pattern.permute.xlu1 %v2196_v27  ;;  %2118 = vmatprep.mubr.f32.mxu0 %v2646_v48 }
  0x90   :  { %2168 = vmatprep.mubr.f32.mxu1 %v2558_v8  ;;  %76 = vperm.xlu1 %2191, %v50_v23   ;;  %v53_v8 = vld [vmem:[%s3484_s1 + $0x28] sm:$0xff] }
  0x91   :  { %71 = vperm.xlu0 %2190, %v49_v29  }
  0x92   :  { %2119 = vmatmul.mubr.f32.gmra.mxu0 %v2655_v53  ;;  %2169 = vmatmul.mubr.f32.gmra.mxu1 %v2587_v51  ;;  %v54_v51 = vld [vmem:[%s3484_s1 + $0x30] sm:$0xff] }
  0x93   :  { %2121 = vmatprep.mubr.f32.mxu0 %v2682_v35  ;;  %2171 = vmatprep.mubr.f32.mxu1 %v2606_v36  ;;  %v55_v36 = vld [vmem:[%s3484_s1 + $0x38] sm:$0xff] }
  0x94   :  { %81 = vperm.xlu1 %2191, %v51_v31  }
  0x95   :  { %86 = vperm.xlu0 %2190, %v52_v52  }
  0x96   :  { %2122 = vmatmul.mubr.f32.gmra.mxu0 %v2699_v47  ;;  %2172 = vmatmul.mubr.f32.gmra.mxu1 %v2636_v14  ;;  %v56_v14 = vld [vmem:[%s3484_s1 + $0x40] sm:$0xff] }
  0x97   :  { %2124 = vmatprep.mubr.f32.mxu0 %v2715_v28  ;;  %2174 = vmatprep.mubr.f32.mxu1 %v2646_v48  ;;  %v57_v48 = vld [vmem:[%s3484_s1 + $0x48] sm:$0xff] }
  0x98   :  { %91 = vperm.xlu1 %2191, %v53_v8  }
  0x99   :  { %96 = vperm.xlu0 %2190, %v54_v51  }
  0x9a   :  { %2125 = vmatmul.mubr.f32.gmra.mxu0 %v2727_v34  ;;  %2175 = vmatmul.mubr.f32.gmra.mxu1 %v2655_v53  ;;  %v58_v53 = vld [vmem:[%s3484_s1 + $0x50] sm:$0xff] }
  0x9b   :  { %2127 = vmatprep.mubr.f32.mxu0 %v3661_v54  ;;  %2177 = vmatprep.mubr.f32.mxu1 %v2682_v35  ;;  %v59_v35 = vld [vmem:[%s3484_s1 + $0x58] sm:$0xff] }
  0x9c   :  { %101 = vperm.xlu1 %2191, %v55_v36  }
  0x9d   :  { %106 = vperm.xlu0 %2190, %v56_v14  }
  0x9e   :  { %2128 = vmatmul.mubr.f32.gmra.mxu0 %v2765_v30  ;;  %2178 = vmatmul.mubr.f32.gmra.mxu1 %v2699_v47  ;;  %v60_v47 = vld [vmem:[%s3484_s1 + $0x60] sm:$0xff] }
  0x9f   :  { %2130 = vmatprep.mubr.f32.mxu0 %v2779_v45  ;;  %2180 = vmatprep.mubr.f32.mxu1 %v2715_v28  ;;  %v61_v28 = vld [vmem:[%s3484_s1 + $0x68] sm:$0xff] }
  0xa0   :  { %111 = vperm.xlu1 %2191, %v57_v48  }
  0xa1   :  { %116 = vperm.xlu0 %2190, %v58_v53  }
  0xa2   :  { %2131 = vmatmul.mubr.f32.gmra.mxu0 %v2799_v17  ;;  %2181 = vmatmul.mubr.f32.gmra.mxu1 %v2727_v34  ;;  %v63_v34 = vld [vmem:[%s3484_s1 + $0x78] sm:$0xff] }
  0xa3   :  { %2183 = vmatprep.mubr.f32.mxu1 %v3661_v54 }
  0xa4   :  { %121 = vperm.xlu1 %2191, %v59_v35  }
  0xa5   :  { %126 = vperm.xlu0 %2190, %v60_v47  }
  0xa6   :  { %2184 = vmatmul.mubr.f32.gmra.mxu1 %v2765_v30 }
  0xa7   :  { %2186 = vmatprep.mubr.f32.mxu1 %v2779_v45 }
  0xa8   :  { %131 = vperm.xlu1 %2191, %v61_v28  }
  0xa9   :  { %136 = vperm.xlu0 %2190, %v62_v5  }
  0xaa   :  { %2187 = vmatmul.mubr.f32.gmra.mxu1 %v2799_v17 }
  0xac   :  { %141 = vperm.xlu1 %2191, %v63_v34  }
  0xe4   :  { %v3148_v19 = vpop.f32.mrf.mxu0 }
  0xe6   :  { %v3150_v18 = vpop.f32.mrf.mxu0 }
  0xea   :  { %v3152_v30 = vpop.f32.mrf.mxu0 }
  0xec   :  { %v3154_v42 = vpop.f32.mrf.mxu0 }
  0xef   :  { %v3156_v40 = vpop.f32.mrf.mxu1  ;;  %v3158_v45 = vpop.f32.mrf.mxu0 }
  0xf1   :  { %v3160_v26 = vpop.f32.mrf.mxu0  ;;  %v3162_v0 = vpop.f32.mrf.mxu1 }
  0xf5   :  { %v3164_v1 = vpop.f32.mrf.mxu0  ;;  %v3166_v17 = vpop.f32.mrf.mxu1 }
  0xf7   :  { %v3168_v2 = vpop.f32.mrf.mxu0  ;;  %v3170_v37 = vpop.f32.mrf.mxu1 }
  0xfb   :  { %v3172_v24 = vpop.f32.mrf.mxu0  ;;  %v3174_v15 = vpop.f32.mrf.mxu1 }
  0xfd   :  { %v3176_v43 = vpop.f32.mrf.mxu0  ;;  %v3178_v55 = vpop.f32.mrf.mxu1 }
 0x101   :  { %v3180_v11 = vpop.f32.mrf.mxu0  ;;  %v3182_v59 = vpop.f32.mrf.mxu1 }
 0x103   :  { %v3184_v44 = vpop.f32.mrf.mxu0  ;;  %v3186_v39 = vpop.f32.mrf.mxu1 }
 0x107   :  { %v3188_v63 = vpop.f32.mrf.mxu0  ;;  %v3190_v33 = vpop.f32.mrf.mxu1 }
 0x108   :  { %v67_v21 = vpop.permute.xlu0 %66 }
 0x109   :  { %v3192_v6 = vpop.f32.mrf.mxu0  ;;  %v3194_v62 = vpop.f32.mrf.mxu1 }
 0x10b   :  { %v77_v16 = vpop.permute.xlu1 %76 }
 0x10c   :  { %v72_v13 = vpop.permute.xlu0 %71 }
 0x10d   :  { %v3196_v57 = vpop.f32.mrf.mxu0  ;;  %v3198_v3 = vpop.f32.mrf.mxu1 }
 0x10f   :  { %v3200_v4 = vpop.f32.mrf.mxu1  ;;  %v3202_v49 = vpop.f32.mrf.mxu0 }
 0x110   :  { %v82_v38 = vpop.permute.xlu1 %81  ;;  %v87_v27 = vpop.permute.xlu0 %86 }
 0x114   :  { %v3204_v41 = vpop.f32.mrf.mxu1  ;;  %v92_v23 = vpop.permute.xlu1 %91 }
 0x115   :  { %v1999_v7 = vpop.f32.mrf.mxu0  ;;  %v97_v8 = vpop.permute.xlu0 %96 }
 0x116   :  { %v3206_v9 = vpop.f32.mrf.mxu1 }
 0x117   :  { %v3208_v61 = vpop.f32.mrf.mxu0 }
 0x118   :  { %v102_v36 = vpop.permute.xlu1 %101 }
 0x119   :  { %v107_v53 = vpop.permute.xlu0 %106 }
 0x11b   :  { %v3210_v10 = vpop.f32.mrf.mxu1  ;;  %v3212_v12 = vpop.f32.mrf.mxu0 }
 0x11c   :  { %3662 = vst [vmem:[#allocation14_spill] sm:$0xff] %v3210_v10  ;;  %v112_v47 = vpop.permute.xlu1 %111 }
 0x11d   :  { %v3214_v22 = vpop.f32.mrf.mxu1  ;;  %v3216_v50 = vpop.f32.mrf.mxu0 }
 0x121   :  { %v3218_v25 = vpop.f32.mrf.mxu1  ;;  %v3220_v56 = vpop.f32.mrf.mxu0 }
 0x123   :  { %v3222_v32 = vpop.f32.mrf.mxu0  ;;  %v3224_v20 = vpop.f32.mrf.mxu1 }
 0x127   :  { %v3226_v58 = vpop.f32.mrf.mxu0  ;;  %v3228_v60 = vpop.f32.mrf.mxu1 }
 0x128   :  { %3663 = vst [vmem:[#allocation17_spill] sm:$0xff] %v3228_v60  ;;  %v292_v60 = vadd.f32 %v3168_v2, %v97_v8  ;;  %v3684_v8 = vld [vmem:[#allocation14_spill] sm:$0xff] }
 0x129   :  { %v3230_v46 = vpop.f32.mrf.mxu0  ;;  %v3232_v29 = vpop.f32.mrf.mxu1 }
 0x12a   :  { %3664 = vst [vmem:[#allocation20_spill] sm:$0xff] %v3230_v46  ;;  %3665 = vst [vmem:[#allocation24_spill] sm:$0xff] %v3232_v29 }
 0x12d   :  { %v3234_v31 = vpop.f32.mrf.mxu0  ;;  %v3236_v52 = vpop.f32.mrf.mxu1 }
 0x12e   :  { %3666 = vst [vmem:[#allocation21_spill] sm:$0xff] %v3234_v31  ;;  %3667 = vst [vmem:[#allocation18_spill] sm:$0xff] %v3236_v52  ;;  %v117_v52 = vpop.permute.xlu0 %116 }
 0x12f   :  { %v3238_v51 = vpop.f32.mrf.mxu0  ;;  %v3240_v54 = vpop.f32.mrf.mxu1 }
 0x130   :  { %3668 = vst [vmem:[#allocation15_spill] sm:$0xff] %v3238_v51  ;;  %3669 = vst [vmem:[#allocation13_spill] sm:$0xff] %v3240_v54  ;;  %v122_v51 = vpop.permute.xlu1 %121 }
 0x131   :  { %v342_v2 = vadd.f32 %v3180_v11, %v122_v51  ;;  %v3685_v51 = vld [vmem:[#allocation24_spill] sm:$0xff] }
 0x133   :  { %v3242_v14 = vpop.f32.mrf.mxu0  ;;  %v3244_v48 = vpop.f32.mrf.mxu1 }
 0x134   :  { %3670 = vst [vmem:[#allocation10_spill] sm:$0xff] %v3242_v14  ;;  %3671 = vst [vmem:[#allocation7_spill] sm:$0xff] %v3244_v48  ;;  %v242_v48 = vadd.f32 %v3148_v19, %v72_v13  ;;  %v302_v19 = vadd.f32 %v3164_v1, %v102_v36 }
 0x135   :  { %v3246_v35 = vpop.f32.mrf.mxu0  ;;  %v3248_v28 = vpop.f32.mrf.mxu1 }
 0x136   :  { %3672 = vst [vmem:[#allocation6_spill] sm:$0xff] %v3246_v35  ;;  %3673 = vst [vmem:[#allocation5_spill] sm:$0xff] %v3248_v28  ;;  %v127_v35 = vpop.permute.xlu0 %126  ;;  %v132_v28 = vpop.permute.xlu1 %131 }
 0x139   :  { %v3250_v5 = vpop.f32.mrf.mxu0  ;;  %v3252_v34 = vpop.f32.mrf.mxu1 }
 0x13a   :  { %3674 = vst [vmem:[#allocation4_spill] sm:$0xff] %v3250_v5  ;;  %3675 = vst [vmem:[#allocation3_spill] sm:$0xff] %v3252_v34  ;;  %v262_v34 = vadd.f32 %v3152_v30, %v82_v38  ;;  %v232_v5 = vadd.f32 %v3150_v18, %v67_v21  ;;  %v569_v21 = vadd.f32 %v3186_v39, %v292_v60 }
 0x13b   :  { %v3254_v31 = vpop.f32.mrf.mxu0  ;;  %v3256_v29 = vpop.f32.mrf.mxu1 }
 0x13c   :  { %3676 = vst [vmem:[#allocation33_spill] sm:$0xff] %v3254_v31  ;;  %3677 = vst [vmem:[#allocation2_spill] sm:$0xff] %v3256_v29  ;;  %v282_v31 = vadd.f32 %v3158_v45, %v92_v23  ;;  %v252_v29 = vadd.f32 %v3154_v42, %v77_v16  ;;  %v551_v18 = vadd.f32 %v3166_v17, %v262_v34  ;;  %v137_v16 = vpop.permute.xlu0 %136 }
 0x13d   :  { %v575_v17 = vadd.f32 %v3182_v59, %v302_v19  ;;  %v3691_v19 = vld [vmem:[#allocation7_spill] sm:$0xff] }
 0x13e   :  { %v545_v45 = vadd.f32 %v3170_v37, %v252_v29  ;;  %v563_v1 = vadd.f32 %v3174_v15, %v282_v31  ;;  %v332_v37 = vadd.f32 %v3184_v44, %v117_v52  ;;  %v748_v11 = vadd.f32 %v3212_v12, %v551_v18  ;;  %v3682_v29 = vld [vmem:[#allocation17_spill] sm:$0xff]  ;;  %v3683_v31 = vld [vmem:[#allocation20_spill] sm:$0xff]  ;;  %v3692_v18 = vld [vmem:[#allocation6_spill] sm:$0xff] }
 0x13f   :  { %v3258_v54 = vpop.f32.mrf.mxu0  ;;  %v3260_v14 = vpop.f32.mrf.mxu1  ;;  %v372_v44 = vadd.f32 %v3202_v49, %v137_v16 }
 0x140   :  { %3678 = vst [vmem:[#allocation23_spill] sm:$0xff] %v3258_v54  ;;  %3679 = vst [vmem:[#allocation8_spill] sm:$0xff] %v3260_v14  ;;  %v539_v54 = vadd.f32 %v3156_v40, %v242_v48  ;;  %v272_v14 = vadd.f32 %v3160_v26, %v87_v27  ;;  %v593_v23 = vadd.f32 %v3200_v4, %v332_v37 }
 0x141   :  { %v3263_v10 = vpop.f32.mrf.mxu0  ;;  %v3265_v46 = vpop.f32.mrf.mxu1  ;;  %v617_v4 = vadd.f32 %v3214_v22, %v372_v44  ;;  %v3695_v37 = vld [vmem:[#allocation3_spill] sm:$0xff] }
 0x142   :  { %3680 = vst [vmem:[#allocation26_spill] sm:$0xff] %v3263_v10  ;;  %3681 = vst [vmem:[#allocation9_spill] sm:$0xff] %v3265_v46  ;;  %v533_v10 = vadd.f32 %v3162_v0, %v232_v5  ;;  %v322_v46 = vadd.f32 %v3172_v24, %v112_v47  ;;  %v557_v42 = vadd.f32 %v3178_v55, %v272_v14  ;;  %v142_v24 = vpop.permute.xlu1 %141  ;;  %v3687_v14 = vld [vmem:[#allocation18_spill] sm:$0xff] }
 0x143   :  { %v734_v40 = vadd.f32 %v1999_v7, %v539_v54  ;;  %v312_v0 = vadd.f32 %v3176_v43, %v107_v53  ;;  %v362_v55 = vadd.f32 %v3188_v63, %v132_v28  ;;  %v352_v43 = vadd.f32 %v3192_v6, %v127_v35  ;;  %v3686_v54 = vld [vmem:[#allocation21_spill] sm:$0xff]  ;;  %v3690_v5 = vld [vmem:[#allocation10_spill] sm:$0xff] }
 0x144   :  { %v727_v7 = vadd.f32 %v3208_v61, %v533_v10  ;;  %v587_v15 = vadd.f32 %v3190_v33, %v322_v46  ;;  %v382_v59 = vadd.f32 %v3196_v57, %v142_v24  ;;  %v741_v63 = vadd.f32 %v3216_v50, %v545_v45  ;;  %v3694_v24 = vld [vmem:[#allocation4_spill] sm:$0xff]  ;;  %v3697_v44 = vld [vmem:[#allocation2_spill] sm:$0xff] }
 0x145   :  { %v2111_v13 = vpop.f32.mrf.mxu0  ;;  %v3277_v30 = vpop.f32.mrf.mxu1  ;;  %v581_v39 = vadd.f32 %v3194_v62, %v312_v0  ;;  %v599_v10 = vadd.f32 %v3198_v3, %v342_v2  ;;  %v605_v33 = vadd.f32 %v3206_v9, %v352_v43  ;;  %v762_v62 = vadd.f32 %v3220_v56, %v563_v1 }
 0x146   :  { %v929_v6 = vadd.f32 %v3218_v25, %v734_v40  ;;  %v611_v46 = vadd.f32 %v3204_v41, %v362_v55  ;;  %v755_v57 = vadd.f32 %v3222_v32, %v557_v42  ;;  %v921_v49 = vadd.f32 %v3224_v20, %v727_v7  ;;  %v3688_v32 = vld [vmem:[#allocation15_spill] sm:$0xff]  ;;  %v3689_v20 = vld [vmem:[#allocation13_spill] sm:$0xff] }
 0x147   :  { %v1159_v26 = vpop.f32.mrf.mxu0  ;;  %v3286_v38 = vpop.f32.mrf.mxu1  ;;  %v776_v50 = vadd.f32 %v3226_v58, %v575_v17  ;;  %v945_v3 = vadd.f32 %v3682_v29, %v748_v11  ;;  %v769_v9 = vadd.f32 %v3683_v31, %v569_v21  ;;  %v623_v25 = vadd.f32 %v3684_v8, %v382_v59  ;;  %v3693_v42 = vld [vmem:[#allocation5_spill] sm:$0xff] }
 0x148   :  { %v1166_v52 = vadd.f32 %v2111_v13, %v929_v6  ;;  %v937_v36 = vadd.f32 %v3685_v51, %v741_v63  ;;  %v790_v41 = vadd.f32 %v3686_v54, %v587_v15  ;;  %v961_v22 = vadd.f32 %v3687_v14, %v762_v62  ;;  %v3696_v55 = vld [vmem:[#allocation33_spill] sm:$0xff]  ;;  %v3698_v63 = vld [vmem:[#allocation23_spill] sm:$0xff]  ;;  %v3699_v62 = vld [vmem:[#allocation8_spill] sm:$0xff] }
 0x149   :  { %v2114_v27 = vpop.f32.mrf.mxu0  ;;  %v783_v53 = vadd.f32 %v3688_v32, %v581_v39  ;;  %v953_v35 = vadd.f32 %v3689_v20, %v755_v57  ;;  %v1160_v58 = vadd.f32 %v1159_v26, %v921_v49  ;;  %v804_v34 = vadd.f32 %v3690_v5, %v599_v10  ;;  %v3700_v29 = vld [vmem:[#allocation26_spill] sm:$0xff]  ;;  %v3701_v31 = vld [vmem:[#allocation9_spill] sm:$0xff] }
 0x14a   :  { %v3296_v60 = vpop.f32.mrf.mxu1  ;;  %v977_v13 = vadd.f32 %v3691_v19, %v776_v50  ;;  %v797_v45 = vadd.f32 %v3692_v18, %v593_v23  ;;  %v969_v40 = vadd.f32 %v3693_v42, %v769_v9  ;;  %v1178_v1 = vadd.f32 %v2114_v27, %v945_v3 }
 0x14b   :  { %v1171_v61 = vpop.f32.mrf.mxu0  ;;  %v818_v17 = vadd.f32 %v3694_v24, %v611_v46  ;;  %v993_v26 = vadd.f32 %v3695_v37, %v790_v41  ;;  %v811_v7 = vadd.f32 %v3696_v55, %v605_v33  ;;  %v985_v27 = vadd.f32 %v3697_v44, %v783_v53 }
 0x14c   :  { %v3306_v12 = vpop.f32.mrf.mxu1  ;;  %v1172_v15 = vadd.f32 %v1171_v61, %v937_v36  ;;  %v3332_v10 = vadd.f32 %v3698_v63, %v623_v25  ;;  %v1009_v6 = vadd.f32 %v3699_v62, %v804_v34  ;;  %v3338_v3 = vadd.f32 %v3700_v29, %v617_v4 }
 0x14d   :  { %v1001_v9 = vadd.f32 %v3701_v31, %v797_v45  ;;  %v1025_v41 = vadd.f32 %v3277_v30, %v818_v17  ;;  %v3349_v4 = vadd.f32 %v3286_v38, %v811_v7 }
 0x14e   :  { %v2117_v56 = vpop.f32.mrf.mxu0  ;;  %v2167_v48 = vpop.f32.mrf.mxu1 }
 0x14f   :  { %v1343_v47 = vadd.f32 %v2167_v48, %v1166_v52  ;;  %v1190_v46 = vadd.f32 %v2117_v56, %v961_v22 }
 0x150   :  { %v1183_v28 = vpop.f32.mrf.mxu0  ;;  %v1336_v16 = vpop.f32.mrf.mxu1 }
 0x151   :  { %vm1431_vm1 = vcmp.gt.f32.partialorder %v1343_v47, 0.0  ;;  %v1447_v21 = vmul.f32 0.2, %v1343_v47  ;;  %v1337_v0 = vadd.f32 %v1336_v16, %v1160_v58  ;;  %v1184_v14 = vadd.f32 %v1183_v28, %v953_v35 }
 0x152   :  { %v2120_v2 = vpop.f32.mrf.mxu0  ;;  %v2170_v39 = vpop.f32.mrf.mxu1 }
 0x153   :  { %v3328_v43 = vsel %vm1431_vm1, %v1343_v47, %v1447_v21  ;;  %vm1430_vm2 = vcmp.gt.f32.partialorder %v1337_v0, 0.0  ;;  %v1446_v11 = vmul.f32 0.2, %v1337_v0  ;;  %v1355_v23 = vadd.f32 %v2170_v39, %v1178_v1 }
 0x154   :  { %v1195_v59 = vpop.f32.mrf.mxu0  ;;  %v1348_v57 = vpop.f32.mrf.mxu1  ;;  %v1479_v52 = vmul.f32 %v3328_v43, %v3328_v43  ;;  %v1202_v32 = vadd.f32 %v2120_v2, %v977_v13 }
 0x155   :  { %v3335_v49 = vsel %vm1430_vm2, %v1337_v0, %v1446_v11  ;;  %vm1433_vm3 = vcmp.gt.f32.partialorder %v1355_v23, 0.0  ;;  %v1449_v61 = vmul.f32 0.2, %v1355_v23  ;;  %v1349_v33 = vadd.f32 %v1348_v57, %v1172_v15 }
 0x156   :  { %v2123_v50 = vpop.f32.mrf.mxu0  ;;  %v1478_v8 = vmul.f32 %v3335_v49, %v3335_v49  ;;  %v2173_v25 = vpop.f32.mrf.mxu1  ;;  %v1496_v47 = vsel %vm1494_vm0, %v1479_v52, 0.0  ;;  %v1196_v28 = vadd.f32 %v1195_v59, %v969_v40 }
 0x157   :  { %v3345_v56 = vsel %vm1433_vm3, %v1355_v23, %v1449_v61  ;;  %vm1432_vm4 = vcmp.gt.f32.partialorder %v1349_v33, 0.0  ;;  %v1448_v51 = vmul.f32 0.2, %v1349_v33  ;;  %v1367_v36 = vadd.f32 %v2173_v25, %v1190_v46 }
 0x158   :  { %v1207_v54 = vpop.f32.mrf.mxu0  ;;  %v1495_v22 = vsel %vm1494_vm0, %v1478_v8, 0.0  ;;  %v1360_v48 = vpop.f32.mrf.mxu1  ;;  %v1481_v5 = vmul.f32 %v3345_v56, %v3345_v56  ;;  %v1214_v42 = vadd.f32 %v2123_v50, %v993_v26  ;;  %v1041_v25 = vadd.f32 %v3296_v60, %v3332_v10 }
 0x159   :  { %v3352_v53 = vsel %vm1432_vm4, %v1349_v33, %v1448_v51  ;;  %vm1435_vm5 = vcmp.gt.f32.partialorder %v1367_v36, 0.0  ;;  %v1451_v20 = vmul.f32 0.2, %v1367_v36  ;;  %v1361_v38 = vadd.f32 %v1360_v48, %v1184_v14 }
 0x15a   :  { %v2126_v58 = vpop.f32.mrf.mxu0  ;;  %v1480_v30 = vmul.f32 %v3352_v53, %v3352_v53  ;;  %v2176_v34 = vpop.f32.mrf.mxu1  ;;  %v1497_v35 = vadd.f32 %v1496_v47, %v1495_v22  ;;  %v1208_v0 = vadd.f32 %v1207_v54, %v985_v27  ;;  %v1500_v17 = vsel %vm1494_vm0, %v1481_v5, 0.0 }
 0x15b   :  { %v3359_v19 = vsel %vm1435_vm5, %v1367_v36, %v1451_v20  ;;  %v1379_v13 = vadd.f32 %v2176_v34, %v1202_v32  ;;  %vm1434_vm6 = vcmp.gt.f32.partialorder %v1361_v38, 0.0  ;;  %v1450_v16 = vmul.f32 0.2, %v1361_v38 }
 0x15c   :  { %v1219_v18 = vpop.f32.mrf.mxu0  ;;  %v1498_v45 = vsel %vm1494_vm0, %v1480_v30, 0.0  ;;  %v1372_v1 = vpop.f32.mrf.mxu1  ;;  %v1483_v40 = vmul.f32 %v3359_v19, %v3359_v19  ;;  %v1226_v23 = vadd.f32 %v2126_v58, %v1009_v6 }
 0x15d   :  { %v1499_v21 = vadd.f32 %v1498_v45, %v1497_v35  ;;  %vm1437_vm7 = vcmp.gt.f32.partialorder %v1379_v13, 0.0  ;;  %v1453_v2 = vmul.f32 0.2, %v1379_v13  ;;  %v3365_v37 = vsel %vm1434_vm6, %v1361_v38, %v1450_v16 }
 0x15e   :  { %v2129_v24 = vpop.f32.mrf.mxu0  ;;  %v1373_v55 = vadd.f32 %v1372_v1, %v1196_v28  ;;  %v2179_v7 = vpop.f32.mrf.mxu1  ;;  %v1482_v26 = vmul.f32 %v3365_v37, %v3365_v37  ;;  %v1504_v61 = vsel %vm1494_vm0, %v1483_v40, 0.0  ;;  %v1220_v50 = vadd.f32 %v1219_v18, %v1001_v9 }
 0x15f   :  { %v1501_v15 = vadd.f32 %v1500_v17, %v1499_v21  ;;  %v3369_v39 = vsel %vm1437_vm7, %v1379_v13, %v1453_v2  ;;  %v1391_v11 = vadd.f32 %v2179_v7, %v1214_v42  ;;  %v1238_v36 = vadd.f32 %v2129_v24, %v1025_v41 }
 0x160   :  { %v1485_v59 = vmul.f32 %v3369_v39, %v3369_v39  ;;  %vm1436_vm8 = vcmp.gt.f32.partialorder %v1373_v55, 0.0  ;;  %v1452_v44 = vmul.f32 0.2, %v1373_v55  ;;  %v1384_v27 = vpop.f32.mrf.mxu1  ;;  %v1502_v63 = vsel %vm1494_vm0, %v1482_v26, 0.0  ;;  %v1231_v46 = vpop.f32.mrf.mxu0 }
 0x161   :  { %vm1439_vm9 = vcmp.gt.f32.partialorder %v1391_v11, 0.0  ;;  %v1455_v62 = vmul.f32 0.2, %v1391_v11  ;;  %v1385_v57 = vadd.f32 %v1384_v27, %v1208_v0  ;;  %v1503_v33 = vadd.f32 %v1502_v63, %v1501_v15 }
 0x162   :  { %v3375_v29 = vsel %vm1436_vm8, %v1373_v55, %v1452_v44  ;;  %v2182_v31 = vpop.f32.mrf.mxu1  ;;  %v1508_v22 = vsel %vm1494_vm0, %v1485_v59, 0.0  ;;  %v2132_v32 = vpop.f32.mrf.mxu0  ;;  %v1033_v38 = vadd.f32 %v3306_v12, %v3338_v3  ;;  %v1232_v34 = vadd.f32 %v1231_v46, %v3349_v4 }
 0x163   :  { %v1484_v6 = vmul.f32 %v3375_v29, %v3375_v29  ;;  %v3379_v52 = vsel %vm1439_vm9, %v1391_v11, %v1455_v62  ;;  %vm1438_vm10 = vcmp.gt.f32.partialorder %v1385_v57, 0.0  ;;  %v1454_v8 = vmul.f32 0.2, %v1385_v57 }
 0x164   :  { %v1505_v51 = vadd.f32 %v1504_v61, %v1503_v33  ;;  %v1403_v54 = vadd.f32 %v2182_v31, %v1226_v23  ;;  %v1396_v14 = vpop.f32.mrf.mxu1  ;;  %v1487_v47 = vmul.f32 %v3379_v52, %v3379_v52  ;;  %v1250_v18 = vadd.f32 %v2132_v32, %v1041_v25  ;;  %v1243_v42 = vpop.f32.mrf.mxu0 }
 0x165   :  { %v1506_v9 = vsel %vm1494_vm0, %v1484_v6, 0.0  ;;  %v3385_v48 = vsel %vm1438_vm10, %v1385_v57, %v1454_v8  ;;  %v1397_v20 = vadd.f32 %v1396_v14, %v1220_v50  ;;  %v1244_v4 = vadd.f32 %v1243_v42, %v1033_v38 }
 0x166   :  { %v1507_v58 = vadd.f32 %v1506_v9, %v1505_v51  ;;  %v1486_v5 = vmul.f32 %v3385_v48, %v3385_v48  ;;  %vm1441_vm11 = vcmp.gt.f32.partialorder %v1403_v54, 0.0  ;;  %v2185_v60 = vpop.f32.mrf.mxu1  ;;  %v1457_v10 = vmul.f32 0.2, %v1403_v54 }
 0x167   :  { %vm1440_vm12 = vcmp.gt.f32.partialorder %v1397_v20, 0.0  ;;  %v1456_v41 = vmul.f32 0.2, %v1397_v20  ;;  %v1415_v30 = vadd.f32 %v2185_v60, %v1238_v36  ;;  %v1512_v17 = vsel %vm1494_vm0, %v1487_v47, 0.0 }
 0x168   :  { %v1509_v35 = vadd.f32 %v1508_v22, %v1507_v58  ;;  %v1510_v28 = vsel %vm1494_vm0, %v1486_v5, 0.0  ;;  %v1408_v13 = vpop.f32.mrf.mxu1  ;;  %v3395_v45 = vsel %vm1441_vm11, %v1403_v54, %v1457_v10 }
 0x169   :  { %v1472_v16 = vsel %vm1440_vm12, %v1397_v20, %v1456_v41  ;;  %v1459_v1 = vmul.f32 0.2, %v1415_v30  ;;  %vm1443_vm13 = vcmp.gt.f32.partialorder %v1415_v30, 0.0  ;;  %v1409_v2 = vadd.f32 %v1408_v13, %v1232_v34 }
 0x16a   :  { %v1511_v21 = vadd.f32 %v1510_v28, %v1509_v35  ;;  %v1488_v0 = vmul.f32 %v1472_v16, %v1472_v16  ;;  %v2188_v24 = vpop.f32.mrf.mxu1  ;;  %v1489_v12 = vmul.f32 %v3395_v45, %v3395_v45 }
 0x16b   :  { %v1427_v3 = vadd.f32 %v2188_v24, %v1250_v18  ;;  %v1475_v26 = vsel %vm1443_vm13, %v1415_v30, %v1459_v1  ;;  %vm1442_vm14 = vcmp.gt.f32.partialorder %v1409_v2, 0.0  ;;  %v1458_v15 = vmul.f32 0.2, %v1409_v2 }
 0x16c   :  { %v1513_v40 = vadd.f32 %v1512_v17, %v1511_v21  ;;  %v1514_v55 = vsel %vm1494_vm0, %v1488_v0, 0.0  ;;  %v1420_v7 = vpop.f32.mrf.mxu1  ;;  %v1516_v44 = vsel %vm1494_vm0, %v1489_v12, 0.0  ;;  %v1491_v63 = vmul.f32 %v1475_v26, %v1475_v26 }
 0x16d   :  { %v1461_v11 = vmul.f32 0.2, %v1427_v3  ;;  %vm1445_vm15 = vcmp.gt.f32.partialorder %v1427_v3, 0.0  ;;  %v1421_v59 = vadd.f32 %v1420_v7, %v1244_v4  ;;  %v1474_v27 = vsel %vm1442_vm14, %v1409_v2, %v1458_v15 }
 0x16e   :  { %v1515_v23 = vadd.f32 %v1514_v55, %v1513_v40  ;;  %v1490_v62 = vmul.f32 %v1474_v27, %v1474_v27  ;;  %v1520_v6 = vsel %vm1494_vm0, %v1491_v63, 0.0 }
 0x16f   :  { %vm1444_vm1 = vcmp.gt.f32.partialorder %v1421_v59, 0.0  ;;  %v1477_v57 = vsel %vm1445_vm15, %v1427_v3, %v1461_v11  ;;  %v1460_v61 = vmul.f32 0.2, %v1421_v59 }
 0x170   :  { %v1517_v46 = vadd.f32 %v1516_v44, %v1515_v23  ;;  %v1518_v33 = vsel %vm1494_vm0, %v1490_v62, 0.0  ;;  %v1493_v8 = vmul.f32 %v1477_v57, %v1477_v57 }
 0x171   :  { %v1476_v31 = vsel %vm1444_vm1, %v1421_v59, %v1460_v61 }
 0x172   :  { %v1519_v50 = vadd.f32 %v1518_v33, %v1517_v46  ;;  %v1492_v25 = vmul.f32 %v1476_v31, %v1476_v31  ;;  %v1524_v14 = vsel %vm1494_vm0, %v1493_v8, 0.0 }
 0x174   :  { %v1521_v51 = vadd.f32 %v1520_v6, %v1519_v50  ;;  %v1522_v36 = vsel %vm1494_vm0, %v1492_v25, 0.0 }
 0x176   :  { %v1523_v54 = vadd.f32 %v1522_v36, %v1521_v51 }
 0x178   :  { %v1525_v22 = vadd.f32 %v1524_v14, %v1523_v54 }
 0x17a   :  { %v1526_v9 = vrot.slane %v1525_v22, 4 }
 0x17c   :  { %v1527_v32 = vadd.f32 %v1526_v9, %v1525_v22 }
 0x17e   :  { %v1528_v20 = vrot.slane %v1527_v32, 2 }
 0x180   :  { %v1529_v58 = vadd.f32 %v1528_v20, %v1527_v32 }
 0x182   :  { %v1530_v47 = vrot.slane %v1529_v58, 1 }
 0x184   :  { %v1531_v5 = vadd.f32 %v1530_v47, %v1529_v58 }
 0x186   :  { %v1532_v60 = vmax.f32 %v1531_v5, 1e-24 }
 0x188   :  { %2194 = vrsqrt.f32 %v1532_v60 }
 0x195   :  { %v2195_v10 = vpop.eup %2194 }
 0x196   :  { %v1534_v41 = vmul.f32 %v2195_v10, %v3335_v49  ;;  %v1535_v30 = vmul.f32 %v2195_v10, %v3328_v43  ;;  %v1536_v38 = vmul.f32 %v2195_v10, %v3352_v53  ;;  %v1537_v34 = vmul.f32 %v2195_v10, %v3345_v56 }
 0x197   :  { %v1538_v35 = vmul.f32 %v2195_v10, %v3365_v37  ;;  %v1539_v28 = vmul.f32 %v2195_v10, %v3359_v19  ;;  %v1540_v13 = vmul.f32 %v2195_v10, %v3375_v29  ;;  %v1541_v18 = vmul.f32 %v2195_v10, %v3369_v39 }
 0x198   :  { %v1542_v42 = vmul.f32 %v2195_v10, %v3385_v48  ;;  %v1543_v1 = vmul.f32 %v2195_v10, %v3379_v52  ;;  %v1544_v21 = vmul.f32 %v2195_v10, %v1472_v16  ;;  %v1545_v49 = vmul.f32 %v2195_v10, %v3395_v45  ;;  %1550 = vst.msk [vmem:[%s3485_s3] sm:$0xff] %vm1494_vm0, %v1534_v41 }
 0x199   :  { %1551 = vst.msk [vmem:[%s3485_s3 + $0x8] sm:$0xff] %vm1494_vm0, %v1535_v30  ;;  %1552 = vst.msk [vmem:[%s3485_s3 + $0x10] sm:$0xff] %vm1494_vm0, %v1536_v38  ;;  %v1546_v43 = vmul.f32 %v2195_v10, %v1474_v27  ;;  %v1547_v56 = vmul.f32 %v2195_v10, %v1475_v26  ;;  %v1548_v53 = vmul.f32 %v2195_v10, %v1476_v31 }
 0x19a   :  { %1553 = vst.msk [vmem:[%s3485_s3 + $0x18] sm:$0xff] %vm1494_vm0, %v1537_v34  ;;  %v1549_v19 = vmul.f32 %v2195_v10, %v1477_v57  ;;  %1554 = vst.msk [vmem:[%s3485_s3 + $0x20] sm:$0xff] %vm1494_vm0, %v1538_v35 }
 0x19b   :  { %1555 = vst.msk [vmem:[%s3485_s3 + $0x28] sm:$0xff] %vm1494_vm0, %v1539_v28  ;;  %1556 = vst.msk [vmem:[%s3485_s3 + $0x30] sm:$0xff] %vm1494_vm0, %v1540_v13 }
 0x19c   :  { %1557 = vst.msk [vmem:[%s3485_s3 + $0x38] sm:$0xff] %vm1494_vm0, %v1541_v18  ;;  %1558 = vst.msk [vmem:[%s3485_s3 + $0x40] sm:$0xff] %vm1494_vm0, %v1542_v42 }
 0x19d   :  { %1559 = vst.msk [vmem:[%s3485_s3 + $0x48] sm:$0xff] %vm1494_vm0, %v1543_v1  ;;  %1560 = vst.msk [vmem:[%s3485_s3 + $0x50] sm:$0xff] %vm1494_vm0, %v1544_v21 }
 0x19e   :  { %1561 = vst.msk [vmem:[%s3485_s3 + $0x58] sm:$0xff] %vm1494_vm0, %v1545_v49  ;;  %1562 = vst.msk [vmem:[%s3485_s3 + $0x60] sm:$0xff] %vm1494_vm0, %v1546_v43 }
 0x19f   :  { %1563 = vst.msk [vmem:[%s3485_s3 + $0x68] sm:$0xff] %vm1494_vm0, %v1547_v56  ;;  %1564 = vst.msk [vmem:[%s3485_s3 + $0x70] sm:$0xff] %vm1494_vm0, %v1548_v53 }
 0x1a0   :  { %1565 = vst.msk [vmem:[%s3485_s3 + $0x78] sm:$0xff] %vm1494_vm0, %v1549_v19 }

// kernel: tl_module_forward.3
= control target key start
LH: loop header
LB: loop body
LE: loop exit
PB: predicated region body
PF: predicated region fallthrough
CT: control target
= control target key end

     0   :  { %s3138_s24 = smov 0   ;;  %s4701_s0 = inlined_call_operand.vmem [shape: f32[32,128], index: 0, kind: input, shape index: {}]   ;;  %s4702_s1 = inlined_call_operand.vmem [shape: f32[128,176], index: 1, kind: input, shape index: {}]   ;;  %s4703_s2 = inlined_call_operand.vmem [shape: f32[1,128], index: 2, kind: input, shape index: {}]   ;;  %s4704_s3 = inlined_call_operand.vmem [shape: f32[128,176], index: 3, kind: input, shape index: {}]   ;;  %s4705_s4 = inlined_call_operand.vmem [shape: f32[1,128], index: 4, kind: input, shape index: {}]   ;;  %s4706_s5 = inlined_call_operand.vmem [shape: f32[1,128], index: 5, kind: input, shape index: {}]   ;;  %s4707_s6 = inlined_call_operand.vmem [shape: f32[48,128], index: 6, kind: input, shape index: {}]   ;;  %s4708_s7 = inlined_call_operand.vmem [shape: f32[32,128], index: 7, kind: output, shape index: {}]  }
   0x1 LB: > { %s2896_s25 = sadd.s32 4294967295, %s3095_s24   ;;  %p2900_p0 = scmp.ge.s32.totalorder %s3095_s24, 1  ;;  %s3095_s24 = sphi %s3138_s24, %s17_s24  }
   0x2   : > { %p238_p1 = scmp.lt.s32.totalorder %s3095_s24, 3 }
   0x4   : > { %p239_p2 = pnand %p2900_p0, %p238_p1 }
   0x6   : > { %242 = sbr.rel (%p239_p2) target bundleno = 1385 (0x569), region = 48 }
   0xb   : > { %v315_v0 = vld [vmem:[%s4702_s1 + $0xf8] sm:$0xff]  ;;  %v314_v1 = vld [vmem:[%s4702_s1 + $0xf0] sm:$0xff]  ;;  %v313_v2 = vld [vmem:[%s4702_s1 + $0xe8] sm:$0xff]  ;;  %v4723_v9 = vmov 0.0   ;;  %s3347_s26 = sshll.u32 %s2896_s25, 1  ;;  %vm2257_vm4 = vcmask 392192  }
   0xc   : > { %v3155_v3 = vand.u32 4294901760, %v315_v0  ;;  %v3157_v4 = vand.u32 4294901760, %v314_v1  ;;  %v3159_v5 = vand.u32 4294901760, %v313_v2  ;;  %v312_v6 = vld [vmem:[%s4702_s1 + $0xe0] sm:$0xff]  ;;  %v311_v7 = vld [vmem:[%s4702_s1 + $0xd8] sm:$0xff]  ;;  %v310_v8 = vld [vmem:[%s4702_s1 + $0xd0] sm:$0xff]  ;;  %412 = vmatprep.mubr.f32.mxu0 %v4723_v9  ;;  %659 = vmatprep.mubr.f32.mxu1 %v4723_v9 }
   0xd   : > { %v3172_v10 = vand.u32 4294901760, %v312_v6  ;;  %v3174_v11 = vand.u32 4294901760, %v311_v7  ;;  %v3176_v12 = vand.u32 4294901760, %v310_v8  ;;  %v309_v13 = vld [vmem:[%s4702_s1 + $0xc8] sm:$0xff]  ;;  %v308_v14 = vld [vmem:[%s4702_s1 + $0xc0] sm:$0xff]  ;;  %v307_v15 = vld [vmem:[%s4702_s1 + $0xb8] sm:$0xff] }
   0xe   : > { %317 = vmatprep.subr.mxu0 %v3155_v3  ;;  %v3188_v16 = vand.u32 4294901760, %v309_v13  ;;  %v3190_v17 = vand.u32 4294901760, %v308_v14  ;;  %v3192_v18 = vand.u32 4294901760, %v307_v15  ;;  %v3195_v19 = vsub.f32 %v315_v0, %v3155_v3  ;;  %v3200_v20 = vld [vmem:[%s4702_s1 + $0xb0] sm:$0xff]  ;;  %v3205_v21 = vld [vmem:[%s4702_s1 + $0xa8] sm:$0xff]  ;;  %v3210_v22 = vld [vmem:[%s4702_s1 + $0xa0] sm:$0xff] }
   0xf   : > { %319 = vmatpush1.msra.mxu0 %v3157_v4  ;;  %v3214_v23 = vand.u32 4294901760, %v3200_v20  ;;  %v3217_v24 = vsub.f32 %v314_v1, %v3157_v4  ;;  %v3220_v25 = vand.u32 4294901760, %v3205_v21  ;;  %v3223_v26 = vsub.f32 %v313_v2, %v3159_v5  ;;  %v3228_v27 = vld [vmem:[%s4702_s1 + $0x98] sm:$0xff]  ;;  %v3233_v28 = vld [vmem:[%s4702_s1 + $0x90] sm:$0xff]  ;;  %v3238_v29 = vld [vmem:[%s4702_s1 + $0x88] sm:$0xff]  ;;  %p271_p3 = scmp.lt.s32.totalorder %s3347_s26, 3 }
  0x10   : > { %321 = vmatprep.subr.mxu0 %v3159_v5  ;;  %v4722_v30 = vand.u32 4294901760, %v3195_v19  ;;  %v3243_v31 = vand.u32 4294901760, %v3210_v22  ;;  %v3246_v32 = vsub.f32 %v312_v6, %v3172_v10  ;;  %v3249_v33 = vand.u32 4294901760, %v3228_v27  ;;  %v3263_v38 = vld [vmem:[%s4702_s1 + $0x80] sm:$0xff]  ;;  %v3290_v47 = vld [vmem:[%s4702_s1 + $0x78] sm:$0xff]  ;;  %v3303_v52 = vld [vmem:[%s4702_s1 + $0x70] sm:$0xff] }
  0x11   : > { %323 = vmatpush1.msra.mxu0 %v3172_v10  ;;  %v4721_v34 = vand.u32 4294901760, %v3217_v24  ;;  %v4719_v35 = vand.u32 4294901760, %v3223_v26  ;;  %v3255_v36 = vsub.f32 %v311_v7, %v3174_v11  ;;  %v3258_v37 = vand.u32 4294901760, %v3233_v28  ;;  %v3313_v57 = vld [vmem:[%s4702_s1 + $0x68] sm:$0xff]  ;;  %v3328_v62 = vld [vmem:[%s4702_s1 + $0x60] sm:$0xff]  ;;  %v3343_v6 = vld [vmem:[%s4702_s1 + $0x58] sm:$0xff] }
  0x12   : > { %4846 = vst [vmem:[#allocation2_spill] sm:$0xff] %v3243_v31  ;;  %4847 = vst [vmem:[#allocation3_spill] sm:$0xff] %v3249_v33  ;;  %325 = vmatprep.subr.mxu0 %v3174_v11  ;;  %v438_v39 = vsub.f32 %v3195_v19, %v4722_v30  ;;  %v4717_v40 = vand.u32 4294901760, %v3246_v32  ;;  %v3271_v41 = vsub.f32 %v310_v8, %v3176_v12  ;;  %v3274_v42 = vand.u32 4294901760, %v3238_v29  ;;  %s5019_s26 = smov (!%p271_p3, %s3347_s26), 3  ;;  %v3489_v30 = vld [vmem:[%s4702_s1 + $0x18] sm:$0xff] }
  0x13   : > { %4848 = vst [vmem:[#allocation4_spill] sm:$0xff] %v3258_v37  ;;  %327 = vmatpush1.msra.mxu0 %v3176_v12  ;;  %v444_v43 = vsub.f32 %v3217_v24, %v4721_v34  ;;  %v450_v44 = vsub.f32 %v3223_v26, %v4719_v35  ;;  %v4715_v45 = vand.u32 4294901760, %v3255_v36  ;;  %v3285_v46 = vsub.f32 %v309_v13, %v3188_v16  ;;  %s2902_s19 = sshll.u32 %s5019_s26, 3 }
  0x14   : > { %4849 = vst [vmem:[#allocation5_spill] sm:$0xff] %v3274_v42  ;;  %329 = vmatprep.subr.mxu0 %v3188_v16  ;;  %v439_v48 = vand.u32 4294901760, %v438_v39  ;;  %v456_v49 = vsub.f32 %v3246_v32, %v4717_v40  ;;  %v4714_v50 = vand.u32 4294901760, %v3271_v41  ;;  %v3298_v51 = vand.u32 4294901760, %v3263_v38  ;;  %v3462_v40 = vld [vmem:[%s4702_s1 + $0x28] sm:$0xff]  ;;  %s3548_s25 = scalar_lea.vmem %s4701_s0, %s2902_s19  ;;  %s280_s12 = scalar_lea.vmem %s4708_s7, %s2902_s19 }
  0x15   : > { %331 = vmatpush1.msra.mxu0 %v3190_v17  ;;  %v445_v53 = vand.u32 4294901760, %v444_v43  ;;  %v451_v54 = vand.u32 4294901760, %v450_v44  ;;  %v462_v55 = vsub.f32 %v3255_v36, %v4715_v45  ;;  %v4712_v56 = vand.u32 4294901760, %v3285_v46  ;;  %v3441_v45 = vld [vmem:[%s4702_s1 + $0x30] sm:$0xff] }
  0x16   : > { %4850 = vst [vmem:[#allocation6_spill] sm:$0xff] %v3298_v51  ;;  %333 = vmatprep.subr.mxu0 %v3192_v18  ;;  %440 = vmatprep.subr.mxu1 %v439_v48  ;;  %v457_v58 = vand.u32 4294901760, %v456_v49  ;;  %v468_v59 = vsub.f32 %v3271_v41, %v4714_v50  ;;  %v3320_v60 = vsub.f32 %v308_v14, %v3190_v17  ;;  %v3323_v61 = vand.u32 4294901760, %v3290_v47 }
  0x17   : > { %335 = vmatpush1.msra.mxu0 %v3214_v23  ;;  %446 = vmatpush1.msra.mxu1 %v445_v53  ;;  %v463_v63 = vand.u32 4294901760, %v462_v55  ;;  %v474_v0 = vsub.f32 %v3285_v46, %v4712_v56  ;;  %v3335_v1 = vsub.f32 %v307_v15, %v3192_v18  ;;  %v3338_v2 = vand.u32 4294901760, %v3303_v52  ;;  %v3361_v15 = vld [vmem:[%s4702_s1 + $0x50] sm:$0xff] }
  0x18   : > { %4851 = vst [vmem:[#allocation7_spill] sm:$0xff] %v3323_v61  ;;  %337 = vmatprep.subr.mxu0 %v3220_v25  ;;  %452 = vmatprep.subr.mxu1 %v451_v54  ;;  %v469_v7 = vand.u32 4294901760, %v468_v59  ;;  %v4711_v8 = vand.u32 4294901760, %v3320_v60  ;;  %v3353_v13 = vsub.f32 %v3200_v20, %v3214_v23  ;;  %v3356_v14 = vand.u32 4294901760, %v3313_v57 }
  0x19   : > { %4852 = vst [vmem:[#allocation8_spill] sm:$0xff] %v3338_v2  ;;  %339 = vmatpush1.msra.mxu0 %v3243_v31  ;;  %458 = vmatpush1.msra.mxu1 %v457_v58  ;;  %v475_v39 = vand.u32 4294901760, %v474_v0  ;;  %v4709_v43 = vand.u32 4294901760, %v3335_v1  ;;  %v3367_v44 = vsub.f32 %v3205_v21, %v3220_v25  ;;  %v3370_v20 = vand.u32 4294901760, %v3328_v62  ;;  %v3387_v21 = vld [vmem:[%s4702_s1 + $0x48] sm:$0xff] }
  0x1a   : > { %4853 = vst [vmem:[#allocation9_spill] sm:$0xff] %v3356_v14  ;;  %341 = vmatprep.subr.mxu0 %v3249_v33  ;;  %464 = vmatprep.subr.mxu1 %v463_v63  ;;  %v480_v48 = vsub.f32 %v3320_v60, %v4711_v8  ;;  %v4710_v49 = vand.u32 4294901760, %v3353_v13  ;;  %v3379_v53 = vsub.f32 %v3210_v22, %v3243_v31  ;;  %v3382_v54 = vand.u32 4294901760, %v3343_v6 }
  0x1b   : > { %4854 = vst [vmem:[#allocation10_spill] sm:$0xff] %v3370_v20  ;;  %343 = vmatpush1.msra.mxu0 %v3258_v37  ;;  %470 = vmatpush1.msra.mxu1 %v469_v7  ;;  %v486_v55 = vsub.f32 %v3335_v1, %v4709_v43  ;;  %v4713_v58 = vand.u32 4294901760, %v3367_v44  ;;  %v3397_v22 = vsub.f32 %v3228_v27, %v3249_v33  ;;  %v3400_v59 = vand.u32 4294901760, %v3361_v15  ;;  %v3414_v27 = vld [vmem:[%s4702_s1 + $0x40] sm:$0xff] }
  0x1c   : > { %4855 = vst [vmem:[#allocation11_spill] sm:$0xff] %v3382_v54  ;;  %345 = vmatprep.subr.mxu0 %v3274_v42  ;;  %476 = vmatprep.subr.mxu1 %v475_v39  ;;  %v481_v63 = vand.u32 4294901760, %v480_v48  ;;  %v492_v0 = vsub.f32 %v3353_v13, %v4710_v49  ;;  %v4716_v7 = vand.u32 4294901760, %v3379_v53  ;;  %v3409_v43 = vsub.f32 %v3233_v28, %v3258_v37  ;;  %v3427_v28 = vld [vmem:[%s4702_s1 + $0x38] sm:$0xff]  ;;  %v3585_v33 = vld [vmem:[%s3548_s25] sm:$0xff] }
  0x1d   : > { %4856 = vst [vmem:[#allocation12_spill] sm:$0xff] %v3400_v59  ;;  %347 = vmatpush1.msra.mxu0 %v3298_v51  ;;  %v487_v39 = vand.u32 4294901760, %v486_v55  ;;  %v498_v48 = vsub.f32 %v3367_v44, %v4713_v58  ;;  %v4718_v49 = vand.u32 4294901760, %v3397_v22  ;;  %v3422_v8 = vand.u32 4294901760, %v3387_v21  ;;  %4868 = vst [vmem:[#allocation20_spill] sm:$0xff] %v3585_v33 }
  0x1e   : > { %482 = vmatpush1.msra.mxu1 %v481_v63  ;;  %349 = vmatprep.subr.mxu0 %v3323_v61  ;;  %v493_v56 = vand.u32 4294901760, %v492_v0  ;;  %v504_v55 = vsub.f32 %v3379_v53, %v4716_v7  ;;  %v4720_v58 = vand.u32 4294901760, %v3409_v43  ;;  %v3436_v50 = vsub.f32 %v3238_v29, %v3274_v42 }
  0x1f   : > { %4857 = vst [vmem:[#allocation13_spill] sm:$0xff] %v3422_v8  ;;  %488 = vmatprep.subr.mxu1 %v487_v39  ;;  %351 = vmatpush1.msra.mxu0 %v3338_v2  ;;  %v499_v63 = vand.u32 4294901760, %v498_v48  ;;  %v510_v0 = vsub.f32 %v3397_v22, %v4718_v49  ;;  %v3453_v7 = vand.u32 4294901760, %v3414_v27  ;;  %v3457_v29 = vsub.f32 %v3263_v38, %v3298_v51  ;;  %v3475_v38 = vld [vmem:[%s4702_s1 + $0x20] sm:$0xff] }
  0x20   : > { %494 = vmatpush1.msra.mxu1 %v493_v56  ;;  %353 = vmatprep.subr.mxu0 %v3356_v14  ;;  %v505_v39 = vand.u32 4294901760, %v504_v55  ;;  %v516_v48 = vsub.f32 %v3409_v43, %v4720_v58  ;;  %v4725_v49 = vand.u32 4294901760, %v3436_v50  ;;  %v3470_v35 = vand.u32 4294901760, %v3427_v28 }
  0x21   : > { %4858 = vst [vmem:[#allocation14_spill] sm:$0xff] %v3453_v7  ;;  %500 = vmatprep.subr.mxu1 %v499_v63  ;;  %355 = vmatpush1.msra.mxu0 %v3370_v20  ;;  %v511_v56 = vand.u32 4294901760, %v510_v0  ;;  %v4728_v55 = vand.u32 4294901760, %v3457_v29  ;;  %v3481_v58 = vsub.f32 %v3290_v47, %v3323_v61  ;;  %v3484_v34 = vand.u32 4294901760, %v3441_v45 }
  0x22   : > { %4859 = vst [vmem:[#allocation15_spill] sm:$0xff] %v3470_v35  ;;  %506 = vmatpush1.msra.mxu1 %v505_v39  ;;  %357 = vmatprep.subr.mxu0 %v3382_v54  ;;  %v517_v63 = vand.u32 4294901760, %v516_v48  ;;  %v522_v0 = vsub.f32 %v3436_v50, %v4725_v49  ;;  %v3497_v47 = vsub.f32 %v3303_v52, %v3338_v2  ;;  %v3500_v9 = vand.u32 4294901760, %v3462_v40 }
  0x23   : > { %4860 = vst [vmem:[#allocation16_spill] sm:$0xff] %v3484_v34  ;;  %512 = vmatprep.subr.mxu1 %v511_v56  ;;  %359 = vmatpush1.msra.mxu0 %v3400_v59  ;;  %v528_v39 = vsub.f32 %v3457_v29, %v4728_v55  ;;  %v3510_v49 = vsub.f32 %v3313_v57, %v3356_v14  ;;  %v3513_v52 = vand.u32 4294901760, %v3475_v38  ;;  %v3518_v56 = vld [vmem:[%s4702_s1 + $0x10] sm:$0xff]  ;;  %v3527_v57 = vand.u32 4294901760, %v3489_v30  ;;  %v3532_v14 = vld [vmem:[%s4702_s1 + $0x8] sm:$0xff] }
  0x24   : > { %4861 = vst [vmem:[#allocation17_spill] sm:$0xff] %v3500_v9  ;;  %518 = vmatpush1.msra.mxu1 %v517_v63  ;;  %361 = vmatprep.subr.mxu0 %v3422_v8  ;;  %v523_v2 = vand.u32 4294901760, %v522_v0  ;;  %v3524_v48 = vsub.f32 %v3328_v62, %v3370_v20  ;;  %v4863_v61 = vand.u32 4294901760, %v3481_v58  ;;  %v3541_v62 = vsub.f32 %v3343_v6, %v3382_v54 }
  0x25   : > { %4862 = vst [vmem:[#allocation18_spill] sm:$0xff] %v3513_v52  ;;  %363 = vmatpush1.msra.mxu0 %v3453_v7  ;;  %v529_v63 = vand.u32 4294901760, %v528_v39  ;;  %v4864_v39 = vand.u32 4294901760, %v3497_v47  ;;  %v3556_v55 = vand.u32 4294901760, %v3518_v56  ;;  %v3560_v6 = vsub.f32 %v3361_v15, %v3400_v59 }
  0x26   : > { %v534_v0 = vsub.f32 %v3481_v58, %v4863_v61  ;;  %524 = vmatprep.subr.mxu1 %v523_v2  ;;  %365 = vmatprep.subr.mxu0 %v3470_v35  ;;  %v3565_v2 = vld [vmem:[%s4702_s1] sm:$0xff]  ;;  %v4749_v51 = vand.u32 4294901760, %v3541_v62  ;;  %v3573_v42 = vand.u32 4294901760, %v3532_v14  ;;  %v4867_v59 = vand.u32 4294901760, %v3524_v48 }
  0x27   : > { %v540_v20 = vsub.f32 %v3497_v47, %v4864_v39  ;;  %4865 = vst [vmem:[#allocation19_spill] sm:$0xff] %v3556_v55  ;;  %530 = vmatpush1.msra.mxu1 %v529_v63  ;;  %367 = vmatpush1.msra.mxu0 %v3484_v34  ;;  %v4866_v39 = vand.u32 4294901760, %v3510_v49  ;;  %v4752_v63 = vand.u32 4294901760, %v3560_v6  ;;  %v3592_v31 = vand.u32 4294901760, %v3565_v2 }
  0x28   : > { %v535_v54 = vand.u32 4294901760, %v534_v0  ;;  %369 = vmatprep.subr.mxu0 %v3500_v9  ;;  %v552_v37 = vsub.f32 %v3524_v48, %v4867_v59  ;;  %v3582_v0 = vsub.f32 %v3387_v21, %v3422_v8  ;;  %v3596_v59 = vsub.f32 %v3414_v27, %v3453_v7 }
  0x29   : > { %v546_v61 = vsub.f32 %v3510_v49, %v4866_v39  ;;  %v541_v15 = vand.u32 4294901760, %v540_v20  ;;  %371 = vmatpush1.msra.mxu0 %v3513_v52  ;;  %v558_v20 = vsub.f32 %v3541_v62, %v4749_v51  ;;  %v3605_v51 = vsub.f32 %v3427_v28, %v3470_v35 }
  0x2a   : > { %536 = vmatprep.subr.mxu1 %v535_v54  ;;  %v553_v21 = vand.u32 4294901760, %v552_v37  ;;  %373 = vmatprep.subr.mxu0 %v3527_v57  ;;  %v564_v54 = vsub.f32 %v3560_v6, %v4752_v63  ;;  %v4754_v27 = vand.u32 4294901760, %v3596_v59  ;;  %v3610_v37 = vand.u32 4294901760, %v3585_v33 }
  0x2b   : > { %v547_v39 = vand.u32 4294901760, %v546_v61  ;;  %542 = vmatpush1.msra.mxu1 %v541_v15  ;;  %v4753_v61 = vand.u32 4294901760, %v3582_v0  ;;  %v559_v8 = vand.u32 4294901760, %v558_v20  ;;  %375 = vmatpush1.msra.mxu0 %v3556_v55  ;;  %v3614_v15 = vsub.f32 %v3441_v45, %v3484_v34 }
  0x2c   : > { %4869 = vst [vmem:[#allocation21_spill] sm:$0xff] %v3610_v37  ;;  %v565_v63 = vand.u32 4294901760, %v564_v54  ;;  %377 = vmatprep.subr.mxu0 %v3573_v42  ;;  %v3623_v20 = vsub.f32 %v3462_v40, %v3500_v9  ;;  %v576_v45 = vsub.f32 %v3596_v59, %v4754_v27 }
  0x2d   : > { %548 = vmatprep.subr.mxu1 %v547_v39  ;;  %v570_v28 = vsub.f32 %v3582_v0, %v4753_v61  ;;  %v4760_v39 = vand.u32 4294901760, %v3605_v51  ;;  %379 = vmatpush1.msra.mxu0 %v3592_v31  ;;  %v3636_v61 = vsub.f32 %v3475_v38, %v3513_v52  ;;  %v4870_v38 = vand.u32 4294901760, %v3614_v15 }
  0x2e   : > { %554 = vmatpush1.msra.mxu1 %v553_v21  ;;  %v3631_v21 = vsub.f32 %v3585_v33, %v3610_v37  ;;  %676 = vmatprep.subr.mxu0 %v3195_v19  ;;  %v4763_v27 = vand.u32 4294901760, %v3623_v20  ;;  %v3645_v33 = vsub.f32 %v3489_v30, %v3527_v57  ;;  %v577_v9 = vand.u32 4294901760, %v576_v45 }
  0x2f   : > { %560 = vmatprep.subr.mxu1 %v559_v8  ;;  %v571_v40 = vand.u32 4294901760, %v570_v28  ;;  %v582_v8 = vsub.f32 %v3605_v51, %v4760_v39  ;;  %v4767_v28 = vand.u32 4294901760, %v3636_v61  ;;  %v3658_v30 = vsub.f32 %v3518_v56, %v3556_v55 }
  0x30   : > { %566 = vmatpush1.msra.mxu1 %v565_v63  ;;  %v4764_v54 = vand.u32 4294901760, %v3631_v21  ;;  %v588_v63 = vsub.f32 %v3614_v15, %v4870_v38  ;;  %v594_v39 = vsub.f32 %v3623_v20, %v4763_v27  ;;  %v4771_v34 = vand.u32 4294901760, %v3645_v33 }
  0x31   : > { %572 = vmatprep.subr.mxu1 %v571_v40  ;;  %v583_v52 = vand.u32 4294901760, %v582_v8  ;;  %v600_v40 = vsub.f32 %v3636_v61, %v4767_v28  ;;  %v3668_v8 = vsub.f32 %v3532_v14, %v3573_v42 }
  0x32   : > { %578 = vmatpush1.msra.mxu1 %v577_v9  ;;  %v416_v45 = vsub.f32 %v3631_v21, %v4764_v54  ;;  %v589_v38 = vand.u32 4294901760, %v588_v63  ;;  %v595_v27 = vand.u32 4294901760, %v594_v39  ;;  %v606_v56 = vsub.f32 %v3645_v33, %v4771_v34 }
  0x33   : > { %4871 = vst [vmem:[#allocation22_spill] sm:$0xff] %v3668_v8  ;;  %584 = vmatprep.subr.mxu1 %v583_v52  ;;  %v4770_v9 = vand.u32 4294901760, %v3658_v30  ;;  %v3676_v54 = vsub.f32 %v3565_v2, %v3592_v31  ;;  %v601_v55 = vand.u32 4294901760, %v600_v40  ;;  %v4769_v28 = vand.u32 4294901760, %v3668_v8 }
  0x34   : > { %v417_v63 = vand.u32 4294901760, %v416_v45  ;;  %590 = vmatpush1.msra.mxu1 %v589_v38  ;;  %v607_v14 = vand.u32 4294901760, %v606_v56  ;;  %v4873_v40 = vmov 0.0   ;;  %v3696_v56 = vld [vmem:[%s3548_s25 + $0x8] sm:$0xff] }
  0x35   : > { %4872 = vst [vmem:[#allocation23_spill] sm:$0xff] %v3676_v54  ;;  %596 = vmatprep.subr.mxu1 %v595_v27  ;;  %v612_v52 = vsub.f32 %v3658_v30, %v4770_v9  ;;  %v4768_v39 = vand.u32 4294901760, %v3676_v54  ;;  %v618_v2 = vsub.f32 %v3668_v8, %v4769_v28  ;;  %4874 = vst [vmem:[#allocation24_spill] sm:$0xff] %v3696_v56  ;;  %v4880_v28 = vld [vmem:[#allocation7_spill] sm:$0xff]  ;;  %v4881_v9 = vld [vmem:[#allocation8_spill] sm:$0xff] }
  0x36   : > { %418 = vmatmul.mubr.f32.vlgmr.msra.gmra.mxu0 %v417_v63  ;;  %602 = vmatpush1.msra.mxu1 %v601_v55  ;;  %v3705_v63 = vand.u32 4294901760, %v3696_v56 }
  0x37   : > { %679 = vmatpush1.msra.mxu0 %v3217_v24  ;;  %608 = vmatprep.subr.mxu1 %v607_v14  ;;  %v613_v45 = vand.u32 4294901760, %v612_v52  ;;  %v624_v27 = vsub.f32 %v3676_v54, %v4768_v39  ;;  %v619_v38 = vand.u32 4294901760, %v618_v2  ;;  %v4875_v2 = vld [vmem:[#allocation2_spill] sm:$0xff] }
  0x38   : > { %682 = vmatprep.subr.mxu0 %v3223_v26  ;;  %423 = vmatprep.mubr.f32.mxu0 %v4873_v40  ;;  %v3717_v14 = vsub.f32 %v3696_v56, %v3705_v63  ;;  %v4879_v39 = vld [vmem:[#allocation6_spill] sm:$0xff] }
  0x39   : > { %685 = vmatpush1.msra.mxu0 %v3246_v32  ;;  %614 = vmatpush1.msra.mxu1 %v613_v45  ;;  %v625_v55 = vand.u32 4294901760, %v624_v27  ;;  %v4876_v45 = vld [vmem:[#allocation3_spill] sm:$0xff]  ;;  %v4877_v27 = vld [vmem:[#allocation4_spill] sm:$0xff]  ;;  %v4883_v56 = vld [vmem:[#allocation10_spill] sm:$0xff] }
  0x3a   : > { %688 = vmatprep.subr.mxu0 %v3255_v36  ;;  %620 = vmatprep.subr.mxu1 %v619_v38  ;;  %v4772_v52 = vand.u32 4294901760, %v3717_v14 }
  0x3b   : > { %691 = vmatpush1.msra.mxu0 %v3271_v41  ;;  %626 = vmatpush1.msra.mxu1 %v625_v55  ;;  %v4878_v55 = vld [vmem:[#allocation5_spill] sm:$0xff] }
  0x3c   : > { %694 = vmatprep.subr.mxu0 %v3285_v46  ;;  %661 = vmatmul.mubr.f32.vlgmr.msra.gmra.mxu1 %v3610_v37  ;;  %v427_v38 = vsub.f32 %v3717_v14, %v4772_v52  ;;  %v4882_v52 = vld [vmem:[#allocation9_spill] sm:$0xff]  ;;  %v4884_v37 = vld [vmem:[#allocation11_spill] sm:$0xff] }
  0x3d   : > { %697 = vmatpush1.msra.mxu0 %v3320_v60  ;;  %820 = vmatprep.subr.mxu1 %v3155_v3 }
  0x3e   : > { %700 = vmatprep.subr.mxu0 %v3335_v1  ;;  %822 = vmatpush1.msra.mxu1 %v3157_v4  ;;  %v428_v34 = vand.u32 4294901760, %v427_v38  ;;  %v4886_v38 = vld [vmem:[#allocation13_spill] sm:$0xff] }
  0x3f   : > { %703 = vmatpush1.msra.mxu0 %v3353_v13  ;;  %824 = vmatprep.subr.mxu1 %v3159_v5 }
  0x40   : > { %706 = vmatprep.subr.mxu0 %v3367_v44  ;;  %826 = vmatpush1.msra.mxu1 %v3172_v10 }
  0x41   : > { %709 = vmatpush1.msra.mxu0 %v3379_v53  ;;  %828 = vmatprep.subr.mxu1 %v3174_v11 }
  0x42   : > { %712 = vmatprep.subr.mxu0 %v3397_v22  ;;  %830 = vmatpush1.msra.mxu1 %v3176_v12 }
  0x43   : > { %715 = vmatpush1.msra.mxu0 %v3409_v43  ;;  %832 = vmatprep.subr.mxu1 %v3188_v16 }
  0x44   : > { %718 = vmatprep.subr.mxu0 %v3436_v50  ;;  %834 = vmatpush1.msra.mxu1 %v3190_v17 }
  0x45   : > { %721 = vmatpush1.msra.mxu0 %v3457_v29  ;;  %836 = vmatprep.subr.mxu1 %v3192_v18 }
  0x46   : > { %724 = vmatprep.subr.mxu0 %v3481_v58  ;;  %838 = vmatpush1.msra.mxu1 %v3214_v23 }
  0x47   : > { %727 = vmatpush1.msra.mxu0 %v3497_v47  ;;  %840 = vmatprep.subr.mxu1 %v3220_v25 }
  0x48   : > { %730 = vmatprep.subr.mxu0 %v3510_v49  ;;  %842 = vmatpush1.msra.mxu1 %v4875_v2 }
  0x49   : > { %733 = vmatpush1.msra.mxu0 %v3524_v48  ;;  %844 = vmatprep.subr.mxu1 %v4876_v45 }
  0x4a   : > { %736 = vmatprep.subr.mxu0 %v3541_v62  ;;  %846 = vmatpush1.msra.mxu1 %v4877_v27 }
  0x4b   : > { %739 = vmatpush1.msra.mxu0 %v3560_v6  ;;  %848 = vmatprep.subr.mxu1 %v4878_v55 }
  0x4c   : > { %742 = vmatprep.subr.mxu0 %v3582_v0  ;;  %850 = vmatpush1.msra.mxu1 %v4879_v39 }
  0x4d   : > { %745 = vmatpush1.msra.mxu0 %v3596_v59  ;;  %852 = vmatprep.subr.mxu1 %v4880_v28  ;;  %v4885_v28 = vld [vmem:[#allocation12_spill] sm:$0xff] }
  0x4e   : > { %748 = vmatprep.subr.mxu0 %v3605_v51  ;;  %854 = vmatpush1.msra.mxu1 %v4881_v9 }
  0x4f   : > { %751 = vmatpush1.msra.mxu0 %v3614_v15  ;;  %856 = vmatprep.subr.mxu1 %v4882_v52 }
  0x50   : > { %754 = vmatprep.subr.mxu0 %v3623_v20  ;;  %858 = vmatpush1.msra.mxu1 %v4883_v56 }
  0x51   : > { %757 = vmatpush1.msra.mxu0 %v3636_v61  ;;  %860 = vmatprep.subr.mxu1 %v4884_v37 }
  0x52   : > { %429 = vmatmul.mubr.f32.gmra.mxu0 %v428_v34  ;;  %760 = vmatprep.subr.mxu0 %v3645_v33  ;;  %v4887_v34 = vand.u32 4294901760, %v3195_v19  ;;  %v4894_v19 = vand.u32 4294901760, %v3255_v36  ;;  %v4900_v36 = vand.u32 4294901760, %v3335_v1  ;;  %v4904_v1 = vand.u32 4294901760, %v3397_v22  ;;  %v4924_v22 = vld [vmem:[#allocation12_spill] sm:$0xff] }
  0x53   : > { %763 = vmatpush1.msra.mxu0 %v3658_v30  ;;  %862 = vmatpush1.msra.mxu1 %v4885_v28  ;;  %v4892_v28 = vld [vmem:[#allocation18_spill] sm:$0xff] }
  0x54   : > { %766 = vmatprep.subr.mxu0 %v3668_v8  ;;  %864 = vmatprep.subr.mxu1 %v4886_v38  ;;  %v4888_v8 = vld [vmem:[#allocation16_spill] sm:$0xff]  ;;  %v4889_v38 = vand.u32 4294901760, %v3217_v24  ;;  %v4895_v24 = vld [vmem:[#allocation19_spill] sm:$0xff] }
  0x55   : > { %769 = vmatpush1.msra.mxu0 %v3676_v54  ;;  %802 = vmatprep.mubr.f32.mxu0 %v4873_v40  ;;  %v4890_v54 = vld [vmem:[#allocation17_spill] sm:$0xff] }
  0x56   : > { %866 = vmatpush1.msra.mxu1 %v3453_v7  ;;  %666 = vmatprep.mubr.f32.mxu1 %v4873_v40  ;;  %v4891_v7 = vand.u32 4294901760, %v3223_v26  ;;  %v4897_v26 = vand.u32 4294901760, %v3285_v46  ;;  %v4902_v46 = vand.u32 4294901760, %v3367_v44  ;;  %v4919_v44 = vand.u32 4294901760, %v3614_v15  ;;  %v1287_v15 = vld [vmem:[%s4704_s3 + $0xe0] sm:$0xff] }
  0x57   : > { %805 = vmatmul.mubr.f32.vlgmr.msra.gmra.mxu0 %v3631_v21  ;;  %868 = vmatprep.subr.mxu1 %v3470_v35  ;;  %v4893_v35 = vand.u32 4294901760, %v3246_v32  ;;  %v4898_v32 = vand.u32 4294901760, %v3320_v60  ;;  %v4903_v60 = vand.u32 4294901760, %v3379_v53  ;;  %v4921_v53 = vand.u32 4294901760, %v3636_v61 }
  0x58   : > { %937 = vmatprep.subr.mxu0 %v4887_v34  ;;  %668 = vmatmul.mubr.f32.gmra.mxu1 %v3705_v63 }
  0x59   : > { %870 = vmatpush1.msra.mxu1 %v4888_v8  ;;  %941 = vmatpush1.msra.mxu0 %v4889_v38  ;;  %v4896_v38 = vand.u32 4294901760, %v3271_v41  ;;  %v4901_v41 = vand.u32 4294901760, %v3353_v13  ;;  %v4909_v13 = vand.u32 4294901760, %v3481_v58  ;;  %v4923_v58 = vand.u32 4294901760, %v3658_v30 }
  0x5a   : > { %872 = vmatprep.subr.mxu1 %v4890_v54  ;;  %945 = vmatprep.subr.mxu0 %v4891_v7  ;;  %v4925_v7 = vld [vmem:[#allocation22_spill] sm:$0xff] }
  0x5b   : > { %810 = vmatprep.mubr.f32.mxu0 %v4873_v40  ;;  %874 = vmatpush1.msra.mxu1 %v4892_v28 }
  0x5c   : > { %949 = vmatpush1.msra.mxu0 %v4893_v35  ;;  %876 = vmatprep.subr.mxu1 %v3527_v57  ;;  %v4899_v35 = vand.u32 4294901760, %v3631_v21  ;;  %v1285_v21 = vld [vmem:[%s4704_s3 + $0xd0] sm:$0xff] }
  0x5d   : > { %813 = vmatmul.mubr.f32.gmra.mxu0 %v3717_v14  ;;  %953 = vmatprep.subr.mxu0 %v4894_v19  ;;  %v3914_v30 = vand.u32 4294901760, %v1285_v21 }
  0x5e   : > { %878 = vmatpush1.msra.mxu1 %v4895_v24  ;;  %957 = vmatpush1.msra.mxu0 %v4896_v38 }
  0x5f   : > { %880 = vmatprep.subr.mxu1 %v3573_v42  ;;  %961 = vmatprep.subr.mxu0 %v4897_v26 }
  0x60   : > { %882 = vmatpush1.msra.mxu1 %v3592_v31  ;;  %915 = vmatprep.mubr.f32.mxu1 %v4873_v40 }
  0x61   : > { %965 = vmatpush1.msra.mxu0 %v4898_v32  ;;  %919 = vmatmul.mubr.f32.vlgmr.msra.gmra.mxu1 %v4899_v35 }
  0x62   : > { %969 = vmatprep.subr.mxu0 %v4900_v36  ;;  %1110 = vmatprep.subr.mxu1 %v3155_v3  ;;  %v4905_v3 = vand.u32 4294901760, %v3717_v14 }
  0x63   : > { %973 = vmatpush1.msra.mxu0 %v4901_v41  ;;  %1112 = vmatpush1.msra.mxu1 %v3157_v4  ;;  %v4906_v4 = vand.u32 4294901760, %v3409_v43  ;;  %v4918_v43 = vld [vmem:[#allocation7_spill] sm:$0xff] }
  0x64   : > { %977 = vmatprep.subr.mxu0 %v4902_v46  ;;  %1114 = vmatprep.subr.mxu1 %v3159_v5  ;;  %v4907_v5 = vand.u32 4294901760, %v3436_v50  ;;  %v4917_v50 = vand.u32 4294901760, %v3605_v51  ;;  %v4922_v51 = vand.u32 4294901760, %v3645_v33  ;;  %v4931_v33 = vld [vmem:[#allocation21_spill] sm:$0xff] }
  0x65   : > { %924 = vmatprep.mubr.f32.mxu1 %v4873_v40  ;;  %981 = vmatpush1.msra.mxu0 %v4903_v60 }
  0x66   : > { %1116 = vmatpush1.msra.mxu1 %v3172_v10  ;;  %985 = vmatprep.subr.mxu0 %v4904_v1  ;;  %v4908_v10 = vand.u32 4294901760, %v3457_v29  ;;  %v4926_v29 = vand.u32 4294901760, %v4925_v7 }
  0x67   : > { %928 = vmatmul.mubr.f32.gmra.mxu1 %v4905_v3  ;;  %1118 = vmatprep.subr.mxu1 %v3174_v11  ;;  %v4910_v11 = vand.u32 4294901760, %v3497_v47  ;;  %v4927_v47 = vld [vmem:[#allocation13_spill] sm:$0xff] }
  0x68   : > { %989 = vmatpush1.msra.mxu0 %v4906_v4  ;;  %1120 = vmatpush1.msra.mxu1 %v3176_v12  ;;  %v4911_v12 = vand.u32 4294901760, %v3510_v49  ;;  %v4920_v49 = vand.u32 4294901760, %v3623_v20  ;;  %v1286_v20 = vld [vmem:[%s4704_s3 + $0xd8] sm:$0xff] }
  0x69   : > { %993 = vmatprep.subr.mxu0 %v4907_v5  ;;  %1122 = vmatprep.subr.mxu1 %v3188_v16  ;;  %v4912_v16 = vand.u32 4294901760, %v3524_v48  ;;  %v4928_v48 = vld [vmem:[#allocation23_spill] sm:$0xff] }
  0x6a   : > { %997 = vmatpush1.msra.mxu0 %v4908_v10  ;;  %1124 = vmatpush1.msra.mxu1 %v3190_v17  ;;  %v4913_v17 = vand.u32 4294901760, %v3541_v62  ;;  %v4929_v62 = vand.u32 4294901760, %v4928_v48  ;;  %v1282_v10 = vld [vmem:[%s4704_s3 + $0xb8] sm:$0xff] }
  0x6b   : > { %1001 = vmatprep.subr.mxu0 %v4909_v13  ;;  %1126 = vmatprep.subr.mxu1 %v3192_v18  ;;  %v4914_v18 = vand.u32 4294901760, %v3560_v6  ;;  %v4930_v6 = vld [vmem:[#allocation14_spill] sm:$0xff]  ;;  %v1281_v13 = vld [vmem:[%s4704_s3 + $0xb0] sm:$0xff] }
  0x6c   : > { %1005 = vmatpush1.msra.mxu0 %v4910_v11  ;;  %1128 = vmatpush1.msra.mxu1 %v3214_v23  ;;  %v4915_v23 = vand.u32 4294901760, %v3582_v0  ;;  %v4932_v0 = vld [vmem:[#allocation15_spill] sm:$0xff] }
  0x6d   : > { %1009 = vmatprep.subr.mxu0 %v4911_v12  ;;  %1130 = vmatprep.subr.mxu1 %v3220_v25  ;;  %v4916_v25 = vand.u32 4294901760, %v3596_v59  ;;  %v1289_v59 = vld [vmem:[%s4704_s3 + $0xf0] sm:$0xff]  ;;  %v1280_v11 = vld [vmem:[%s4704_s3 + $0xa8] sm:$0xff] }
  0x6e   : > { %1013 = vmatpush1.msra.mxu0 %v4912_v16  ;;  %1132 = vmatpush1.msra.mxu1 %v4875_v2  ;;  %v3897_v61 = vand.u32 4294901760, %v1289_v59 }
  0x6f   : > { %1017 = vmatprep.subr.mxu0 %v4913_v17  ;;  %1134 = vmatprep.subr.mxu1 %v4876_v45  ;;  %v3941_v45 = vsub.f32 %v1285_v21, %v3914_v30 }
  0x70   : > { %1021 = vmatpush1.msra.mxu0 %v4914_v18  ;;  %1136 = vmatpush1.msra.mxu1 %v4877_v27 }
  0x71   : > { %1025 = vmatprep.subr.mxu0 %v4915_v23  ;;  %1138 = vmatprep.subr.mxu1 %v4878_v55  ;;  %v4789_v32 = vand.u32 4294901760, %v3941_v45  ;;  %v1279_v23 = vld [vmem:[%s4704_s3 + $0xa0] sm:$0xff] }
  0x72   : > { %1029 = vmatpush1.msra.mxu0 %v4916_v25  ;;  %1140 = vmatpush1.msra.mxu1 %v4879_v39  ;;  %v1278_v25 = vld [vmem:[%s4704_s3 + $0x98] sm:$0xff] }
  0x73   : > { %1033 = vmatprep.subr.mxu0 %v4917_v50  ;;  %1142 = vmatprep.subr.mxu1 %v4918_v43  ;;  %v1443_v4 = vsub.f32 %v3941_v45, %v4789_v32  ;;  %v4013_v7 = vand.u32 4294901760, %v1278_v25 }
  0x74   : > { %1037 = vmatpush1.msra.mxu0 %v4919_v44  ;;  %1144 = vmatpush1.msra.mxu1 %v4881_v9  ;;  %v1283_v9 = vld [vmem:[%s4704_s3 + $0xc0] sm:$0xff] }
  0x75   : > { %1041 = vmatprep.subr.mxu0 %v4920_v49  ;;  %1146 = vmatprep.subr.mxu1 %v4882_v52  ;;  %v3943_v27 = vand.u32 4294901760, %v1283_v9  ;;  %v4005_v49 = vand.u32 4294901760, %v1282_v10 }
  0x76   : > { %1045 = vmatpush1.msra.mxu0 %v4921_v53  ;;  %1148 = vmatpush1.msra.mxu1 %v4883_v56  ;;  %v3926_v56 = vsub.f32 %v1289_v59, %v3897_v61  ;;  %v4007_v53 = vand.u32 4294901760, %v1281_v13 }
  0x77   : > { %1049 = vmatprep.subr.mxu0 %v4922_v51  ;;  %1150 = vmatprep.subr.mxu1 %v4884_v37  ;;  %v3957_v35 = vsub.f32 %v1283_v9, %v3943_v27  ;;  %v4009_v51 = vand.u32 4294901760, %v1280_v11 }
  0x78   : > { %1053 = vmatpush1.msra.mxu0 %v4923_v58  ;;  %1152 = vmatpush1.msra.mxu1 %v4924_v22  ;;  %v4795_v34 = vand.u32 4294901760, %v3926_v56  ;;  %v1444_v58 = vand.u32 4294901760, %v1443_v4  ;;  %v4011_v22 = vand.u32 4294901760, %v1279_v23  ;;  %v4019_v48 = vsub.f32 %v1281_v13, %v4007_v53 }
  0x79   : > { %1057 = vmatprep.subr.mxu0 %v4926_v29  ;;  %1154 = vmatprep.subr.mxu1 %v4927_v47  ;;  %v4786_v5 = vand.u32 4294901760, %v3957_v35  ;;  %v4016_v47 = vsub.f32 %v1282_v10, %v4005_v49 }
  0x7a   : > { %1061 = vmatpush1.msra.mxu0 %v4929_v62  ;;  %1094 = vmatprep.mubr.f32.mxu0 %v4873_v40  ;;  %v1419_v41 = vsub.f32 %v3926_v56, %v4795_v34  ;;  %v4022_v62 = vsub.f32 %v1280_v11, %v4009_v51  ;;  %v4783_v59 = vand.u32 4294901760, %v4019_v48 }
  0x7b   : > { %1156 = vmatpush1.msra.mxu1 %v4930_v6  ;;  %1096 = vmatmul.mubr.f32.vlgmr.msra.gmra.mxu0 %v4931_v33  ;;  %v1455_v43 = vsub.f32 %v3957_v35, %v4786_v5 }
  0x7c   : > { %1158 = vmatprep.subr.mxu1 %v4932_v0  ;;  %1101 = vmatprep.mubr.f32.mxu0 %v4873_v40  ;;  %v1420_v16 = vand.u32 4294901760, %v1419_v41  ;;  %v4029_v0 = vsub.f32 %v1278_v25, %v4013_v7 }
  0x7d   : > { %1160 = vmatpush1.msra.mxu1 %v4888_v8  ;;  %1205 = vmatprep.mubr.f32.mxu1 %v4873_v40  ;;  %v1284_v8 = vld [vmem:[%s4704_s3 + $0xc8] sm:$0xff]  ;;  %v1456_v6 = vand.u32 4294901760, %v1455_v43 }
  0x7e   : > { %1162 = vmatprep.subr.mxu1 %v4890_v54  ;;  %v3910_v54 = vand.u32 4294901760, %v1287_v15  ;;  %v3931_v14 = vand.u32 4294901760, %v1284_v8 }
  0x7f   : > { %1164 = vmatpush1.msra.mxu1 %v4892_v28  ;;  %1103 = vmatmul.mubr.f32.gmra.mxu0 %v3705_v63  ;;  %v3912_v28 = vand.u32 4294901760, %v1286_v20 }
  0x80   : > { %1166 = vmatprep.subr.mxu1 %v3527_v57  ;;  %1387 = vmatprep.mubr.f32.mxu0 %v4873_v40  ;;  %v1290_v57 = vld [vmem:[%s4704_s3 + $0xf8] sm:$0xff]  ;;  %v3935_v52 = vsub.f32 %v1287_v15, %v3910_v54 }
  0x81   : > { %1168 = vmatpush1.msra.mxu1 %v4895_v24  ;;  %v3938_v2 = vsub.f32 %v1286_v20, %v3912_v28  ;;  %v3950_v24 = vsub.f32 %v1284_v8, %v3931_v14  ;;  %v4780_v20 = vand.u32 4294901760, %v4029_v0  ;;  %v1467_v8 = vsub.f32 %v4019_v48, %v4783_v59 }
  0x82   : > { %1170 = vmatprep.subr.mxu1 %v3573_v42  ;;  %v3895_v42 = vand.u32 4294901760, %v1290_v57  ;;  %v4792_v38 = vand.u32 4294901760, %v3935_v52 }
  0x83   : > { %1172 = vmatpush1.msra.mxu1 %v3592_v31  ;;  %v1288_v31 = vld [vmem:[%s4704_s3 + $0xe8] sm:$0xff]  ;;  %v4790_v26 = vand.u32 4294901760, %v3938_v2  ;;  %v4787_v60 = vand.u32 4294901760, %v3950_v24  ;;  %v1485_v41 = vsub.f32 %v4029_v0, %v4780_v20 }
  0x84   : > { %1207 = vmatmul.mubr.f32.vlgmr.msra.gmra.mxu1 %v4931_v33  ;;  %v3899_v37 = vand.u32 4294901760, %v1288_v31  ;;  %v3923_v39 = vsub.f32 %v1290_v57, %v3895_v42  ;;  %1292 = vmatprep.subr.mxu0 %v3895_v42  ;;  %v1431_v1 = vsub.f32 %v3935_v52, %v4792_v38  ;;  %v4026_v33 = vsub.f32 %v1279_v23, %v4011_v22 }
  0x85   : > { %1212 = vmatprep.mubr.f32.mxu1 %v4873_v40  ;;  %1294 = vmatpush1.msra.mxu0 %v3897_v61  ;;  %v1437_v3 = vsub.f32 %v3938_v2, %v4790_v26  ;;  %v1449_v18 = vsub.f32 %v3950_v24, %v4787_v60  ;;  %v4785_v57 = vand.u32 4294901760, %v4016_v47  ;;  %v1486_v10 = vand.u32 4294901760, %v1485_v41 }
  0x86   : > { %4933 = vst [vmem:[#allocation2_spill] sm:$0xff] %v3923_v39  ;;  %v4796_v55 = vand.u32 4294901760, %v3923_v39  ;;  %1296 = vmatprep.subr.mxu0 %v3899_v37  ;;  %v1432_v50 = vand.u32 4294901760, %v1431_v1  ;;  %v4781_v15 = vand.u32 4294901760, %v4026_v33  ;;  %v1468_v1 = vand.u32 4294901760, %v1467_v8 }
  0x87   : > { %1298 = vmatpush1.msra.mxu0 %v3910_v54  ;;  %v1438_v44 = vand.u32 4294901760, %v1437_v3  ;;  %v1450_v29 = vand.u32 4294901760, %v1449_v18  ;;  %v1461_v21 = vsub.f32 %v4016_v47, %v4785_v57 }
  0x88   : > { %1214 = vmatmul.mubr.f32.gmra.mxu1 %v3705_v63  ;;  %v3929_v63 = vsub.f32 %v1288_v31, %v3899_v37  ;;  %v1413_v36 = vsub.f32 %v3923_v39, %v4796_v55  ;;  %1300 = vmatprep.subr.mxu0 %v3912_v28  ;;  %v4782_v31 = vand.u32 4294901760, %v4022_v62 }
  0x89   : > { %1634 = vmatprep.mubr.f32.mxu1 %v4873_v40  ;;  %1302 = vmatpush1.msra.mxu0 %v3914_v30 }
  0x8a   : > { %v4793_v19 = vand.u32 4294901760, %v3929_v63  ;;  %v1414_v12 = vand.u32 4294901760, %v1413_v36  ;;  %1304 = vmatprep.subr.mxu0 %v3931_v14  ;;  %v1473_v9 = vsub.f32 %v4022_v62, %v4782_v31  ;;  %v1479_v36 = vsub.f32 %v4026_v33, %v4781_v15 }
  0x8b   : > { %1306 = vmatpush1.msra.mxu0 %v3943_v27 }
  0x8c   : > { %v1425_v46 = vsub.f32 %v3929_v63, %v4793_v19  ;;  %1415 = vmatprep.subr.mxu1 %v1414_v12  ;;  %1308 = vmatprep.subr.mxu0 %v4005_v49  ;;  %v1474_v3 = vand.u32 4294901760, %v1473_v9  ;;  %v1480_v4 = vand.u32 4294901760, %v1479_v36 }
  0x8d   : > { %1421 = vmatpush1.msra.mxu1 %v1420_v16  ;;  %1310 = vmatpush1.msra.mxu0 %v4007_v53 }
  0x8e   : > { %v1426_v17 = vand.u32 4294901760, %v1425_v46  ;;  %1312 = vmatprep.subr.mxu0 %v4009_v51  ;;  %v1462_v46 = vand.u32 4294901760, %v1461_v21 }
  0x8f   : > { %1314 = vmatpush1.msra.mxu0 %v4011_v22 }
  0x90   : > { %1427 = vmatprep.subr.mxu1 %v1426_v17  ;;  %1316 = vmatprep.subr.mxu0 %v4013_v7 }
  0x91   : > { %1433 = vmatpush1.msra.mxu1 %v1432_v50 }
  0x92   : > { %1439 = vmatprep.subr.mxu1 %v1438_v44 }
  0x93   : > { %1445 = vmatpush1.msra.mxu1 %v1444_v58 }
  0x94   : > { %1451 = vmatprep.subr.mxu1 %v1450_v29 }
  0x95   : > { %1457 = vmatpush1.msra.mxu1 %v1456_v6 }
  0x96   : > { %1463 = vmatprep.subr.mxu1 %v1462_v46 }
  0x97   : > { %1469 = vmatpush1.msra.mxu1 %v1468_v1 }
  0x98   : > { %1475 = vmatprep.subr.mxu1 %v1474_v3 }
  0x99   : > { %1481 = vmatpush1.msra.mxu1 %v1480_v4 }
  0x9a   : > { %1487 = vmatprep.subr.mxu1 %v1486_v10 }
  0xf6   : > { %v419_v13 = vpop.f32.mrf.mxu0 }
  0xf8   : > { %v421_v12 = vpop.f32.mrf.mxu0 }
  0xfc   : > { %v662_v11 = vpop.f32.mrf.mxu1 }
  0xfd   : > { %v663_v10 = vadd.f32 %v662_v11, %v419_v13 }
  0xfe   : > { %v664_v16 = vpop.f32.mrf.mxu1 }
  0xff   : > { %v665_v17 = vadd.f32 %v664_v16, %v421_v12 }
 0x112   : > { %v430_v18 = vpop.f32.mrf.mxu0 }
 0x114   : > { %v432_v23 = vpop.f32.mrf.mxu0 }
 0x117   : > { %v806_v25 = vpop.f32.mrf.mxu0 }
 0x118   : > { %v669_v50 = vpop.f32.mrf.mxu1  ;;  %v807_v20 = vadd.f32 %v806_v25, %v663_v10 }
 0x119   : > { %v808_v43 = vpop.f32.mrf.mxu0  ;;  %v670_v15 = vadd.f32 %v669_v50, %v430_v18  ;;  %v1277_v50 = vld [vmem:[%s4704_s3 + $0x90] sm:$0xff] }
 0x11a   : > { %v809_v44 = vadd.f32 %v808_v43, %v665_v17  ;;  %v671_v58 = vpop.f32.mrf.mxu1 }
 0x11b   : > { %v672_v29 = vadd.f32 %v671_v58, %v432_v23 }
 0x11d   : > { %v814_v6 = vpop.f32.mrf.mxu0 }
 0x11e   : > { %v815_v17 = vadd.f32 %v814_v6, %v670_v15  ;;  %v4069_v6 = vand.u32 4294901760, %v1277_v50 }
 0x11f   : > { %v816_v21 = vpop.f32.mrf.mxu0 }
 0x120   : > { %v817_v8 = vadd.f32 %v816_v21, %v672_v29  ;;  %v2905_v29 = vld [vmem:[%s4703_s2] ss:$0 sm:$0xff]  ;;  %1318 = vmatpush1.msra.mxu0 %v4069_v6 }
 0x121   : > { %v920_v9 = vpop.f32.mrf.mxu1 }
 0x122   : > { %v921_v31 = vadd.f32 %v920_v9, %v807_v20  ;;  %v1276_v9 = vld [vmem:[%s4704_s3 + $0x88] sm:$0xff] }
 0x123   : > { %v922_v36 = vpop.f32.mrf.mxu1 }
 0x124   : > { %v923_v41 = vadd.f32 %v922_v36, %v809_v44 }
 0x127   : > { %v929_v46 = vpop.f32.mrf.mxu1 }
 0x128   : > { %v930_v44 = vadd.f32 %v929_v46, %v815_v17  ;;  %v4076_v46 = vand.u32 4294901760, %v1276_v9  ;;  %v1274_v17 = vld [vmem:[%s4704_s3 + $0x78] sm:$0xff] }
 0x129   : > { %v931_v1 = vpop.f32.mrf.mxu1 }
 0x12a   : > { %v4055_v3 = vadd.f32 %v931_v1, %v817_v8  ;;  %1320 = vmatprep.subr.mxu0 %v4076_v46 }
 0x12c   : > { %4934 = vst [vmem:[#allocation3_spill] sm:$0xff] %v4055_v3 }
 0x13b   : > { %v1097_v4 = vpop.f32.mrf.mxu0 }
 0x13c   : > { %v1098_v43 = vadd.f32 %v1097_v4, %v921_v31  ;;  %v1275_v4 = vld [vmem:[%s4704_s3 + $0x80] sm:$0xff] }
 0x13d   : > { %v1099_v12 = vpop.f32.mrf.mxu0 }
 0x13e   : > { %v1100_v16 = vadd.f32 %v1099_v12, %v923_v41  ;;  %v4084_v12 = vsub.f32 %v1277_v50, %v4069_v6 }
 0x13f   : > { %v1104_v23 = vpop.f32.mrf.mxu0 }
 0x140   : > { %v1105_v8 = vadd.f32 %v1104_v23, %v930_v44  ;;  %v4095_v23 = vand.u32 4294901760, %v1274_v17 }
 0x144   : > { %v1208_v58 = vpop.f32.mrf.mxu1 }
 0x145   : > { %v1209_v21 = vadd.f32 %v1208_v58, %v1098_v43  ;;  %v4093_v43 = vsub.f32 %v1276_v9, %v4076_v46  ;;  %v1273_v58 = vld [vmem:[%s4704_s3 + $0x70] sm:$0xff] }
 0x146   : > { %v1210_v36 = vpop.f32.mrf.mxu1 }
 0x147   : > { %v1227_v1 = vadd.f32 %v2905_v29, %v1209_v21  ;;  %v4060_v59 = vadd.f32 %v1210_v36, %v1100_v16  ;;  %v4086_v16 = vand.u32 4294901760, %v1275_v4  ;;  %v4784_v21 = vand.u32 4294901760, %v4084_v12 }
 0x148   : > { %v1215_v13 = vpop.f32.mrf.mxu1 }
 0x149   : > { %4935 = vst [vmem:[#allocation4_spill] sm:$0xff] %v4060_v59  ;;  %v1216_v11 = vadd.f32 %v1215_v13, %v1105_v8  ;;  %vm1229_vm0 = vcmp.gt.f32.partialorder %v1227_v1, 0.0  ;;  %v1231_v18 = vmul.f32 0.2, %v1227_v1  ;;  %v4105_v36 = vsub.f32 %v1275_v4, %v4086_v16  ;;  %1322 = vmatpush1.msra.mxu0 %v4086_v16  ;;  %v4937_v13 = vld [vmem:[#allocation24_spill] sm:$0xff] }
 0x14a   : > { %v4107_v8 = vand.u32 4294901760, %v1273_v58  ;;  %1324 = vmatprep.subr.mxu0 %v4095_v23  ;;  %v1491_v50 = vsub.f32 %v4084_v12, %v4784_v21 }
 0x14b   : > { %v1228_v20 = vadd.f32 %v2905_v29, %v1216_v11  ;;  %v4062_v15 = vsel %vm1229_vm0, %v1227_v1, %v1231_v18  ;;  %v4936_v29 = vld [vmem:[#allocation20_spill] sm:$0xff]  ;;  %v1272_v1 = vld [vmem:[%s4704_s3 + $0x68] sm:$0xff]  ;;  %v1248_v11 = vmul.f32 %v4937_v13, %v4937_v13  ;;  %v4788_v18 = vand.u32 4294901760, %v4093_v43 }
 0x14c   : > { %v1235_v31 = vmul.f32 %v4062_v15, %v4062_v15  ;;  %v1247_v44 = vmul.f32 %v4936_v29, %v4936_v29  ;;  %v4791_v9 = vand.u32 4294901760, %v4105_v36  ;;  %v4130_v4 = vsub.f32 %v1273_v58, %v4107_v8  ;;  %1326 = vmatpush1.msra.mxu0 %v4107_v8  ;;  %v1269_v58 = vld [vmem:[%s4704_s3 + $0x50] sm:$0xff] }
 0x14d   : > { %vm1230_vm1 = vcmp.gt.f32.partialorder %v1228_v20, 0.0  ;;  %v1232_v25 = vmul.f32 0.2, %v1228_v20  ;;  %v1497_v29 = vsub.f32 %v4093_v43, %v4788_v18  ;;  %v1492_v5 = vand.u32 4294901760, %v1491_v50 }
 0x14e   : > { %1237 = vadd.xlane.f32.xlu0 %v1235_v31  ;;  %v4119_v31 = vand.u32 4294901760, %v1272_v1  ;;  %4939 = vst [vmem:[#allocation6_spill] sm:$0xff] %v4130_v4  ;;  %v1503_v60 = vsub.f32 %v4105_v36, %v4791_v9  ;;  %v4797_v18 = vand.u32 4294901760, %v4130_v4 }
 0x14f   : > { %v4074_v41 = vsel %vm1230_vm1, %v1228_v20, %v1232_v25  ;;  %v4117_v20 = vsub.f32 %v1274_v17, %v4095_v23  ;;  %v1271_v25 = vld [vmem:[%s4704_s3 + $0x60] sm:$0xff]  ;;  %v1270_v17 = vld [vmem:[%s4704_s3 + $0x58] sm:$0xff]  ;;  %v1498_v26 = vand.u32 4294901760, %v1497_v29  ;;  %1493 = vmatpush1.msra.mxu1 %v1492_v5 }
 0x150   : > { %v1236_v10 = vmul.f32 %v4074_v41, %v4074_v41  ;;  %v4143_v21 = vsub.f32 %v1272_v1, %v4119_v31  ;;  %v4145_v57 = vand.u32 4294901760, %v1270_v17  ;;  %1328 = vmatprep.subr.mxu0 %v4119_v31  ;;  %v1268_v1 = vld [vmem:[%s4704_s3 + $0x48] sm:$0xff]  ;;  %v1504_v38 = vand.u32 4294901760, %v1503_v60 }
 0x151   : > { %4938 = vst [vmem:[#allocation5_spill] sm:$0xff] %v4117_v20  ;;  %v4794_v13 = vand.u32 4294901760, %v4117_v20  ;;  %v1515_v29 = vsub.f32 %v4130_v4, %v4797_v18  ;;  %1499 = vmatprep.subr.mxu1 %v1498_v26  ;;  %v4186_v5 = vand.u32 4294901760, %v1268_v1  ;;  %v1265_v18 = vld [vmem:[%s4704_s3 + $0x30] sm:$0xff] }
 0x152   : > { %1239 = vadd.xlane.f32.xlu0 %v1236_v10  ;;  %v4132_v10 = vand.u32 4294901760, %v1271_v25  ;;  %4940 = vst [vmem:[#allocation8_spill] sm:$0xff] %v4143_v21  ;;  %v4798_v50 = vand.u32 4294901760, %v4143_v21  ;;  %v4167_v9 = vsub.f32 %v1270_v17, %v4145_v57  ;;  %v1266_v17 = vld [vmem:[%s4704_s3 + $0x38] sm:$0xff]  ;;  %1505 = vmatpush1.msra.mxu1 %v1504_v38 }
 0x153   : > { %v1516_v19 = vand.u32 4294901760, %v1515_v29  ;;  %v4208_v29 = vand.u32 4294901760, %v1266_v17 }
 0x154   : > { %v4156_v32 = vsub.f32 %v1271_v25, %v4132_v10  ;;  %1330 = vmatpush1.msra.mxu0 %v4132_v10  ;;  %4942 = vst [vmem:[#allocation10_spill] sm:$0xff] %v4167_v9  ;;  %v1267_v25 = vld [vmem:[%s4704_s3 + $0x40] sm:$0xff]  ;;  %v1521_v55 = vsub.f32 %v4143_v21, %v4798_v50  ;;  %v1264_v50 = vld [vmem:[%s4704_s3 + $0x28] sm:$0xff]  ;;  %v4945_v21 = vand.u32 4294901760, %v4167_v9 }
 0x155   : > { %1332 = vmatprep.subr.mxu0 %v4145_v57  ;;  %v4197_v3 = vand.u32 4294901760, %v1267_v25  ;;  %4947 = vst [vmem:[#allocation17_spill] sm:$0xff] %v4208_v29 }
 0x156   : > { %1249 = vadd.xlane.f32.xlu0 %v1247_v44  ;;  %4941 = vst [vmem:[#allocation9_spill] sm:$0xff] %v4156_v32  ;;  %v1509_v44 = vsub.f32 %v4117_v20, %v4794_v13  ;;  %v4177_v13 = vand.u32 4294901760, %v1269_v58  ;;  %v4943_v59 = vand.u32 4294901760, %v4156_v32  ;;  %v1522_v60 = vand.u32 4294901760, %v1521_v55 }
 0x157   : > { %v1533_v38 = vsub.f32 %v4167_v9, %v4945_v21  ;;  %v4216_v55 = vsub.f32 %v1267_v25, %v4197_v3  ;;  %v1262_v21 = vld [vmem:[%s4704_s3 + $0x18] sm:$0xff] }
 0x158   : > { %v1510_v34 = vand.u32 4294901760, %v1509_v44  ;;  %v1527_v26 = vsub.f32 %v4156_v32, %v4943_v59  ;;  %v4195_v44 = vsub.f32 %v1269_v58, %v4177_v13  ;;  %v1263_v59 = vld [vmem:[%s4704_s3 + $0x20] sm:$0xff]  ;;  %1334 = vmatpush1.msra.mxu0 %v4177_v13  ;;  %v4218_v32 = vand.u32 4294901760, %v1265_v18 }
 0x159   : > { %4948 = vst [vmem:[#allocation18_spill] sm:$0xff] %v4216_v55  ;;  %1336 = vmatprep.subr.mxu0 %v4186_v5 }
 0x15a   : > { %1251 = vadd.xlane.f32.xlu0 %v1248_v11  ;;  %4944 = vst [vmem:[#allocation11_spill] sm:$0xff] %v4195_v44  ;;  %1511 = vmatprep.subr.mxu1 %v1510_v34  ;;  %v4206_v11 = vsub.f32 %v1268_v1, %v4186_v5  ;;  %v1528_v58 = vand.u32 4294901760, %v1527_v26  ;;  %v4809_v34 = vand.u32 4294901760, %v4195_v44  ;;  %4949 = vst [vmem:[#allocation19_spill] sm:$0xff] %v4218_v32  ;;  %v1534_v1 = vand.u32 4294901760, %v1533_v38 }
 0x15b   : > { %1517 = vmatpush1.msra.mxu1 %v1516_v19  ;;  %v4226_v19 = vsub.f32 %v1266_v17, %v4208_v29  ;;  %v4228_v26 = vand.u32 4294901760, %v1264_v50  ;;  %1338 = vmatpush1.msra.mxu0 %v4197_v3  ;;  %v4236_v20 = vsub.f32 %v1265_v18, %v4218_v32  ;;  %v1261_v18 = vld [vmem:[%s4704_s3 + $0x10] sm:$0xff] }
 0x15c   : > { %4946 = vst [vmem:[#allocation16_spill] sm:$0xff] %v4206_v11  ;;  %1523 = vmatprep.subr.mxu1 %v1522_v60  ;;  %v4812_v9 = vand.u32 4294901760, %v4206_v11  ;;  %v1539_v25 = vsub.f32 %v4195_v44, %v4809_v34  ;;  %v4238_v60 = vand.u32 4294901760, %v1263_v59  ;;  %1340 = vmatprep.subr.mxu0 %v4208_v29  ;;  %v4248_v34 = vand.u32 4294901760, %v1262_v21 }
 0x15d   : > { %4950 = vst [vmem:[#allocation7_spill] sm:$0xff] %v4226_v19  ;;  %4951 = vst [vmem:[#allocation12_spill] sm:$0xff] %v4228_v26  ;;  %1529 = vmatpush1.msra.mxu1 %v1528_v58  ;;  %v4246_v58 = vsub.f32 %v1264_v50, %v4228_v26  ;;  %1342 = vmatpush1.msra.mxu0 %v4218_v32  ;;  %v1260_v50 = vld [vmem:[%s4704_s3 + $0x8] sm:$0xff]  ;;  %v4956_v29 = vand.u32 4294901760, %v4226_v19 }
 0x15e   : > { %4952 = vst [vmem:[#allocation22_spill] sm:$0xff] %v4236_v20  ;;  %4953 = vst [vmem:[#allocation13_spill] sm:$0xff] %v4238_v60  ;;  %1535 = vmatprep.subr.mxu1 %v1534_v1  ;;  %v1545_v17 = vsub.f32 %v4206_v11, %v4812_v9  ;;  %v1540_v4 = vand.u32 4294901760, %v1539_v25  ;;  %v4955_v1 = vand.u32 4294901760, %v4216_v55  ;;  %v4259_v38 = vsub.f32 %v1263_v59, %v4238_v60  ;;  %v1259_v59 = vld [vmem:[%s4704_s3] sm:$0xff] }
 0x15f   : > { %4954 = vst [vmem:[#allocation23_spill] sm:$0xff] %v4248_v34  ;;  %1344 = vmatprep.subr.mxu0 %v4228_v26  ;;  %v1557_v25 = vsub.f32 %v4226_v19, %v4956_v29  ;;  %v4834_v32 = vand.u32 4294901760, %v4246_v58  ;;  %v4280_v29 = vand.u32 4294901760, %v1261_v18 }
 0x160   : > { %v1551_v44 = vsub.f32 %v4216_v55, %v4955_v1  ;;  %v1546_v11 = vand.u32 4294901760, %v1545_v17  ;;  %v4270_v1 = vsub.f32 %v1262_v21, %v4248_v34  ;;  %1346 = vmatpush1.msra.mxu0 %v4238_v60  ;;  %1541 = vmatpush1.msra.mxu1 %v1540_v4  ;;  %v4957_v55 = vand.u32 4294901760, %v4236_v20 }
 0x161   : > { %v4831_v26 = vand.u32 4294901760, %v4259_v38  ;;  %1348 = vmatprep.subr.mxu0 %v4248_v34  ;;  %v1558_v21 = vand.u32 4294901760, %v1557_v25  ;;  %v1569_v19 = vsub.f32 %v4246_v58, %v4834_v32  ;;  %v4287_v4 = vand.u32 4294901760, %v1260_v50 }
 0x162   : > { %v1552_v9 = vand.u32 4294901760, %v1551_v44  ;;  %v1563_v17 = vsub.f32 %v4236_v20, %v4957_v55  ;;  %1547 = vmatprep.subr.mxu1 %v1546_v11  ;;  %v4832_v60 = vand.u32 4294901760, %v4270_v1  ;;  %v4293_v20 = vsub.f32 %v1261_v18, %v4280_v29  ;;  %1350 = vmatpush1.msra.mxu0 %v4280_v29 }
 0x163   : > { %v1575_v55 = vsub.f32 %v4259_v38, %v4831_v26  ;;  %v4295_v34 = vand.u32 4294901760, %v1259_v59  ;;  %v1570_v11 = vand.u32 4294901760, %v1569_v19  ;;  %1352 = vmatprep.subr.mxu0 %v4287_v4 }
 0x164   : > { %1553 = vmatpush1.msra.mxu1 %v1552_v9  ;;  %v1564_v44 = vand.u32 4294901760, %v1563_v17  ;;  %v1581_v25 = vsub.f32 %v4270_v1, %v4832_v60  ;;  %v4302_v9 = vsub.f32 %v1260_v50, %v4287_v4  ;;  %v4833_v18 = vand.u32 4294901760, %v4293_v20 }
 0x165   : > { %1559 = vmatprep.subr.mxu1 %v1558_v21  ;;  %v1576_v17 = vand.u32 4294901760, %v1575_v55  ;;  %v4307_v26 = vsub.f32 %v1259_v59, %v4295_v34  ;;  %1354 = vmatpush1.msra.mxu0 %v4295_v34 }
 0x166   : > { %4958 = vst [vmem:[#allocation14_spill] sm:$0xff] %v4302_v9  ;;  %1565 = vmatpush1.msra.mxu1 %v1564_v44  ;;  %v1582_v19 = vand.u32 4294901760, %v1581_v25  ;;  %v4836_v21 = vand.u32 4294901760, %v4302_v9  ;;  %1651 = vmatprep.subr.mxu0 %v3923_v39  ;;  %v1587_v50 = vsub.f32 %v4293_v20, %v4833_v18 }
 0x167   : > { %1571 = vmatprep.subr.mxu1 %v1570_v11  ;;  %v4839_v44 = vand.u32 4294901760, %v4307_v26 }
 0x168   : > { %1577 = vmatpush1.msra.mxu1 %v1576_v17  ;;  %v1593_v59 = vsub.f32 %v4302_v9, %v4836_v21  ;;  %v1588_v55 = vand.u32 4294901760, %v1587_v50 }
 0x169   : > { %1583 = vmatprep.subr.mxu1 %v1582_v19  ;;  %v1599_v11 = vsub.f32 %v4307_v26, %v4839_v44  ;;  %v4970_v44 = vld [vmem:[#allocation23_spill] sm:$0xff] }
 0x16a   : > { %v1594_v25 = vand.u32 4294901760, %v1593_v59  ;;  %1589 = vmatpush1.msra.mxu1 %v1588_v55 }
 0x16b   : > { %v1600_v60 = vand.u32 4294901760, %v1599_v11 }
 0x16c   : > { %1595 = vmatprep.subr.mxu1 %v1594_v25  ;;  %v4961_v25 = vld [vmem:[#allocation5_spill] sm:$0xff] }
 0x16d   : > { %1601 = vmatpush1.msra.mxu1 %v1600_v60 }
 0x16e   : > { %1795 = vmatprep.subr.mxu1 %v3895_v42 }
 0x1d7   : > { %v1238_v17 = vpop.xlane.xlu0 %1237 }
 0x1d8   : > { %v1241_v18 = vmax.f32 %v1238_v17, 1e-24  ;;  %v4962_v17 = vld [vmem:[#allocation17_spill] sm:$0xff] }
 0x1da   : > { %3061 = vrsqrt.f32 %v1241_v18 }
 0x1db   : > { %v1240_v19 = vpop.xlane.xlu0 %1239 }
 0x1dc   : > { %v1242_v32 = vmax.f32 %v1240_v19, 1e-24  ;;  %v4963_v19 = vld [vmem:[#allocation6_spill] sm:$0xff] }
 0x1de   : > { %3063 = vrsqrt.f32 %v1242_v32 }
 0x1e7   : > { %v3062_v39 = vpop.eup %3061 }
 0x1e8   : > { %v1245_v50 = vmul.f32 %v3062_v39, %v4062_v15 }
 0x1ea   : > { %v4324_v21 = vand.u32 4294901760, %v1245_v50 }
 0x1eb   : > { %v3064_v9 = vpop.eup %3063 }
 0x1ec   : > { %4959 = vst [vmem:[#allocation21_spill] sm:$0xff] %v4324_v21  ;;  %v4327_v59 = vsub.f32 %v1245_v50, %v4324_v21  ;;  %1636 = vmatmul.mubr.f32.vlgmr.msra.gmra.mxu1 %v4324_v21  ;;  %v1246_v60 = vmul.f32 %v3064_v9, %v4074_v41  ;;  %v4964_v50 = vld [vmem:[#allocation19_spill] sm:$0xff] }
 0x1ed   : > { %1797 = vmatpush1.msra.mxu1 %v3897_v61  ;;  %1641 = vmatprep.mubr.f32.mxu1 %v4873_v40  ;;  %v4974_v21 = vld [vmem:[#allocation7_spill] sm:$0xff] }
 0x1ee   : > { %1799 = vmatprep.subr.mxu1 %v3899_v37  ;;  %v4334_v32 = vand.u32 4294901760, %v1246_v60  ;;  %v4841_v39 = vand.u32 4294901760, %v4327_v59 }
 0x1ef   : > { %1801 = vmatpush1.msra.mxu1 %v3910_v54 }
 0x1f0   : > { %4960 = vst [vmem:[#allocation15_spill] sm:$0xff] %v4334_v32  ;;  %1803 = vmatprep.subr.mxu1 %v3912_v28  ;;  %1643 = vmatmul.mubr.f32.gmra.mxu1 %v4334_v32  ;;  %v1391_v15 = vsub.f32 %v4327_v59, %v4841_v39  ;;  %v4344_v41 = vsub.f32 %v1246_v60, %v4334_v32  ;;  %v4965_v60 = vld [vmem:[#allocation8_spill] sm:$0xff]  ;;  %v4973_v32 = vld [vmem:[#allocation18_spill] sm:$0xff] }
 0x1f1   : > { %1805 = vmatpush1.msra.mxu1 %v3914_v30  ;;  %1890 = vmatprep.mubr.f32.mxu1 %v4873_v40  ;;  %v4972_v39 = vld [vmem:[#allocation16_spill] sm:$0xff] }
 0x1f2   : > { %1807 = vmatprep.subr.mxu1 %v3931_v14  ;;  %v1392_v9 = vand.u32 4294901760, %v1391_v15  ;;  %v4840_v18 = vand.u32 4294901760, %v4344_v41  ;;  %v4966_v15 = vld [vmem:[#allocation12_spill] sm:$0xff] }
 0x1f3   : > { %1809 = vmatpush1.msra.mxu1 %v3943_v27 }
 0x1f4   : > { %1811 = vmatprep.subr.mxu1 %v4005_v49  ;;  %1393 = vmatmul.mubr.f32.vlgmr.msra.gmra.mxu0 %v1392_v9  ;;  %v1402_v55 = vsub.f32 %v4344_v41, %v4840_v18  ;;  %v4967_v9 = vld [vmem:[#allocation9_spill] sm:$0xff]  ;;  %v4971_v18 = vld [vmem:[#allocation11_spill] sm:$0xff] }
 0x1f5   : > { %1654 = vmatpush1.msra.mxu0 %v3926_v56  ;;  %1813 = vmatpush1.msra.mxu1 %v4007_v53 }
 0x1f6   : > { %1657 = vmatprep.subr.mxu0 %v3929_v63  ;;  %1815 = vmatprep.subr.mxu1 %v4009_v51  ;;  %v1403_v11 = vand.u32 4294901760, %v1402_v55  ;;  %v4968_v55 = vld [vmem:[#allocation13_spill] sm:$0xff] }
 0x1f7   : > { %1660 = vmatpush1.msra.mxu0 %v3935_v52  ;;  %1817 = vmatpush1.msra.mxu1 %v4011_v22 }
 0x1f8   : > { %1398 = vmatprep.mubr.f32.mxu0 %v4873_v40  ;;  %1663 = vmatprep.subr.mxu0 %v3938_v2 }
 0x1f9   : > { %1819 = vmatprep.subr.mxu1 %v4013_v7  ;;  %1404 = vmatmul.mubr.f32.gmra.mxu0 %v1403_v11  ;;  %v4969_v11 = vld [vmem:[#allocation10_spill] sm:$0xff] }
 0x1fa   : > { %1666 = vmatpush1.msra.mxu0 %v3941_v45  ;;  %1821 = vmatpush1.msra.mxu1 %v4069_v6 }
 0x1fb   : > { %1669 = vmatprep.subr.mxu0 %v3950_v24  ;;  %1823 = vmatprep.subr.mxu1 %v4076_v46 }
 0x1fc   : > { %1672 = vmatpush1.msra.mxu0 %v3957_v35  ;;  %1825 = vmatpush1.msra.mxu1 %v4086_v16 }
 0x1fd   : > { %1675 = vmatprep.subr.mxu0 %v4016_v47  ;;  %1827 = vmatprep.subr.mxu1 %v4095_v23 }
 0x1fe   : > { %1678 = vmatpush1.msra.mxu0 %v4019_v48  ;;  %1829 = vmatpush1.msra.mxu1 %v4107_v8 }
 0x1ff   : > { %1681 = vmatprep.subr.mxu0 %v4022_v62  ;;  %1831 = vmatprep.subr.mxu1 %v4119_v31 }
 0x200   : > { %1684 = vmatpush1.msra.mxu0 %v4026_v33  ;;  %1833 = vmatpush1.msra.mxu1 %v4132_v10 }
 0x201   : > { %1687 = vmatprep.subr.mxu0 %v4029_v0  ;;  %1835 = vmatprep.subr.mxu1 %v4145_v57 }
 0x202   : > { %1690 = vmatpush1.msra.mxu0 %v4084_v12  ;;  %1837 = vmatpush1.msra.mxu1 %v4177_v13 }
 0x203   : > { %1693 = vmatprep.subr.mxu0 %v4093_v43  ;;  %1839 = vmatprep.subr.mxu1 %v4186_v5 }
 0x204   : > { %1696 = vmatpush1.msra.mxu0 %v4105_v36  ;;  %1841 = vmatpush1.msra.mxu1 %v4197_v3 }
 0x205   : > { %1699 = vmatprep.subr.mxu0 %v4961_v25  ;;  %1843 = vmatprep.subr.mxu1 %v4962_v17 }
 0x206   : > { %1702 = vmatpush1.msra.mxu0 %v4963_v19  ;;  %1845 = vmatpush1.msra.mxu1 %v4964_v50 }
 0x207   : > { %1705 = vmatprep.subr.mxu0 %v4965_v60  ;;  %1847 = vmatprep.subr.mxu1 %v4966_v15 }
 0x208   : > { %1708 = vmatpush1.msra.mxu0 %v4967_v9  ;;  %1849 = vmatpush1.msra.mxu1 %v4968_v55  ;;  %v4975_v55 = vand.u32 4294901760, %v4327_v59 }
 0x209   : > { %1711 = vmatprep.subr.mxu0 %v4969_v11  ;;  %1851 = vmatprep.subr.mxu1 %v4970_v44  ;;  %v4976_v44 = vld [vmem:[#allocation22_spill] sm:$0xff] }
 0x20a   : > { %1714 = vmatpush1.msra.mxu0 %v4971_v18  ;;  %1853 = vmatpush1.msra.mxu1 %v4280_v29 }
 0x20b   : > { %1717 = vmatprep.subr.mxu0 %v4972_v39  ;;  %1855 = vmatprep.subr.mxu1 %v4287_v4 }
 0x20c   : > { %1720 = vmatpush1.msra.mxu0 %v4973_v32  ;;  %1857 = vmatpush1.msra.mxu1 %v4295_v34 }
 0x20d   : > { %1723 = vmatprep.subr.mxu0 %v4974_v21  ;;  %1894 = vmatmul.mubr.f32.vlgmr.msra.gmra.mxu1 %v4975_v55  ;;  %v4977_v55 = vand.u32 4294901760, %v4344_v41 }
 0x20e   : > { %2085 = vmatprep.subr.mxu1 %v3895_v42  ;;  %1726 = vmatpush1.msra.mxu0 %v4976_v44  ;;  %v4978_v42 = vld [vmem:[#allocation14_spill] sm:$0xff] }
 0x20f   : > { %2087 = vmatpush1.msra.mxu1 %v3897_v61  ;;  %1729 = vmatprep.subr.mxu0 %v4246_v58  ;;  %v4979_v61 = vld [vmem:[#allocation2_spill] sm:$0xff] }
 0x210   : > { %2089 = vmatprep.subr.mxu1 %v3899_v37  ;;  %1732 = vmatpush1.msra.mxu0 %v4259_v38  ;;  %v4980_v37 = vand.u32 4294901760, %v4979_v61 }
 0x211   : > { %1899 = vmatprep.mubr.f32.mxu1 %v4873_v40  ;;  %2091 = vmatpush1.msra.mxu1 %v3910_v54  ;;  %v4981_v54 = vand.u32 4294901760, %v3926_v56  ;;  %v4985_v56 = vand.u32 4294901760, %v3941_v45  ;;  %v4989_v45 = vand.u32 4294901760, %v4019_v48  ;;  %v4999_v48 = vand.u32 4294901760, %v4967_v9 }
 0x212   : > { %1735 = vmatprep.subr.mxu0 %v4270_v1  ;;  %1903 = vmatmul.mubr.f32.gmra.mxu1 %v4977_v55 }
 0x213   : > { %2093 = vmatprep.subr.mxu1 %v3912_v28  ;;  %1738 = vmatpush1.msra.mxu0 %v4293_v20  ;;  %v4982_v28 = vand.u32 4294901760, %v3929_v63  ;;  %v4986_v63 = vand.u32 4294901760, %v3950_v24  ;;  %v4991_v24 = vand.u32 4294901760, %v4026_v33  ;;  %v5001_v33 = vand.u32 4294901760, %v4969_v11 }
 0x214   : > { %2095 = vmatpush1.msra.mxu1 %v3914_v30  ;;  %1741 = vmatprep.subr.mxu0 %v4978_v42  ;;  %v4983_v30 = vand.u32 4294901760, %v3935_v52  ;;  %v4987_v52 = vand.u32 4294901760, %v3957_v35  ;;  %v4992_v35 = vand.u32 4294901760, %v4029_v0  ;;  %v5002_v0 = vld [vmem:[#allocation23_spill] sm:$0xff] }
 0x215   : > { %2097 = vmatprep.subr.mxu1 %v3931_v14  ;;  %1744 = vmatpush1.msra.mxu0 %v4307_v26  ;;  %v4984_v14 = vand.u32 4294901760, %v3938_v2  ;;  %v4988_v2 = vand.u32 4294901760, %v4016_v47  ;;  %v4998_v47 = vand.u32 4294901760, %v4965_v60 }
 0x216   : > { %1777 = vmatprep.mubr.f32.mxu0 %v4873_v40  ;;  %2099 = vmatpush1.msra.mxu1 %v3943_v27  ;;  %v4990_v27 = vand.u32 4294901760, %v4022_v62  ;;  %v5000_v62 = vld [vmem:[#allocation13_spill] sm:$0xff] }
 0x217   : > { %1780 = vmatmul.mubr.f32.vlgmr.msra.gmra.mxu0 %v4327_v59  ;;  %1912 = vmatprep.subr.mxu0 %v4980_v37 }
 0x218   : > { %2101 = vmatprep.subr.mxu1 %v4005_v49  ;;  %1916 = vmatpush1.msra.mxu0 %v4981_v54  ;;  %v4993_v49 = vand.u32 4294901760, %v4084_v12  ;;  %v5007_v12 = vld [vmem:[#allocation21_spill] sm:$0xff] }
 0x219   : > { %2103 = vmatpush1.msra.mxu1 %v4007_v53  ;;  %1920 = vmatprep.subr.mxu0 %v4982_v28  ;;  %v4994_v53 = vand.u32 4294901760, %v4093_v43  ;;  %v5009_v43 = vand.u32 4294901760, %v4246_v58 }
 0x21a   : > { %2105 = vmatprep.subr.mxu1 %v4009_v51  ;;  %1785 = vmatprep.mubr.f32.mxu0 %v4873_v40  ;;  %v4995_v51 = vand.u32 4294901760, %v4105_v36  ;;  %v5011_v36 = vand.u32 4294901760, %v4270_v1 }
 0x21b   : > { %1924 = vmatpush1.msra.mxu0 %v4983_v30  ;;  %2107 = vmatpush1.msra.mxu1 %v4011_v22  ;;  %v4996_v22 = vand.u32 4294901760, %v4961_v25 }
 0x21c   : > { %1788 = vmatmul.mubr.f32.gmra.mxu0 %v4344_v41  ;;  %1928 = vmatprep.subr.mxu0 %v4984_v14 }
 0x21d   : > { %2109 = vmatprep.subr.mxu1 %v4013_v7  ;;  %1932 = vmatpush1.msra.mxu0 %v4985_v56  ;;  %v4997_v7 = vand.u32 4294901760, %v4963_v19  ;;  %v2906_v56 = vld [vmem:[%s4705_s4] ss:$0 sm:$0xff] }
 0x21e   : > { %2111 = vmatpush1.msra.mxu1 %v4069_v6  ;;  %1936 = vmatprep.subr.mxu0 %v4986_v63  ;;  %v5005_v6 = vand.u32 4294901760, %v4973_v32 }
 0x21f   : > { %2113 = vmatprep.subr.mxu1 %v4076_v46  ;;  %1940 = vmatpush1.msra.mxu0 %v4987_v52  ;;  %v5006_v46 = vand.u32 4294901760, %v4974_v21 }
 0x220   : > { %2115 = vmatpush1.msra.mxu1 %v4086_v16  ;;  %1944 = vmatprep.subr.mxu0 %v4988_v2  ;;  %v5008_v16 = vand.u32 4294901760, %v4976_v44 }
 0x221   : > { %2117 = vmatprep.subr.mxu1 %v4095_v23  ;;  %1948 = vmatpush1.msra.mxu0 %v4989_v45  ;;  %v5010_v23 = vand.u32 4294901760, %v4259_v38  ;;  %v4525_v38 = vpop.f32.mrf.mxu0 }
 0x222   : > { %2119 = vmatpush1.msra.mxu1 %v4107_v8  ;;  %1952 = vmatprep.subr.mxu0 %v4990_v27  ;;  %v5012_v8 = vld [vmem:[#allocation15_spill] sm:$0xff] }
 0x223   : > { %2121 = vmatprep.subr.mxu1 %v4119_v31  ;;  %1956 = vmatpush1.msra.mxu0 %v4991_v24  ;;  %v5013_v31 = vand.u32 4294901760, %v4293_v20 }
 0x224   : > { %2123 = vmatpush1.msra.mxu1 %v4132_v10  ;;  %1960 = vmatprep.subr.mxu0 %v4992_v35  ;;  %v5014_v10 = vand.u32 4294901760, %v4978_v42 }
 0x225   : > { %2125 = vmatprep.subr.mxu1 %v4145_v57  ;;  %1964 = vmatpush1.msra.mxu0 %v4993_v49  ;;  %v5003_v57 = vand.u32 4294901760, %v4971_v18 }
 0x226   : > { %2127 = vmatpush1.msra.mxu1 %v4177_v13  ;;  %1968 = vmatprep.subr.mxu0 %v4994_v53  ;;  %v5015_v13 = vand.u32 4294901760, %v4307_v26 }
 0x227   : > { %2129 = vmatprep.subr.mxu1 %v4186_v5  ;;  %1972 = vmatpush1.msra.mxu0 %v4995_v51  ;;  %v4523_v5 = vpop.f32.mrf.mxu1 }
 0x228   : > { %2131 = vmatpush1.msra.mxu1 %v4197_v3  ;;  %1976 = vmatprep.subr.mxu0 %v4996_v22  ;;  %v5004_v3 = vand.u32 4294901760, %v4972_v39 }
 0x229   : > { %2133 = vmatprep.subr.mxu1 %v4962_v17  ;;  %1980 = vmatpush1.msra.mxu0 %v4997_v7  ;;  %v2907_v7 = vld [vmem:[%s4706_s5] ss:$0 sm:$0xff] }
 0x22a   : > { %2135 = vmatpush1.msra.mxu1 %v4964_v50  ;;  %1984 = vmatprep.subr.mxu0 %v4998_v47 }
 0x22b   : > { %2137 = vmatprep.subr.mxu1 %v4966_v15  ;;  %1988 = vmatpush1.msra.mxu0 %v4999_v48 }
 0x22c   : > { %2139 = vmatpush1.msra.mxu1 %v5000_v62  ;;  %1992 = vmatprep.subr.mxu0 %v5001_v33 }
 0x22d   : > { %2141 = vmatprep.subr.mxu1 %v5002_v0  ;;  %1996 = vmatpush1.msra.mxu0 %v5003_v57 }
 0x22e   : > { %2143 = vmatpush1.msra.mxu1 %v4280_v29  ;;  %2000 = vmatprep.subr.mxu0 %v5004_v3 }
 0x22f   : > { %2145 = vmatprep.subr.mxu1 %v4287_v4  ;;  %2004 = vmatpush1.msra.mxu0 %v5005_v6 }
 0x230   : > { %2147 = vmatpush1.msra.mxu1 %v4295_v34  ;;  %2180 = vmatprep.mubr.f32.mxu1 %v4873_v40 }
 0x231   : > { %2008 = vmatprep.subr.mxu0 %v5006_v46  ;;  %2182 = vmatmul.mubr.f32.vlgmr.msra.gmra.mxu1 %v5007_v12 }
 0x232   : > { %2012 = vmatpush1.msra.mxu0 %v5008_v16  ;;  %2187 = vmatprep.mubr.f32.mxu1 %v4873_v40 }
 0x233   : > { %2016 = vmatprep.subr.mxu0 %v5009_v43  ;;  %2069 = vmatprep.mubr.f32.mxu0 %v4873_v40 }
 0x234   : > { %2020 = vmatpush1.msra.mxu0 %v5010_v23 }
 0x235   : > { %2024 = vmatprep.subr.mxu0 %v5011_v36  ;;  %2189 = vmatmul.mubr.f32.gmra.mxu1 %v5012_v8 }
 0x236   : > { %2028 = vmatpush1.msra.mxu0 %v5013_v31 }
 0x237   : > { %2032 = vmatprep.subr.mxu0 %v5014_v10 }
 0x238   : > { %2036 = vmatpush1.msra.mxu0 %v5015_v13 }
 0x239   : > { %2071 = vmatmul.mubr.f32.vlgmr.msra.gmra.mxu0 %v5007_v12 }
 0x23a   : > { %2076 = vmatprep.mubr.f32.mxu0 %v4873_v40 }
 0x23d   : > { %2078 = vmatmul.mubr.f32.gmra.mxu0 %v5012_v8 }
 0x2ac   : > { %v1637_v34 = vpop.f32.mrf.mxu1 }
 0x2ae   : > { %v1639_v58 = vpop.f32.mrf.mxu1 }
 0x2b0   : > { %v1644_v29 = vpop.f32.mrf.mxu1 }
 0x2b2   : > { %v1646_v44 = vpop.f32.mrf.mxu1 }
 0x2b4   : > { %v1394_v20 = vpop.f32.mrf.mxu0 }
 0x2b5   : > { %v1638_v11 = vadd.f32 %v1637_v34, %v1394_v20 }
 0x2b6   : > { %v1396_v1 = vpop.f32.mrf.mxu0 }
 0x2b7   : > { %v1640_v4 = vadd.f32 %v1639_v58, %v1396_v1 }
 0x2b9   : > { %v1405_v21 = vpop.f32.mrf.mxu0 }
 0x2ba   : > { %v1645_v42 = vadd.f32 %v1644_v29, %v1405_v21 }
 0x2bb   : > { %v1407_v26 = vpop.f32.mrf.mxu0 }
 0x2bc   : > { %v1647_v59 = vadd.f32 %v1646_v44, %v1407_v26 }
 0x2cd   : > { %v1895_v32 = vpop.f32.mrf.mxu1 }
 0x2cf   : > { %v1897_v41 = vpop.f32.mrf.mxu1 }
 0x2d2   : > { %v1904_v25 = vpop.f32.mrf.mxu1 }
 0x2d4   : > { %v1906_v15 = vpop.f32.mrf.mxu1 }
 0x2d7   : > { %v1781_v39 = vpop.f32.mrf.mxu0 }
 0x2d8   : > { %v1782_v55 = vadd.f32 %v1781_v39, %v1638_v11  ;;  %v2277_v11 = vld [vmem:[%s4707_s6 + $0x28] sm:$0xff] }
 0x2d9   : > { %v1783_v40 = vpop.f32.mrf.mxu0 }
 0x2da   : > { %v1784_v18 = vadd.f32 %v1783_v40, %v1640_v4  ;;  %v1896_v54 = vadd.f32 %v1895_v32, %v1782_v55  ;;  %v4544_v55 = vand.u32 4294901760, %v2277_v11 }
 0x2dc   : > { %v1789_v17 = vpop.f32.mrf.mxu0  ;;  %v1898_v19 = vadd.f32 %v1897_v41, %v1784_v18  ;;  %2962 = vmatprep.subr.mxu0 %v4544_v55 }
 0x2dd   : > { %v1790_v37 = vadd.f32 %v1789_v17, %v1645_v42  ;;  %v2276_v42 = vld [vmem:[%s4707_s6 + $0x20] sm:$0xff]  ;;  %2963 = vmatpush3.msra.mxu0 %v4544_v55 }
 0x2de   : > { %v1791_v50 = vpop.f32.mrf.mxu0 }
 0x2df   : > { %v1792_v60 = vadd.f32 %v1791_v50, %v1647_v59  ;;  %v1905_v45 = vadd.f32 %v1904_v25, %v1790_v37  ;;  %v4552_v37 = vand.u32 4294901760, %v2276_v42 }
 0x2e1   : > { %v1907_v9 = vadd.f32 %v1906_v15, %v1792_v60  ;;  %2964 = vmatprep.subr.mxu0 %v4552_v37 }
 0x2e2   : > { %2965 = vmatpush3.msra.mxu0 %v4552_v37 }
 0x2f1   : > { %v2183_v61 = vpop.f32.mrf.mxu1 }
 0x2f3   : > { %v2185_v14 = vpop.f32.mrf.mxu1 }
 0x2f5   : > { %v2190_v53 = vpop.f32.mrf.mxu1 }
 0x2f7   : > { %v2192_v29 = vpop.f32.mrf.mxu1 }
 0x2f9   : > { %v2072_v28 = vpop.f32.mrf.mxu0 }
 0x2fa   : > { %v2073_v30 = vadd.f32 %v2072_v28, %v1896_v54  ;;  %v2275_v54 = vld [vmem:[%s4707_s6 + $0x18] sm:$0xff] }
 0x2fb   : > { %v2074_v63 = vpop.f32.mrf.mxu0 }
 0x2fc   : > { %v2184_v52 = vadd.f32 %v2183_v61, %v2073_v30  ;;  %v2075_v2 = vadd.f32 %v2074_v63, %v1898_v19  ;;  %v4550_v61 = vsub.f32 %v2277_v11, %v4544_v55  ;;  %v4563_v30 = vsub.f32 %v2276_v42, %v4552_v37 }
 0x2fd   : > { %v2079_v27 = vpop.f32.mrf.mxu0 }
 0x2fe   : > { %v2202_v24 = vadd.f32 %v2906_v56, %v2184_v52  ;;  %v2186_v35 = vadd.f32 %v2185_v14, %v2075_v2  ;;  %v2080_v49 = vadd.f32 %v2079_v27, %v1905_v45  ;;  %v4560_v28 = vand.u32 4294901760, %v4550_v61  ;;  %v2273_v27 = vld [vmem:[%s4707_s6 + $0x8] sm:$0xff] }
 0x2ff   : > { %v2081_v31 = vpop.f32.mrf.mxu0  ;;  %v4565_v14 = vand.u32 4294901760, %v2275_v54  ;;  %v4575_v52 = vand.u32 4294901760, %v4563_v30 }
 0x300   : > { %v2191_v51 = vadd.f32 %v2190_v53, %v2080_v49  ;;  %vm2204_vm2 = vcmp.gt.f32.partialorder %v2202_v24, 0.0  ;;  %v2206_v22 = vmul.f32 0.2, %v2202_v24  ;;  %v2082_v13 = vadd.f32 %v2081_v31, %v1907_v9 }
 0x301   : > { %v2399_v63 = vsub.f32 %v4550_v61, %v4560_v28  ;;  %v4578_v2 = vsub.f32 %v2275_v54, %v4565_v14  ;;  %2966 = vmatprep.subr.mxu0 %v4565_v14 }
 0x302   : > { %v2203_v47 = vadd.f32 %v2906_v56, %v2191_v51  ;;  %v2208_v48 = vsel %vm2204_vm2, %v2202_v24, %v2206_v22  ;;  %v2193_v4 = vadd.f32 %v2192_v29, %v2082_v13  ;;  %v2274_v56 = vld [vmem:[%s4707_s6 + $0x10] sm:$0xff]  ;;  %2967 = vmatpush3.msra.mxu0 %v4565_v14  ;;  %v4596_v51 = vand.u32 4294901760, %v2273_v27  ;;  %v2272_v22 = vld [vmem:[%s4707_s6] sm:$0xff] }
 0x303   : > { %v2217_v62 = vmul.f32 %v2907_v7, %v2208_v48  ;;  %v4580_v45 = vand.u32 4294901760, %v2274_v56  ;;  %v2400_v24 = vand.u32 4294901760, %v2399_v63  ;;  %v4590_v49 = vand.u32 4294901760, %v4578_v2 }
 0x304   : > { %vm2205_vm3 = vcmp.gt.f32.partialorder %v2203_v47, 0.0  ;;  %v2207_v33 = vmul.f32 0.2, %v2203_v47 }
 0x305   : > { %2219 = vadd.xlane.f32.xlu1 %v2217_v62  ;;  %v4593_v53 = vsub.f32 %v2274_v56, %v4580_v45  ;;  %2968 = vmatprep.subr.mxu0 %v4580_v45  ;;  %v4607_v62 = vand.u32 4294901760, %v2272_v22 }
 0x306   : > { %v2209_v0 = vsel %vm2205_vm3, %v2203_v47, %v2207_v33  ;;  %2969 = vmatpush3.msra.mxu0 %v4580_v45  ;;  %2977 = vmatprep.subr.mxu1 %v2400_v24  ;;  %v2413_v47 = vsub.f32 %v4578_v2, %v4590_v49  ;;  %v4610_v33 = vsub.f32 %v2273_v27, %v4596_v51 }
 0x307   : > { %v2218_v57 = vmul.f32 %v2907_v7, %v2209_v0  ;;  %v4605_v48 = vand.u32 4294901760, %v4593_v53  ;;  %2978 = vmatpush3.msra.mxu1 %v2400_v24  ;;  %2970 = vmatprep.subr.mxu0 %v4596_v51 }
 0x308   : > { %v2414_v0 = vand.u32 4294901760, %v2413_v47  ;;  %2971 = vmatpush3.msra.mxu0 %v4596_v51 }
 0x309   : > { %2221 = vadd.xlane.f32.xlu1 %v2218_v57  ;;  %v2420_v57 = vsub.f32 %v4593_v53, %v4605_v48  ;;  %2972 = vmatprep.subr.mxu0 %v4607_v62 }
 0x30a   : > { %2973 = vmatpush3.msra.mxu0 %v4607_v62 }
 0x30b   : > { %2992 = vmatprep.subr.mxu0 %v4550_v61 }
 0x38e   : > { %v2220_v3 = vpop.xlane.xlu1 %2219 }
 0x38f   : > { %v2908_v6 = vmul.f32 -1.442695, %v2220_v3  ;;  %v4616_v3 = vsub.f32 %v2272_v22, %v4607_v62 }
 0x391   : > { %3065 = vpow2.f32 %v2908_v6  ;;  %v4620_v6 = vand.u32 4294901760, %v4610_v33 }
 0x392   : > { %v2222_v46 = vpop.xlane.xlu1 %2221 }
 0x393   : > { %v2909_v12 = vmul.f32 -1.442695, %v2222_v46  ;;  %v2421_v46 = vand.u32 4294901760, %v2420_v57 }
 0x395   : > { %3067 = vpow2.f32 %v2909_v12  ;;  %v4624_v12 = vand.u32 4294901760, %v4616_v3 }
 0x39e   : > { %v3066_v16 = vpop.eup %3065 }
 0x39f   : > { %v2229_v43 = vadd.f32 1.0, %v3066_v16  ;;  %v2427_v16 = vsub.f32 %v4610_v33, %v4620_v6 }
 0x3a1   : > { %3069 = vrcp.f32 %v2229_v43  ;;  %v2434_v43 = vsub.f32 %v4616_v3, %v4624_v12 }
 0x3a2   : > { %v3068_v23 = vpop.eup %3067 }
 0x3a3   : > { %v2230_v36 = vadd.f32 1.0, %v3068_v23  ;;  %v2428_v23 = vand.u32 4294901760, %v2427_v16 }
 0x3a5   : > { %3071 = vrcp.f32 %v2230_v36  ;;  %v2435_v36 = vand.u32 4294901760, %v2434_v43 }
 0x3ae   : > { %v3070_v8 = vpop.eup %3069 }
 0x3af   : > { %v2235_v10 = vmul.f32 0.3, %v3070_v8  ;;  %v1250_v8 = vpop.xlane.xlu0 %1249 }
 0x3b0   : > { %v1253_v31 = vmax.f32 %v1250_v8, 1e-24 }
 0x3b1   : > { %v2237_v34 = vadd.f32 0.5, %v2235_v10 }
 0x3b2   : > { %v3072_v58 = vpop.eup %3071 }
 0x3b3   : > { %v2239_v20 = vsub.f32 %v2186_v35, %v2237_v34  ;;  %v2236_v1 = vmul.f32 0.3, %v3072_v58  ;;  %v2406_v35 = vsub.f32 %v4563_v30, %v4575_v52  ;;  %v1252_v10 = vpop.xlane.xlu0 %1251 }
 0x3b4   : > { %v1254_v34 = vmax.f32 %v1252_v10, 1e-24 }
 0x3b5   : > { %v2910_v21 = vmul.f32 -50.0, %v2239_v20  ;;  %v2238_v44 = vadd.f32 0.5, %v2236_v1  ;;  %v2407_v7 = vand.u32 4294901760, %v2406_v35 }
 0x3b7   : > { %v2245_v26 = vmul.f32 1.442695, %v2910_v21  ;;  %v2240_v59 = vsub.f32 %v2193_v4, %v2238_v44  ;;  %2979 = vmatprep.subr.mxu1 %v2407_v7  ;;  %v5016_v21 = vld [vmem:[#allocation3_spill] sm:$0xff] }
 0x3b8   : > { %2980 = vmatpush3.msra.mxu1 %v2407_v7  ;;  %v1107_v44 = vadd.f32 %v4525_v38, %v5016_v21 }
 0x3b9   : > { %3073 = vpow2.f32 %v2245_v26  ;;  %v2911_v32 = vmul.f32 -50.0, %v2240_v59  ;;  %2981 = vmatprep.subr.mxu1 %v2414_v0  ;;  %v5017_v26 = vld [vmem:[#allocation4_spill] sm:$0xff] }
 0x3ba   : > { %2982 = vmatpush3.msra.mxu1 %v2414_v0 }
 0x3bb   : > { %v2247_v39 = vmul.f32 1.442695, %v2911_v32  ;;  %2983 = vmatprep.subr.mxu1 %v2421_v46 }
 0x3bc   : > { %2984 = vmatpush3.msra.mxu1 %v2421_v46 }
 0x3bd   : > { %3075 = vpow2.f32 %v2247_v39  ;;  %2985 = vmatprep.subr.mxu1 %v2428_v23 }
 0x3be   : > { %2986 = vmatpush3.msra.mxu1 %v2428_v23 }
 0x3bf   : > { %2987 = vmatprep.subr.mxu1 %v2435_v36 }
 0x3c0   : > { %2988 = vmatpush3.msra.mxu1 %v2435_v36 }
 0x3c1   : > { %3007 = vmatprep.subr.mxu1 %v4544_v55 }
 0x3c6   : > { %v3074_v41 = vpop.eup %3073 }
 0x3c7   : > { %v2249_v40 = vadd.f32 1.0, %v3074_v41  ;;  %v1218_v41 = vadd.f32 %v4523_v5, %v1107_v44 }
 0x3c9   : > { %3077 = vrcp.f32 %v2249_v40 }
 0x3ca   : > { %v3076_v18 = vpop.eup %3075 }
 0x3cb   : > { %v2250_v25 = vadd.f32 1.0, %v3076_v18 }
 0x3cd   : > { %3079 = vrcp.f32 %v2250_v25 }
 0x3ce   : > { %3081 = vrsqrt.f32 %v1253_v31 }
 0x3d6   : > { %v4533_v17 = vpop.eup %3077 }
 0x3d7   : > { %v2255_v19 = vand.u32 2147483647, %v4533_v17 }
 0x3d9   : > { %v2258_v50 = vsel %vm2257_vm4, %v2255_v19, 0.0 }
 0x3da   : > { %v4537_v60 = vpop.eup %3079  ;;  %2259 = vadd.xlane.f32.xlu1 %v2258_v50 }
 0x3db   : > { %v2256_v15 = vand.u32 2147483647, %v4537_v60  ;;  %v3082_v29 = vpop.eup %3081 }
 0x3dc   : > { %v1257_v59 = vmul.f32 %v3082_v29, %v5017_v26 }
 0x3dd   : > { %v2261_v9 = vsel %vm2257_vm4, %v2256_v15, 0.0 }
 0x3de   : > { %2262 = vadd.xlane.f32.xlu1 %v2261_v9 }
 0x463   : > { %v2260_v13 = vpop.xlane.xlu1 %2259 }
 0x464   : > { %v2264_v58 = vmax.f32 %v2260_v13, 1e-12 }
 0x466   : > { %3083 = vrcp.f32 %v2264_v58 }
 0x467   : > { %v2263_v20 = vpop.xlane.xlu1 %2262  ;;  %3085 = vrsqrt.f32 %v1254_v34 }
 0x468   : > { %v2265_v1 = vmax.f32 %v2263_v20, 1e-12 }
 0x46a   : > { %3087 = vrcp.f32 %v2265_v1 }
 0x473   : > { %v3084_v4 = vpop.eup %3083 }
 0x474   : > { %v2268_v32 = vmul.f32 %v3084_v4, %v4533_v17  ;;  %v3086_v39 = vpop.eup %3085 }
 0x475   : > { %v1258_v25 = vmul.f32 %v3086_v39, %v1218_v41 }
 0x476   : > { %v2270_v40 = vmul.f32 %v2268_v32, %v1257_v59 }
 0x477   : > { %v3088_v18 = vpop.eup %3087 }
 0x478   : > { %v2269_v19 = vmul.f32 %v3088_v18, %v4537_v60  ;;  %v2279_v50 = vsel %vm2257_vm4, %v2270_v40, 0 }
 0x479   : > { %v2355_v15 = vand.u32 4294901760, %v2279_v50 }
 0x47a   : > { %v2271_v9 = vmul.f32 %v2269_v19, %v1258_v25 }
 0x47b   : > { %2989 = vmatprep.mubr.f32.mxu1 %v2355_v15  ;;  %v2356_v11 = vsub.f32 %v2279_v50, %v2355_v15 }
 0x47c   : > { %v2282_v38 = vsel %vm2257_vm4, %v2271_v9, 0 }
 0x47d   : > { %v4641_v42 = vand.u32 4294901760, %v2282_v38  ;;  %v2357_v54 = vand.u32 4294901760, %v2356_v11 }
 0x47f   : > { %v2366_v17 = vsub.f32 %v2282_v38, %v4641_v42  ;;  %2990 = vmatmul.mubr.f32.vlgmr.msra.gmra.mxu1 %v4641_v42  ;;  %v2358_v5 = vsub.f32 %v2356_v11, %v2357_v54 }
 0x480   : > { %3008 = vmatpush3.msra.mxu1 %v4544_v55  ;;  %3019 = vmatprep.mubr.f32.mxu1 %v2357_v54 }
 0x481   : > { %3009 = vmatprep.subr.mxu1 %v4552_v37  ;;  %v2359_v60 = vand.u32 4294901760, %v2358_v5  ;;  %v2367_v56 = vand.u32 4294901760, %v2366_v17 }
 0x482   : > { %3010 = vmatpush3.msra.mxu1 %v4552_v37 }
 0x483   : > { %3011 = vmatprep.subr.mxu1 %v4565_v14  ;;  %2974 = vmatprep.mubr.f32.mxu0 %v2359_v60  ;;  %v2368_v63 = vsub.f32 %v2366_v17, %v2367_v56 }
 0x484   : > { %3012 = vmatpush3.msra.mxu1 %v4565_v14 }
 0x485   : > { %3013 = vmatprep.subr.mxu1 %v4580_v45  ;;  %v2369_v27 = vand.u32 4294901760, %v2368_v63 }
 0x486   : > { %3014 = vmatpush3.msra.mxu1 %v4580_v45 }
 0x487   : > { %3015 = vmatprep.subr.mxu1 %v4596_v51  ;;  %2975 = vmatmul.mubr.f32.vlgmr.msra.gmra.mxu0 %v2369_v27 }
 0x488   : > { %2993 = vmatpush3.msra.mxu0 %v4550_v61  ;;  %3016 = vmatpush3.msra.mxu1 %v4596_v51 }
 0x489   : > { %2994 = vmatprep.subr.mxu0 %v4563_v30  ;;  %3004 = vmatprep.mubr.f32.mxu0 %v2356_v11 }
 0x48a   : > { %3017 = vmatprep.subr.mxu1 %v4607_v62  ;;  %2995 = vmatpush3.msra.mxu0 %v4563_v30 }
 0x48b   : > { %3018 = vmatpush3.msra.mxu1 %v4607_v62  ;;  %2996 = vmatprep.subr.mxu0 %v4578_v2 }
 0x48c   : > { %3020 = vmatmul.mubr.f32.vlgmr.msra.gmra.mxu1 %v2367_v56  ;;  %3037 = vmatprep.subr.mxu1 %v4544_v55 }
 0x48d   : > { %2997 = vmatpush3.msra.mxu0 %v4578_v2  ;;  %3038 = vmatpush3.msra.mxu1 %v4544_v55 }
 0x48e   : > { %3049 = vmatprep.mubr.f32.mxu1 %v2355_v15  ;;  %2998 = vmatprep.subr.mxu0 %v4593_v53 }
 0x48f   : > { %3039 = vmatprep.subr.mxu1 %v4552_v37  ;;  %2999 = vmatpush3.msra.mxu0 %v4593_v53 }
 0x490   : > { %3040 = vmatpush3.msra.mxu1 %v4552_v37  ;;  %3000 = vmatprep.subr.mxu0 %v4610_v33 }
 0x491   : > { %3041 = vmatprep.subr.mxu1 %v4565_v14  ;;  %3001 = vmatpush3.msra.mxu0 %v4610_v33 }
 0x492   : > { %3042 = vmatpush3.msra.mxu1 %v4565_v14  ;;  %3002 = vmatprep.subr.mxu0 %v4616_v3 }
 0x493   : > { %3043 = vmatprep.subr.mxu1 %v4580_v45  ;;  %3003 = vmatpush3.msra.mxu0 %v4616_v3 }
 0x494   : > { %3044 = vmatpush3.msra.mxu1 %v4580_v45  ;;  %3005 = vmatmul.mubr.f32.vlgmr.msra.gmra.mxu0 %v2366_v17 }
 0x495   : > { %3022 = vmatprep.subr.mxu0 %v4560_v28  ;;  %3045 = vmatprep.subr.mxu1 %v4596_v51 }
 0x496   : > { %3023 = vmatpush3.msra.mxu0 %v4560_v28  ;;  %3034 = vmatprep.mubr.f32.mxu0 %v2355_v15 }
 0x497   : > { %3046 = vmatpush3.msra.mxu1 %v4596_v51  ;;  %3024 = vmatprep.subr.mxu0 %v4575_v52 }
 0x498   : > { %3047 = vmatprep.subr.mxu1 %v4607_v62  ;;  %3025 = vmatpush3.msra.mxu0 %v4575_v52 }
 0x499   : > { %3048 = vmatpush3.msra.mxu1 %v4607_v62  ;;  %3026 = vmatprep.subr.mxu0 %v4590_v49 }
 0x49a   : > { %3050 = vmatmul.mubr.f32.vlgmr.msra.gmra.mxu1 %v4641_v42  ;;  %3027 = vmatpush3.msra.mxu0 %v4590_v49 }
 0x49b   : > { %3028 = vmatprep.subr.mxu0 %v4605_v48 }
 0x49c   : > { %3029 = vmatpush3.msra.mxu0 %v4605_v48 }
 0x49d   : > { %3030 = vmatprep.subr.mxu0 %v4620_v6 }
 0x49e   : > { %3031 = vmatpush3.msra.mxu0 %v4620_v6 }
 0x49f   : > { %3032 = vmatprep.subr.mxu0 %v4624_v12 }
 0x4a0   : > { %3033 = vmatpush3.msra.mxu0 %v4624_v12 }
 0x4a1   : > { %3035 = vmatmul.mubr.f32.vlgmr.msra.gmra.mxu0 %v4641_v42 }
 0x53f   : > { %v2991_v61 = vpop.f32.mrf.mxu1 }
 0x541   : > { %v2472_v30 = vpop.f32.mrf.mxu1 }
 0x547   : > { %v2976_v55 = vpop.f32.mrf.mxu0 }
 0x548   : > { %v2479_v14 = vadd.f32 %v2991_v61, %v2976_v55 }
 0x549   : > { %v2361_v37 = vpop.f32.mrf.mxu0 }
 0x54a   : > { %v2473_v45 = vadd.f32 %v2472_v30, %v2361_v37 }
 0x54c   : > { %v3021_v52 = vpop.f32.mrf.mxu1 }
 0x54e   : > { %v2648_v49 = vpop.f32.mrf.mxu1 }
 0x554   : > { %v3006_v28 = vpop.f32.mrf.mxu0 }
 0x555   : > { %v2570_v24 = vadd.f32 %v3006_v28, %v2479_v14 }
 0x556   : > { %v2562_v2 = vpop.f32.mrf.mxu0 }
 0x557   : > { %v2563_v35 = vadd.f32 %v2562_v2, %v2473_v45  ;;  %v2657_v51 = vadd.f32 %v3021_v52, %v2570_v24 }
 0x559   : > { %v2649_v7 = vadd.f32 %v2648_v49, %v2563_v35 }
 0x55a   : > { %v3051_v53 = vpop.f32.mrf.mxu1 }
 0x55c   : > { %v2828_v33 = vpop.f32.mrf.mxu1 }
 0x561   : > { %v3036_v22 = vpop.f32.mrf.mxu0 }
 0x562   : > { %v2752_v47 = vadd.f32 %v3036_v22, %v2657_v51 }
 0x563   : > { %v2745_v48 = vpop.f32.mrf.mxu0 }
 0x564   : > { %v2746_v62 = vadd.f32 %v2745_v48, %v2649_v7  ;;  %v2835_v57 = vadd.f32 %v3051_v53, %v2752_v47 }
 0x566   : > { %v2829_v0 = vadd.f32 %v2828_v33, %v2746_v62  ;;  %2839 = vst [vmem:[%s280_s12 + $0x8] sm:$0xff] %v2835_v57 }
 0x568   : > { %2838 = vst [vmem:[%s280_s12] sm:$0xff] %v2829_v0 }
 0x569 PF: > { %s17_s24 = sadd.s32 1, %s3095_s24  }
 0x56a   : > { %p14_p4 = scmp.ge.s32.totalorder %s17_s24, 4  }
 0x56c   :  { %16 = sbr.rel (!%p14_p4) target bundleno = 1 (0x1), region = 78 }

// kernel: tl_module_forward.2
= control target key start
LH: loop header
LB: loop body
LE: loop exit
PB: predicated region body
PF: predicated region fallthrough
CT: control target
= control target key end

     0   :  { %vm1494_vm0 = vcmask 392192   ;;  %s3481_s2 = inlined_call_operand.vmem [shape: f32[128,48], index: 2, kind: input, shape index: {}]   ;;  %s3482_s0 = inlined_call_operand.vmem [shape: f32[128,128], index: 0, kind: input, shape index: {}]   ;;  %s3483_s4 = inlined_call_operand.vmem [shape: f32[128,48], index: 4, kind: output, shape index: {1}]   ;;  %s3484_s1 = inlined_call_operand.vmem [shape: f32[128,1], index: 1, kind: input, shape index: {}]   ;;  %s3485_s3 = inlined_call_operand.vmem [shape: f32[128,48], index: 3, kind: output, shape index: {0}]  }
   0x1   :  { %v2225_v0 = vld [vmem:[%s3481_s2 + $0x78] sm:$0xff]  ;;  %v2230_v1 = vld [vmem:[%s3481_s2 + $0x70] sm:$0xff]  ;;  %v2235_v2 = vld [vmem:[%s3481_s2 + $0x68] sm:$0xff] }
   0x2   :  { %v2238_v3 = vand.u32 4294901760, %v2225_v0  ;;  %v2241_v4 = vand.u32 4294901760, %v2230_v1  ;;  %v2246_v5 = vld [vmem:[%s3481_s2 + $0x60] sm:$0xff]  ;;  %v2251_v6 = vld [vmem:[%s3481_s2 + $0x58] sm:$0xff]  ;;  %v2254_v7 = vand.u32 4294901760, %v2235_v2  ;;  %v2259_v8 = vld [vmem:[%s3481_s2 + $0x50] sm:$0xff] }
   0x3   :  { %3565 = vst [vmem:[#allocation2_spill] sm:$0xff] %v2246_v5  ;;  %3566 = vst [vmem:[#allocation3_spill] sm:$0xff] %v2251_v6  ;;  %v2263_v9 = vand.u32 4294901760, %v2246_v5  ;;  %v2268_v10 = vld [vmem:[%s3481_s2 + $0x48] sm:$0xff]  ;;  %v2273_v11 = vmul.f32 %v2246_v5, %v2246_v5  ;;  %v2276_v12 = vand.u32 4294901760, %v2251_v6  ;;  %v2285_v14 = vld [vmem:[%s3481_s2 + $0x40] sm:$0xff]  ;;  %v2290_v15 = vmul.f32 %v2251_v6, %v2251_v6 }
   0x4   :  { %3567 = vst [vmem:[#allocation4_spill] sm:$0xff] %v2259_v8  ;;  %1853 = vmatprep.subr.mxu0 %v2238_v3  ;;  %3568 = vst [vmem:[#allocation5_spill] sm:$0xff] %v2268_v10  ;;  %v2280_v13 = vsub.f32 %v2225_v0, %v2238_v3  ;;  %v2293_v16 = vand.u32 4294901760, %v2259_v8  ;;  %v2297_v17 = vmul.f32 %v2259_v8, %v2259_v8  ;;  %v2306_v19 = vld [vmem:[%s3481_s2 + $0x38] sm:$0xff]  ;;  %v2313_v21 = vand.u32 4294901760, %v2268_v10  ;;  %v2337_v28 = vld [vmem:[%s3481_s2 + $0x30] sm:$0xff] }
   0x5   :  { %1854 = vmatpush3.msra.mxu0 %v2238_v3  ;;  %3569 = vst [vmem:[#allocation6_spill] sm:$0xff] %v2285_v14  ;;  %v2301_v18 = vsub.f32 %v2230_v1, %v2241_v4  ;;  %3570 = vst [vmem:[#allocation7_spill] sm:$0xff] %v2306_v19  ;;  %v1575_v22 = vmul.f32 %v2268_v10, %v2268_v10  ;;  %v2319_v23 = vsub.f32 %v2235_v2, %v2254_v7  ;;  %v2365_v37 = vld [vmem:[%s3481_s2 + $0x28] sm:$0xff]  ;;  %v2388_v46 = vld [vmem:[%s3481_s2 + $0x20] sm:$0xff] }
   0x6   :  { %1855 = vmatprep.subr.mxu0 %v2241_v4  ;;  %v2310_v20 = vand.u32 4294901760, %v2280_v13  ;;  %v2326_v25 = vand.u32 4294901760, %v2285_v14  ;;  %v1574_v26 = vmul.f32 %v2285_v14, %v2285_v14  ;;  %v2332_v27 = vsub.f32 %v2246_v5, %v2263_v9  ;;  %3573 = vst [vmem:[#allocation10_spill] sm:$0xff] %v2337_v28  ;;  %3576 = vst [vmem:[#allocation13_spill] sm:$0xff] %v2365_v37  ;;  %v2404_v51 = vld [vmem:[%s3481_s2 + $0x18] sm:$0xff]  ;;  %v2430_v60 = vld [vmem:[%s3481_s2 + $0x10] sm:$0xff] }
   0x7   :  { %1856 = vmatpush3.msra.mxu0 %v2241_v4  ;;  %v2323_v24 = vand.u32 4294901760, %v2301_v18  ;;  %v2343_v30 = vsel %vm1494_vm0, %v1575_v22, 0.0  ;;  %v2346_v31 = vand.u32 4294901760, %v2319_v23  ;;  %v2349_v32 = vand.u32 4294901760, %v2306_v19  ;;  %3578 = vst [vmem:[#allocation15_spill] sm:$0xff] %v2388_v46  ;;  %3581 = vst [vmem:[#allocation18_spill] sm:$0xff] %v2404_v51 }
   0x8   :  { %3571 = vst [vmem:[#allocation8_spill] sm:$0xff] %v2310_v20  ;;  %1857 = vmatprep.subr.mxu0 %v2254_v7  ;;  %v389_v29 = vsub.f32 %v2280_v13, %v2310_v20  ;;  %v2355_v34 = vsel %vm1494_vm0, %v1574_v26, 0.0  ;;  %v2358_v35 = vand.u32 4294901760, %v2332_v27  ;;  %v1573_v36 = vmul.f32 %v2306_v19, %v2306_v19  ;;  %3584 = vst [vmem:[#allocation21_spill] sm:$0xff] %v2430_v60 }
   0x9   :  { %3572 = vst [vmem:[#allocation9_spill] sm:$0xff] %v2323_v24  ;;  %1858 = vmatpush3.msra.mxu0 %v2254_v7  ;;  %3574 = vst [vmem:[#allocation11_spill] sm:$0xff] %v2346_v31  ;;  %v396_v33 = vsub.f32 %v2301_v18, %v2323_v24  ;;  %v403_v39 = vsub.f32 %v2319_v23, %v2346_v31  ;;  %v2372_v40 = vsub.f32 %v2251_v6, %v2276_v12  ;;  %v33_v24 = vld [vmem:[%s3482_s0 + $0x8] sm:$0xff] }
   0xa   :  { %1859 = vmatprep.subr.mxu0 %v2263_v9  ;;  %3575 = vst [vmem:[#allocation12_spill] sm:$0xff] %v2358_v35  ;;  %v390_v38 = vand.u32 4294901760, %v389_v29  ;;  %v2375_v41 = vand.u32 4294901760, %v2337_v28  ;;  %v410_v43 = vsub.f32 %v2332_v27, %v2358_v35  ;;  %v2381_v44 = vsel %vm1494_vm0, %v1573_v36, 0.0 }
   0xb   :  { %1860 = vmatpush3.msra.mxu0 %v2263_v9  ;;  %v397_v42 = vand.u32 4294901760, %v396_v33  ;;  %v1572_v45 = vmul.f32 %v2337_v28, %v2337_v28  ;;  %v404_v47 = vand.u32 4294901760, %v403_v39  ;;  %v2392_v48 = vand.u32 4294901760, %v2372_v40 }
   0xc   :  { %3577 = vst [vmem:[#allocation14_spill] sm:$0xff] %v2375_v41  ;;  %1861 = vmatprep.subr.mxu0 %v2276_v12  ;;  %1909 = vmatprep.subr.mxu1 %v390_v38  ;;  %v2396_v49 = vsub.f32 %v2259_v8, %v2293_v16  ;;  %v2399_v50 = vand.u32 4294901760, %v2365_v37  ;;  %v411_v52 = vand.u32 4294901760, %v410_v43  ;;  %v1571_v54 = vmul.f32 %v2365_v37, %v2365_v37 }
   0xd   :  { %1862 = vmatpush3.msra.mxu0 %v2276_v12  ;;  %3579 = vst [vmem:[#allocation16_spill] sm:$0xff] %v2392_v48  ;;  %1910 = vmatpush3.msra.mxu1 %v390_v38  ;;  %v2408_v53 = vsel %vm1494_vm0, %v1572_v45, 0.0  ;;  %v2414_v55 = vsub.f32 %v2268_v10, %v2313_v21  ;;  %v417_v56 = vsub.f32 %v2372_v40, %v2392_v48  ;;  %v2423_v58 = vand.u32 4294901760, %v2388_v46  ;;  %v2457_v38 = vld [vmem:[%s3481_s2 + $0x8] sm:$0xff] }
   0xe   :  { %3580 = vst [vmem:[#allocation17_spill] sm:$0xff] %v2399_v50  ;;  %1863 = vmatprep.subr.mxu0 %v2293_v16  ;;  %1911 = vmatprep.subr.mxu1 %v397_v42  ;;  %v2420_v57 = vand.u32 4294901760, %v2396_v49  ;;  %v1570_v59 = vmul.f32 %v2388_v46, %v2388_v46  ;;  %v2434_v61 = vsel %vm1494_vm0, %v1571_v54, 0.0  ;;  %v2441_v63 = vsub.f32 %v2285_v14, %v2326_v25 }
   0xf   :  { %1864 = vmatpush3.msra.mxu0 %v2293_v16  ;;  %3583 = vst [vmem:[#allocation20_spill] sm:$0xff] %v2423_v58  ;;  %1912 = vmatpush3.msra.mxu1 %v397_v42  ;;  %v2437_v62 = vand.u32 4294901760, %v2414_v55  ;;  %v2444_v22 = vand.u32 4294901760, %v2404_v51  ;;  %v418_v26 = vand.u32 4294901760, %v417_v56  ;;  %v1569_v36 = vmul.f32 %v2404_v51, %v2404_v51  ;;  %3587 = vst [vmem:[#allocation24_spill] sm:$0xff] %v2457_v38 }
  0x10   :  { %3582 = vst [vmem:[#allocation19_spill] sm:$0xff] %v2420_v57  ;;  %1865 = vmatprep.subr.mxu0 %v2313_v21  ;;  %1913 = vmatprep.subr.mxu1 %v404_v47  ;;  %v424_v29 = vsub.f32 %v2396_v49, %v2420_v57  ;;  %v2450_v33 = vsel %vm1494_vm0, %v1570_v59, 0.0  ;;  %v2463_v42 = vand.u32 4294901760, %v2441_v63  ;;  %v2467_v43 = vsub.f32 %v2306_v19, %v2349_v32 }
  0x11   :  { %3585 = vst [vmem:[#allocation22_spill] sm:$0xff] %v2437_v62  ;;  %3586 = vst [vmem:[#allocation23_spill] sm:$0xff] %v2444_v22  ;;  %1866 = vmatpush3.msra.mxu0 %v2313_v21  ;;  %1914 = vmatpush3.msra.mxu1 %v404_v47  ;;  %v431_v39 = vsub.f32 %v2414_v55, %v2437_v62  ;;  %v2470_v45 = vand.u32 4294901760, %v2430_v60  ;;  %v2474_v47 = vsel %vm1494_vm0, %v1569_v36, 0.0  ;;  %v2485_v62 = vld [vmem:[%s3481_s2] sm:$0xff]  ;;  %v2494_v48 = vand.u32 4294901760, %v2457_v38 }
  0x12   :  { %1867 = vmatprep.subr.mxu0 %v2326_v25  ;;  %3588 = vst [vmem:[#allocation25_spill] sm:$0xff] %v2463_v42  ;;  %1915 = vmatprep.subr.mxu1 %v411_v52  ;;  %v425_v54 = vand.u32 4294901760, %v424_v29  ;;  %v1568_v56 = vmul.f32 %v2430_v60, %v2430_v60  ;;  %v2480_v59 = vsub.f32 %v2337_v28, %v2375_v41  ;;  %v2491_v36 = vand.u32 4294901760, %v2467_v43 }
  0x13   :  { %3589 = vst [vmem:[#allocation26_spill] sm:$0xff] %v2470_v45  ;;  %1868 = vmatpush3.msra.mxu0 %v2326_v25  ;;  %1916 = vmatpush3.msra.mxu1 %v411_v52  ;;  %v432_v57 = vand.u32 4294901760, %v431_v39  ;;  %v438_v29 = vsub.f32 %v2441_v63, %v2463_v42  ;;  %3591 = vst [vmem:[#allocation28_spill] sm:$0xff] %v2494_v48  ;;  %v1567_v52 = vmul.f32 %v2457_v38, %v2457_v38  ;;  %v32_v42 = vld [vmem:[%s3482_s0] sm:$0xff] }
  0x14   :  { %1869 = vmatprep.subr.mxu0 %v2349_v32  ;;  %3590 = vst [vmem:[#allocation27_spill] sm:$0xff] %v2491_v36  ;;  %1917 = vmatprep.subr.mxu1 %v418_v26  ;;  %v1585_v35 = vsel %vm1494_vm0, %v1568_v56, 0.0  ;;  %v2499_v31 = vand.u32 4294901760, %v2480_v59  ;;  %v2505_v39 = vsub.f32 %v2365_v37, %v2399_v50  ;;  %v445_v20 = vsub.f32 %v2467_v43, %v2491_v36  ;;  %v34_v36 = vld [vmem:[%s3482_s0 + $0x10] sm:$0xff] }
  0x15   :  { %1870 = vmatpush3.msra.mxu0 %v2349_v32  ;;  %1918 = vmatpush3.msra.mxu1 %v418_v26  ;;  %v439_v56 = vand.u32 4294901760, %v438_v29  ;;  %v2517_v5 = vand.u32 4294901760, %v2485_v62  ;;  %v1566_v6 = vmul.f32 %v2485_v62, %v2485_v62  ;;  %v1583_v26 = vsel %vm1494_vm0, %v1567_v52, 0.0 }
  0x16   :  { %3592 = vst [vmem:[#allocation29_spill] sm:$0xff] %v2499_v31  ;;  %1871 = vmatprep.subr.mxu0 %v2375_v41  ;;  %1919 = vmatprep.subr.mxu1 %v425_v54  ;;  %v452_v8 = vsub.f32 %v2480_v59, %v2499_v31  ;;  %v2526_v10 = vand.u32 4294901760, %v2505_v39  ;;  %v2530_v29 = vsub.f32 %v2388_v46, %v2423_v58  ;;  %v446_v14 = vand.u32 4294901760, %v445_v20 }
  0x17   :  { %3593 = vst [vmem:[#allocation30_spill] sm:$0xff] %v2517_v5  ;;  %1872 = vmatpush3.msra.mxu0 %v2375_v41  ;;  %1920 = vmatpush3.msra.mxu1 %v425_v54  ;;  %v1582_v19 = vsel %vm1494_vm0, %v1566_v6, 0.0  ;;  %v2537_v31 = vand.u32 4294901760, %v32_v42  ;;  %v2539_v52 = vand.u32 4294901760, %v33_v24  ;;  %v2556_v54 = vsub.f32 %v2404_v51, %v2444_v22 }
  0x18   :  { %3594 = vst [vmem:[#allocation31_spill] sm:$0xff] %v2526_v10  ;;  %1873 = vmatprep.subr.mxu0 %v2399_v50  ;;  %1921 = vmatprep.subr.mxu1 %v432_v57  ;;  %v453_v28 = vand.u32 4294901760, %v452_v8  ;;  %v459_v37 = vsub.f32 %v2505_v39, %v2526_v10  ;;  %v1584_v46 = vadd.f32 %v1583_v26, %v1582_v19  ;;  %v2545_v41 = vand.u32 4294901760, %v2530_v29  ;;  %v35_v19 = vld [vmem:[%s3482_s0 + $0x18] sm:$0xff] }
  0x19   :  { %1874 = vmatpush3.msra.mxu0 %v2399_v50  ;;  %1922 = vmatpush3.msra.mxu1 %v432_v57  ;;  %v2549_v6 = vsub.f32 %v32_v42, %v2537_v31  ;;  %v2552_v20 = vsub.f32 %v33_v24, %v2539_v52  ;;  %v2558_v8 = vand.u32 4294901760, %v34_v36  ;;  %v2568_v24 = vsub.f32 %v2430_v60, %v2470_v45 }
  0x1a   :  { %3595 = vst [vmem:[#allocation32_spill] sm:$0xff] %v2545_v41  ;;  %1875 = vmatprep.subr.mxu0 %v2423_v58  ;;  %1923 = vmatprep.subr.mxu1 %v439_v56  ;;  %v460_v57 = vand.u32 4294901760, %v459_v37  ;;  %v1586_v26 = vadd.f32 %v1585_v35, %v1584_v46  ;;  %v466_v42 = vsub.f32 %v2530_v29, %v2545_v41  ;;  %v2574_v50 = vand.u32 4294901760, %v2556_v54  ;;  %v36_v35 = vld [vmem:[%s3482_s0 + $0x20] sm:$0xff] }
  0x1b   :  { %3596 = vst [vmem:[#allocation33_spill] sm:$0xff] %v2552_v20  ;;  %1876 = vmatpush3.msra.mxu0 %v2423_v58  ;;  %1924 = vmatpush3.msra.mxu1 %v439_v56  ;;  %v2577_v37 = vsub.f32 %v34_v36, %v2558_v8  ;;  %v2585_v10 = vand.u32 4294901760, %v2568_v24  ;;  %v2587_v51 = vand.u32 4294901760, %v35_v19  ;;  %v3600_v36 = vand.u32 4294901760, %v2549_v6 }
  0x1c   :  { %1877 = vmatprep.subr.mxu0 %v2444_v22  ;;  %3597 = vst [vmem:[#allocation34_spill] sm:$0xff] %v2574_v50  ;;  %1925 = vmatprep.subr.mxu1 %v446_v14  ;;  %v1588_v46 = vadd.f32 %v2474_v47, %v1586_v26  ;;  %v467_v56 = vand.u32 4294901760, %v466_v42  ;;  %v3601_v60 = vand.u32 4294901760, %v2552_v20  ;;  %v473_v47 = vsub.f32 %v2556_v54, %v2574_v50 }
  0x1d   :  { %3598 = vst [vmem:[#allocation35_spill] sm:$0xff] %v2577_v37  ;;  %1878 = vmatpush3.msra.mxu0 %v2444_v22  ;;  %3599 = vst [vmem:[#allocation36_spill] sm:$0xff] %v2585_v10  ;;  %1926 = vmatpush3.msra.mxu1 %v446_v14  ;;  %v228_v41 = vsub.f32 %v2549_v6, %v3600_v36  ;;  %v480_v42 = vsub.f32 %v2568_v24, %v2585_v10  ;;  %v2606_v36 = vand.u32 4294901760, %v36_v35 }
  0x1e   :  { %1879 = vmatprep.subr.mxu0 %v2470_v45  ;;  %v238_v58 = vsub.f32 %v2552_v20, %v3601_v60  ;;  %1927 = vmatprep.subr.mxu1 %v453_v28  ;;  %v1590_v14 = vadd.f32 %v2450_v33, %v1588_v46  ;;  %v2604_v22 = vsub.f32 %v35_v19, %v2587_v51  ;;  %v37_v60 = vld [vmem:[%s3482_s0 + $0x28] sm:$0xff]  ;;  %v3603_v33 = vand.u32 4294901760, %v2577_v37  ;;  %v38_v19 = vld [vmem:[%s3482_s0 + $0x30] sm:$0xff] }
  0x1f   :  { %1880 = vmatpush3.msra.mxu0 %v2470_v45  ;;  %1928 = vmatpush3.msra.mxu1 %v453_v28  ;;  %v229_v26 = vand.u32 4294901760, %v228_v41  ;;  %v474_v45 = vand.u32 4294901760, %v473_v47  ;;  %v481_v20 = vand.u32 4294901760, %v480_v42  ;;  %v2623_v41 = vsub.f32 %v2457_v38, %v2494_v48 }
  0x20   :  { %3602 = vst [vmem:[#allocation37_spill] sm:$0xff] %v2604_v22  ;;  %1881 = vmatprep.subr.mxu0 %v2494_v48  ;;  %v239_v50 = vand.u32 4294901760, %v238_v58  ;;  %v248_v46 = vsub.f32 %v2577_v37, %v3603_v33  ;;  %1929 = vmatprep.subr.mxu1 %v460_v57  ;;  %v1592_v10 = vadd.f32 %v2434_v61, %v1590_v14  ;;  %v3541_v28 = vand.u32 4294901760, %v2604_v22  ;;  %v39_v58 = vld [vmem:[%s3482_s0 + $0x38] sm:$0xff] }
  0x21   :  { %1882 = vmatpush3.msra.mxu0 %v2494_v48  ;;  %1930 = vmatpush3.msra.mxu1 %v460_v57  ;;  %v2631_v33 = vsub.f32 %v2485_v62, %v2517_v5  ;;  %v2634_v61 = vsub.f32 %v36_v35, %v2606_v36  ;;  %v2636_v14 = vand.u32 4294901760, %v37_v60  ;;  %v2646_v48 = vand.u32 4294901760, %v38_v19 }
  0x22   :  { %1883 = vmatprep.subr.mxu0 %v2517_v5  ;;  %v249_v47 = vand.u32 4294901760, %v248_v46  ;;  %v1594_v42 = vadd.f32 %v2408_v53, %v1592_v10  ;;  %1931 = vmatprep.subr.mxu1 %v467_v56  ;;  %v258_v57 = vsub.f32 %v2604_v22, %v3541_v28  ;;  %v2644_v46 = vand.u32 4294901760, %v2623_v41  ;;  %v40_v28 = vld [vmem:[%s3482_s0 + $0x40] sm:$0xff] }
  0x23   :  { %1884 = vmatpush3.msra.mxu0 %v2517_v5  ;;  %1885 = vmatprep.mubr.f32.mxu0 %v229_v26  ;;  %v2649_v35 = vand.u32 4294901760, %v2631_v33  ;;  %v3549_v37 = vand.u32 4294901760, %v2634_v61  ;;  %v2653_v10 = vsub.f32 %v37_v60, %v2636_v14  ;;  %v2655_v53 = vand.u32 4294901760, %v39_v58 }
  0x24   :  { %3604 = vst [vmem:[#allocation38_spill] sm:$0xff] %v2644_v46  ;;  %1932 = vmatpush3.msra.mxu1 %v467_v56  ;;  %v1596_v5 = vadd.f32 %v2381_v44, %v1594_v42  ;;  %1886 = vmatmul.mubr.f32.vlgmr.msra.gmra.mxu0 %v239_v50  ;;  %v259_v26 = vand.u32 4294901760, %v258_v57  ;;  %v487_v56 = vsub.f32 %v2623_v41, %v2644_v46 }
  0x25   :  { %3605 = vst [vmem:[#allocation39_spill] sm:$0xff] %v2649_v35  ;;  %1933 = vmatprep.subr.mxu1 %v474_v45  ;;  %v2664_v22 = vsub.f32 %v38_v19, %v2646_v48  ;;  %1965 = vmatprep.subr.mxu0 %v2280_v13  ;;  %v494_v60 = vsub.f32 %v2631_v33, %v2649_v35  ;;  %v3552_v44 = vand.u32 4294901760, %v2653_v10  ;;  %v41_v19 = vld [vmem:[%s3482_s0 + $0x48] sm:$0xff]  ;;  %v2682_v35 = vand.u32 4294901760, %v40_v28 }
  0x26   :  { %1934 = vmatpush3.msra.mxu1 %v474_v45  ;;  %v268_v38 = vsub.f32 %v2634_v61, %v3549_v37  ;;  %v2674_v50 = vsub.f32 %v39_v58, %v2655_v53  ;;  %v1598_v42 = vadd.f32 %v2355_v34, %v1596_v5  ;;  %1966 = vmatpush3.msra.mxu0 %v2280_v13  ;;  %v488_v45 = vand.u32 4294901760, %v487_v56  ;;  %v42_v13 = vld [vmem:[%s3482_s0 + $0x50] sm:$0xff] }
  0x27   :  { %1935 = vmatprep.subr.mxu1 %v481_v20  ;;  %v3553_v57 = vand.u32 4294901760, %v2664_v22  ;;  %v1601_v37 = vsel %vm1494_vm0, %v2297_v17, 0.0  ;;  %1967 = vmatprep.subr.mxu0 %v2301_v18  ;;  %v495_v58 = vand.u32 4294901760, %v494_v60  ;;  %v278_v46 = vsub.f32 %v2653_v10, %v3552_v44 }
  0x28   :  { %1888 = vmatprep.mubr.f32.mxu0 %v249_v47  ;;  %v3562_v5 = vand.u32 4294901760, %v2674_v50  ;;  %v1600_v34 = vadd.f32 %v2343_v30, %v1598_v42  ;;  %1936 = vmatpush3.msra.mxu1 %v481_v20  ;;  %v269_v17 = vand.u32 4294901760, %v268_v38  ;;  %v2697_v56 = vsub.f32 %v40_v28, %v2682_v35  ;;  %v43_v30 = vld [vmem:[%s3482_s0 + $0x58] sm:$0xff] }
  0x29   :  { %1968 = vmatpush3.msra.mxu0 %v2301_v18  ;;  %v2699_v47 = vand.u32 4294901760, %v41_v19  ;;  %v1579_v60 = vmul.f32 %v2235_v2, %v2235_v2  ;;  %v1603_v44 = vsel %vm1494_vm0, %v2290_v15, 0.0  ;;  %1937 = vmatprep.subr.mxu1 %v488_v45  ;;  %v288_v18 = vsub.f32 %v2664_v22, %v3553_v57 }
  0x2a   :  { %1889 = vmatmul.mubr.f32.gmra.mxu0 %v259_v26  ;;  %v1602_v20 = vadd.f32 %v1601_v37, %v1600_v34  ;;  %1969 = vmatprep.subr.mxu0 %v2319_v23  ;;  %v2715_v28 = vand.u32 4294901760, %v42_v13  ;;  %v1580_v15 = vmul.f32 %v2230_v1, %v2230_v1  ;;  %v1605_v26 = vsel %vm1494_vm0, %v2273_v11, 0.0 }
  0x2b   :  { %1938 = vmatpush3.msra.mxu1 %v488_v45  ;;  %v2713_v38 = vsub.f32 %v41_v19, %v2699_v47  ;;  %1970 = vmatpush3.msra.mxu0 %v2319_v23  ;;  %v279_v37 = vand.u32 4294901760, %v278_v46  ;;  %v298_v42 = vsub.f32 %v2674_v50, %v3562_v5  ;;  %v3561_v19 = vand.u32 4294901760, %v2697_v56  ;;  %v44_v23 = vld [vmem:[%s3482_s0 + $0x60] sm:$0xff]  ;;  %v3619_v5 = vld [vmem:[#allocation4_spill] sm:$0xff] }
  0x2c   :  { %1939 = vmatprep.subr.mxu1 %v495_v58  ;;  %v1604_v45 = vadd.f32 %v1603_v44, %v1602_v20  ;;  %1971 = vmatprep.subr.mxu0 %v2332_v27  ;;  %v2727_v34 = vand.u32 4294901760, %v43_v30  ;;  %v1581_v57 = vmul.f32 %v2225_v0, %v2225_v0  ;;  %v1607_v11 = vsel %vm1494_vm0, %v1579_v60, 0.0 }
  0x2d   :  { %1891 = vmatprep.mubr.f32.mxu0 %v269_v17  ;;  %1940 = vmatpush3.msra.mxu1 %v495_v58  ;;  %v289_v44 = vand.u32 4294901760, %v288_v18  ;;  %v3554_v17 = vand.u32 4294901760, %v2713_v38  ;;  %v2740_v20 = vsub.f32 %v42_v13, %v2715_v28  ;;  %v1609_v60 = vsel %vm1494_vm0, %v1580_v15, 0.0 }
  0x2e   :  { %1941 = vmatprep.mubr.f32.mxu1 %v2537_v31  ;;  %v1606_v46 = vadd.f32 %v1605_v26, %v1604_v45  ;;  %1972 = vmatpush3.msra.mxu0 %v2332_v27  ;;  %v299_v58 = vand.u32 4294901760, %v298_v42  ;;  %v45_v26 = vld [vmem:[%s3482_s0 + $0x68] sm:$0xff]  ;;  %v308_v27 = vsub.f32 %v2697_v56, %v3561_v19  ;;  %v2753_v13 = vsub.f32 %v43_v30, %v2727_v34  ;;  %v3618_v19 = vld [vmem:[#allocation5_spill] sm:$0xff] }
  0x2f   :  { %1942 = vmatmul.mubr.f32.vlgmr.msra.gmra.mxu1 %v2539_v52  ;;  %1892 = vmatmul.mubr.f32.gmra.mxu0 %v279_v37  ;;  %v2755_v18 = vand.u32 4294901760, %v44_v23  ;;  %v1611_v15 = vsel %vm1494_vm0, %v1581_v57, 0.0  ;;  %v3560_v42 = vand.u32 4294901760, %v2740_v20  ;;  %v2765_v30 = vand.u32 4294901760, %v45_v26  ;;  %v46_v57 = vld [vmem:[%s3482_s0 + $0x70] sm:$0xff] }
  0x30   :  { %1973 = vmatprep.subr.mxu0 %v2372_v40  ;;  %v1608_v45 = vadd.f32 %v1607_v11, %v1606_v46  ;;  %2021 = vmatprep.subr.mxu1 %v2238_v3  ;;  %v309_v46 = vand.u32 4294901760, %v308_v27 }
  0x31   :  { %1974 = vmatpush3.msra.mxu0 %v2372_v40  ;;  %3606 = vst [vmem:[#allocation40_spill] sm:$0xff] %v2755_v18  ;;  %2022 = vmatpush3.msra.mxu1 %v2238_v3  ;;  %v318_v40 = vsub.f32 %v2713_v38, %v3554_v17  ;;  %v2790_v27 = vsub.f32 %v45_v26, %v2765_v30 }
  0x32   :  { %1975 = vmatprep.subr.mxu0 %v2396_v49  ;;  %v1610_v37 = vadd.f32 %v1609_v60, %v1608_v45  ;;  %2023 = vmatprep.subr.mxu1 %v2241_v4  ;;  %v2775_v60 = vsub.f32 %v44_v23, %v2755_v18  ;;  %v2779_v45 = vand.u32 4294901760, %v46_v57  ;;  %v328_v23 = vsub.f32 %v2740_v20, %v3560_v42  ;;  %v3617_v42 = vld [vmem:[#allocation6_spill] sm:$0xff] }
  0x33   :  { %1894 = vmatprep.mubr.f32.mxu0 %v289_v44  ;;  %1944 = vmatprep.mubr.f32.mxu1 %v2558_v8  ;;  %v3555_v44 = vand.u32 4294901760, %v2753_v13 }
  0x34   :  { %1976 = vmatpush3.msra.mxu0 %v2396_v49  ;;  %v1612_v11 = vadd.f32 %v1611_v15, %v1610_v37  ;;  %2024 = vmatpush3.msra.mxu1 %v2241_v4  ;;  %v47_v49 = vld [vmem:[%s3482_s0 + $0x78] sm:$0xff] }
  0x35   :  { %1895 = vmatmul.mubr.f32.gmra.mxu0 %v299_v58  ;;  %1945 = vmatmul.mubr.f32.gmra.mxu1 %v2587_v51  ;;  %v319_v58 = vand.u32 4294901760, %v318_v40  ;;  %v3559_v40 = vand.u32 4294901760, %v2775_v60  ;;  %v2799_v17 = vand.u32 4294901760, %v47_v49 }
  0x36   :  { %1977 = vmatprep.subr.mxu0 %v2414_v55  ;;  %v1613_v15 = vrot.slane %v1612_v11, 4  ;;  %2025 = vmatprep.subr.mxu1 %v2254_v7 }
  0x37   :  { %1978 = vmatpush3.msra.mxu0 %v2414_v55  ;;  %2026 = vmatpush3.msra.mxu1 %v2254_v7  ;;  %v338_v55 = vsub.f32 %v2753_v13, %v3555_v44 }
  0x38   :  { %1979 = vmatprep.subr.mxu0 %v2441_v63  ;;  %v1614_v37 = vadd.f32 %v1613_v15, %v1612_v11  ;;  %2027 = vmatprep.subr.mxu1 %v2263_v9  ;;  %v329_v11 = vand.u32 4294901760, %v328_v23  ;;  %v3556_v15 = vand.u32 4294901760, %v2790_v27  ;;  %v2816_v23 = vsub.f32 %v47_v49, %v2799_v17 }
  0x39   :  { %1897 = vmatprep.mubr.f32.mxu0 %v309_v46  ;;  %1947 = vmatprep.mubr.f32.mxu1 %v2606_v36  ;;  %v2806_v46 = vsub.f32 %v46_v57, %v2779_v45 }
  0x3a   :  { %1980 = vmatpush3.msra.mxu0 %v2441_v63  ;;  %v1615_v26 = vrot.slane %v1614_v37, 2  ;;  %2028 = vmatpush3.msra.mxu1 %v2263_v9  ;;  %v339_v63 = vand.u32 4294901760, %v338_v55 }
  0x3b   :  { %1898 = vmatmul.mubr.f32.gmra.mxu0 %v319_v58  ;;  %1948 = vmatmul.mubr.f32.gmra.mxu1 %v2636_v14  ;;  %v348_v58 = vsub.f32 %v2775_v60, %v3559_v40  ;;  %v3616_v40 = vld [vmem:[#allocation7_spill] sm:$0xff] }
  0x3c   :  { %1981 = vmatprep.subr.mxu0 %v2467_v43  ;;  %v1616_v44 = vadd.f32 %v1615_v26, %v1614_v37  ;;  %2029 = vmatprep.subr.mxu1 %v2276_v12  ;;  %v3558_v37 = vand.u32 4294901760, %v2806_v46  ;;  %v3557_v26 = vand.u32 4294901760, %v2816_v23 }
  0x3d   :  { %1982 = vmatpush3.msra.mxu0 %v2467_v43  ;;  %2030 = vmatpush3.msra.mxu1 %v2276_v12  ;;  %v358_v43 = vsub.f32 %v2790_v27, %v3556_v15  ;;  %v349_v55 = vand.u32 4294901760, %v348_v58  ;;  %v3607_v58 = vld [vmem:[#allocation14_spill] sm:$0xff] }
  0x3e   :  { %1983 = vmatprep.subr.mxu0 %v2480_v59  ;;  %v1617_v57 = vrot.slane %v1616_v44, 1  ;;  %2031 = vmatprep.subr.mxu1 %v2293_v16 }
  0x3f   :  { %1900 = vmatprep.mubr.f32.mxu0 %v329_v11  ;;  %1950 = vmatprep.mubr.f32.mxu1 %v2646_v48  ;;  %v359_v15 = vand.u32 4294901760, %v358_v43 }
  0x40   :  { %1984 = vmatpush3.msra.mxu0 %v2480_v59  ;;  %v1618_v49 = vadd.f32 %v1617_v57, %v1616_v44  ;;  %2032 = vmatpush3.msra.mxu1 %v2293_v16  ;;  %v368_v59 = vsub.f32 %v2806_v46, %v3558_v37  ;;  %v378_v44 = vsub.f32 %v2816_v23, %v3557_v26  ;;  %v3610_v57 = vld [vmem:[#allocation24_spill] sm:$0xff]  ;;  %v3615_v26 = vld [vmem:[#allocation10_spill] sm:$0xff] }
  0x41   :  { %1901 = vmatmul.mubr.f32.gmra.mxu0 %v339_v63  ;;  %1951 = vmatmul.mubr.f32.gmra.mxu1 %v2655_v53 }
  0x42   :  { %1985 = vmatprep.subr.mxu0 %v2505_v39  ;;  %v1619_v11 = vmax.f32 %v1618_v49, 1e-24  ;;  %2033 = vmatprep.subr.mxu1 %v2313_v21  ;;  %v379_v63 = vand.u32 4294901760, %v378_v44  ;;  %v3611_v49 = vld [vmem:[#allocation21_spill] sm:$0xff] }
  0x43   :  { %1986 = vmatpush3.msra.mxu0 %v2505_v39  ;;  %2034 = vmatpush3.msra.mxu1 %v2313_v21  ;;  %v369_v39 = vand.u32 4294901760, %v368_v59  ;;  %v3613_v59 = vld [vmem:[#allocation15_spill] sm:$0xff] }
  0x44   :  { %1987 = vmatprep.subr.mxu0 %v2530_v29  ;;  %2192 = vrsqrt.f32 %v1619_v11  ;;  %2035 = vmatprep.subr.mxu1 %v2326_v25 }
  0x45   :  { %1903 = vmatprep.mubr.f32.mxu0 %v349_v55  ;;  %1953 = vmatprep.mubr.f32.mxu1 %v2682_v35 }
  0x46   :  { %1988 = vmatpush3.msra.mxu0 %v2530_v29  ;;  %2036 = vmatpush3.msra.mxu1 %v2326_v25  ;;  %v3608_v29 = vld [vmem:[#allocation17_spill] sm:$0xff] }
  0x47   :  { %1904 = vmatmul.mubr.f32.gmra.mxu0 %v359_v15  ;;  %1954 = vmatmul.mubr.f32.gmra.mxu1 %v2699_v47 }
  0x48   :  { %1989 = vmatprep.subr.mxu0 %v2556_v54  ;;  %2037 = vmatprep.subr.mxu1 %v2349_v32 }
  0x49   :  { %1990 = vmatpush3.msra.mxu0 %v2556_v54  ;;  %2038 = vmatpush3.msra.mxu1 %v2349_v32  ;;  %v3609_v54 = vld [vmem:[#allocation20_spill] sm:$0xff] }
  0x4a   :  { %1991 = vmatprep.subr.mxu0 %v2568_v24  ;;  %2039 = vmatprep.subr.mxu1 %v3607_v58 }
  0x4b   :  { %1906 = vmatprep.mubr.f32.mxu0 %v369_v39  ;;  %1956 = vmatprep.mubr.f32.mxu1 %v2715_v28  ;;  %v3614_v39 = vld [vmem:[#allocation13_spill] sm:$0xff] }
  0x4c   :  { %1992 = vmatpush3.msra.mxu0 %v2568_v24  ;;  %2040 = vmatpush3.msra.mxu1 %v3607_v58 }
  0x4d   :  { %1907 = vmatmul.mubr.f32.gmra.mxu0 %v379_v63  ;;  %1957 = vmatmul.mubr.f32.gmra.mxu1 %v2727_v34 }
  0x4e   :  { %1993 = vmatprep.subr.mxu0 %v2623_v41  ;;  %2041 = vmatprep.subr.mxu1 %v3608_v29 }
  0x4f   :  { %1994 = vmatpush3.msra.mxu0 %v2623_v41  ;;  %2042 = vmatpush3.msra.mxu1 %v3608_v29  ;;  %v3612_v41 = vld [vmem:[#allocation18_spill] sm:$0xff] }
  0x50   :  { %1995 = vmatprep.subr.mxu0 %v2631_v33  ;;  %2043 = vmatprep.subr.mxu1 %v3609_v54 }
  0x51   :  { %1959 = vmatprep.mubr.f32.mxu1 %v2755_v18  ;;  %v2193_v24 = vpop.eup %2192  ;;  %1996 = vmatpush3.msra.mxu0 %v2631_v33  ;;  %v3620_v18 = vld [vmem:[#allocation3_spill] sm:$0xff] }
  0x52   :  { %1997 = vmatprep.mubr.f32.mxu0 %v2549_v6  ;;  %v1621_v15 = vmul.f32 %v2193_v24, %v2485_v62  ;;  %v1622_v43 = vmul.f32 %v2193_v24, %v3610_v57  ;;  %v1623_v55 = vmul.f32 %v2193_v24, %v3611_v49  ;;  %v1624_v11 = vmul.f32 %v2193_v24, %v3612_v41 }
  0x53   :  { %2044 = vmatpush3.msra.mxu1 %v3609_v54  ;;  %v1625_v44 = vmul.f32 %v2193_v24, %v3613_v59  ;;  %v1626_v63 = vmul.f32 %v2193_v24, %v3614_v39  ;;  %v1627_v37 = vmul.f32 %v2193_v24, %v3615_v26  ;;  %v1628_v33 = vmul.f32 %v2193_v24, %v3616_v40  ;;  %v3632_v59 = vld [vmem:[#allocation12_spill] sm:$0xff] }
  0x54   :  { %1960 = vmatmul.mubr.f32.gmra.mxu1 %v2765_v30  ;;  %v1629_v62 = vmul.f32 %v2193_v24, %v3617_v42  ;;  %v1630_v57 = vmul.f32 %v2193_v24, %v3618_v19  ;;  %v1631_v49 = vmul.f32 %v2193_v24, %v3619_v5  ;;  %v1632_v41 = vmul.f32 %v2193_v24, %v3620_v18  ;;  %v3621_v5 = vld [vmem:[#allocation33_spill] sm:$0xff]  ;;  %v3622_v19 = vld [vmem:[#allocation2_spill] sm:$0xff] }
  0x55   :  { %1637 = vst.msk [vmem:[%s3483_s4] sm:$0xff] %vm1494_vm0, %v1621_v15  ;;  %1638 = vst.msk [vmem:[%s3483_s4 + $0x8] sm:$0xff] %vm1494_vm0, %v1622_v43  ;;  %1998 = vmatmul.mubr.f32.vlgmr.msra.gmra.mxu0 %v3621_v5  ;;  %v1633_v18 = vmul.f32 %v2193_v24, %v3622_v19  ;;  %v1634_v42 = vmul.f32 %v2193_v24, %v2235_v2  ;;  %v1635_v40 = vmul.f32 %v2193_v24, %v2230_v1  ;;  %v3624_v1 = vld [vmem:[#allocation8_spill] sm:$0xff]  ;;  %v3625_v2 = vld [vmem:[#allocation26_spill] sm:$0xff] }
  0x56   :  { %1639 = vst.msk [vmem:[%s3483_s4 + $0x10] sm:$0xff] %vm1494_vm0, %v1623_v55  ;;  %1640 = vst.msk [vmem:[%s3483_s4 + $0x18] sm:$0xff] %vm1494_vm0, %v1624_v11  ;;  %v1636_v26 = vmul.f32 %v2193_v24, %v2225_v0  ;;  %v3623_v0 = vld [vmem:[#allocation23_spill] sm:$0xff]  ;;  %2077 = vmatprep.subr.mxu0 %v3624_v1  ;;  %1962 = vmatprep.mubr.f32.mxu1 %v2779_v45  ;;  %v3628_v15 = vld [vmem:[#allocation37_spill] sm:$0xff]  ;;  %v3634_v39 = vand.u32 4294901760, %v3621_v5 }
  0x57   :  { %1641 = vst.msk [vmem:[%s3483_s4 + $0x20] sm:$0xff] %vm1494_vm0, %v1625_v44  ;;  %1642 = vst.msk [vmem:[%s3483_s4 + $0x28] sm:$0xff] %vm1494_vm0, %v1626_v63  ;;  %2045 = vmatprep.subr.mxu1 %v3623_v0  ;;  %2078 = vmatpush3.msra.mxu0 %v3624_v1  ;;  %v3627_v24 = vld [vmem:[#allocation35_spill] sm:$0xff]  ;;  %v3629_v43 = vld [vmem:[#allocation28_spill] sm:$0xff]  ;;  %v3633_v44 = vand.u32 4294901760, %v2549_v6 }
  0x58   :  { %1643 = vst.msk [vmem:[%s3483_s4 + $0x30] sm:$0xff] %vm1494_vm0, %v1627_v37  ;;  %1644 = vst.msk [vmem:[%s3483_s4 + $0x38] sm:$0xff] %vm1494_vm0, %v1628_v33  ;;  %2046 = vmatpush3.msra.mxu1 %v3623_v0  ;;  %v3626_v37 = vld [vmem:[#allocation9_spill] sm:$0xff]  ;;  %2000 = vmatprep.mubr.f32.mxu0 %v3627_v24  ;;  %v3630_v55 = vld [vmem:[#allocation11_spill] sm:$0xff]  ;;  %v3637_v6 = vand.u32 4294901760, %v3627_v24 }
  0x59   :  { %1645 = vst.msk [vmem:[%s3483_s4 + $0x40] sm:$0xff] %vm1494_vm0, %v1629_v62  ;;  %1646 = vst.msk [vmem:[%s3483_s4 + $0x48] sm:$0xff] %vm1494_vm0, %v1630_v57  ;;  %2047 = vmatprep.subr.mxu1 %v3625_v2  ;;  %2079 = vmatprep.subr.mxu0 %v3626_v37  ;;  %v3631_v11 = vld [vmem:[#allocation30_spill] sm:$0xff]  ;;  %v3635_v63 = vld [vmem:[#allocation16_spill] sm:$0xff]  ;;  %v3638_v62 = vand.u32 4294901760, %v3628_v15 }
  0x5a   :  { %1647 = vst.msk [vmem:[%s3483_s4 + $0x50] sm:$0xff] %vm1494_vm0, %v1631_v49  ;;  %1648 = vst.msk [vmem:[%s3483_s4 + $0x58] sm:$0xff] %vm1494_vm0, %v1632_v41  ;;  %2048 = vmatpush3.msra.mxu1 %v3625_v2  ;;  %2080 = vmatpush3.msra.mxu0 %v3626_v37  ;;  %v3636_v33 = vld [vmem:[#allocation19_spill] sm:$0xff]  ;;  %v3639_v57 = vld [vmem:[#allocation22_spill] sm:$0xff]  ;;  %v3642_v49 = vand.u32 4294901760, %v2653_v10 }
  0x5b   :  { %1649 = vst.msk [vmem:[%s3483_s4 + $0x60] sm:$0xff] %vm1494_vm0, %v1633_v18  ;;  %1650 = vst.msk [vmem:[%s3483_s4 + $0x68] sm:$0xff] %vm1494_vm0, %v1634_v42  ;;  %1963 = vmatmul.mubr.f32.gmra.mxu1 %v2799_v17  ;;  %2001 = vmatmul.mubr.f32.gmra.mxu0 %v3628_v15  ;;  %v3643_v41 = vld [vmem:[#allocation27_spill] sm:$0xff]  ;;  %v62_v5 = vld [vmem:[%s3484_s1 + $0x70] sm:$0xff] }
  0x5c   :  { %1651 = vst.msk [vmem:[%s3483_s4 + $0x70] sm:$0xff] %vm1494_vm0, %v1635_v40  ;;  %1652 = vst.msk [vmem:[%s3483_s4 + $0x78] sm:$0xff] %vm1494_vm0, %v1636_v26  ;;  %2049 = vmatprep.subr.mxu1 %v3629_v43  ;;  %2081 = vmatprep.subr.mxu0 %v3630_v55 }
  0x5d   :  { %2050 = vmatpush3.msra.mxu1 %v3629_v43  ;;  %2082 = vmatpush3.msra.mxu0 %v3630_v55 }
  0x5e   :  { %2051 = vmatprep.subr.mxu1 %v3631_v11  ;;  %2083 = vmatprep.subr.mxu0 %v3632_v59 }
  0x5f   :  { %2003 = vmatprep.mubr.f32.mxu0 %v2634_v61  ;;  %2052 = vmatpush3.msra.mxu1 %v3631_v11 }
  0x60   :  { %2053 = vmatprep.mubr.f32.mxu1 %v3633_v44  ;;  %2084 = vmatpush3.msra.mxu0 %v3632_v59 }
  0x61   :  { %2054 = vmatmul.mubr.f32.vlgmr.msra.gmra.mxu1 %v3634_v39  ;;  %2004 = vmatmul.mubr.f32.gmra.mxu0 %v2653_v10  ;;  %v3647_v10 = vld [vmem:[#allocation31_spill] sm:$0xff] }
  0x62   :  { %2085 = vmatprep.subr.mxu0 %v3635_v63  ;;  %2133 = vmatprep.subr.mxu1 %v2238_v3 }
  0x63   :  { %2086 = vmatpush3.msra.mxu0 %v3635_v63  ;;  %2134 = vmatpush3.msra.mxu1 %v2238_v3  ;;  %v3640_v3 = vld [vmem:[#allocation25_spill] sm:$0xff] }
  0x64   :  { %2087 = vmatprep.subr.mxu0 %v3636_v33  ;;  %2135 = vmatprep.subr.mxu1 %v2241_v4 }
  0x65   :  { %2006 = vmatprep.mubr.f32.mxu0 %v2664_v22  ;;  %2056 = vmatprep.mubr.f32.mxu1 %v3637_v6 }
  0x66   :  { %2088 = vmatpush3.msra.mxu0 %v3636_v33  ;;  %2136 = vmatpush3.msra.mxu1 %v2241_v4  ;;  %v3641_v4 = vand.u32 4294901760, %v2634_v61  ;;  %v3646_v61 = vand.u32 4294901760, %v2674_v50 }
  0x67   :  { %2007 = vmatmul.mubr.f32.gmra.mxu0 %v2674_v50  ;;  %2057 = vmatmul.mubr.f32.gmra.mxu1 %v3638_v62  ;;  %v3651_v50 = vld [vmem:[#allocation34_spill] sm:$0xff] }
  0x68   :  { %2089 = vmatprep.subr.mxu0 %v3639_v57  ;;  %2137 = vmatprep.subr.mxu1 %v2254_v7 }
  0x69   :  { %2090 = vmatpush3.msra.mxu0 %v3639_v57  ;;  %2138 = vmatpush3.msra.mxu1 %v2254_v7  ;;  %v3644_v7 = vld [vmem:[#allocation29_spill] sm:$0xff] }
  0x6a   :  { %2091 = vmatprep.subr.mxu0 %v3640_v3  ;;  %2139 = vmatprep.subr.mxu1 %v2263_v9 }
  0x6b   :  { %2009 = vmatprep.mubr.f32.mxu0 %v2697_v56  ;;  %2059 = vmatprep.mubr.f32.mxu1 %v3641_v4 }
  0x6c   :  { %2092 = vmatpush3.msra.mxu0 %v3640_v3  ;;  %2140 = vmatpush3.msra.mxu1 %v2263_v9  ;;  %v3645_v9 = vand.u32 4294901760, %v2664_v22  ;;  %v3650_v22 = vand.u32 4294901760, %v2713_v38 }
  0x6d   :  { %2010 = vmatmul.mubr.f32.gmra.mxu0 %v2713_v38  ;;  %2060 = vmatmul.mubr.f32.gmra.mxu1 %v3642_v49  ;;  %v3655_v38 = vld [vmem:[#allocation38_spill] sm:$0xff] }
  0x6e   :  { %2093 = vmatprep.subr.mxu0 %v3643_v41  ;;  %2141 = vmatprep.subr.mxu1 %v2276_v12 }
  0x6f   :  { %2094 = vmatpush3.msra.mxu0 %v3643_v41  ;;  %2142 = vmatpush3.msra.mxu1 %v2276_v12  ;;  %v3648_v12 = vld [vmem:[#allocation32_spill] sm:$0xff] }
  0x70   :  { %2095 = vmatprep.subr.mxu0 %v3644_v7  ;;  %2143 = vmatprep.subr.mxu1 %v2293_v16 }
  0x71   :  { %2012 = vmatprep.mubr.f32.mxu0 %v2740_v20  ;;  %2062 = vmatprep.mubr.f32.mxu1 %v3645_v9 }
  0x72   :  { %2096 = vmatpush3.msra.mxu0 %v3644_v7  ;;  %2144 = vmatpush3.msra.mxu1 %v2293_v16  ;;  %v3649_v16 = vand.u32 4294901760, %v2697_v56  ;;  %v3654_v56 = vand.u32 4294901760, %v2753_v13 }
  0x73   :  { %2013 = vmatmul.mubr.f32.gmra.mxu0 %v2753_v13  ;;  %2063 = vmatmul.mubr.f32.gmra.mxu1 %v3646_v61  ;;  %v3658_v13 = vand.u32 4294901760, %v2790_v27 }
  0x74   :  { %2097 = vmatprep.subr.mxu0 %v3647_v10  ;;  %2145 = vmatprep.subr.mxu1 %v2313_v21 }
  0x75   :  { %2098 = vmatpush3.msra.mxu0 %v3647_v10  ;;  %2146 = vmatpush3.msra.mxu1 %v2313_v21  ;;  %v3652_v21 = vld [vmem:[#allocation36_spill] sm:$0xff] }
  0x76   :  { %2099 = vmatprep.subr.mxu0 %v3648_v12  ;;  %2147 = vmatprep.subr.mxu1 %v2326_v25 }
  0x77   :  { %2015 = vmatprep.mubr.f32.mxu0 %v2775_v60  ;;  %2065 = vmatprep.mubr.f32.mxu1 %v3649_v16 }
  0x78   :  { %2100 = vmatpush3.msra.mxu0 %v3648_v12  ;;  %2148 = vmatpush3.msra.mxu1 %v2326_v25  ;;  %v3653_v25 = vand.u32 4294901760, %v2740_v20  ;;  %v3657_v20 = vand.u32 4294901760, %v2775_v60  ;;  %v3660_v60 = vand.u32 4294901760, %v2816_v23 }
  0x79   :  { %2016 = vmatmul.mubr.f32.gmra.mxu0 %v2790_v27  ;;  %2066 = vmatmul.mubr.f32.gmra.mxu1 %v3650_v22  ;;  %v2196_v27 = vmov 0  }
  0x7a   :  { %2101 = vmatprep.subr.mxu0 %v3651_v50  ;;  %2149 = vmatprep.subr.mxu1 %v2349_v32 }
  0x7b   :  { %2102 = vmatpush3.msra.mxu0 %v3651_v50  ;;  %2150 = vmatpush3.msra.mxu1 %v2349_v32  ;;  %v3656_v32 = vld [vmem:[#allocation39_spill] sm:$0xff] }
  0x7c   :  { %2103 = vmatprep.subr.mxu0 %v3652_v21  ;;  %2151 = vmatprep.subr.mxu1 %v3607_v58 }
  0x7d   :  { %2018 = vmatprep.mubr.f32.mxu0 %v2806_v46  ;;  %2068 = vmatprep.mubr.f32.mxu1 %v3653_v25 }
  0x7e   :  { %2104 = vmatpush3.msra.mxu0 %v3652_v21  ;;  %2152 = vmatpush3.msra.mxu1 %v3607_v58  ;;  %v3659_v58 = vand.u32 4294901760, %v2806_v46  ;;  %v48_v46 = vld [vmem:[%s3484_s1] sm:$0xff] }
  0x7f   :  { %2019 = vmatmul.mubr.f32.gmra.mxu0 %v2816_v23  ;;  %2069 = vmatmul.mubr.f32.gmra.mxu1 %v3654_v56  ;;  %v50_v23 = vld [vmem:[%s3484_s1 + $0x10] sm:$0xff] }
  0x80   :  { %2105 = vmatprep.subr.mxu0 %v3655_v38  ;;  %2153 = vmatprep.subr.mxu1 %v3608_v29 }
  0x81   :  { %2106 = vmatpush3.msra.mxu0 %v3655_v38  ;;  %2154 = vmatpush3.msra.mxu1 %v3608_v29  ;;  %v49_v29 = vld [vmem:[%s3484_s1 + $0x8] sm:$0xff] }
  0x82   :  { %2107 = vmatprep.subr.mxu0 %v3656_v32  ;;  %2155 = vmatprep.subr.mxu1 %v3609_v54 }
  0x83   :  { %2071 = vmatprep.mubr.f32.mxu1 %v3657_v20  ;;  %2108 = vmatpush3.msra.mxu0 %v3656_v32 }
  0x84   :  { %2109 = vmatprep.mubr.f32.mxu0 %v2537_v31  ;;  %2156 = vmatpush3.msra.mxu1 %v3609_v54  ;;  %v3661_v54 = vld [vmem:[#allocation40_spill] sm:$0xff] }
  0x85   :  { %2110 = vmatmul.mubr.f32.vlgmr.msra.gmra.mxu0 %v2539_v52  ;;  %2072 = vmatmul.mubr.f32.gmra.mxu1 %v3658_v13 }
  0x86   :  { %2157 = vmatprep.subr.mxu1 %v3623_v0  ;;  %2074 = vmatprep.mubr.f32.mxu1 %v3659_v58 }
  0x87   :  { %2158 = vmatpush3.msra.mxu1 %v3623_v0  ;;  %2112 = vmatprep.mubr.f32.mxu0 %v2558_v8 }
  0x88   :  { %2159 = vmatprep.subr.mxu1 %v3625_v2  ;;  %2190 = vset.pattern.permute.xlu0 %v2196_v27 }
  0x89   :  { %2160 = vmatpush3.msra.mxu1 %v3625_v2  ;;  %2113 = vmatmul.mubr.f32.gmra.mxu0 %v2587_v51 }
  0x8a   :  { %2075 = vmatmul.mubr.f32.gmra.mxu1 %v3660_v60  ;;  %2161 = vmatprep.subr.mxu1 %v3629_v43 }
  0x8b   :  { %2162 = vmatpush3.msra.mxu1 %v3629_v43  ;;  %2115 = vmatprep.mubr.f32.mxu0 %v2606_v36 }
  0x8c   :  { %2163 = vmatprep.subr.mxu1 %v3631_v11  ;;  %2165 = vmatprep.mubr.f32.mxu1 %v2537_v31  ;;  %v51_v31 = vld [vmem:[%s3484_s1 + $0x18] sm:$0xff] }
  0x8d   :  { %2164 = vmatpush3.msra.mxu1 %v3631_v11  ;;  %66 = vperm.xlu0 %2190, %v48_v46  }
  0x8e   :  { %2116 = vmatmul.mubr.f32.gmra.mxu0 %v2636_v14  ;;  %2166 = vmatmul.mubr.f32.vlgmr.msra.gmra.mxu1 %v2539_v52  ;;  %v52_v52 = vld [vmem:[%s3484_s1 + $0x20] sm:$0xff] }
  0x8f   :  { %2191 = vset.pattern.permute.xlu1 %v2196_v27  ;;  %2118 = vmatprep.mubr.f32.mxu0 %v2646_v48 }
  0x90   :  { %2168 = vmatprep.mubr.f32.mxu1 %v2558_v8  ;;  %76 = vperm.xlu1 %2191, %v50_v23   ;;  %v53_v8 = vld [vmem:[%s3484_s1 + $0x28] sm:$0xff] }
  0x91   :  { %71 = vperm.xlu0 %2190, %v49_v29  }
  0x92   :  { %2119 = vmatmul.mubr.f32.gmra.mxu0 %v2655_v53  ;;  %2169 = vmatmul.mubr.f32.gmra.mxu1 %v2587_v51  ;;  %v54_v51 = vld [vmem:[%s3484_s1 + $0x30] sm:$0xff] }
  0x93   :  { %2121 = vmatprep.mubr.f32.mxu0 %v2682_v35  ;;  %2171 = vmatprep.mubr.f32.mxu1 %v2606_v36  ;;  %v55_v36 = vld [vmem:[%s3484_s1 + $0x38] sm:$0xff] }
  0x94   :  { %81 = vperm.xlu1 %2191, %v51_v31  }
  0x95   :  { %86 = vperm.xlu0 %2190, %v52_v52  }
  0x96   :  { %2122 = vmatmul.mubr.f32.gmra.mxu0 %v2699_v47  ;;  %2172 = vmatmul.mubr.f32.gmra.mxu1 %v2636_v14  ;;  %v56_v14 = vld [vmem:[%s3484_s1 + $0x40] sm:$0xff] }
  0x97   :  { %2124 = vmatprep.mubr.f32.mxu0 %v2715_v28  ;;  %2174 = vmatprep.mubr.f32.mxu1 %v2646_v48  ;;  %v57_v48 = vld [vmem:[%s3484_s1 + $0x48] sm:$0xff] }
  0x98   :  { %91 = vperm.xlu1 %2191, %v53_v8  }
  0x99   :  { %96 = vperm.xlu0 %2190, %v54_v51  }
  0x9a   :  { %2125 = vmatmul.mubr.f32.gmra.mxu0 %v2727_v34  ;;  %2175 = vmatmul.mubr.f32.gmra.mxu1 %v2655_v53  ;;  %v58_v53 = vld [vmem:[%s3484_s1 + $0x50] sm:$0xff] }
  0x9b   :  { %2127 = vmatprep.mubr.f32.mxu0 %v3661_v54  ;;  %2177 = vmatprep.mubr.f32.mxu1 %v2682_v35  ;;  %v59_v35 = vld [vmem:[%s3484_s1 + $0x58] sm:$0xff] }
  0x9c   :  { %101 = vperm.xlu1 %2191, %v55_v36  }
  0x9d   :  { %106 = vperm.xlu0 %2190, %v56_v14  }
  0x9e   :  { %2128 = vmatmul.mubr.f32.gmra.mxu0 %v2765_v30  ;;  %2178 = vmatmul.mubr.f32.gmra.mxu1 %v2699_v47  ;;  %v60_v47 = vld [vmem:[%s3484_s1 + $0x60] sm:$0xff] }
  0x9f   :  { %2130 = vmatprep.mubr.f32.mxu0 %v2779_v45  ;;  %2180 = vmatprep.mubr.f32.mxu1 %v2715_v28  ;;  %v61_v28 = vld [vmem:[%s3484_s1 + $0x68] sm:$0xff] }
  0xa0   :  { %111 = vperm.xlu1 %2191, %v57_v48  }
  0xa1   :  { %116 = vperm.xlu0 %2190, %v58_v53  }
  0xa2   :  { %2131 = vmatmul.mubr.f32.gmra.mxu0 %v2799_v17  ;;  %2181 = vmatmul.mubr.f32.gmra.mxu1 %v2727_v34  ;;  %v63_v34 = vld [vmem:[%s3484_s1 + $0x78] sm:$0xff] }
  0xa3   :  { %2183 = vmatprep.mubr.f32.mxu1 %v3661_v54 }
  0xa4   :  { %121 = vperm.xlu1 %2191, %v59_v35  }
  0xa5   :  { %126 = vperm.xlu0 %2190, %v60_v47  }
  0xa6   :  { %2184 = vmatmul.mubr.f32.gmra.mxu1 %v2765_v30 }
  0xa7   :  { %2186 = vmatprep.mubr.f32.mxu1 %v2779_v45 }
  0xa8   :  { %131 = vperm.xlu1 %2191, %v61_v28  }
  0xa9   :  { %136 = vperm.xlu0 %2190, %v62_v5  }
  0xaa   :  { %2187 = vmatmul.mubr.f32.gmra.mxu1 %v2799_v17 }
  0xac   :  { %141 = vperm.xlu1 %2191, %v63_v34  }
  0xe4   :  { %v3148_v19 = vpop.f32.mrf.mxu0 }
  0xe6   :  { %v3150_v18 = vpop.f32.mrf.mxu0 }
  0xea   :  { %v3152_v30 = vpop.f32.mrf.mxu0 }
  0xec   :  { %v3154_v42 = vpop.f32.mrf.mxu0 }
  0xef   :  { %v3156_v40 = vpop.f32.mrf.mxu1  ;;  %v3158_v45 = vpop.f32.mrf.mxu0 }
  0xf1   :  { %v3160_v26 = vpop.f32.mrf.mxu0  ;;  %v3162_v0 = vpop.f32.mrf.mxu1 }
  0xf5   :  { %v3164_v1 = vpop.f32.mrf.mxu0  ;;  %v3166_v17 = vpop.f32.mrf.mxu1 }
  0xf7   :  { %v3168_v2 = vpop.f32.mrf.mxu0  ;;  %v3170_v37 = vpop.f32.mrf.mxu1 }
  0xfb   :  { %v3172_v24 = vpop.f32.mrf.mxu0  ;;  %v3174_v15 = vpop.f32.mrf.mxu1 }
  0xfd   :  { %v3176_v43 = vpop.f32.mrf.mxu0  ;;  %v3178_v55 = vpop.f32.mrf.mxu1 }
 0x101   :  { %v3180_v11 = vpop.f32.mrf.mxu0  ;;  %v3182_v59 = vpop.f32.mrf.mxu1 }
 0x103   :  { %v3184_v44 = vpop.f32.mrf.mxu0  ;;  %v3186_v39 = vpop.f32.mrf.mxu1 }
 0x107   :  { %v3188_v63 = vpop.f32.mrf.mxu0  ;;  %v3190_v33 = vpop.f32.mrf.mxu1 }
 0x108   :  { %v67_v21 = vpop.permute.xlu0 %66 }
 0x109   :  { %v3192_v6 = vpop.f32.mrf.mxu0  ;;  %v3194_v62 = vpop.f32.mrf.mxu1 }
 0x10b   :  { %v77_v16 = vpop.permute.xlu1 %76 }
 0x10c   :  { %v72_v13 = vpop.permute.xlu0 %71 }
 0x10d   :  { %v3196_v57 = vpop.f32.mrf.mxu0  ;;  %v3198_v3 = vpop.f32.mrf.mxu1 }
 0x10f   :  { %v3200_v4 = vpop.f32.mrf.mxu1  ;;  %v3202_v49 = vpop.f32.mrf.mxu0 }
 0x110   :  { %v82_v38 = vpop.permute.xlu1 %81  ;;  %v87_v27 = vpop.permute.xlu0 %86 }
 0x114   :  { %v3204_v41 = vpop.f32.mrf.mxu1  ;;  %v92_v23 = vpop.permute.xlu1 %91 }
 0x115   :  { %v1999_v7 = vpop.f32.mrf.mxu0  ;;  %v97_v8 = vpop.permute.xlu0 %96 }
 0x116   :  { %v3206_v9 = vpop.f32.mrf.mxu1 }
 0x117   :  { %v3208_v61 = vpop.f32.mrf.mxu0 }
 0x118   :  { %v102_v36 = vpop.permute.xlu1 %101 }
 0x119   :  { %v107_v53 = vpop.permute.xlu0 %106 }
 0x11b   :  { %v3210_v10 = vpop.f32.mrf.mxu1  ;;  %v3212_v12 = vpop.f32.mrf.mxu0 }
 0x11c   :  { %3662 = vst [vmem:[#allocation14_spill] sm:$0xff] %v3210_v10  ;;  %v112_v47 = vpop.permute.xlu1 %111 }
 0x11d   :  { %v3214_v22 = vpop.f32.mrf.mxu1  ;;  %v3216_v50 = vpop.f32.mrf.mxu0 }
 0x121   :  { %v3218_v25 = vpop.f32.mrf.mxu1  ;;  %v3220_v56 = vpop.f32.mrf.mxu0 }
 0x123   :  { %v3222_v32 = vpop.f32.mrf.mxu0  ;;  %v3224_v20 = vpop.f32.mrf.mxu1 }
 0x127   :  { %v3226_v58 = vpop.f32.mrf.mxu0  ;;  %v3228_v60 = vpop.f32.mrf.mxu1 }
 0x128   :  { %3663 = vst [vmem:[#allocation17_spill] sm:$0xff] %v3228_v60  ;;  %v292_v60 = vadd.f32 %v3168_v2, %v97_v8  ;;  %v3684_v8 = vld [vmem:[#allocation14_spill] sm:$0xff] }
 0x129   :  { %v3230_v46 = vpop.f32.mrf.mxu0  ;;  %v3232_v29 = vpop.f32.mrf.mxu1 }
 0x12a   :  { %3664 = vst [vmem:[#allocation20_spill] sm:$0xff] %v3230_v46  ;;  %3665 = vst [vmem:[#allocation24_spill] sm:$0xff] %v3232_v29 }
 0x12d   :  { %v3234_v31 = vpop.f32.mrf.mxu0  ;;  %v3236_v52 = vpop.f32.mrf.mxu1 }
 0x12e   :  { %3666 = vst [vmem:[#allocation21_spill] sm:$0xff] %v3234_v31  ;;  %3667 = vst [vmem:[#allocation18_spill] sm:$0xff] %v3236_v52  ;;  %v117_v52 = vpop.permute.xlu0 %116 }
 0x12f   :  { %v3238_v51 = vpop.f32.mrf.mxu0  ;;  %v3240_v54 = vpop.f32.mrf.mxu1 }
 0x130   :  { %3668 = vst [vmem:[#allocation15_spill] sm:$0xff] %v3238_v51  ;;  %3669 = vst [vmem:[#allocation13_spill] sm:$0xff] %v3240_v54  ;;  %v122_v51 = vpop.permute.xlu1 %121 }
 0x131   :  { %v342_v2 = vadd.f32 %v3180_v11, %v122_v51  ;;  %v3685_v51 = vld [vmem:[#allocation24_spill] sm:$0xff] }
 0x133   :  { %v3242_v14 = vpop.f32.mrf.mxu0  ;;  %v3244_v48 = vpop.f32.mrf.mxu1 }
 0x134   :  { %3670 = vst [vmem:[#allocation10_spill] sm:$0xff] %v3242_v14  ;;  %3671 = vst [vmem:[#allocation7_spill] sm:$0xff] %v3244_v48  ;;  %v242_v48 = vadd.f32 %v3148_v19, %v72_v13  ;;  %v302_v19 = vadd.f32 %v3164_v1, %v102_v36 }
 0x135   :  { %v3246_v35 = vpop.f32.mrf.mxu0  ;;  %v3248_v28 = vpop.f32.mrf.mxu1 }
 0x136   :  { %3672 = vst [vmem:[#allocation6_spill] sm:$0xff] %v3246_v35  ;;  %3673 = vst [vmem:[#allocation5_spill] sm:$0xff] %v3248_v28  ;;  %v127_v35 = vpop.permute.xlu0 %126  ;;  %v132_v28 = vpop.permute.xlu1 %131 }
 0x139   :  { %v3250_v5 = vpop.f32.mrf.mxu0  ;;  %v3252_v34 = vpop.f32.mrf.mxu1 }
 0x13a   :  { %3674 = vst [vmem:[#allocation4_spill] sm:$0xff] %v3250_v5  ;;  %3675 = vst [vmem:[#allocation3_spill] sm:$0xff] %v3252_v34  ;;  %v262_v34 = vadd.f32 %v3152_v30, %v82_v38  ;;  %v232_v5 = vadd.f32 %v3150_v18, %v67_v21  ;;  %v569_v21 = vadd.f32 %v3186_v39, %v292_v60 }
 0x13b   :  { %v3254_v31 = vpop.f32.mrf.mxu0  ;;  %v3256_v29 = vpop.f32.mrf.mxu1 }
 0x13c   :  { %3676 = vst [vmem:[#allocation33_spill] sm:$0xff] %v3254_v31  ;;  %3677 = vst [vmem:[#allocation2_spill] sm:$0xff] %v3256_v29  ;;  %v282_v31 = vadd.f32 %v3158_v45, %v92_v23  ;;  %v252_v29 = vadd.f32 %v3154_v42, %v77_v16  ;;  %v551_v18 = vadd.f32 %v3166_v17, %v262_v34  ;;  %v137_v16 = vpop.permute.xlu0 %136 }
 0x13d   :  { %v575_v17 = vadd.f32 %v3182_v59, %v302_v19  ;;  %v3691_v19 = vld [vmem:[#allocation7_spill] sm:$0xff] }
 0x13e   :  { %v545_v45 = vadd.f32 %v3170_v37, %v252_v29  ;;  %v563_v1 = vadd.f32 %v3174_v15, %v282_v31  ;;  %v332_v37 = vadd.f32 %v3184_v44, %v117_v52  ;;  %v748_v11 = vadd.f32 %v3212_v12, %v551_v18  ;;  %v3682_v29 = vld [vmem:[#allocation17_spill] sm:$0xff]  ;;  %v3683_v31 = vld [vmem:[#allocation20_spill] sm:$0xff]  ;;  %v3692_v18 = vld [vmem:[#allocation6_spill] sm:$0xff] }
 0x13f   :  { %v3258_v54 = vpop.f32.mrf.mxu0  ;;  %v3260_v14 = vpop.f32.mrf.mxu1  ;;  %v372_v44 = vadd.f32 %v3202_v49, %v137_v16 }
 0x140   :  { %3678 = vst [vmem:[#allocation23_spill] sm:$0xff] %v3258_v54  ;;  %3679 = vst [vmem:[#allocation8_spill] sm:$0xff] %v3260_v14  ;;  %v539_v54 = vadd.f32 %v3156_v40, %v242_v48  ;;  %v272_v14 = vadd.f32 %v3160_v26, %v87_v27  ;;  %v593_v23 = vadd.f32 %v3200_v4, %v332_v37 }
 0x141   :  { %v3263_v10 = vpop.f32.mrf.mxu0  ;;  %v3265_v46 = vpop.f32.mrf.mxu1  ;;  %v617_v4 = vadd.f32 %v3214_v22, %v372_v44  ;;  %v3695_v37 = vld [vmem:[#allocation3_spill] sm:$0xff] }
 0x142   :  { %3680 = vst [vmem:[#allocation26_spill] sm:$0xff] %v3263_v10  ;;  %3681 = vst [vmem:[#allocation9_spill] sm:$0xff] %v3265_v46  ;;  %v533_v10 = vadd.f32 %v3162_v0, %v232_v5  ;;  %v322_v46 = vadd.f32 %v3172_v24, %v112_v47  ;;  %v557_v42 = vadd.f32 %v3178_v55, %v272_v14  ;;  %v142_v24 = vpop.permute.xlu1 %141  ;;  %v3687_v14 = vld [vmem:[#allocation18_spill] sm:$0xff] }
 0x143   :  { %v734_v40 = vadd.f32 %v1999_v7, %v539_v54  ;;  %v312_v0 = vadd.f32 %v3176_v43, %v107_v53  ;;  %v362_v55 = vadd.f32 %v3188_v63, %v132_v28  ;;  %v352_v43 = vadd.f32 %v3192_v6, %v127_v35  ;;  %v3686_v54 = vld [vmem:[#allocation21_spill] sm:$0xff]  ;;  %v3690_v5 = vld [vmem:[#allocation10_spill] sm:$0xff] }
 0x144   :  { %v727_v7 = vadd.f32 %v3208_v61, %v533_v10  ;;  %v587_v15 = vadd.f32 %v3190_v33, %v322_v46  ;;  %v382_v59 = vadd.f32 %v3196_v57, %v142_v24  ;;  %v741_v63 = vadd.f32 %v3216_v50, %v545_v45  ;;  %v3694_v24 = vld [vmem:[#allocation4_spill] sm:$0xff]  ;;  %v3697_v44 = vld [vmem:[#allocation2_spill] sm:$0xff] }
 0x145   :  { %v2111_v13 = vpop.f32.mrf.mxu0  ;;  %v3277_v30 = vpop.f32.mrf.mxu1  ;;  %v581_v39 = vadd.f32 %v3194_v62, %v312_v0  ;;  %v599_v10 = vadd.f32 %v3198_v3, %v342_v2  ;;  %v605_v33 = vadd.f32 %v3206_v9, %v352_v43  ;;  %v762_v62 = vadd.f32 %v3220_v56, %v563_v1 }
 0x146   :  { %v929_v6 = vadd.f32 %v3218_v25, %v734_v40  ;;  %v611_v46 = vadd.f32 %v3204_v41, %v362_v55  ;;  %v755_v57 = vadd.f32 %v3222_v32, %v557_v42  ;;  %v921_v49 = vadd.f32 %v3224_v20, %v727_v7  ;;  %v3688_v32 = vld [vmem:[#allocation15_spill] sm:$0xff]  ;;  %v3689_v20 = vld [vmem:[#allocation13_spill] sm:$0xff] }
 0x147   :  { %v1159_v26 = vpop.f32.mrf.mxu0  ;;  %v3286_v38 = vpop.f32.mrf.mxu1  ;;  %v776_v50 = vadd.f32 %v3226_v58, %v575_v17  ;;  %v945_v3 = vadd.f32 %v3682_v29, %v748_v11  ;;  %v769_v9 = vadd.f32 %v3683_v31, %v569_v21  ;;  %v623_v25 = vadd.f32 %v3684_v8, %v382_v59  ;;  %v3693_v42 = vld [vmem:[#allocation5_spill] sm:$0xff] }
 0x148   :  { %v1166_v52 = vadd.f32 %v2111_v13, %v929_v6  ;;  %v937_v36 = vadd.f32 %v3685_v51, %v741_v63  ;;  %v790_v41 = vadd.f32 %v3686_v54, %v587_v15  ;;  %v961_v22 = vadd.f32 %v3687_v14, %v762_v62  ;;  %v3696_v55 = vld [vmem:[#allocation33_spill] sm:$0xff]  ;;  %v3698_v63 = vld [vmem:[#allocation23_spill] sm:$0xff]  ;;  %v3699_v62 = vld [vmem:[#allocation8_spill] sm:$0xff] }
 0x149   :  { %v2114_v27 = vpop.f32.mrf.mxu0  ;;  %v783_v53 = vadd.f32 %v3688_v32, %v581_v39  ;;  %v953_v35 = vadd.f32 %v3689_v20, %v755_v57  ;;  %v1160_v58 = vadd.f32 %v1159_v26, %v921_v49  ;;  %v804_v34 = vadd.f32 %v3690_v5, %v599_v10  ;;  %v3700_v29 = vld [vmem:[#allocation26_spill] sm:$0xff]  ;;  %v3701_v31 = vld [vmem:[#allocation9_spill] sm:$0xff] }
 0x14a   :  { %v3296_v60 = vpop.f32.mrf.mxu1  ;;  %v977_v13 = vadd.f32 %v3691_v19, %v776_v50  ;;  %v797_v45 = vadd.f32 %v3692_v18, %v593_v23  ;;  %v969_v40 = vadd.f32 %v3693_v42, %v769_v9  ;;  %v1178_v1 = vadd.f32 %v2114_v27, %v945_v3 }
 0x14b   :  { %v1171_v61 = vpop.f32.mrf.mxu0  ;;  %v818_v17 = vadd.f32 %v3694_v24, %v611_v46  ;;  %v993_v26 = vadd.f32 %v3695_v37, %v790_v41  ;;  %v811_v7 = vadd.f32 %v3696_v55, %v605_v33  ;;  %v985_v27 = vadd.f32 %v3697_v44, %v783_v53 }
 0x14c   :  { %v3306_v12 = vpop.f32.mrf.mxu1  ;;  %v1172_v15 = vadd.f32 %v1171_v61, %v937_v36  ;;  %v3332_v10 = vadd.f32 %v3698_v63, %v623_v25  ;;  %v1009_v6 = vadd.f32 %v3699_v62, %v804_v34  ;;  %v3338_v3 = vadd.f32 %v3700_v29, %v617_v4 }
 0x14d   :  { %v1001_v9 = vadd.f32 %v3701_v31, %v797_v45  ;;  %v1025_v41 = vadd.f32 %v3277_v30, %v818_v17  ;;  %v3349_v4 = vadd.f32 %v3286_v38, %v811_v7 }
 0x14e   :  { %v2117_v56 = vpop.f32.mrf.mxu0  ;;  %v2167_v48 = vpop.f32.mrf.mxu1 }
 0x14f   :  { %v1343_v47 = vadd.f32 %v2167_v48, %v1166_v52  ;;  %v1190_v46 = vadd.f32 %v2117_v56, %v961_v22 }
 0x150   :  { %v1183_v28 = vpop.f32.mrf.mxu0  ;;  %v1336_v16 = vpop.f32.mrf.mxu1 }
 0x151   :  { %vm1431_vm1 = vcmp.gt.f32.partialorder %v1343_v47, 0.0  ;;  %v1447_v21 = vmul.f32 0.2, %v1343_v47  ;;  %v1337_v0 = vadd.f32 %v1336_v16, %v1160_v58  ;;  %v1184_v14 = vadd.f32 %v1183_v28, %v953_v35 }
 0x152   :  { %v2120_v2 = vpop.f32.mrf.mxu0  ;;  %v2170_v39 = vpop.f32.mrf.mxu1 }
 0x153   :  { %v3328_v43 = vsel %vm1431_vm1, %v1343_v47, %v1447_v21  ;;  %vm1430_vm2 = vcmp.gt.f32.partialorder %v1337_v0, 0.0  ;;  %v1446_v11 = vmul.f32 0.2, %v1337_v0  ;;  %v1355_v23 = vadd.f32 %v2170_v39, %v1178_v1 }
 0x154   :  { %v1195_v59 = vpop.f32.mrf.mxu0  ;;  %v1348_v57 = vpop.f32.mrf.mxu1  ;;  %v1479_v52 = vmul.f32 %v3328_v43, %v3328_v43  ;;  %v1202_v32 = vadd.f32 %v2120_v2, %v977_v13 }
 0x155   :  { %v3335_v49 = vsel %vm1430_vm2, %v1337_v0, %v1446_v11  ;;  %vm1433_vm3 = vcmp.gt.f32.partialorder %v1355_v23, 0.0  ;;  %v1449_v61 = vmul.f32 0.2, %v1355_v23  ;;  %v1349_v33 = vadd.f32 %v1348_v57, %v1172_v15 }
 0x156   :  { %v2123_v50 = vpop.f32.mrf.mxu0  ;;  %v1478_v8 = vmul.f32 %v3335_v49, %v3335_v49  ;;  %v2173_v25 = vpop.f32.mrf.mxu1  ;;  %v1496_v47 = vsel %vm1494_vm0, %v1479_v52, 0.0  ;;  %v1196_v28 = vadd.f32 %v1195_v59, %v969_v40 }
 0x157   :  { %v3345_v56 = vsel %vm1433_vm3, %v1355_v23, %v1449_v61  ;;  %vm1432_vm4 = vcmp.gt.f32.partialorder %v1349_v33, 0.0  ;;  %v1448_v51 = vmul.f32 0.2, %v1349_v33  ;;  %v1367_v36 = vadd.f32 %v2173_v25, %v1190_v46 }
 0x158   :  { %v1207_v54 = vpop.f32.mrf.mxu0  ;;  %v1495_v22 = vsel %vm1494_vm0, %v1478_v8, 0.0  ;;  %v1360_v48 = vpop.f32.mrf.mxu1  ;;  %v1481_v5 = vmul.f32 %v3345_v56, %v3345_v56  ;;  %v1214_v42 = vadd.f32 %v2123_v50, %v993_v26  ;;  %v1041_v25 = vadd.f32 %v3296_v60, %v3332_v10 }
 0x159   :  { %v3352_v53 = vsel %vm1432_vm4, %v1349_v33, %v1448_v51  ;;  %vm1435_vm5 = vcmp.gt.f32.partialorder %v1367_v36, 0.0  ;;  %v1451_v20 = vmul.f32 0.2, %v1367_v36  ;;  %v1361_v38 = vadd.f32 %v1360_v48, %v1184_v14 }
 0x15a   :  { %v2126_v58 = vpop.f32.mrf.mxu0  ;;  %v1480_v30 = vmul.f32 %v3352_v53, %v3352_v53  ;;  %v2176_v34 = vpop.f32.mrf.mxu1  ;;  %v1497_v35 = vadd.f32 %v1496_v47, %v1495_v22  ;;  %v1208_v0 = vadd.f32 %v1207_v54, %v985_v27  ;;  %v1500_v17 = vsel %vm1494_vm0, %v1481_v5, 0.0 }
 0x15b   :  { %v3359_v19 = vsel %vm1435_vm5, %v1367_v36, %v1451_v20  ;;  %v1379_v13 = vadd.f32 %v2176_v34, %v1202_v32  ;;  %vm1434_vm6 = vcmp.gt.f32.partialorder %v1361_v38, 0.0  ;;  %v1450_v16 = vmul.f32 0.2, %v1361_v38 }
 0x15c   :  { %v1219_v18 = vpop.f32.mrf.mxu0  ;;  %v1498_v45 = vsel %vm1494_vm0, %v1480_v30, 0.0  ;;  %v1372_v1 = vpop.f32.mrf.mxu1  ;;  %v1483_v40 = vmul.f32 %v3359_v19, %v3359_v19  ;;  %v1226_v23 = vadd.f32 %v2126_v58, %v1009_v6 }
 0x15d   :  { %v1499_v21 = vadd.f32 %v1498_v45, %v1497_v35  ;;  %vm1437_vm7 = vcmp.gt.f32.partialorder %v1379_v13, 0.0  ;;  %v1453_v2 = vmul.f32 0.2, %v1379_v13  ;;  %v3365_v37 = vsel %vm1434_vm6, %v1361_v38, %v1450_v16 }
 0x15e   :  { %v2129_v24 = vpop.f32.mrf.mxu0  ;;  %v1373_v55 = vadd.f32 %v1372_v1, %v1196_v28  ;;  %v2179_v7 = vpop.f32.mrf.mxu1  ;;  %v1482_v26 = vmul.f32 %v3365_v37, %v3365_v37  ;;  %v1504_v61 = vsel %vm1494_vm0, %v1483_v40, 0.0  ;;  %v1220_v50 = vadd.f32 %v1219_v18, %v1001_v9 }
 0x15f   :  { %v1501_v15 = vadd.f32 %v1500_v17, %v1499_v21  ;;  %v3369_v39 = vsel %vm1437_vm7, %v1379_v13, %v1453_v2  ;;  %v1391_v11 = vadd.f32 %v2179_v7, %v1214_v42  ;;  %v1238_v36 = vadd.f32 %v2129_v24, %v1025_v41 }
 0x160   :  { %v1485_v59 = vmul.f32 %v3369_v39, %v3369_v39  ;;  %vm1436_vm8 = vcmp.gt.f32.partialorder %v1373_v55, 0.0  ;;  %v1452_v44 = vmul.f32 0.2, %v1373_v55  ;;  %v1384_v27 = vpop.f32.mrf.mxu1  ;;  %v1502_v63 = vsel %vm1494_vm0, %v1482_v26, 0.0  ;;  %v1231_v46 = vpop.f32.mrf.mxu0 }
 0x161   :  { %vm1439_vm9 = vcmp.gt.f32.partialorder %v1391_v11, 0.0  ;;  %v1455_v62 = vmul.f32 0.2, %v1391_v11  ;;  %v1385_v57 = vadd.f32 %v1384_v27, %v1208_v0  ;;  %v1503_v33 = vadd.f32 %v1502_v63, %v1501_v15 }
 0x162   :  { %v3375_v29 = vsel %vm1436_vm8, %v1373_v55, %v1452_v44  ;;  %v2182_v31 = vpop.f32.mrf.mxu1  ;;  %v1508_v22 = vsel %vm1494_vm0, %v1485_v59, 0.0  ;;  %v2132_v32 = vpop.f32.mrf.mxu0  ;;  %v1033_v38 = vadd.f32 %v3306_v12, %v3338_v3  ;;  %v1232_v34 = vadd.f32 %v1231_v46, %v3349_v4 }
 0x163   :  { %v1484_v6 = vmul.f32 %v3375_v29, %v3375_v29  ;;  %v3379_v52 = vsel %vm1439_vm9, %v1391_v11, %v1455_v62  ;;  %vm1438_vm10 = vcmp.gt.f32.partialorder %v1385_v57, 0.0  ;;  %v1454_v8 = vmul.f32 0.2, %v1385_v57 }
 0x164   :  { %v1505_v51 = vadd.f32 %v1504_v61, %v1503_v33  ;;  %v1403_v54 = vadd.f32 %v2182_v31, %v1226_v23  ;;  %v1396_v14 = vpop.f32.mrf.mxu1  ;;  %v1487_v47 = vmul.f32 %v3379_v52, %v3379_v52  ;;  %v1250_v18 = vadd.f32 %v2132_v32, %v1041_v25  ;;  %v1243_v42 = vpop.f32.mrf.mxu0 }
 0x165   :  { %v1506_v9 = vsel %vm1494_vm0, %v1484_v6, 0.0  ;;  %v3385_v48 = vsel %vm1438_vm10, %v1385_v57, %v1454_v8  ;;  %v1397_v20 = vadd.f32 %v1396_v14, %v1220_v50  ;;  %v1244_v4 = vadd.f32 %v1243_v42, %v1033_v38 }
 0x166   :  { %v1507_v58 = vadd.f32 %v1506_v9, %v1505_v51  ;;  %v1486_v5 = vmul.f32 %v3385_v48, %v3385_v48  ;;  %vm1441_vm11 = vcmp.gt.f32.partialorder %v1403_v54, 0.0  ;;  %v2185_v60 = vpop.f32.mrf.mxu1  ;;  %v1457_v10 = vmul.f32 0.2, %v1403_v54 }
 0x167   :  { %vm1440_vm12 = vcmp.gt.f32.partialorder %v1397_v20, 0.0  ;;  %v1456_v41 = vmul.f32 0.2, %v1397_v20  ;;  %v1415_v30 = vadd.f32 %v2185_v60, %v1238_v36  ;;  %v1512_v17 = vsel %vm1494_vm0, %v1487_v47, 0.0 }
 0x168   :  { %v1509_v35 = vadd.f32 %v1508_v22, %v1507_v58  ;;  %v1510_v28 = vsel %vm1494_vm0, %v1486_v5, 0.0  ;;  %v1408_v13 = vpop.f32.mrf.mxu1  ;;  %v3395_v45 = vsel %vm1441_vm11, %v1403_v54, %v1457_v10 }
 0x169   :  { %v1472_v16 = vsel %vm1440_vm12, %v1397_v20, %v1456_v41  ;;  %v1459_v1 = vmul.f32 0.2, %v1415_v30  ;;  %vm1443_vm13 = vcmp.gt.f32.partialorder %v1415_v30, 0.0  ;;  %v1409_v2 = vadd.f32 %v1408_v13, %v1232_v34 }
 0x16a   :  { %v1511_v21 = vadd.f32 %v1510_v28, %v1509_v35  ;;  %v1488_v0 = vmul.f32 %v1472_v16, %v1472_v16  ;;  %v2188_v24 = vpop.f32.mrf.mxu1  ;;  %v1489_v12 = vmul.f32 %v3395_v45, %v3395_v45 }
 0x16b   :  { %v1427_v3 = vadd.f32 %v2188_v24, %v1250_v18  ;;  %v1475_v26 = vsel %vm1443_vm13, %v1415_v30, %v1459_v1  ;;  %vm1442_vm14 = vcmp.gt.f32.partialorder %v1409_v2, 0.0  ;;  %v1458_v15 = vmul.f32 0.2, %v1409_v2 }
 0x16c   :  { %v1513_v40 = vadd.f32 %v1512_v17, %v1511_v21  ;;  %v1514_v55 = vsel %vm1494_vm0, %v1488_v0, 0.0  ;;  %v1420_v7 = vpop.f32.mrf.mxu1  ;;  %v1516_v44 = vsel %vm1494_vm0, %v1489_v12, 0.0  ;;  %v1491_v63 = vmul.f32 %v1475_v26, %v1475_v26 }
 0x16d   :  { %v1461_v11 = vmul.f32 0.2, %v1427_v3  ;;  %vm1445_vm15 = vcmp.gt.f32.partialorder %v1427_v3, 0.0  ;;  %v1421_v59 = vadd.f32 %v1420_v7, %v1244_v4  ;;  %v1474_v27 = vsel %vm1442_vm14, %v1409_v2, %v1458_v15 }
 0x16e   :  { %v1515_v23 = vadd.f32 %v1514_v55, %v1513_v40  ;;  %v1490_v62 = vmul.f32 %v1474_v27, %v1474_v27  ;;  %v1520_v6 = vsel %vm1494_vm0, %v1491_v63, 0.0 }
 0x16f   :  { %vm1444_vm1 = vcmp.gt.f32.partialorder %v1421_v59, 0.0  ;;  %v1477_v57 = vsel %vm1445_vm15, %v1427_v3, %v1461_v11  ;;  %v1460_v61 = vmul.f32 0.2, %v1421_v59 }
 0x170   :  { %v1517_v46 = vadd.f32 %v1516_v44, %v1515_v23  ;;  %v1518_v33 = vsel %vm1494_vm0, %v1490_v62, 0.0  ;;  %v1493_v8 = vmul.f32 %v1477_v57, %v1477_v57 }
 0x171   :  { %v1476_v31 = vsel %vm1444_vm1, %v1421_v59, %v1460_v61 }
 0x172   :  { %v1519_v50 = vadd.f32 %v1518_v33, %v1517_v46  ;;  %v1492_v25 = vmul.f32 %v1476_v31, %v1476_v31  ;;  %v1524_v14 = vsel %vm1494_vm0, %v1493_v8, 0.0 }
 0x174   :  { %v1521_v51 = vadd.f32 %v1520_v6, %v1519_v50  ;;  %v1522_v36 = vsel %vm1494_vm0, %v1492_v25, 0.0 }
 0x176   :  { %v1523_v54 = vadd.f32 %v1522_v36, %v1521_v51 }
 0x178   :  { %v1525_v22 = vadd.f32 %v1524_v14, %v1523_v54 }
 0x17a   :  { %v1526_v9 = vrot.slane %v1525_v22, 4 }
 0x17c   :  { %v1527_v32 = vadd.f32 %v1526_v9, %v1525_v22 }
 0x17e   :  { %v1528_v20 = vrot.slane %v1527_v32, 2 }
 0x180   :  { %v1529_v58 = vadd.f32 %v1528_v20, %v1527_v32 }
 0x182   :  { %v1530_v47 = vrot.slane %v1529_v58, 1 }
 0x184   :  { %v1531_v5 = vadd.f32 %v1530_v47, %v1529_v58 }
 0x186   :  { %v1532_v60 = vmax.f32 %v1531_v5, 1e-24 }
 0x188   :  { %2194 = vrsqrt.f32 %v1532_v60 }
 0x195   :  { %v2195_v10 = vpop.eup %2194 }
 0x196   :  { %v1534_v41 = vmul.f32 %v2195_v10, %v3335_v49  ;;  %v1535_v30 = vmul.f32 %v2195_v10, %v3328_v43  ;;  %v1536_v38 = vmul.f32 %v2195_v10, %v3352_v53  ;;  %v1537_v34 = vmul.f32 %v2195_v10, %v3345_v56 }
 0x197   :  { %v1538_v35 = vmul.f32 %v2195_v10, %v3365_v37  ;;  %v1539_v28 = vmul.f32 %v2195_v10, %v3359_v19  ;;  %v1540_v13 = vmul.f32 %v2195_v10, %v3375_v29  ;;  %v1541_v18 = vmul.f32 %v2195_v10, %v3369_v39 }
 0x198   :  { %v1542_v42 = vmul.f32 %v2195_v10, %v3385_v48  ;;  %v1543_v1 = vmul.f32 %v2195_v10, %v3379_v52  ;;  %v1544_v21 = vmul.f32 %v2195_v10, %v1472_v16  ;;  %v1545_v49 = vmul.f32 %v2195_v10, %v3395_v45  ;;  %1550 = vst.msk [vmem:[%s3485_s3] sm:$0xff] %vm1494_vm0, %v1534_v41 }
 0x199   :  { %1551 = vst.msk [vmem:[%s3485_s3 + $0x8] sm:$0xff] %vm1494_vm0, %v1535_v30  ;;  %1552 = vst.msk [vmem:[%s3485_s3 + $0x10] sm:$0xff] %vm1494_vm0, %v1536_v38  ;;  %v1546_v43 = vmul.f32 %v2195_v10, %v1474_v27  ;;  %v1547_v56 = vmul.f32 %v2195_v10, %v1475_v26  ;;  %v1548_v53 = vmul.f32 %v2195_v10, %v1476_v31 }
 0x19a   :  { %1553 = vst.msk [vmem:[%s3485_s3 + $0x18] sm:$0xff] %vm1494_vm0, %v1537_v34  ;;  %v1549_v19 = vmul.f32 %v2195_v10, %v1477_v57  ;;  %1554 = vst.msk [vmem:[%s3485_s3 + $0x20] sm:$0xff] %vm1494_vm0, %v1538_v35 }
 0x19b   :  { %1555 = vst.msk [vmem:[%s3485_s3 + $0x28] sm:$0xff] %vm1494_vm0, %v1539_v28  ;;  %1556 = vst.msk [vmem:[%s3485_s3 + $0x30] sm:$0xff] %vm1494_vm0, %v1540_v13 }
 0x19c   :  { %1557 = vst.msk [vmem:[%s3485_s3 + $0x38] sm:$0xff] %vm1494_vm0, %v1541_v18  ;;  %1558 = vst.msk [vmem:[%s3485_s3 + $0x40] sm:$0xff] %vm1494_vm0, %v1542_v42 }
 0x19d   :  { %1559 = vst.msk [vmem:[%s3485_s3 + $0x48] sm:$0xff] %vm1494_vm0, %v1543_v1  ;;  %1560 = vst.msk [vmem:[%s3485_s3 + $0x50] sm:$0xff] %vm1494_vm0, %v1544_v21 }
 0x19e   :  { %1561 = vst.msk [vmem:[%s3485_s3 + $0x58] sm:$0xff] %vm1494_vm0, %v1545_v49  ;;  %1562 = vst.msk [vmem:[%s3485_s3 + $0x60] sm:$0xff] %vm1494_vm0, %v1546_v43 }
 0x19f   :  { %1563 = vst.msk [vmem:[%s3485_s3 + $0x68] sm:$0xff] %vm1494_vm0, %v1547_v56  ;;  %1564 = vst.msk [vmem:[%s3485_s3 + $0x70] sm:$0xff] %vm1494_vm0, %v1548_v53 }
 0x1a0   :  { %1565 = vst.msk [vmem:[%s3485_s3 + $0x78] sm:$0xff] %vm1494_vm0, %v1549_v19 }

// kernel: tl_module_forward.3
= control target key start
LH: loop header
LB: loop body
LE: loop exit
PB: predicated region body
PF: predicated region fallthrough
CT: control target
= control target key end

     0   :  { %s3138_s24 = smov 0   ;;  %s4701_s0 = inlined_call_operand.vmem [shape: f32[32,128], index: 0, kind: input, shape index: {}]   ;;  %s4702_s1 = inlined_call_operand.vmem [shape: f32[128,176], index: 1, kind: input, shape index: {}]   ;;  %s4703_s2 = inlined_call_operand.vmem [shape: f32[1,128], index: 2, kind: input, shape index: {}]   ;;  %s4704_s3 = inlined_call_operand.vmem [shape: f32[128,176], index: 3, kind: input, shape index: {}]   ;;  %s4705_s4 = inlined_call_operand.vmem [shape: f32[1,128], index: 4, kind: input, shape index: {}]   ;;  %s4706_s5 = inlined_call_operand.vmem [shape: f32[1,128], index: 5, kind: input, shape index: {}]   ;;  %s4707_s6 = inlined_call_operand.vmem [shape: f32[48,128], index: 6, kind: input, shape index: {}]   ;;  %s4708_s7 = inlined_call_operand.vmem [shape: f32[32,128], index: 7, kind: output, shape index: {}]  }
   0x1 LB: > { %s2896_s25 = sadd.s32 4294967295, %s3095_s24   ;;  %p2900_p0 = scmp.ge.s32.totalorder %s3095_s24, 1  ;;  %s3095_s24 = sphi %s3138_s24, %s17_s24  }
   0x2   : > { %p238_p1 = scmp.lt.s32.totalorder %s3095_s24, 3 }
   0x4   : > { %p239_p2 = pnand %p2900_p0, %p238_p1 }
   0x6   : > { %242 = sbr.rel (%p239_p2) target bundleno = 1385 (0x569), region = 48 }
   0xb   : > { %v315_v0 = vld [vmem:[%s4702_s1 + $0xf8] sm:$0xff]  ;;  %v314_v1 = vld [vmem:[%s4702_s1 + $0xf0] sm:$0xff]  ;;  %v313_v2 = vld [vmem:[%s4702_s1 + $0xe8] sm:$0xff]  ;;  %v4723_v9 = vmov 0.0   ;;  %s3347_s26 = sshll.u32 %s2896_s25, 1  ;;  %vm2257_vm4 = vcmask 392192  }
   0xc   : > { %v3155_v3 = vand.u32 4294901760, %v315_v0  ;;  %v3157_v4 = vand.u32 4294901760, %v314_v1  ;;  %v3159_v5 = vand.u32 4294901760, %v313_v2  ;;  %v312_v6 = vld [vmem:[%s4702_s1 + $0xe0] sm:$0xff]  ;;  %v311_v7 = vld [vmem:[%s4702_s1 + $0xd8] sm:$0xff]  ;;  %v310_v8 = vld [vmem:[%s4702_s1 + $0xd0] sm:$0xff]  ;;  %412 = vmatprep.mubr.f32.mxu0 %v4723_v9  ;;  %659 = vmatprep.mubr.f32.mxu1 %v4723_v9 }
   0xd   : > { %v3172_v10 = vand.u32 4294901760, %v312_v6  ;;  %v3174_v11 = vand.u32 4294901760, %v311_v7  ;;  %v3176_v12 = vand.u32 4294901760, %v310_v8  ;;  %v309_v13 = vld [vmem:[%s4702_s1 + $0xc8] sm:$0xff]  ;;  %v308_v14 = vld [vmem:[%s4702_s1 + $0xc0] sm:$0xff]  ;;  %v307_v15 = vld [vmem:[%s4702_s1 + $0xb8] sm:$0xff] }
   0xe   : > { %317 = vmatprep.subr.mxu0 %v3155_v3  ;;  %v3188_v16 = vand.u32 4294901760, %v309_v13  ;;  %v3190_v17 = vand.u32 4294901760, %v308_v14  ;;  %v3192_v18 = vand.u32 4294901760, %v307_v15  ;;  %v3195_v19 = vsub.f32 %v315_v0, %v3155_v3  ;;  %v3200_v20 = vld [vmem:[%s4702_s1 + $0xb0] sm:$0xff]  ;;  %v3205_v21 = vld [vmem:[%s4702_s1 + $0xa8] sm:$0xff]  ;;  %v3210_v22 = vld [vmem:[%s4702_s1 + $0xa0] sm:$0xff] }
   0xf   : > { %319 = vmatpush1.msra.mxu0 %v3157_v4  ;;  %v3214_v23 = vand.u32 4294901760, %v3200_v20  ;;  %v3217_v24 = vsub.f32 %v314_v1, %v3157_v4  ;;  %v3220_v25 = vand.u32 4294901760, %v3205_v21  ;;  %v3223_v26 = vsub.f32 %v313_v2, %v3159_v5  ;;  %v3228_v27 = vld [vmem:[%s4702_s1 + $0x98] sm:$0xff]  ;;  %v3233_v28 = vld [vmem:[%s4702_s1 + $0x90] sm:$0xff]  ;;  %v3238_v29 = vld [vmem:[%s4702_s1 + $0x88] sm:$0xff]  ;;  %p271_p3 = scmp.lt.s32.totalorder %s3347_s26, 3 }
  0x10   : > { %321 = vmatprep.subr.mxu0 %v3159_v5  ;;  %v4722_v30 = vand.u32 4294901760, %v3195_v19  ;;  %v3243_v31 = vand.u32 4294901760, %v3210_v22  ;;  %v3246_v32 = vsub.f32 %v312_v6, %v3172_v10  ;;  %v3249_v33 = vand.u32 4294901760, %v3228_v27  ;;  %v3263_v38 = vld [vmem:[%s4702_s1 + $0x80] sm:$0xff]  ;;  %v3290_v47 = vld [vmem:[%s4702_s1 + $0x78] sm:$0xff]  ;;  %v3303_v52 = vld [vmem:[%s4702_s1 + $0x70] sm:$0xff] }
  0x11   : > { %323 = vmatpush1.msra.mxu0 %v3172_v10  ;;  %v4721_v34 = vand.u32 4294901760, %v3217_v24  ;;  %v4719_v35 = vand.u32 4294901760, %v3223_v26  ;;  %v3255_v36 = vsub.f32 %v311_v7, %v3174_v11  ;;  %v3258_v37 = vand.u32 4294901760, %v3233_v28  ;;  %v3313_v57 = vld [vmem:[%s4702_s1 + $0x68] sm:$0xff]  ;;  %v3328_v62 = vld [vmem:[%s4702_s1 + $0x60] sm:$0xff]  ;;  %v3343_v6 = vld [vmem:[%s4702_s1 + $0x58] sm:$0xff] }
  0x12   : > { %4846 = vst [vmem:[#allocation2_spill] sm:$0xff] %v3243_v31  ;;  %4847 = vst [vmem:[#allocation3_spill] sm:$0xff] %v3249_v33  ;;  %325 = vmatprep.subr.mxu0 %v3174_v11  ;;  %v438_v39 = vsub.f32 %v3195_v19, %v4722_v30  ;;  %v4717_v40 = vand.u32 4294901760, %v3246_v32  ;;  %v3271_v41 = vsub.f32 %v310_v8, %v3176_v12  ;;  %v3274_v42 = vand.u32 4294901760, %v3238_v29  ;;  %s5019_s26 = smov (!%p271_p3, %s3347_s26), 3  ;;  %v3489_v30 = vld [vmem:[%s4702_s1 + $0x18] sm:$0xff] }
  0x13   : > { %4848 = vst [vmem:[#allocation4_spill] sm:$0xff] %v3258_v37  ;;  %327 = vmatpush1.msra.mxu0 %v3176_v12  ;;  %v444_v43 = vsub.f32 %v3217_v24, %v4721_v34  ;;  %v450_v44 = vsub.f32 %v3223_v26, %v4719_v35  ;;  %v4715_v45 = vand.u32 4294901760, %v3255_v36  ;;  %v3285_v46 = vsub.f32 %v309_v13, %v3188_v16  ;;  %s2902_s19 = sshll.u32 %s5019_s26, 3 }
  0x14   : > { %4849 = vst [vmem:[#allocation5_spill] sm:$0xff] %v3274_v42  ;;  %329 = vmatprep.subr.mxu0 %v3188_v16  ;;  %v439_v48 = vand.u32 4294901760, %v438_v39  ;;  %v456_v49 = vsub.f32 %v3246_v32, %v4717_v40  ;;  %v4714_v50 = vand.u32 4294901760, %v3271_v41  ;;  %v3298_v51 = vand.u32 4294901760, %v3263_v38  ;;  %v3462_v40 = vld [vmem:[%s4702_s1 + $0x28] sm:$0xff]  ;;  %s3548_s25 = scalar_lea.vmem %s4701_s0, %s2902_s19  ;;  %s280_s12 = scalar_lea.vmem %s4708_s7, %s2902_s19 }
  0x15   : > { %331 = vmatpush1.msra.mxu0 %v3190_v17  ;;  %v445_v53 = vand.u32 4294901760, %v444_v43  ;;  %v451_v54 = vand.u32 4294901760, %v450_v44  ;;  %v462_v55 = vsub.f32 %v3255_v36, %v4715_v45  ;;  %v4712_v56 = vand.u32 4294901760, %v3285_v46  ;;  %v3441_v45 = vld [vmem:[%s4702_s1 + $0x30] sm:$0xff] }
  0x16   : > { %4850 = vst [vmem:[#allocation6_spill] sm:$0xff] %v3298_v51  ;;  %333 = vmatprep.subr.mxu0 %v3192_v18  ;;  %440 = vmatprep.subr.mxu1 %v439_v48  ;;  %v457_v58 = vand.u32 4294901760, %v456_v49  ;;  %v468_v59 = vsub.f32 %v3271_v41, %v4714_v50  ;;  %v3320_v60 = vsub.f32 %v308_v14, %v3190_v17  ;;  %v3323_v61 = vand.u32 4294901760, %v3290_v47 }
  0x17   : > { %335 = vmatpush1.msra.mxu0 %v3214_v23  ;;  %446 = vmatpush1.msra.mxu1 %v445_v53  ;;  %v463_v63 = vand.u32 4294901760, %v462_v55  ;;  %v474_v0 = vsub.f32 %v3285_v46, %v4712_v56  ;;  %v3335_v1 = vsub.f32 %v307_v15, %v3192_v18  ;;  %v3338_v2 = vand.u32 4294901760, %v3303_v52  ;;  %v3361_v15 = vld [vmem:[%s4702_s1 + $0x50] sm:$0xff] }
  0x18   : > { %4851 = vst [vmem:[#allocation7_spill] sm:$0xff] %v3323_v61  ;;  %337 = vmatprep.subr.mxu0 %v3220_v25  ;;  %452 = vmatprep.subr.mxu1 %v451_v54  ;;  %v469_v7 = vand.u32 4294901760, %v468_v59  ;;  %v4711_v8 = vand.u32 4294901760, %v3320_v60  ;;  %v3353_v13 = vsub.f32 %v3200_v20, %v3214_v23  ;;  %v3356_v14 = vand.u32 4294901760, %v3313_v57 }
  0x19   : > { %4852 = vst [vmem:[#allocation8_spill] sm:$0xff] %v3338_v2  ;;  %339 = vmatpush1.msra.mxu0 %v3243_v31  ;;  %458 = vmatpush1.msra.mxu1 %v457_v58  ;;  %v475_v39 = vand.u32 4294901760, %v474_v0  ;;  %v4709_v43 = vand.u32 4294901760, %v3335_v1  ;;  %v3367_v44 = vsub.f32 %v3205_v21, %v3220_v25  ;;  %v3370_v20 = vand.u32 4294901760, %v3328_v62  ;;  %v3387_v21 = vld [vmem:[%s4702_s1 + $0x48] sm:$0xff] }
  0x1a   : > { %4853 = vst [vmem:[#allocation9_spill] sm:$0xff] %v3356_v14  ;;  %341 = vmatprep.subr.mxu0 %v3249_v33  ;;  %464 = vmatprep.subr.mxu1 %v463_v63  ;;  %v480_v48 = vsub.f32 %v3320_v60, %v4711_v8  ;;  %v4710_v49 = vand.u32 4294901760, %v3353_v13  ;;  %v3379_v53 = vsub.f32 %v3210_v22, %v3243_v31  ;;  %v3382_v54 = vand.u32 4294901760, %v3343_v6 }
  0x1b   : > { %4854 = vst [vmem:[#allocation10_spill] sm:$0xff] %v3370_v20  ;;  %343 = vmatpush1.msra.mxu0 %v3258_v37  ;;  %470 = vmatpush1.msra.mxu1 %v469_v7  ;;  %v486_v55 = vsub.f32 %v3335_v1, %v4709_v43  ;;  %v4713_v58 = vand.u32 4294901760, %v3367_v44  ;;  %v3397_v22 = vsub.f32 %v3228_v27, %v3249_v33  ;;  %v3400_v59 = vand.u32 4294901760, %v3361_v15  ;;  %v3414_v27 = vld [vmem:[%s4702_s1 + $0x40] sm:$0xff] }
  0x1c   : > { %4855 = vst [vmem:[#allocation11_spill] sm:$0xff] %v3382_v54  ;;  %345 = vmatprep.subr.mxu0 %v3274_v42  ;;  %476 = vmatprep.subr.mxu1 %v475_v39  ;;  %v481_v63 = vand.u32 4294901760, %v480_v48  ;;  %v492_v0 = vsub.f32 %v3353_v13, %v4710_v49  ;;  %v4716_v7 = vand.u32 4294901760, %v3379_v53  ;;  %v3409_v43 = vsub.f32 %v3233_v28, %v3258_v37  ;;  %v3427_v28 = vld [vmem:[%s4702_s1 + $0x38] sm:$0xff]  ;;  %v3585_v33 = vld [vmem:[%s3548_s25] sm:$0xff] }
  0x1d   : > { %4856 = vst [vmem:[#allocation12_spill] sm:$0xff] %v3400_v59  ;;  %347 = vmatpush1.msra.mxu0 %v3298_v51  ;;  %v487_v39 = vand.u32 4294901760, %v486_v55  ;;  %v498_v48 = vsub.f32 %v3367_v44, %v4713_v58  ;;  %v4718_v49 = vand.u32 4294901760, %v3397_v22  ;;  %v3422_v8 = vand.u32 4294901760, %v3387_v21  ;;  %4868 = vst [vmem:[#allocation20_spill] sm:$0xff] %v3585_v33 }
  0x1e   : > { %482 = vmatpush1.msra.mxu1 %v481_v63  ;;  %349 = vmatprep.subr.mxu0 %v3323_v61  ;;  %v493_v56 = vand.u32 4294901760, %v492_v0  ;;  %v504_v55 = vsub.f32 %v3379_v53, %v4716_v7  ;;  %v4720_v58 = vand.u32 4294901760, %v3409_v43  ;;  %v3436_v50 = vsub.f32 %v3238_v29, %v3274_v42 }
  0x1f   : > { %4857 = vst [vmem:[#allocation13_spill] sm:$0xff] %v3422_v8  ;;  %488 = vmatprep.subr.mxu1 %v487_v39  ;;  %351 = vmatpush1.msra.mxu0 %v3338_v2  ;;  %v499_v63 = vand.u32 4294901760, %v498_v48  ;;  %v510_v0 = vsub.f32 %v3397_v22, %v4718_v49  ;;  %v3453_v7 = vand.u32 4294901760, %v3414_v27  ;;  %v3457_v29 = vsub.f32 %v3263_v38, %v3298_v51  ;;  %v3475_v38 = vld [vmem:[%s4702_s1 + $0x20] sm:$0xff] }
  0x20   : > { %494 = vmatpush1.msra.mxu1 %v493_v56  ;;  %353 = vmatprep.subr.mxu0 %v3356_v14  ;;  %v505_v39 = vand.u32 4294901760, %v504_v55  ;;  %v516_v48 = vsub.f32 %v3409_v43, %v4720_v58  ;;  %v4725_v49 = vand.u32 4294901760, %v3436_v50  ;;  %v3470_v35 = vand.u32 4294901760, %v3427_v28 }
  0x21   : > { %4858 = vst [vmem:[#allocation14_spill] sm:$0xff] %v3453_v7  ;;  %500 = vmatprep.subr.mxu1 %v499_v63  ;;  %355 = vmatpush1.msra.mxu0 %v3370_v20  ;;  %v511_v56 = vand.u32 4294901760, %v510_v0  ;;  %v4728_v55 = vand.u32 4294901760, %v3457_v29  ;;  %v3481_v58 = vsub.f32 %v3290_v47, %v3323_v61  ;;  %v3484_v34 = vand.u32 4294901760, %v3441_v45 }
  0x22   : > { %4859 = vst [vmem:[#allocation15_spill] sm:$0xff] %v3470_v35  ;;  %506 = vmatpush1.msra.mxu1 %v505_v39  ;;  %357 = vmatprep.subr.mxu0 %v3382_v54  ;;  %v517_v63 = vand.u32 4294901760, %v516_v48  ;;  %v522_v0 = vsub.f32 %v3436_v50, %v4725_v49  ;;  %v3497_v47 = vsub.f32 %v3303_v52, %v3338_v2  ;;  %v3500_v9 = vand.u32 4294901760, %v3462_v40 }
  0x23   : > { %4860 = vst [vmem:[#allocation16_spill] sm:$0xff] %v3484_v34  ;;  %512 = vmatprep.subr.mxu1 %v511_v56  ;;  %359 = vmatpush1.msra.mxu0 %v3400_v59  ;;  %v528_v39 = vsub.f32 %v3457_v29, %v4728_v55  ;;  %v3510_v49 = vsub.f32 %v3313_v57, %v3356_v14  ;;  %v3513_v52 = vand.u32 4294901760, %v3475_v38  ;;  %v3518_v56 = vld [vmem:[%s4702_s1 + $0x10] sm:$0xff]  ;;  %v3527_v57 = vand.u32 4294901760, %v3489_v30  ;;  %v3532_v14 = vld [vmem:[%s4702_s1 + $0x8] sm:$0xff] }
  0x24   : > { %4861 = vst [vmem:[#allocation17_spill] sm:$0xff] %v3500_v9  ;;  %518 = vmatpush1.msra.mxu1 %v517_v63  ;;  %361 = vmatprep.subr.mxu0 %v3422_v8  ;;  %v523_v2 = vand.u32 4294901760, %v522_v0  ;;  %v3524_v48 = vsub.f32 %v3328_v62, %v3370_v20  ;;  %v4863_v61 = vand.u32 4294901760, %v3481_v58  ;;  %v3541_v62 = vsub.f32 %v3343_v6, %v3382_v54 }
  0x25   : > { %4862 = vst [vmem:[#allocation18_spill] sm:$0xff] %v3513_v52  ;;  %363 = vmatpush1.msra.mxu0 %v3453_v7  ;;  %v529_v63 = vand.u32 4294901760, %v528_v39  ;;  %v4864_v39 = vand.u32 4294901760, %v3497_v47  ;;  %v3556_v55 = vand.u32 4294901760, %v3518_v56  ;;  %v3560_v6 = vsub.f32 %v3361_v15, %v3400_v59 }
  0x26   : > { %v534_v0 = vsub.f32 %v3481_v58, %v4863_v61  ;;  %524 = vmatprep.subr.mxu1 %v523_v2  ;;  %365 = vmatprep.subr.mxu0 %v3470_v35  ;;  %v3565_v2 = vld [vmem:[%s4702_s1] sm:$0xff]  ;;  %v4749_v51 = vand.u32 4294901760, %v3541_v62  ;;  %v3573_v42 = vand.u32 4294901760, %v3532_v14  ;;  %v4867_v59 = vand.u32 4294901760, %v3524_v48 }
  0x27   : > { %v540_v20 = vsub.f32 %v3497_v47, %v4864_v39  ;;  %4865 = vst [vmem:[#allocation19_spill] sm:$0xff] %v3556_v55  ;;  %530 = vmatpush1.msra.mxu1 %v529_v63  ;;  %367 = vmatpush1.msra.mxu0 %v3484_v34  ;;  %v4866_v39 = vand.u32 4294901760, %v3510_v49  ;;  %v4752_v63 = vand.u32 4294901760, %v3560_v6  ;;  %v3592_v31 = vand.u32 4294901760, %v3565_v2 }
  0x28   : > { %v535_v54 = vand.u32 4294901760, %v534_v0  ;;  %369 = vmatprep.subr.mxu0 %v3500_v9  ;;  %v552_v37 = vsub.f32 %v3524_v48, %v4867_v59  ;;  %v3582_v0 = vsub.f32 %v3387_v21, %v3422_v8  ;;  %v3596_v59 = vsub.f32 %v3414_v27, %v3453_v7 }
  0x29   : > { %v546_v61 = vsub.f32 %v3510_v49, %v4866_v39  ;;  %v541_v15 = vand.u32 4294901760, %v540_v20  ;;  %371 = vmatpush1.msra.mxu0 %v3513_v52  ;;  %v558_v20 = vsub.f32 %v3541_v62, %v4749_v51  ;;  %v3605_v51 = vsub.f32 %v3427_v28, %v3470_v35 }
  0x2a   : > { %536 = vmatprep.subr.mxu1 %v535_v54  ;;  %v553_v21 = vand.u32 4294901760, %v552_v37  ;;  %373 = vmatprep.subr.mxu0 %v3527_v57  ;;  %v564_v54 = vsub.f32 %v3560_v6, %v4752_v63  ;;  %v4754_v27 = vand.u32 4294901760, %v3596_v59  ;;  %v3610_v37 = vand.u32 4294901760, %v3585_v33 }
  0x2b   : > { %v547_v39 = vand.u32 4294901760, %v546_v61  ;;  %542 = vmatpush1.msra.mxu1 %v541_v15  ;;  %v4753_v61 = vand.u32 4294901760, %v3582_v0  ;;  %v559_v8 = vand.u32 4294901760, %v558_v20  ;;  %375 = vmatpush1.msra.mxu0 %v3556_v55  ;;  %v3614_v15 = vsub.f32 %v3441_v45, %v3484_v34 }
  0x2c   : > { %4869 = vst [vmem:[#allocation21_spill] sm:$0xff] %v3610_v37  ;;  %v565_v63 = vand.u32 4294901760, %v564_v54  ;;  %377 = vmatprep.subr.mxu0 %v3573_v42  ;;  %v3623_v20 = vsub.f32 %v3462_v40, %v3500_v9  ;;  %v576_v45 = vsub.f32 %v3596_v59, %v4754_v27 }
  0x2d   : > { %548 = vmatprep.subr.mxu1 %v547_v39  ;;  %v570_v28 = vsub.f32 %v3582_v0, %v4753_v61  ;;  %v4760_v39 = vand.u32 4294901760, %v3605_v51  ;;  %379 = vmatpush1.msra.mxu0 %v3592_v31  ;;  %v3636_v61 = vsub.f32 %v3475_v38, %v3513_v52  ;;  %v4870_v38 = vand.u32 4294901760, %v3614_v15 }
  0x2e   : > { %554 = vmatpush1.msra.mxu1 %v553_v21  ;;  %v3631_v21 = vsub.f32 %v3585_v33, %v3610_v37  ;;  %676 = vmatprep.subr.mxu0 %v3195_v19  ;;  %v4763_v27 = vand.u32 4294901760, %v3623_v20  ;;  %v3645_v33 = vsub.f32 %v3489_v30, %v3527_v57  ;;  %v577_v9 = vand.u32 4294901760, %v576_v45 }
  0x2f   : > { %560 = vmatprep.subr.mxu1 %v559_v8  ;;  %v571_v40 = vand.u32 4294901760, %v570_v28  ;;  %v582_v8 = vsub.f32 %v3605_v51, %v4760_v39  ;;  %v4767_v28 = vand.u32 4294901760, %v3636_v61  ;;  %v3658_v30 = vsub.f32 %v3518_v56, %v3556_v55 }
  0x30   : > { %566 = vmatpush1.msra.mxu1 %v565_v63  ;;  %v4764_v54 = vand.u32 4294901760, %v3631_v21  ;;  %v588_v63 = vsub.f32 %v3614_v15, %v4870_v38  ;;  %v594_v39 = vsub.f32 %v3623_v20, %v4763_v27  ;;  %v4771_v34 = vand.u32 4294901760, %v3645_v33 }
  0x31   : > { %572 = vmatprep.subr.mxu1 %v571_v40  ;;  %v583_v52 = vand.u32 4294901760, %v582_v8  ;;  %v600_v40 = vsub.f32 %v3636_v61, %v4767_v28  ;;  %v3668_v8 = vsub.f32 %v3532_v14, %v3573_v42 }
  0x32   : > { %578 = vmatpush1.msra.mxu1 %v577_v9  ;;  %v416_v45 = vsub.f32 %v3631_v21, %v4764_v54  ;;  %v589_v38 = vand.u32 4294901760, %v588_v63  ;;  %v595_v27 = vand.u32 4294901760, %v594_v39  ;;  %v606_v56 = vsub.f32 %v3645_v33, %v4771_v34 }
  0x33   : > { %4871 = vst [vmem:[#allocation22_spill] sm:$0xff] %v3668_v8  ;;  %584 = vmatprep.subr.mxu1 %v583_v52  ;;  %v4770_v9 = vand.u32 4294901760, %v3658_v30  ;;  %v3676_v54 = vsub.f32 %v3565_v2, %v3592_v31  ;;  %v601_v55 = vand.u32 4294901760, %v600_v40  ;;  %v4769_v28 = vand.u32 4294901760, %v3668_v8 }
  0x34   : > { %v417_v63 = vand.u32 4294901760, %v416_v45  ;;  %590 = vmatpush1.msra.mxu1 %v589_v38  ;;  %v607_v14 = vand.u32 4294901760, %v606_v56  ;;  %v4873_v40 = vmov 0.0   ;;  %v3696_v56 = vld [vmem:[%s3548_s25 + $0x8] sm:$0xff] }
  0x35   : > { %4872 = vst [vmem:[#allocation23_spill] sm:$0xff] %v3676_v54  ;;  %596 = vmatprep.subr.mxu1 %v595_v27  ;;  %v612_v52 = vsub.f32 %v3658_v30, %v4770_v9  ;;  %v4768_v39 = vand.u32 4294901760, %v3676_v54  ;;  %v618_v2 = vsub.f32 %v3668_v8, %v4769_v28  ;;  %4874 = vst [vmem:[#allocation24_spill] sm:$0xff] %v3696_v56  ;;  %v4880_v28 = vld [vmem:[#allocation7_spill] sm:$0xff]  ;;  %v4881_v9 = vld [vmem:[#allocation8_spill] sm:$0xff] }
  0x36   : > { %418 = vmatmul.mubr.f32.vlgmr.msra.gmra.mxu0 %v417_v63  ;;  %602 = vmatpush1.msra.mxu1 %v601_v55  ;;  %v3705_v63 = vand.u32 4294901760, %v3696_v56 }
  0x37   : > { %679 = vmatpush1.msra.mxu0 %v3217_v24  ;;  %608 = vmatprep.subr.mxu1 %v607_v14  ;;  %v613_v45 = vand.u32 4294901760, %v612_v52  ;;  %v624_v27 = vsub.f32 %v3676_v54, %v4768_v39  ;;  %v619_v38 = vand.u32 4294901760, %v618_v2  ;;  %v4875_v2 = vld [vmem:[#allocation2_spill] sm:$0xff] }
  0x38   : > { %682 = vmatprep.subr.mxu0 %v3223_v26  ;;  %423 = vmatprep.mubr.f32.mxu0 %v4873_v40  ;;  %v3717_v14 = vsub.f32 %v3696_v56, %v3705_v63  ;;  %v4879_v39 = vld [vmem:[#allocation6_spill] sm:$0xff] }
  0x39   : > { %685 = vmatpush1.msra.mxu0 %v3246_v32  ;;  %614 = vmatpush1.msra.mxu1 %v613_v45  ;;  %v625_v55 = vand.u32 4294901760, %v624_v27  ;;  %v4876_v45 = vld [vmem:[#allocation3_spill] sm:$0xff]  ;;  %v4877_v27 = vld [vmem:[#allocation4_spill] sm:$0xff]  ;;  %v4883_v56 = vld [vmem:[#allocation10_spill] sm:$0xff] }
  0x3a   : > { %688 = vmatprep.subr.mxu0 %v3255_v36  ;;  %620 = vmatprep.subr.mxu1 %v619_v38  ;;  %v4772_v52 = vand.u32 4294901760, %v3717_v14 }
  0x3b   : > { %691 = vmatpush1.msra.mxu0 %v3271_v41  ;;  %626 = vmatpush1.msra.mxu1 %v625_v55  ;;  %v4878_v55 = vld [vmem:[#allocation5_spill] sm:$0xff] }
  0x3c   : > { %694 = vmatprep.subr.mxu0 %v3285_v46  ;;  %661 = vmatmul.mubr.f32.vlgmr.msra.gmra.mxu1 %v3610_v37  ;;  %v427_v38 = vsub.f32 %v3717_v14, %v4772_v52  ;;  %v4882_v52 = vld [vmem:[#allocation9_spill] sm:$0xff]  ;;  %v4884_v37 = vld [vmem:[#allocation11_spill] sm:$0xff] }
  0x3d   : > { %697 = vmatpush1.msra.mxu0 %v3320_v60  ;;  %820 = vmatprep.subr.mxu1 %v3155_v3 }
  0x3e   : > { %700 = vmatprep.subr.mxu0 %v3335_v1  ;;  %822 = vmatpush1.msra.mxu1 %v3157_v4  ;;  %v428_v34 = vand.u32 4294901760, %v427_v38  ;;  %v4886_v38 = vld [vmem:[#allocation13_spill] sm:$0xff] }
  0x3f   : > { %703 = vmatpush1.msra.mxu0 %v3353_v13  ;;  %824 = vmatprep.subr.mxu1 %v3159_v5 }
  0x40   : > { %706 = vmatprep.subr.mxu0 %v3367_v44  ;;  %826 = vmatpush1.msra.mxu1 %v3172_v10 }
  0x41   : > { %709 = vmatpush1.msra.mxu0 %v3379_v53  ;;  %828 = vmatprep.subr.mxu1 %v3174_v11 }
  0x42   : > { %712 = vmatprep.subr.mxu0 %v3397_v22  ;;  %830 = vmatpush1.msra.mxu1 %v3176_v12 }
  0x43   : > { %715 = vmatpush1.msra.mxu0 %v3409_v43  ;;  %832 = vmatprep.subr.mxu1 %v3188_v16 }
  0x44   : > { %718 = vmatprep.subr.mxu0 %v3436_v50  ;;  %834 = vmatpush1.msra.mxu1 %v3190_v17 }
  0x45   : > { %721 = vmatpush1.msra.mxu0 %v3457_v29  ;;  %836 = vmatprep.subr.mxu1 %v3192_v18 }
  0x46   : > { %724 = vmatprep.subr.mxu0 %v3481_v58  ;;  %838 = vmatpush1.msra.mxu1 %v3214_v23 }
  0x47   : > { %727 = vmatpush1.msra.mxu0 %v3497_v47  ;;  %840 = vmatprep.subr.mxu1 %v3220_v25 }
  0x48   : > { %730 = vmatprep.subr.mxu0 %v3510_v49  ;;  %842 = vmatpush1.msra.mxu1 %v4875_v2 }
  0x49   : > { %733 = vmatpush1.msra.mxu0 %v3524_v48  ;;  %844 = vmatprep.subr.mxu1 %v4876_v45 }
  0x4a   : > { %736 = vmatprep.subr.mxu0 %v3541_v62  ;;  %846 = vmatpush1.msra.mxu1 %v4877_v27 }
  0x4b   : > { %739 = vmatpush1.msra.mxu0 %v3560_v6  ;;  %848 = vmatprep.subr.mxu1 %v4878_v55 }
  0x4c   : > { %742 = vmatprep.subr.mxu0 %v3582_v0  ;;  %850 = vmatpush1.msra.mxu1 %v4879_v39 }
  0x4d   : > { %745 = vmatpush1.msra.mxu0 %v3596_v59  ;;  %852 = vmatprep.subr.mxu1 %v4880_v28  ;;  %v4885_v28 = vld [vmem:[#allocation12_spill] sm:$0xff] }
  0x4e   : > { %748 = vmatprep.subr.mxu0 %v3605_v51  ;;  %854 = vmatpush1.msra.mxu1 %v4881_v9 }
  0x4f   : > { %751 = vmatpush1.msra.mxu0 %v3614_v15  ;;  %856 = vmatprep.subr.mxu1 %v4882_v52 }
  0x50   : > { %754 = vmatprep.subr.mxu0 %v3623_v20  ;;  %858 = vmatpush1.msra.mxu1 %v4883_v56 }
  0x51   : > { %757 = vmatpush1.msra.mxu0 %v3636_v61  ;;  %860 = vmatprep.subr.mxu1 %v4884_v37 }
  0x52   : > { %429 = vmatmul.mubr.f32.gmra.mxu0 %v428_v34  ;;  %760 = vmatprep.subr.mxu0 %v3645_v33  ;;  %v4887_v34 = vand.u32 4294901760, %v3195_v19  ;;  %v4894_v19 = vand.u32 4294901760, %v3255_v36  ;;  %v4900_v36 = vand.u32 4294901760, %v3335_v1  ;;  %v4904_v1 = vand.u32 4294901760, %v3397_v22  ;;  %v4924_v22 = vld [vmem:[#allocation12_spill] sm:$0xff] }
  0x53   : > { %763 = vmatpush1.msra.mxu0 %v3658_v30  ;;  %862 = vmatpush1.msra.mxu1 %v4885_v28  ;;  %v4892_v28 = vld [vmem:[#allocation18_spill] sm:$0xff] }
  0x54   : > { %766 = vmatprep.subr.mxu0 %v3668_v8  ;;  %864 = vmatprep.subr.mxu1 %v4886_v38  ;;  %v4888_v8 = vld [vmem:[#allocation16_spill] sm:$0xff]  ;;  %v4889_v38 = vand.u32 4294901760, %v3217_v24  ;;  %v4895_v24 = vld [vmem:[#allocation19_spill] sm:$0xff] }
  0x55   : > { %769 = vmatpush1.msra.mxu0 %v3676_v54  ;;  %802 = vmatprep.mubr.f32.mxu0 %v4873_v40  ;;  %v4890_v54 = vld [vmem:[#allocation17_spill] sm:$0xff] }
  0x56   : > { %866 = vmatpush1.msra.mxu1 %v3453_v7  ;;  %666 = vmatprep.mubr.f32.mxu1 %v4873_v40  ;;  %v4891_v7 = vand.u32 4294901760, %v3223_v26  ;;  %v4897_v26 = vand.u32 4294901760, %v3285_v46  ;;  %v4902_v46 = vand.u32 4294901760, %v3367_v44  ;;  %v4919_v44 = vand.u32 4294901760, %v3614_v15  ;;  %v1287_v15 = vld [vmem:[%s4704_s3 + $0xe0] sm:$0xff] }
  0x57   : > { %805 = vmatmul.mubr.f32.vlgmr.msra.gmra.mxu0 %v3631_v21  ;;  %868 = vmatprep.subr.mxu1 %v3470_v35  ;;  %v4893_v35 = vand.u32 4294901760, %v3246_v32  ;;  %v4898_v32 = vand.u32 4294901760, %v3320_v60  ;;  %v4903_v60 = vand.u32 4294901760, %v3379_v53  ;;  %v4921_v53 = vand.u32 4294901760, %v3636_v61 }
  0x58   : > { %937 = vmatprep.subr.mxu0 %v4887_v34  ;;  %668 = vmatmul.mubr.f32.gmra.mxu1 %v3705_v63 }
  0x59   : > { %870 = vmatpush1.msra.mxu1 %v4888_v8  ;;  %941 = vmatpush1.msra.mxu0 %v4889_v38  ;;  %v4896_v38 = vand.u32 4294901760, %v3271_v41  ;;  %v4901_v41 = vand.u32 4294901760, %v3353_v13  ;;  %v4909_v13 = vand.u32 4294901760, %v3481_v58  ;;  %v4923_v58 = vand.u32 4294901760, %v3658_v30 }
  0x5a   : > { %872 = vmatprep.subr.mxu1 %v4890_v54  ;;  %945 = vmatprep.subr.mxu0 %v4891_v7  ;;  %v4925_v7 = vld [vmem:[#allocation22_spill] sm:$0xff] }
  0x5b   : > { %810 = vmatprep.mubr.f32.mxu0 %v4873_v40  ;;  %874 = vmatpush1.msra.mxu1 %v4892_v28 }
  0x5c   : > { %949 = vmatpush1.msra.mxu0 %v4893_v35  ;;  %876 = vmatprep.subr.mxu1 %v3527_v57  ;;  %v4899_v35 = vand.u32 4294901760, %v3631_v21  ;;  %v1285_v21 = vld [vmem:[%s4704_s3 + $0xd0] sm:$0xff] }
  0x5d   : > { %813 = vmatmul.mubr.f32.gmra.mxu0 %v3717_v14  ;;  %953 = vmatprep.subr.mxu0 %v4894_v19  ;;  %v3914_v30 = vand.u32 4294901760, %v1285_v21 }
  0x5e   : > { %878 = vmatpush1.msra.mxu1 %v4895_v24  ;;  %957 = vmatpush1.msra.mxu0 %v4896_v38 }
  0x5f   : > { %880 = vmatprep.subr.mxu1 %v3573_v42  ;;  %961 = vmatprep.subr.mxu0 %v4897_v26 }
  0x60   : > { %882 = vmatpush1.msra.mxu1 %v3592_v31  ;;  %915 = vmatprep.mubr.f32.mxu1 %v4873_v40 }
  0x61   : > { %965 = vmatpush1.msra.mxu0 %v4898_v32  ;;  %919 = vmatmul.mubr.f32.vlgmr.msra.gmra.mxu1 %v4899_v35 }
  0x62   : > { %969 = vmatprep.subr.mxu0 %v4900_v36  ;;  %1110 = vmatprep.subr.mxu1 %v3155_v3  ;;  %v4905_v3 = vand.u32 4294901760, %v3717_v14 }
  0x63   : > { %973 = vmatpush1.msra.mxu0 %v4901_v41  ;;  %1112 = vmatpush1.msra.mxu1 %v3157_v4  ;;  %v4906_v4 = vand.u32 4294901760, %v3409_v43  ;;  %v4918_v43 = vld [vmem:[#allocation7_spill] sm:$0xff] }
  0x64   : > { %977 = vmatprep.subr.mxu0 %v4902_v46  ;;  %1114 = vmatprep.subr.mxu1 %v3159_v5  ;;  %v4907_v5 = vand.u32 4294901760, %v3436_v50  ;;  %v4917_v50 = vand.u32 4294901760, %v3605_v51  ;;  %v4922_v51 = vand.u32 4294901760, %v3645_v33  ;;  %v4931_v33 = vld [vmem:[#allocation21_spill] sm:$0xff] }
  0x65   : > { %924 = vmatprep.mubr.f32.mxu1 %v4873_v40  ;;  %981 = vmatpush1.msra.mxu0 %v4903_v60 }
  0x66   : > { %1116 = vmatpush1.msra.mxu1 %v3172_v10  ;;  %985 = vmatprep.subr.mxu0 %v4904_v1  ;;  %v4908_v10 = vand.u32 4294901760, %v3457_v29  ;;  %v4926_v29 = vand.u32 4294901760, %v4925_v7 }
  0x67   : > { %928 = vmatmul.mubr.f32.gmra.mxu1 %v4905_v3  ;;  %1118 = vmatprep.subr.mxu1 %v3174_v11  ;;  %v4910_v11 = vand.u32 4294901760, %v3497_v47  ;;  %v4927_v47 = vld [vmem:[#allocation13_spill] sm:$0xff] }
  0x68   : > { %989 = vmatpush1.msra.mxu0 %v4906_v4  ;;  %1120 = vmatpush1.msra.mxu1 %v3176_v12  ;;  %v4911_v12 = vand.u32 4294901760, %v3510_v49  ;;  %v4920_v49 = vand.u32 4294901760, %v3623_v20  ;;  %v1286_v20 = vld [vmem:[%s4704_s3 + $0xd8] sm:$0xff] }
  0x69   : > { %993 = vmatprep.subr.mxu0 %v4907_v5  ;;  %1122 = vmatprep.subr.mxu1 %v3188_v16  ;;  %v4912_v16 = vand.u32 4294901760, %v3524_v48  ;;  %v4928_v48 = vld [vmem:[#allocation23_spill] sm:$0xff] }
  0x6a   : > { %997 = vmatpush1.msra.mxu0 %v4908_v10  ;;  %1124 = vmatpush1.msra.mxu1 %v3190_v17  ;;  %v4913_v17 = vand.u32 4294901760, %v3541_v62  ;;  %v4929_v62 = vand.u32 4294901760, %v4928_v48  ;;  %v1282_v10 = vld [vmem:[%s4704_s3 + $0xb8] sm:$0xff] }
  0x6b   : > { %1001 = vmatprep.subr.mxu0 %v4909_v13  ;;  %1126 = vmatprep.subr.mxu1 %v3192_v18  ;;  %v4914_v18 = vand.u32 4294901760, %v3560_v6  ;;  %v4930_v6 = vld [vmem:[#allocation14_spill] sm:$0xff]  ;;  %v1281_v13 = vld [vmem:[%s4704_s3 + $0xb0] sm:$0xff] }
  0x6c   : > { %1005 = vmatpush1.msra.mxu0 %v4910_v11  ;;  %1128 = vmatpush1.msra.mxu1 %v3214_v23  ;;  %v4915_v23 = vand.u32 4294901760, %v3582_v0  ;;  %v4932_v0 = vld [vmem:[#allocation15_spill] sm:$0xff] }
  0x6d   : > { %1009 = vmatprep.subr.mxu0 %v4911_v12  ;;  %1130 = vmatprep.subr.mxu1 %v3220_v25  ;;  %v4916_v25 = vand.u32 4294901760, %v3596_v59  ;;  %v1289_v59 = vld [vmem:[%s4704_s3 + $0xf0] sm:$0xff]  ;;  %v1280_v11 = vld [vmem:[%s4704_s3 + $0xa8] sm:$0xff] }
  0x6e   : > { %1013 = vmatpush1.msra.mxu0 %v4912_v16  ;;  %1132 = vmatpush1.msra.mxu1 %v4875_v2  ;;  %v3897_v61 = vand.u32 4294901760, %v1289_v59 }
  0x6f   : > { %1017 = vmatprep.subr.mxu0 %v4913_v17  ;;  %1134 = vmatprep.subr.mxu1 %v4876_v45  ;;  %v3941_v45 = vsub.f32 %v1285_v21, %v3914_v30 }
  0x70   : > { %1021 = vmatpush1.msra.mxu0 %v4914_v18  ;;  %1136 = vmatpush1.msra.mxu1 %v4877_v27 }
  0x71   : > { %1025 = vmatprep.subr.mxu0 %v4915_v23  ;;  %1138 = vmatprep.subr.mxu1 %v4878_v55  ;;  %v4789_v32 = vand.u32 4294901760, %v3941_v45  ;;  %v1279_v23 = vld [vmem:[%s4704_s3 + $0xa0] sm:$0xff] }
  0x72   : > { %1029 = vmatpush1.msra.mxu0 %v4916_v25  ;;  %1140 = vmatpush1.msra.mxu1 %v4879_v39  ;;  %v1278_v25 = vld [vmem:[%s4704_s3 + $0x98] sm:$0xff] }
  0x73   : > { %1033 = vmatprep.subr.mxu0 %v4917_v50  ;;  %1142 = vmatprep.subr.mxu1 %v4918_v43  ;;  %v1443_v4 = vsub.f32 %v3941_v45, %v4789_v32  ;;  %v4013_v7 = vand.u32 4294901760, %v1278_v25 }
  0x74   : > { %1037 = vmatpush1.msra.mxu0 %v4919_v44  ;;  %1144 = vmatpush1.msra.mxu1 %v4881_v9  ;;  %v1283_v9 = vld [vmem:[%s4704_s3 + $0xc0] sm:$0xff] }
  0x75   : > { %1041 = vmatprep.subr.mxu0 %v4920_v49  ;;  %1146 = vmatprep.subr.mxu1 %v4882_v52  ;;  %v3943_v27 = vand.u32 4294901760, %v1283_v9  ;;  %v4005_v49 = vand.u32 4294901760, %v1282_v10 }
  0x76   : > { %1045 = vmatpush1.msra.mxu0 %v4921_v53  ;;  %1148 = vmatpush1.msra.mxu1 %v4883_v56  ;;  %v3926_v56 = vsub.f32 %v1289_v59, %v3897_v61  ;;  %v4007_v53 = vand.u32 4294901760, %v1281_v13 }
  0x77   : > { %1049 = vmatprep.subr.mxu0 %v4922_v51  ;;  %1150 = vmatprep.subr.mxu1 %v4884_v37  ;;  %v3957_v35 = vsub.f32 %v1283_v9, %v3943_v27  ;;  %v4009_v51 = vand.u32 4294901760, %v1280_v11 }
  0x78   : > { %1053 = vmatpush1.msra.mxu0 %v4923_v58  ;;  %1152 = vmatpush1.msra.mxu1 %v4924_v22  ;;  %v4795_v34 = vand.u32 4294901760, %v3926_v56  ;;  %v1444_v58 = vand.u32 4294901760, %v1443_v4  ;;  %v4011_v22 = vand.u32 4294901760, %v1279_v23  ;;  %v4019_v48 = vsub.f32 %v1281_v13, %v4007_v53 }
  0x79   : > { %1057 = vmatprep.subr.mxu0 %v4926_v29  ;;  %1154 = vmatprep.subr.mxu1 %v4927_v47  ;;  %v4786_v5 = vand.u32 4294901760, %v3957_v35  ;;  %v4016_v47 = vsub.f32 %v1282_v10, %v4005_v49 }
  0x7a   : > { %1061 = vmatpush1.msra.mxu0 %v4929_v62  ;;  %1094 = vmatprep.mubr.f32.mxu0 %v4873_v40  ;;  %v1419_v41 = vsub.f32 %v3926_v56, %v4795_v34  ;;  %v4022_v62 = vsub.f32 %v1280_v11, %v4009_v51  ;;  %v4783_v59 = vand.u32 4294901760, %v4019_v48 }
  0x7b   : > { %1156 = vmatpush1.msra.mxu1 %v4930_v6  ;;  %1096 = vmatmul.mubr.f32.vlgmr.msra.gmra.mxu0 %v4931_v33  ;;  %v1455_v43 = vsub.f32 %v3957_v35, %v4786_v5 }
  0x7c   : > { %1158 = vmatprep.subr.mxu1 %v4932_v0  ;;  %1101 = vmatprep.mubr.f32.mxu0 %v4873_v40  ;;  %v1420_v16 = vand.u32 4294901760, %v1419_v41  ;;  %v4029_v0 = vsub.f32 %v1278_v25, %v4013_v7 }
  0x7d   : > { %1160 = vmatpush1.msra.mxu1 %v4888_v8  ;;  %1205 = vmatprep.mubr.f32.mxu1 %v4873_v40  ;;  %v1284_v8 = vld [vmem:[%s4704_s3 + $0xc8] sm:$0xff]  ;;  %v1456_v6 = vand.u32 4294901760, %v1455_v43 }
  0x7e   : > { %1162 = vmatprep.subr.mxu1 %v4890_v54  ;;  %v3910_v54 = vand.u32 4294901760, %v1287_v15  ;;  %v3931_v14 = vand.u32 4294901760, %v1284_v8 }
  0x7f   : > { %1164 = vmatpush1.msra.mxu1 %v4892_v28  ;;  %1103 = vmatmul.mubr.f32.gmra.mxu0 %v3705_v63  ;;  %v3912_v28 = vand.u32 4294901760, %v1286_v20 }
  0x80   : > { %1166 = vmatprep.subr.mxu1 %v3527_v57  ;;  %1387 = vmatprep.mubr.f32.mxu0 %v4873_v40  ;;  %v1290_v57 = vld [vmem:[%s4704_s3 + $0xf8] sm:$0xff]  ;;  %v3935_v52 = vsub.f32 %v1287_v15, %v3910_v54 }
  0x81   : > { %1168 = vmatpush1.msra.mxu1 %v4895_v24  ;;  %v3938_v2 = vsub.f32 %v1286_v20, %v3912_v28  ;;  %v3950_v24 = vsub.f32 %v1284_v8, %v3931_v14  ;;  %v4780_v20 = vand.u32 4294901760, %v4029_v0  ;;  %v1467_v8 = vsub.f32 %v4019_v48, %v4783_v59 }
  0x82   : > { %1170 = vmatprep.subr.mxu1 %v3573_v42  ;;  %v3895_v42 = vand.u32 4294901760, %v1290_v57  ;;  %v4792_v38 = vand.u32 4294901760, %v3935_v52 }
  0x83   : > { %1172 = vmatpush1.msra.mxu1 %v3592_v31  ;;  %v1288_v31 = vld [vmem:[%s4704_s3 + $0xe8] sm:$0xff]  ;;  %v4790_v26 = vand.u32 4294901760, %v3938_v2  ;;  %v4787_v60 = vand.u32 4294901760, %v3950_v24  ;;  %v1485_v41 = vsub.f32 %v4029_v0, %v4780_v20 }
  0x84   : > { %1207 = vmatmul.mubr.f32.vlgmr.msra.gmra.mxu1 %v4931_v33  ;;  %v3899_v37 = vand.u32 4294901760, %v1288_v31  ;;  %v3923_v39 = vsub.f32 %v1290_v57, %v3895_v42  ;;  %1292 = vmatprep.subr.mxu0 %v3895_v42  ;;  %v1431_v1 = vsub.f32 %v3935_v52, %v4792_v38  ;;  %v4026_v33 = vsub.f32 %v1279_v23, %v4011_v22 }
  0x85   : > { %1212 = vmatprep.mubr.f32.mxu1 %v4873_v40  ;;  %1294 = vmatpush1.msra.mxu0 %v3897_v61  ;;  %v1437_v3 = vsub.f32 %v3938_v2, %v4790_v26  ;;  %v1449_v18 = vsub.f32 %v3950_v24, %v4787_v60  ;;  %v4785_v57 = vand.u32 4294901760, %v4016_v47  ;;  %v1486_v10 = vand.u32 4294901760, %v1485_v41 }
  0x86   : > { %4933 = vst [vmem:[#allocation2_spill] sm:$0xff] %v3923_v39  ;;  %v4796_v55 = vand.u32 4294901760, %v3923_v39  ;;  %1296 = vmatprep.subr.mxu0 %v3899_v37  ;;  %v1432_v50 = vand.u32 4294901760, %v1431_v1  ;;  %v4781_v15 = vand.u32 4294901760, %v4026_v33  ;;  %v1468_v1 = vand.u32 4294901760, %v1467_v8 }
  0x87   : > { %1298 = vmatpush1.msra.mxu0 %v3910_v54  ;;  %v1438_v44 = vand.u32 4294901760, %v1437_v3  ;;  %v1450_v29 = vand.u32 4294901760, %v1449_v18  ;;  %v1461_v21 = vsub.f32 %v4016_v47, %v4785_v57 }
  0x88   : > { %1214 = vmatmul.mubr.f32.gmra.mxu1 %v3705_v63  ;;  %v3929_v63 = vsub.f32 %v1288_v31, %v3899_v37  ;;  %v1413_v36 = vsub.f32 %v3923_v39, %v4796_v55  ;;  %1300 = vmatprep.subr.mxu0 %v3912_v28  ;;  %v4782_v31 = vand.u32 4294901760, %v4022_v62 }
  0x89   : > { %1634 = vmatprep.mubr.f32.mxu1 %v4873_v40  ;;  %1302 = vmatpush1.msra.mxu0 %v3914_v30 }
  0x8a   : > { %v4793_v19 = vand.u32 4294901760, %v3929_v63  ;;  %v1414_v12 = vand.u32 4294901760, %v1413_v36  ;;  %1304 = vmatprep.subr.mxu0 %v3931_v14  ;;  %v1473_v9 = vsub.f32 %v4022_v62, %v4782_v31  ;;  %v1479_v36 = vsub.f32 %v4026_v33, %v4781_v15 }
  0x8b   : > { %1306 = vmatpush1.msra.mxu0 %v3943_v27 }
  0x8c   : > { %v1425_v46 = vsub.f32 %v3929_v63, %v4793_v19  ;;  %1415 = vmatprep.subr.mxu1 %v1414_v12  ;;  %1308 = vmatprep.subr.mxu0 %v4005_v49  ;;  %v1474_v3 = vand.u32 4294901760, %v1473_v9  ;;  %v1480_v4 = vand.u32 4294901760, %v1479_v36 }
  0x8d   : > { %1421 = vmatpush1.msra.mxu1 %v1420_v16  ;;  %1310 = vmatpush1.msra.mxu0 %v4007_v53 }
  0x8e   : > { %v1426_v17 = vand.u32 4294901760, %v1425_v46  ;;  %1312 = vmatprep.subr.mxu0 %v4009_v51  ;;  %v1462_v46 = vand.u32 4294901760, %v1461_v21 }
  0x8f   : > { %1314 = vmatpush1.msra.mxu0 %v4011_v22 }
  0x90   : > { %1427 = vmatprep.subr.mxu1 %v1426_v17  ;;  %1316 = vmatprep.subr.mxu0 %v4013_v7 }
  0x91   : > { %1433 = vmatpush1.msra.mxu1 %v1432_v50 }
  0x92   : > { %1439 = vmatprep.subr.mxu1 %v1438_v44 }
  0x93   : > { %1445 = vmatpush1.msra.mxu1 %v1444_v58 }
  0x94   : > { %1451 = vmatprep.subr.mxu1 %v1450_v29 }
  0x95   : > { %1457 = vmatpush1.msra.mxu1 %v1456_v6 }
  0x96   : > { %1463 = vmatprep.subr.mxu1 %v1462_v46 }
  0x97   : > { %1469 = vmatpush1.msra.mxu1 %v1468_v1 }
  0x98   : > { %1475 = vmatprep.subr.mxu1 %v1474_v3 }
  0x99   : > { %1481 = vmatpush1.msra.mxu1 %v1480_v4 }
  0x9a   : > { %1487 = vmatprep.subr.mxu1 %v1486_v10 }
  0xf6   : > { %v419_v13 = vpop.f32.mrf.mxu0 }
  0xf8   : > { %v421_v12 = vpop.f32.mrf.mxu0 }
  0xfc   : > { %v662_v11 = vpop.f32.mrf.mxu1 }
  0xfd   : > { %v663_v10 = vadd.f32 %v662_v11, %v419_v13 }
  0xfe   : > { %v664_v16 = vpop.f32.mrf.mxu1 }
  0xff   : > { %v665_v17 = vadd.f32 %v664_v16, %v421_v12 }
 0x112   : > { %v430_v18 = vpop.f32.mrf.mxu0 }
 0x114   : > { %v432_v23 = vpop.f32.mrf.mxu0 }
 0x117   : > { %v806_v25 = vpop.f32.mrf.mxu0 }
 0x118   : > { %v669_v50 = vpop.f32.mrf.mxu1  ;;  %v807_v20 = vadd.f32 %v806_v25, %v663_v10 }
 0x119   : > { %v808_v43 = vpop.f32.mrf.mxu0  ;;  %v670_v15 = vadd.f32 %v669_v50, %v430_v18  ;;  %v1277_v50 = vld [vmem:[%s4704_s3 + $0x90] sm:$0xff] }
 0x11a   : > { %v809_v44 = vadd.f32 %v808_v43, %v665_v17  ;;  %v671_v58 = vpop.f32.mrf.mxu1 }
 0x11b   : > { %v672_v29 = vadd.f32 %v671_v58, %v432_v23 }
 0x11d   : > { %v814_v6 = vpop.f32.mrf.mxu0 }
 0x11e   : > { %v815_v17 = vadd.f32 %v814_v6, %v670_v15  ;;  %v4069_v6 = vand.u32 4294901760, %v1277_v50 }
 0x11f   : > { %v816_v21 = vpop.f32.mrf.mxu0 }
 0x120   : > { %v817_v8 = vadd.f32 %v816_v21, %v672_v29  ;;  %v2905_v29 = vld [vmem:[%s4703_s2] ss:$0 sm:$0xff]  ;;  %1318 = vmatpush1.msra.mxu0 %v4069_v6 }
 0x121   : > { %v920_v9 = vpop.f32.mrf.mxu1 }
 0x122   : > { %v921_v31 = vadd.f32 %v920_v9, %v807_v20  ;;  %v1276_v9 = vld [vmem:[%s4704_s3 + $0x88] sm:$0xff] }
 0x123   : > { %v922_v36 = vpop.f32.mrf.mxu1 }
 0x124   : > { %v923_v41 = vadd.f32 %v922_v36, %v809_v44 }
 0x127   : > { %v929_v46 = vpop.f32.mrf.mxu1 }
 0x128   : > { %v930_v44 = vadd.f32 %v929_v46, %v815_v17  ;;  %v4076_v46 = vand.u32 4294901760, %v1276_v9  ;;  %v1274_v17 = vld [vmem:[%s4704_s3 + $0x78] sm:$0xff] }
 0x129   : > { %v931_v1 = vpop.f32.mrf.mxu1 }
 0x12a   : > { %v4055_v3 = vadd.f32 %v931_v1, %v817_v8  ;;  %1320 = vmatprep.subr.mxu0 %v4076_v46 }
 0x12c   : > { %4934 = vst [vmem:[#allocation3_spill] sm:$0xff] %v4055_v3 }
 0x13b   : > { %v1097_v4 = vpop.f32.mrf.mxu0 }
 0x13c   : > { %v1098_v43 = vadd.f32 %v1097_v4, %v921_v31  ;;  %v1275_v4 = vld [vmem:[%s4704_s3 + $0x80] sm:$0xff] }
 0x13d   : > { %v1099_v12 = vpop.f32.mrf.mxu0 }
 0x13e   : > { %v1100_v16 = vadd.f32 %v1099_v12, %v923_v41  ;;  %v4084_v12 = vsub.f32 %v1277_v50, %v4069_v6 }
 0x13f   : > { %v1104_v23 = vpop.f32.mrf.mxu0 }
 0x140   : > { %v1105_v8 = vadd.f32 %v1104_v23, %v930_v44  ;;  %v4095_v23 = vand.u32 4294901760, %v1274_v17 }
 0x144   : > { %v1208_v58 = vpop.f32.mrf.mxu1 }
 0x145   : > { %v1209_v21 = vadd.f32 %v1208_v58, %v1098_v43  ;;  %v4093_v43 = vsub.f32 %v1276_v9, %v4076_v46  ;;  %v1273_v58 = vld [vmem:[%s4704_s3 + $0x70] sm:$0xff] }
 0x146   : > { %v1210_v36 = vpop.f32.mrf.mxu1 }
 0x147   : > { %v1227_v1 = vadd.f32 %v2905_v29, %v1209_v21  ;;  %v4060_v59 = vadd.f32 %v1210_v36, %v1100_v16  ;;  %v4086_v16 = vand.u32 4294901760, %v1275_v4  ;;  %v4784_v21 = vand.u32 4294901760, %v4084_v12 }
 0x148   : > { %v1215_v13 = vpop.f32.mrf.mxu1 }
 0x149   : > { %4935 = vst [vmem:[#allocation4_spill] sm:$0xff] %v4060_v59  ;;  %v1216_v11 = vadd.f32 %v1215_v13, %v1105_v8  ;;  %vm1229_vm0 = vcmp.gt.f32.partialorder %v1227_v1, 0.0  ;;  %v1231_v18 = vmul.f32 0.2, %v1227_v1  ;;  %v4105_v36 = vsub.f32 %v1275_v4, %v4086_v16  ;;  %1322 = vmatpush1.msra.mxu0 %v4086_v16  ;;  %v4937_v13 = vld [vmem:[#allocation24_spill] sm:$0xff] }
 0x14a   : > { %v4107_v8 = vand.u32 4294901760, %v1273_v58  ;;  %1324 = vmatprep.subr.mxu0 %v4095_v23  ;;  %v1491_v50 = vsub.f32 %v4084_v12, %v4784_v21 }
 0x14b   : > { %v1228_v20 = vadd.f32 %v2905_v29, %v1216_v11  ;;  %v4062_v15 = vsel %vm1229_vm0, %v1227_v1, %v1231_v18  ;;  %v4936_v29 = vld [vmem:[#allocation20_spill] sm:$0xff]  ;;  %v1272_v1 = vld [vmem:[%s4704_s3 + $0x68] sm:$0xff]  ;;  %v1248_v11 = vmul.f32 %v4937_v13, %v4937_v13  ;;  %v4788_v18 = vand.u32 4294901760, %v4093_v43 }
 0x14c   : > { %v1235_v31 = vmul.f32 %v4062_v15, %v4062_v15  ;;  %v1247_v44 = vmul.f32 %v4936_v29, %v4936_v29  ;;  %v4791_v9 = vand.u32 4294901760, %v4105_v36  ;;  %v4130_v4 = vsub.f32 %v1273_v58, %v4107_v8  ;;  %1326 = vmatpush1.msra.mxu0 %v4107_v8  ;;  %v1269_v58 = vld [vmem:[%s4704_s3 + $0x50] sm:$0xff] }
 0x14d   : > { %vm1230_vm1 = vcmp.gt.f32.partialorder %v1228_v20, 0.0  ;;  %v1232_v25 = vmul.f32 0.2, %v1228_v20  ;;  %v1497_v29 = vsub.f32 %v4093_v43, %v4788_v18  ;;  %v1492_v5 = vand.u32 4294901760, %v1491_v50 }
 0x14e   : > { %1237 = vadd.xlane.f32.xlu0 %v1235_v31  ;;  %v4119_v31 = vand.u32 4294901760, %v1272_v1  ;;  %4939 = vst [vmem:[#allocation6_spill] sm:$0xff] %v4130_v4  ;;  %v1503_v60 = vsub.f32 %v4105_v36, %v4791_v9  ;;  %v4797_v18 = vand.u32 4294901760, %v4130_v4 }
 0x14f   : > { %v4074_v41 = vsel %vm1230_vm1, %v1228_v20, %v1232_v25  ;;  %v4117_v20 = vsub.f32 %v1274_v17, %v4095_v23  ;;  %v1271_v25 = vld [vmem:[%s4704_s3 + $0x60] sm:$0xff]  ;;  %v1270_v17 = vld [vmem:[%s4704_s3 + $0x58] sm:$0xff]  ;;  %v1498_v26 = vand.u32 4294901760, %v1497_v29  ;;  %1493 = vmatpush1.msra.mxu1 %v1492_v5 }
 0x150   : > { %v1236_v10 = vmul.f32 %v4074_v41, %v4074_v41  ;;  %v4143_v21 = vsub.f32 %v1272_v1, %v4119_v31  ;;  %v4145_v57 = vand.u32 4294901760, %v1270_v17  ;;  %1328 = vmatprep.subr.mxu0 %v4119_v31  ;;  %v1268_v1 = vld [vmem:[%s4704_s3 + $0x48] sm:$0xff]  ;;  %v1504_v38 = vand.u32 4294901760, %v1503_v60 }
 0x151   : > { %4938 = vst [vmem:[#allocation5_spill] sm:$0xff] %v4117_v20  ;;  %v4794_v13 = vand.u32 4294901760, %v4117_v20  ;;  %v1515_v29 = vsub.f32 %v4130_v4, %v4797_v18  ;;  %1499 = vmatprep.subr.mxu1 %v1498_v26  ;;  %v4186_v5 = vand.u32 4294901760, %v1268_v1  ;;  %v1265_v18 = vld [vmem:[%s4704_s3 + $0x30] sm:$0xff] }
 0x152   : > { %1239 = vadd.xlane.f32.xlu0 %v1236_v10  ;;  %v4132_v10 = vand.u32 4294901760, %v1271_v25  ;;  %4940 = vst [vmem:[#allocation8_spill] sm:$0xff] %v4143_v21  ;;  %v4798_v50 = vand.u32 4294901760, %v4143_v21  ;;  %v4167_v9 = vsub.f32 %v1270_v17, %v4145_v57  ;;  %v1266_v17 = vld [vmem:[%s4704_s3 + $0x38] sm:$0xff]  ;;  %1505 = vmatpush1.msra.mxu1 %v1504_v38 }
 0x153   : > { %v1516_v19 = vand.u32 4294901760, %v1515_v29  ;;  %v4208_v29 = vand.u32 4294901760, %v1266_v17 }
 0x154   : > { %v4156_v32 = vsub.f32 %v1271_v25, %v4132_v10  ;;  %1330 = vmatpush1.msra.mxu0 %v4132_v10  ;;  %4942 = vst [vmem:[#allocation10_spill] sm:$0xff] %v4167_v9  ;;  %v1267_v25 = vld [vmem:[%s4704_s3 + $0x40] sm:$0xff]  ;;  %v1521_v55 = vsub.f32 %v4143_v21, %v4798_v50  ;;  %v1264_v50 = vld [vmem:[%s4704_s3 + $0x28] sm:$0xff]  ;;  %v4945_v21 = vand.u32 4294901760, %v4167_v9 }
 0x155   : > { %1332 = vmatprep.subr.mxu0 %v4145_v57  ;;  %v4197_v3 = vand.u32 4294901760, %v1267_v25  ;;  %4947 = vst [vmem:[#allocation17_spill] sm:$0xff] %v4208_v29 }
 0x156   : > { %1249 = vadd.xlane.f32.xlu0 %v1247_v44  ;;  %4941 = vst [vmem:[#allocation9_spill] sm:$0xff] %v4156_v32  ;;  %v1509_v44 = vsub.f32 %v4117_v20, %v4794_v13  ;;  %v4177_v13 = vand.u32 4294901760, %v1269_v58  ;;  %v4943_v59 = vand.u32 4294901760, %v4156_v32  ;;  %v1522_v60 = vand.u32 4294901760, %v1521_v55 }
 0x157   : > { %v1533_v38 = vsub.f32 %v4167_v9, %v4945_v21  ;;  %v4216_v55 = vsub.f32 %v1267_v25, %v4197_v3  ;;  %v1262_v21 = vld [vmem:[%s4704_s3 + $0x18] sm:$0xff] }
 0x158   : > { %v1510_v34 = vand.u32 4294901760, %v1509_v44  ;;  %v1527_v26 = vsub.f32 %v4156_v32, %v4943_v59  ;;  %v4195_v44 = vsub.f32 %v1269_v58, %v4177_v13  ;;  %v1263_v59 = vld [vmem:[%s4704_s3 + $0x20] sm:$0xff]  ;;  %1334 = vmatpush1.msra.mxu0 %v4177_v13  ;;  %v4218_v32 = vand.u32 4294901760, %v1265_v18 }
 0x159   : > { %4948 = vst [vmem:[#allocation18_spill] sm:$0xff] %v4216_v55  ;;  %1336 = vmatprep.subr.mxu0 %v4186_v5 }
 0x15a   : > { %1251 = vadd.xlane.f32.xlu0 %v1248_v11  ;;  %4944 = vst [vmem:[#allocation11_spill] sm:$0xff] %v4195_v44  ;;  %1511 = vmatprep.subr.mxu1 %v1510_v34  ;;  %v4206_v11 = vsub.f32 %v1268_v1, %v4186_v5  ;;  %v1528_v58 = vand.u32 4294901760, %v1527_v26  ;;  %v4809_v34 = vand.u32 4294901760, %v4195_v44  ;;  %4949 = vst [vmem:[#allocation19_spill] sm:$0xff] %v4218_v32  ;;  %v1534_v1 = vand.u32 4294901760, %v1533_v38 }
 0x15b   : > { %1517 = vmatpush1.msra.mxu1 %v1516_v19  ;;  %v4226_v19 = vsub.f32 %v1266_v17, %v4208_v29  ;;  %v4228_v26 = vand.u32 4294901760, %v1264_v50  ;;  %1338 = vmatpush1.msra.mxu0 %v4197_v3  ;;  %v4236_v20 = vsub.f32 %v1265_v18, %v4218_v32  ;;  %v1261_v18 = vld [vmem:[%s4704_s3 + $0x10] sm:$0xff] }
 0x15c   : > { %4946 = vst [vmem:[#allocation16_spill] sm:$0xff] %v4206_v11  ;;  %1523 = vmatprep.subr.mxu1 %v1522_v60  ;;  %v4812_v9 = vand.u32 4294901760, %v4206_v11  ;;  %v1539_v25 = vsub.f32 %v4195_v44, %v4809_v34  ;;  %v4238_v60 = vand.u32 4294901760, %v1263_v59  ;;  %1340 = vmatprep.subr.mxu0 %v4208_v29  ;;  %v4248_v34 = vand.u32 4294901760, %v1262_v21 }
 0x15d   : > { %4950 = vst [vmem:[#allocation7_spill] sm:$0xff] %v4226_v19  ;;  %4951 = vst [vmem:[#allocation12_spill] sm:$0xff] %v4228_v26  ;;  %1529 = vmatpush1.msra.mxu1 %v1528_v58  ;;  %v4246_v58 = vsub.f32 %v1264_v50, %v4228_v26  ;;  %1342 = vmatpush1.msra.mxu0 %v4218_v32  ;;  %v1260_v50 = vld [vmem:[%s4704_s3 + $0x8] sm:$0xff]  ;;  %v4956_v29 = vand.u32 4294901760, %v4226_v19 }
 0x15e   : > { %4952 = vst [vmem:[#allocation22_spill] sm:$0xff] %v4236_v20  ;;  %4953 = vst [vmem:[#allocation13_spill] sm:$0xff] %v4238_v60  ;;  %1535 = vmatprep.subr.mxu1 %v1534_v1  ;;  %v1545_v17 = vsub.f32 %v4206_v11, %v4812_v9  ;;  %v1540_v4 = vand.u32 4294901760, %v1539_v25  ;;  %v4955_v1 = vand.u32 4294901760, %v4216_v55  ;;  %v4259_v38 = vsub.f32 %v1263_v59, %v4238_v60  ;;  %v1259_v59 = vld [vmem:[%s4704_s3] sm:$0xff] }
 0x15f   : > { %4954 = vst [vmem:[#allocation23_spill] sm:$0xff] %v4248_v34  ;;  %1344 = vmatprep.subr.mxu0 %v4228_v26  ;;  %v1557_v25 = vsub.f32 %v4226_v19, %v4956_v29  ;;  %v4834_v32 = vand.u32 4294901760, %v4246_v58  ;;  %v4280_v29 = vand.u32 4294901760, %v1261_v18 }
 0x160   : > { %v1551_v44 = vsub.f32 %v4216_v55, %v4955_v1  ;;  %v1546_v11 = vand.u32 4294901760, %v1545_v17  ;;  %v4270_v1 = vsub.f32 %v1262_v21, %v4248_v34  ;;  %1346 = vmatpush1.msra.mxu0 %v4238_v60  ;;  %1541 = vmatpush1.msra.mxu1 %v1540_v4  ;;  %v4957_v55 = vand.u32 4294901760, %v4236_v20 }
 0x161   : > { %v4831_v26 = vand.u32 4294901760, %v4259_v38  ;;  %1348 = vmatprep.subr.mxu0 %v4248_v34  ;;  %v1558_v21 = vand.u32 4294901760, %v1557_v25  ;;  %v1569_v19 = vsub.f32 %v4246_v58, %v4834_v32  ;;  %v4287_v4 = vand.u32 4294901760, %v1260_v50 }
 0x162   : > { %v1552_v9 = vand.u32 4294901760, %v1551_v44  ;;  %v1563_v17 = vsub.f32 %v4236_v20, %v4957_v55  ;;  %1547 = vmatprep.subr.mxu1 %v1546_v11  ;;  %v4832_v60 = vand.u32 4294901760, %v4270_v1  ;;  %v4293_v20 = vsub.f32 %v1261_v18, %v4280_v29  ;;  %1350 = vmatpush1.msra.mxu0 %v4280_v29 }
 0x163   : > { %v1575_v55 = vsub.f32 %v4259_v38, %v4831_v26  ;;  %v4295_v34 = vand.u32 4294901760, %v1259_v59  ;;  %v1570_v11 = vand.u32 4294901760, %v1569_v19  ;;  %1352 = vmatprep.subr.mxu0 %v4287_v4 }
 0x164   : > { %1553 = vmatpush1.msra.mxu1 %v1552_v9  ;;  %v1564_v44 = vand.u32 4294901760, %v1563_v17  ;;  %v1581_v25 = vsub.f32 %v4270_v1, %v4832_v60  ;;  %v4302_v9 = vsub.f32 %v1260_v50, %v4287_v4  ;;  %v4833_v18 = vand.u32 4294901760, %v4293_v20 }
 0x165   : > { %1559 = vmatprep.subr.mxu1 %v1558_v21  ;;  %v1576_v17 = vand.u32 4294901760, %v1575_v55  ;;  %v4307_v26 = vsub.f32 %v1259_v59, %v4295_v34  ;;  %1354 = vmatpush1.msra.mxu0 %v4295_v34 }
 0x166   : > { %4958 = vst [vmem:[#allocation14_spill] sm:$0xff] %v4302_v9  ;;  %1565 = vmatpush1.msra.mxu1 %v1564_v44  ;;  %v1582_v19 = vand.u32 4294901760, %v1581_v25  ;;  %v4836_v21 = vand.u32 4294901760, %v4302_v9  ;;  %1651 = vmatprep.subr.mxu0 %v3923_v39  ;;  %v1587_v50 = vsub.f32 %v4293_v20, %v4833_v18 }
 0x167   : > { %1571 = vmatprep.subr.mxu1 %v1570_v11  ;;  %v4839_v44 = vand.u32 4294901760, %v4307_v26 }
 0x168   : > { %1577 = vmatpush1.msra.mxu1 %v1576_v17  ;;  %v1593_v59 = vsub.f32 %v4302_v9, %v4836_v21  ;;  %v1588_v55 = vand.u32 4294901760, %v1587_v50 }
 0x169   : > { %1583 = vmatprep.subr.mxu1 %v1582_v19  ;;  %v1599_v11 = vsub.f32 %v4307_v26, %v4839_v44  ;;  %v4970_v44 = vld [vmem:[#allocation23_spill] sm:$0xff] }
 0x16a   : > { %v1594_v25 = vand.u32 4294901760, %v1593_v59  ;;  %1589 = vmatpush1.msra.mxu1 %v1588_v55 }
 0x16b   : > { %v1600_v60 = vand.u32 4294901760, %v1599_v11 }
 0x16c   : > { %1595 = vmatprep.subr.mxu1 %v1594_v25  ;;  %v4961_v25 = vld [vmem:[#allocation5_spill] sm:$0xff] }
 0x16d   : > { %1601 = vmatpush1.msra.mxu1 %v1600_v60 }
 0x16e   : > { %1795 = vmatprep.subr.mxu1 %v3895_v42 }
 0x1d7   : > { %v1238_v17 = vpop.xlane.xlu0 %1237 }
 0x1d8   : > { %v1241_v18 = vmax.f32 %v1238_v17, 1e-24  ;;  %v4962_v17 = vld [vmem:[#allocation17_spill] sm:$0xff] }
 0x1da   : > { %3061 = vrsqrt.f32 %v1241_v18 }
 0x1db   : > { %v1240_v19 = vpop.xlane.xlu0 %1239 }
 0x1dc   : > { %v1242_v32 = vmax.f32 %v1240_v19, 1e-24  ;;  %v4963_v19 = vld [vmem:[#allocation6_spill] sm:$0xff] }
 0x1de   : > { %3063 = vrsqrt.f32 %v1242_v32 }
 0x1e7   : > { %v3062_v39 = vpop.eup %3061 }
 0x1e8   : > { %v1245_v50 = vmul.f32 %v3062_v39, %v4062_v15 }
 0x1ea   : > { %v4324_v21 = vand.u32 4294901760, %v1245_v50 }
 0x1eb   : > { %v3064_v9 = vpop.eup %3063 }
 0x1ec   : > { %4959 = vst [vmem:[#allocation21_spill] sm:$0xff] %v4324_v21  ;;  %v4327_v59 = vsub.f32 %v1245_v50, %v4324_v21  ;;  %1636 = vmatmul.mubr.f32.vlgmr.msra.gmra.mxu1 %v4324_v21  ;;  %v1246_v60 = vmul.f32 %v3064_v9, %v4074_v41  ;;  %v4964_v50 = vld [vmem:[#allocation19_spill] sm:$0xff] }
 0x1ed   : > { %1797 = vmatpush1.msra.mxu1 %v3897_v61  ;;  %1641 = vmatprep.mubr.f32.mxu1 %v4873_v40  ;;  %v4974_v21 = vld [vmem:[#allocation7_spill] sm:$0xff] }
 0x1ee   : > { %1799 = vmatprep.subr.mxu1 %v3899_v37  ;;  %v4334_v32 = vand.u32 4294901760, %v1246_v60  ;;  %v4841_v39 = vand.u32 4294901760, %v4327_v59 }
 0x1ef   : > { %1801 = vmatpush1.msra.mxu1 %v3910_v54 }
 0x1f0   : > { %4960 = vst [vmem:[#allocation15_spill] sm:$0xff] %v4334_v32  ;;  %1803 = vmatprep.subr.mxu1 %v3912_v28  ;;  %1643 = vmatmul.mubr.f32.gmra.mxu1 %v4334_v32  ;;  %v1391_v15 = vsub.f32 %v4327_v59, %v4841_v39  ;;  %v4344_v41 = vsub.f32 %v1246_v60, %v4334_v32  ;;  %v4965_v60 = vld [vmem:[#allocation8_spill] sm:$0xff]  ;;  %v4973_v32 = vld [vmem:[#allocation18_spill] sm:$0xff] }
 0x1f1   : > { %1805 = vmatpush1.msra.mxu1 %v3914_v30  ;;  %1890 = vmatprep.mubr.f32.mxu1 %v4873_v40  ;;  %v4972_v39 = vld [vmem:[#allocation16_spill] sm:$0xff] }
 0x1f2   : > { %1807 = vmatprep.subr.mxu1 %v3931_v14  ;;  %v1392_v9 = vand.u32 4294901760, %v1391_v15  ;;  %v4840_v18 = vand.u32 4294901760, %v4344_v41  ;;  %v4966_v15 = vld [vmem:[#allocation12_spill] sm:$0xff] }
 0x1f3   : > { %1809 = vmatpush1.msra.mxu1 %v3943_v27 }
 0x1f4   : > { %1811 = vmatprep.subr.mxu1 %v4005_v49  ;;  %1393 = vmatmul.mubr.f32.vlgmr.msra.gmra.mxu0 %v1392_v9  ;;  %v1402_v55 = vsub.f32 %v4344_v41, %v4840_v18  ;;  %v4967_v9 = vld [vmem:[#allocation9_spill] sm:$0xff]  ;;  %v4971_v18 = vld [vmem:[#allocation11_spill] sm:$0xff] }
 0x1f5   : > { %1654 = vmatpush1.msra.mxu0 %v3926_v56  ;;  %1813 = vmatpush1.msra.mxu1 %v4007_v53 }
 0x1f6   : > { %1657 = vmatprep.subr.mxu0 %v3929_v63  ;;  %1815 = vmatprep.subr.mxu1 %v4009_v51  ;;  %v1403_v11 = vand.u32 4294901760, %v1402_v55  ;;  %v4968_v55 = vld [vmem:[#allocation13_spill] sm:$0xff] }
 0x1f7   : > { %1660 = vmatpush1.msra.mxu0 %v3935_v52  ;;  %1817 = vmatpush1.msra.mxu1 %v4011_v22 }
 0x1f8   : > { %1398 = vmatprep.mubr.f32.mxu0 %v4873_v40  ;;  %1663 = vmatprep.subr.mxu0 %v3938_v2 }
 0x1f9   : > { %1819 = vmatprep.subr.mxu1 %v4013_v7  ;;  %1404 = vmatmul.mubr.f32.gmra.mxu0 %v1403_v11  ;;  %v4969_v11 = vld [vmem:[#allocation10_spill] sm:$0xff] }
 0x1fa   : > { %1666 = vmatpush1.msra.mxu0 %v3941_v45  ;;  %1821 = vmatpush1.msra.mxu1 %v4069_v6 }
 0x1fb   : > { %1669 = vmatprep.subr.mxu0 %v3950_v24  ;;  %1823 = vmatprep.subr.mxu1 %v4076_v46 }
 0x1fc   : > { %1672 = vmatpush1.msra.mxu0 %v3957_v35  ;;  %1825 = vmatpush1.msra.mxu1 %v4086_v16 }
 0x1fd   : > { %1675 = vmatprep.subr.mxu0 %v4016_v47  ;;  %1827 = vmatprep.subr.mxu1 %v4095_v23 }
 0x1fe   : > { %1678 = vmatpush1.msra.mxu0 %v4019_v48  ;;  %1829 = vmatpush1.msra.mxu1 %v4107_v8 }
 0x1ff   : > { %1681 = vmatprep.subr.mxu0 %v4022_v62  ;;  %1831 = vmatprep.subr.mxu1 %v4119_v31 }
 0x200   : > { %1684 = vmatpush1.msra.mxu0 %v4026_v33  ;;  %1833 = vmatpush1.msra.mxu1 %v4132_v10 }
 0x201   : > { %1687 = vmatprep.subr.mxu0 %v4029_v0  ;;  %1835 = vmatprep.subr.mxu1 %v4145_v57 }
 0x202   : > { %1690 = vmatpush1.msra.mxu0 %v4084_v12  ;;  %1837 = vmatpush1.msra.mxu1 %v4177_v13 }
 0x203   : > { %1693 = vmatprep.subr.mxu0 %v4093_v43  ;;  %1839 = vmatprep.subr.mxu1 %v4186_v5 }
 0x204   : > { %1696 = vmatpush1.msra.mxu0 %v4105_v36  ;;  %1841 = vmatpush1.msra.mxu1 %v4197_v3 }
 0x205   : > { %1699 = vmatprep.subr.mxu0 %v4961_v25  ;;  %1843 = vmatprep.subr.mxu1 %v4962_v17 }
 0x206   : > { %1702 = vmatpush1.msra.mxu0 %v4963_v19  ;;  %1845 = vmatpush1.msra.mxu1 %v4964_v50 }
 0x207   : > { %1705 = vmatprep.subr.mxu0 %v4965_v60  ;;  %1847 = vmatprep.subr.mxu1 %v4966_v15 }
 0x208   : > { %1708 = vmatpush1.msra.mxu0 %v4967_v9  ;;  %1849 = vmatpush1.msra.mxu1 %v4968_v55  ;;  %v4975_v55 = vand.u32 4294901760, %v4327_v59 }
 0x209   : > { %1711 = vmatprep.subr.mxu0 %v4969_v11  ;;  %1851 = vmatprep.subr.mxu1 %v4970_v44  ;;  %v4976_v44 = vld [vmem:[#allocation22_spill] sm:$0xff] }
 0x20a   : > { %1714 = vmatpush1.msra.mxu0 %v4971_v18  ;;  %1853 = vmatpush1.msra.mxu1 %v4280_v29 }
 0x20b   : > { %1717 = vmatprep.subr.mxu0 %v4972_v39  ;;  %1855 = vmatprep.subr.mxu1 %v4287_v4 }
 0x20c   : > { %1720 = vmatpush1.msra.mxu0 %v4973_v32  ;;  %1857 = vmatpush1.msra.mxu1 %v4295_v34 }
 0x20d   : > { %1723 = vmatprep.subr.mxu0 %v4974_v21  ;;  %1894 = vmatmul.mubr.f32.vlgmr.msra.gmra.mxu1 %v4975_v55  ;;  %v4977_v55 = vand.u32 4294901760, %v4344_v41 }
 0x20e   : > { %2085 = vmatprep.subr.mxu1 %v3895_v42  ;;  %1726 = vmatpush1.msra.mxu0 %v4976_v44  ;;  %v4978_v42 = vld [vmem:[#allocation14_spill] sm:$0xff] }
 0x20f   : > { %2087 = vmatpush1.msra.mxu1 %v3897_v61  ;;  %1729 = vmatprep.subr.mxu0 %v4246_v58  ;;  %v4979_v61 = vld [vmem:[#allocation2_spill] sm:$0xff] }
 0x210   : > { %2089 = vmatprep.subr.mxu1 %v3899_v37  ;;  %1732 = vmatpush1.msra.mxu0 %v4259_v38  ;;  %v4980_v37 = vand.u32 4294901760, %v4979_v61 }
 0x211   : > { %1899 = vmatprep.mubr.f32.mxu1 %v4873_v40  ;;  %2091 = vmatpush1.msra.mxu1 %v3910_v54  ;;  %v4981_v54 = vand.u32 4294901760, %v3926_v56  ;;  %v4985_v56 = vand.u32 4294901760, %v3941_v45  ;;  %v4989_v45 = vand.u32 4294901760, %v4019_v48  ;;  %v4999_v48 = vand.u32 4294901760, %v4967_v9 }
 0x212   : > { %1735 = vmatprep.subr.mxu0 %v4270_v1  ;;  %1903 = vmatmul.mubr.f32.gmra.mxu1 %v4977_v55 }
 0x213   : > { %2093 = vmatprep.subr.mxu1 %v3912_v28  ;;  %1738 = vmatpush1.msra.mxu0 %v4293_v20  ;;  %v4982_v28 = vand.u32 4294901760, %v3929_v63  ;;  %v4986_v63 = vand.u32 4294901760, %v3950_v24  ;;  %v4991_v24 = vand.u32 4294901760, %v4026_v33  ;;  %v5001_v33 = vand.u32 4294901760, %v4969_v11 }
 0x214   : > { %2095 = vmatpush1.msra.mxu1 %v3914_v30  ;;  %1741 = vmatprep.subr.mxu0 %v4978_v42  ;;  %v4983_v30 = vand.u32 4294901760, %v3935_v52  ;;  %v4987_v52 = vand.u32 4294901760, %v3957_v35  ;;  %v4992_v35 = vand.u32 4294901760, %v4029_v0  ;;  %v5002_v0 = vld [vmem:[#allocation23_spill] sm:$0xff] }
 0x215   : > { %2097 = vmatprep.subr.mxu1 %v3931_v14  ;;  %1744 = vmatpush1.msra.mxu0 %v4307_v26  ;;  %v4984_v14 = vand.u32 4294901760, %v3938_v2  ;;  %v4988_v2 = vand.u32 4294901760, %v4016_v47  ;;  %v4998_v47 = vand.u32 4294901760, %v4965_v60 }
 0x216   : > { %1777 = vmatprep.mubr.f32.mxu0 %v4873_v40  ;;  %2099 = vmatpush1.msra.mxu1 %v3943_v27  ;;  %v4990_v27 = vand.u32 4294901760, %v4022_v62  ;;  %v5000_v62 = vld [vmem:[#allocation13_spill] sm:$0xff] }
 0x217   : > { %1780 = vmatmul.mubr.f32.vlgmr.msra.gmra.mxu0 %v4327_v59  ;;  %1912 = vmatprep.subr.mxu0 %v4980_v37 }
 0x218   : > { %2101 = vmatprep.subr.mxu1 %v4005_v49  ;;  %1916 = vmatpush1.msra.mxu0 %v4981_v54  ;;  %v4993_v49 = vand.u32 4294901760, %v4084_v12  ;;  %v5007_v12 = vld [vmem:[#allocation21_spill] sm:$0xff] }
 0x219   : > { %2103 = vmatpush1.msra.mxu1 %v4007_v53  ;;  %1920 = vmatprep.subr.mxu0 %v4982_v28  ;;  %v4994_v53 = vand.u32 4294901760, %v4093_v43  ;;  %v5009_v43 = vand.u32 4294901760, %v4246_v58 }
 0x21a   : > { %2105 = vmatprep.subr.mxu1 %v4009_v51  ;;  %1785 = vmatprep.mubr.f32.mxu0 %v4873_v40  ;;  %v4995_v51 = vand.u32 4294901760, %v4105_v36  ;;  %v5011_v36 = vand.u32 4294901760, %v4270_v1 }
 0x21b   : > { %1924 = vmatpush1.msra.mxu0 %v4983_v30  ;;  %2107 = vmatpush1.msra.mxu1 %v4011_v22  ;;  %v4996_v22 = vand.u32 4294901760, %v4961_v25 }
 0x21c   : > { %1788 = vmatmul.mubr.f32.gmra.mxu0 %v4344_v41  ;;  %1928 = vmatprep.subr.mxu0 %v4984_v14 }
 0x21d   : > { %2109 = vmatprep.subr.mxu1 %v4013_v7  ;;  %1932 = vmatpush1.msra.mxu0 %v4985_v56  ;;  %v4997_v7 = vand.u32 4294901760, %v4963_v19  ;;  %v2906_v56 = vld [vmem:[%s4705_s4] ss:$0 sm:$0xff] }
 0x21e   : > { %2111 = vmatpush1.msra.mxu1 %v4069_v6  ;;  %1936 = vmatprep.subr.mxu0 %v4986_v63  ;;  %v5005_v6 = vand.u32 4294901760, %v4973_v32 }
 0x21f   : > { %2113 = vmatprep.subr.mxu1 %v4076_v46  ;;  %1940 = vmatpush1.msra.mxu0 %v4987_v52  ;;  %v5006_v46 = vand.u32 4294901760, %v4974_v21 }
 0x220   : > { %2115 = vmatpush1.msra.mxu1 %v4086_v16  ;;  %1944 = vmatprep.subr.mxu0 %v4988_v2  ;;  %v5008_v16 = vand.u32 4294901760, %v4976_v44 }
 0x221   : > { %2117 = vmatprep.subr.mxu1 %v4095_v23  ;;  %1948 = vmatpush1.msra.mxu0 %v4989_v45  ;;  %v5010_v23 = vand.u32 4294901760, %v4259_v38  ;;  %v4525_v38 = vpop.f32.mrf.mxu0 }
 0x222   : > { %2119 = vmatpush1.msra.mxu1 %v4107_v8  ;;  %1952 = vmatprep.subr.mxu0 %v4990_v27  ;;  %v5012_v8 = vld [vmem:[#allocation15_spill] sm:$0xff] }
 0x223   : > { %2121 = vmatprep.subr.mxu1 %v4119_v31  ;;  %1956 = vmatpush1.msra.mxu0 %v4991_v24  ;;  %v5013_v31 = vand.u32 4294901760, %v4293_v20 }
 0x224   : > { %2123 = vmatpush1.msra.mxu1 %v4132_v10  ;;  %1960 = vmatprep.subr.mxu0 %v4992_v35  ;;  %v5014_v10 = vand.u32 4294901760, %v4978_v42 }
 0x225   : > { %2125 = vmatprep.subr.mxu1 %v4145_v57  ;;  %1964 = vmatpush1.msra.mxu0 %v4993_v49  ;;  %v5003_v57 = vand.u32 4294901760, %v4971_v18 }
 0x226   : > { %2127 = vmatpush1.msra.mxu1 %v4177_v13  ;;  %1968 = vmatprep.subr.mxu0 %v4994_v53  ;;  %v5015_v13 = vand.u32 4294901760, %v4307_v26 }
 0x227   : > { %2129 = vmatprep.subr.mxu1 %v4186_v5  ;;  %1972 = vmatpush1.msra.mxu0 %v4995_v51  ;;  %v4523_v5 = vpop.f32.mrf.mxu1 }
 0x228   : > { %2131 = vmatpush1.msra.mxu1 %v4197_v3  ;;  %1976 = vmatprep.subr.mxu0 %v4996_v22  ;;  %v5004_v3 = vand.u32 4294901760, %v4972_v39 }
 0x229   : > { %2133 = vmatprep.subr.mxu1 %v4962_v17  ;;  %1980 = vmatpush1.msra.mxu0 %v4997_v7  ;;  %v2907_v7 = vld [vmem:[%s4706_s5] ss:$0 sm:$0xff] }
 0x22a   : > { %2135 = vmatpush1.msra.mxu1 %v4964_v50  ;;  %1984 = vmatprep.subr.mxu0 %v4998_v47 }
 0x22b   : > { %2137 = vmatprep.subr.mxu1 %v4966_v15  ;;  %1988 = vmatpush1.msra.mxu0 %v4999_v48 }
 0x22c   : > { %2139 = vmatpush1.msra.mxu1 %v5000_v62  ;;  %1992 = vmatprep.subr.mxu0 %v5001_v33 }
 0x22d   : > { %2141 = vmatprep.subr.mxu1 %v5002_v0  ;;  %1996 = vmatpush1.msra.mxu0 %v5003_v57 }
 0x22e   : > { %2143 = vmatpush1.msra.mxu1 %v4280_v29  ;;  %2000 = vmatprep.subr.mxu0 %v5004_v3 }
 0x22f   : > { %2145 = vmatprep.subr.mxu1 %v4287_v4  ;;  %2004 = vmatpush1.msra.mxu0 %v5005_v6 }
 0x230   : > { %2147 = vmatpush1.msra.mxu1 %v4295_v34  ;;  %2180 = vmatprep.mubr.f32.mxu1 %v4873_v40 }
 0x231   : > { %2008 = vmatprep.subr.mxu0 %v5006_v46  ;;  %2182 = vmatmul.mubr.f32.vlgmr.msra.gmra.mxu1 %v5007_v12 }
 0x232   : > { %2012 = vmatpush1.msra.mxu0 %v5008_v16  ;;  %2187 = vmatprep.mubr.f32.mxu1 %v4873_v40 }
 0x233   : > { %2016 = vmatprep.subr.mxu0 %v5009_v43  ;;  %2069 = vmatprep.mubr.f32.mxu0 %v4873_v40 }
 0x234   : > { %2020 = vmatpush1.msra.mxu0 %v5010_v23 }
 0x235   : > { %2024 = vmatprep.subr.mxu0 %v5011_v36  ;;  %2189 = vmatmul.mubr.f32.gmra.mxu1 %v5012_v8 }
 0x236   : > { %2028 = vmatpush1.msra.mxu0 %v5013_v31 }
 0x237   : > { %2032 = vmatprep.subr.mxu0 %v5014_v10 }
 0x238   : > { %2036 = vmatpush1.msra.mxu0 %v5015_v13 }
 0x239   : > { %2071 = vmatmul.mubr.f32.vlgmr.msra.gmra.mxu0 %v5007_v12 }
 0x23a   : > { %2076 = vmatprep.mubr.f32.mxu0 %v4873_v40 }
 0x23d   : > { %2078 = vmatmul.mubr.f32.gmra.mxu0 %v5012_v8 }
 0x2ac   : > { %v1637_v34 = vpop.f32.mrf.mxu1 }
 0x2ae   : > { %v1639_v58 = vpop.f32.mrf.mxu1 }
 0x2b0   : > { %v1644_v29 = vpop.f32.mrf.mxu1 }
 0x2b2   : > { %v1646_v44 = vpop.f32.mrf.mxu1 }
 0x2b4   : > { %v1394_v20 = vpop.f32.mrf.mxu0 }
 0x2b5   : > { %v1638_v11 = vadd.f32 %v1637_v34, %v1394_v20 }
 0x2b6   : > { %v1396_v1 = vpop.f32.mrf.mxu0 }
 0x2b7   : > { %v1640_v4 = vadd.f32 %v1639_v58, %v1396_v1 }
 0x2b9   : > { %v1405_v21 = vpop.f32.mrf.mxu0 }
 0x2ba   : > { %v1645_v42 = vadd.f32 %v1644_v29, %v1405_v21 }
 0x2bb   : > { %v1407_v26 = vpop.f32.mrf.mxu0 }
 0x2bc   : > { %v1647_v59 = vadd.f32 %v1646_v44, %v1407_v26 }
 0x2cd   : > { %v1895_v32 = vpop.f32.mrf.mxu1 }
 0x2cf   : > { %v1897_v41 = vpop.f32.mrf.mxu1 }
 0x2d2   : > { %v1904_v25 = vpop.f32.mrf.mxu1 }
 0x2d4   : > { %v1906_v15 = vpop.f32.mrf.mxu1 }
 0x2d7   : > { %v1781_v39 = vpop.f32.mrf.mxu0 }
 0x2d8   : > { %v1782_v55 = vadd.f32 %v1781_v39, %v1638_v11  ;;  %v2277_v11 = vld [vmem:[%s4707_s6 + $0x28] sm:$0xff] }
 0x2d9   : > { %v1783_v40 = vpop.f32.mrf.mxu0 }
 0x2da   : > { %v1784_v18 = vadd.f32 %v1783_v40, %v1640_v4  ;;  %v1896_v54 = vadd.f32 %v1895_v32, %v1782_v55  ;;  %v4544_v55 = vand.u32 4294901760, %v2277_v11 }
 0x2dc   : > { %v1789_v17 = vpop.f32.mrf.mxu0  ;;  %v1898_v19 = vadd.f32 %v1897_v41, %v1784_v18  ;;  %2962 = vmatprep.subr.mxu0 %v4544_v55 }
 0x2dd   : > { %v1790_v37 = vadd.f32 %v1789_v17, %v1645_v42  ;;  %v2276_v42 = vld [vmem:[%s4707_s6 + $0x20] sm:$0xff]  ;;  %2963 = vmatpush3.msra.mxu0 %v4544_v55 }
 0x2de   : > { %v1791_v50 = vpop.f32.mrf.mxu0 }
 0x2df   : > { %v1792_v60 = vadd.f32 %v1791_v50, %v1647_v59  ;;  %v1905_v45 = vadd.f32 %v1904_v25, %v1790_v37  ;;  %v4552_v37 = vand.u32 4294901760, %v2276_v42 }
 0x2e1   : > { %v1907_v9 = vadd.f32 %v1906_v15, %v1792_v60  ;;  %2964 = vmatprep.subr.mxu0 %v4552_v37 }
 0x2e2   : > { %2965 = vmatpush3.msra.mxu0 %v4552_v37 }
 0x2f1   : > { %v2183_v61 = vpop.f32.mrf.mxu1 }
 0x2f3   : > { %v2185_v14 = vpop.f32.mrf.mxu1 }
 0x2f5   : > { %v2190_v53 = vpop.f32.mrf.mxu1 }
 0x2f7   : > { %v2192_v29 = vpop.f32.mrf.mxu1 }
 0x2f9   : > { %v2072_v28 = vpop.f32.mrf.mxu0 }
 0x2fa   : > { %v2073_v30 = vadd.f32 %v2072_v28, %v1896_v54  ;;  %v2275_v54 = vld [vmem:[%s4707_s6 + $0x18] sm:$0xff] }
 0x2fb   : > { %v2074_v63 = vpop.f32.mrf.mxu0 }
 0x2fc   : > { %v2184_v52 = vadd.f32 %v2183_v61, %v2073_v30  ;;  %v2075_v2 = vadd.f32 %v2074_v63, %v1898_v19  ;;  %v4550_v61 = vsub.f32 %v2277_v11, %v4544_v55  ;;  %v4563_v30 = vsub.f32 %v2276_v42, %v4552_v37 }
 0x2fd   : > { %v2079_v27 = vpop.f32.mrf.mxu0 }
 0x2fe   : > { %v2202_v24 = vadd.f32 %v2906_v56, %v2184_v52  ;;  %v2186_v35 = vadd.f32 %v2185_v14, %v2075_v2  ;;  %v2080_v49 = vadd.f32 %v2079_v27, %v1905_v45  ;;  %v4560_v28 = vand.u32 4294901760, %v4550_v61  ;;  %v2273_v27 = vld [vmem:[%s4707_s6 + $0x8] sm:$0xff] }
 0x2ff   : > { %v2081_v31 = vpop.f32.mrf.mxu0  ;;  %v4565_v14 = vand.u32 4294901760, %v2275_v54  ;;  %v4575_v52 = vand.u32 4294901760, %v4563_v30 }
 0x300   : > { %v2191_v51 = vadd.f32 %v2190_v53, %v2080_v49  ;;  %vm2204_vm2 = vcmp.gt.f32.partialorder %v2202_v24, 0.0  ;;  %v2206_v22 = vmul.f32 0.2, %v2202_v24  ;;  %v2082_v13 = vadd.f32 %v2081_v31, %v1907_v9 }
 0x301   : > { %v2399_v63 = vsub.f32 %v4550_v61, %v4560_v28  ;;  %v4578_v2 = vsub.f32 %v2275_v54, %v4565_v14  ;;  %2966 = vmatprep.subr.mxu0 %v4565_v14 }
 0x302   : > { %v2203_v47 = vadd.f32 %v2906_v56, %v2191_v51  ;;  %v2208_v48 = vsel %vm2204_vm2, %v2202_v24, %v2206_v22  ;;  %v2193_v4 = vadd.f32 %v2192_v29, %v2082_v13  ;;  %v2274_v56 = vld [vmem:[%s4707_s6 + $0x10] sm:$0xff]  ;;  %2967 = vmatpush3.msra.mxu0 %v4565_v14  ;;  %v4596_v51 = vand.u32 4294901760, %v2273_v27  ;;  %v2272_v22 = vld [vmem:[%s4707_s6] sm:$0xff] }
 0x303   : > { %v2217_v62 = vmul.f32 %v2907_v7, %v2208_v48  ;;  %v4580_v45 = vand.u32 4294901760, %v2274_v56  ;;  %v2400_v24 = vand.u32 4294901760, %v2399_v63  ;;  %v4590_v49 = vand.u32 4294901760, %v4578_v2 }
 0x304   : > { %vm2205_vm3 = vcmp.gt.f32.partialorder %v2203_v47, 0.0  ;;  %v2207_v33 = vmul.f32 0.2, %v2203_v47 }
 0x305   : > { %2219 = vadd.xlane.f32.xlu1 %v2217_v62  ;;  %v4593_v53 = vsub.f32 %v2274_v56, %v4580_v45  ;;  %2968 = vmatprep.subr.mxu0 %v4580_v45  ;;  %v4607_v62 = vand.u32 4294901760, %v2272_v22 }
 0x306   : > { %v2209_v0 = vsel %vm2205_vm3, %v2203_v47, %v2207_v33  ;;  %2969 = vmatpush3.msra.mxu0 %v4580_v45  ;;  %2977 = vmatprep.subr.mxu1 %v2400_v24  ;;  %v2413_v47 = vsub.f32 %v4578_v2, %v4590_v49  ;;  %v4610_v33 = vsub.f32 %v2273_v27, %v4596_v51 }
 0x307   : > { %v2218_v57 = vmul.f32 %v2907_v7, %v2209_v0  ;;  %v4605_v48 = vand.u32 4294901760, %v4593_v53  ;;  %2978 = vmatpush3.msra.mxu1 %v2400_v24  ;;  %2970 = vmatprep.subr.mxu0 %v4596_v51 }
 0x308   : > { %v2414_v0 = vand.u32 4294901760, %v2413_v47  ;;  %2971 = vmatpush3.msra.mxu0 %v4596_v51 }
 0x309   : > { %2221 = vadd.xlane.f32.xlu1 %v2218_v57  ;;  %v2420_v57 = vsub.f32 %v4593_v53, %v4605_v48  ;;  %2972 = vmatprep.subr.mxu0 %v4607_v62 }
 0x30a   : > { %2973 = vmatpush3.msra.mxu0 %v4607_v62 }
 0x30b   : > { %2992 = vmatprep.subr.mxu0 %v4550_v61 }
 0x38e   : > { %v2220_v3 = vpop.xlane.xlu1 %2219 }
 0x38f   : > { %v2908_v6 = vmul.f32 -1.442695, %v2220_v3  ;;  %v4616_v3 = vsub.f32 %v2272_v22, %v4607_v62 }
 0x391   : > { %3065 = vpow2.f32 %v2908_v6  ;;  %v4620_v6 = vand.u32 4294901760, %v4610_v33 }
 0x392   : > { %v2222_v46 = vpop.xlane.xlu1 %2221 }
 0x393   : > { %v2909_v12 = vmul.f32 -1.442695, %v2222_v46  ;;  %v2421_v46 = vand.u32 4294901760, %v2420_v57 }
 0x395   : > { %3067 = vpow2.f32 %v2909_v12  ;;  %v4624_v12 = vand.u32 4294901760, %v4616_v3 }
 0x39e   : > { %v3066_v16 = vpop.eup %3065 }
 0x39f   : > { %v2229_v43 = vadd.f32 1.0, %v3066_v16  ;;  %v2427_v16 = vsub.f32 %v4610_v33, %v4620_v6 }
 0x3a1   : > { %3069 = vrcp.f32 %v2229_v43  ;;  %v2434_v43 = vsub.f32 %v4616_v3, %v4624_v12 }
 0x3a2   : > { %v3068_v23 = vpop.eup %3067 }
 0x3a3   : > { %v2230_v36 = vadd.f32 1.0, %v3068_v23  ;;  %v2428_v23 = vand.u32 4294901760, %v2427_v16 }
 0x3a5   : > { %3071 = vrcp.f32 %v2230_v36  ;;  %v2435_v36 = vand.u32 4294901760, %v2434_v43 }
 0x3ae   : > { %v3070_v8 = vpop.eup %3069 }
 0x3af   : > { %v2235_v10 = vmul.f32 0.3, %v3070_v8  ;;  %v1250_v8 = vpop.xlane.xlu0 %1249 }
 0x3b0   : > { %v1253_v31 = vmax.f32 %v1250_v8, 1e-24 }
 0x3b1   : > { %v2237_v34 = vadd.f32 0.5, %v2235_v10 }
 0x3b2   : > { %v3072_v58 = vpop.eup %3071 }
 0x3b3   : > { %v2239_v20 = vsub.f32 %v2186_v35, %v2237_v34  ;;  %v2236_v1 = vmul.f32 0.3, %v3072_v58  ;;  %v2406_v35 = vsub.f32 %v4563_v30, %v4575_v52  ;;  %v1252_v10 = vpop.xlane.xlu0 %1251 }
 0x3b4   : > { %v1254_v34 = vmax.f32 %v1252_v10, 1e-24 }
 0x3b5   : > { %v2910_v21 = vmul.f32 -50.0, %v2239_v20  ;;  %v2238_v44 = vadd.f32 0.5, %v2236_v1  ;;  %v2407_v7 = vand.u32 4294901760, %v2406_v35 }
 0x3b7   : > { %v2245_v26 = vmul.f32 1.442695, %v2910_v21  ;;  %v2240_v59 = vsub.f32 %v2193_v4, %v2238_v44  ;;  %2979 = vmatprep.subr.mxu1 %v2407_v7  ;;  %v5016_v21 = vld [vmem:[#allocation3_spill] sm:$0xff] }
 0x3b8   : > { %2980 = vmatpush3.msra.mxu1 %v2407_v7  ;;  %v1107_v44 = vadd.f32 %v4525_v38, %v5016_v21 }
 0x3b9   : > { %3073 = vpow2.f32 %v2245_v26  ;;  %v2911_v32 = vmul.f32 -50.0, %v2240_v59  ;;  %2981 = vmatprep.subr.mxu1 %v2414_v0  ;;  %v5017_v26 = vld [vmem:[#allocation4_spill] sm:$0xff] }
 0x3ba   : > { %2982 = vmatpush3.msra.mxu1 %v2414_v0 }
 0x3bb   : > { %v2247_v39 = vmul.f32 1.442695, %v2911_v32  ;;  %2983 = vmatprep.subr.mxu1 %v2421_v46 }
 0x3bc   : > { %2984 = vmatpush3.msra.mxu1 %v2421_v46 }
 0x3bd   : > { %3075 = vpow2.f32 %v2247_v39  ;;  %2985 = vmatprep.subr.mxu1 %v2428_v23 }
 0x3be   : > { %2986 = vmatpush3.msra.mxu1 %v2428_v23 }
 0x3bf   : > { %2987 = vmatprep.subr.mxu1 %v2435_v36 }
 0x3c0   : > { %2988 = vmatpush3.msra.mxu1 %v2435_v36 }
 0x3c1   : > { %3007 = vmatprep.subr.mxu1 %v4544_v55 }
 0x3c6   : > { %v3074_v41 = vpop.eup %3073 }
 0x3c7   : > { %v2249_v40 = vadd.f32 1.0, %v3074_v41  ;;  %v1218_v41 = vadd.f32 %v4523_v5, %v1107_v44 }
 0x3c9   : > { %3077 = vrcp.f32 %v2249_v40 }
 0x3ca   : > { %v3076_v18 = vpop.eup %3075 }
 0x3cb   : > { %v2250_v25 = vadd.f32 1.0, %v3076_v18 }
 0x3cd   : > { %3079 = vrcp.f32 %v2250_v25 }
 0x3ce   : > { %3081 = vrsqrt.f32 %v1253_v31 }
 0x3d6   : > { %v4533_v17 = vpop.eup %3077 }
 0x3d7   : > { %v2255_v19 = vand.u32 2147483647, %v4533_v17 }
 0x3d9   : > { %v2258_v50 = vsel %vm2257_vm4, %v2255_v19, 0.0 }
 0x3da   : > { %v4537_v60 = vpop.eup %3079  ;;  %2259 = vadd.xlane.f32.xlu1 %v2258_v50 }
 0x3db   : > { %v2256_v15 = vand.u32 2147483647, %v4537_v60  ;;  %v3082_v29 = vpop.eup %3081 }
 0x3dc   : > { %v1257_v59 = vmul.f32 %v3082_v29, %v5017_v26 }
 0x3dd   : > { %v2261_v9 = vsel %vm2257_vm4, %v2256_v15, 0.0 }
 0x3de   : > { %2262 = vadd.xlane.f32.xlu1 %v2261_v9 }
 0x463   : > { %v2260_v13 = vpop.xlane.xlu1 %2259 }
 0x464   : > { %v2264_v58 = vmax.f32 %v2260_v13, 1e-12 }
 0x466   : > { %3083 = vrcp.f32 %v2264_v58 }
 0x467   : > { %v2263_v20 = vpop.xlane.xlu1 %2262  ;;  %3085 = vrsqrt.f32 %v1254_v34 }
 0x468   : > { %v2265_v1 = vmax.f32 %v2263_v20, 1e-12 }
 0x46a   : > { %3087 = vrcp.f32 %v2265_v1 }
 0x473   : > { %v3084_v4 = vpop.eup %3083 }
 0x474   : > { %v2268_v32 = vmul.f32 %v3084_v4, %v4533_v17  ;;  %v3086_v39 = vpop.eup %3085 }
 0x475   : > { %v1258_v25 = vmul.f32 %v3086_v39, %v1218_v41 }
 0x476   : > { %v2270_v40 = vmul.f32 %v2268_v32, %v1257_v59 }
 0x477   : > { %v3088_v18 = vpop.eup %3087 }
 0x478   : > { %v2269_v19 = vmul.f32 %v3088_v18, %v4537_v60  ;;  %v2279_v50 = vsel %vm2257_vm4, %v2270_v40, 0 }
 0x479   : > { %v2355_v15 = vand.u32 4294901760, %v2279_v50 }
 0x47a   : > { %v2271_v9 = vmul.f32 %v2269_v19, %v1258_v25 }
 0x47b   : > { %2989 = vmatprep.mubr.f32.mxu1 %v2355_v15  ;;  %v2356_v11 = vsub.f32 %v2279_v50, %v2355_v15 }
 0x47c   : > { %v2282_v38 = vsel %vm2257_vm4, %v2271_v9, 0 }
 0x47d   : > { %v4641_v42 = vand.u32 4294901760, %v2282_v38  ;;  %v2357_v54 = vand.u32 4294901760, %v2356_v11 }
 0x47f   : > { %v2366_v17 = vsub.f32 %v2282_v38, %v4641_v42  ;;  %2990 = vmatmul.mubr.f32.vlgmr.msra.gmra.mxu1 %v4641_v42  ;;  %v2358_v5 = vsub.f32 %v2356_v11, %v2357_v54 }
 0x480   : > { %3008 = vmatpush3.msra.mxu1 %v4544_v55  ;;  %3019 = vmatprep.mubr.f32.mxu1 %v2357_v54 }
 0x481   : > { %3009 = vmatprep.subr.mxu1 %v4552_v37  ;;  %v2359_v60 = vand.u32 4294901760, %v2358_v5  ;;  %v2367_v56 = vand.u32 4294901760, %v2366_v17 }
 0x482   : > { %3010 = vmatpush3.msra.mxu1 %v4552_v37 }
 0x483   : > { %3011 = vmatprep.subr.mxu1 %v4565_v14  ;;  %2974 = vmatprep.mubr.f32.mxu0 %v2359_v60  ;;  %v2368_v63 = vsub.f32 %v2366_v17, %v2367_v56 }
 0x484   : > { %3012 = vmatpush3.msra.mxu1 %v4565_v14 }
 0x485   : > { %3013 = vmatprep.subr.mxu1 %v4580_v45  ;;  %v2369_v27 = vand.u32 4294901760, %v2368_v63 }
 0x486   : > { %3014 = vmatpush3.msra.mxu1 %v4580_v45 }
 0x487   : > { %3015 = vmatprep.subr.mxu1 %v4596_v51  ;;  %2975 = vmatmul.mubr.f32.vlgmr.msra.gmra.mxu0 %v2369_v27 }
 0x488   : > { %2993 = vmatpush3.msra.mxu0 %v4550_v61  ;;  %3016 = vmatpush3.msra.mxu1 %v4596_v51 }
 0x489   : > { %2994 = vmatprep.subr.mxu0 %v4563_v30  ;;  %3004 = vmatprep.mubr.f32.mxu0 %v2356_v11 }
 0x48a   : > { %3017 = vmatprep.subr.mxu1 %v4607_v62  ;;  %2995 = vmatpush3.msra.mxu0 %v4563_v30 }
 0x48b   : > { %3018 = vmatpush3.msra.mxu1 %v4607_v62  ;;  %2996 = vmatprep.subr.mxu0 %v4578_v2 }
 0x48c   : > { %3020 = vmatmul.mubr.f32.vlgmr.msra.gmra.mxu1 %v2367_v56  ;;  %3037 = vmatprep.subr.mxu1 %v4544_v55 }
 0x48d   : > { %2997 = vmatpush3.msra.mxu0 %v4578_v2  ;;  %3038 = vmatpush3.msra.mxu1 %v4544_v55 }
 0x48e   : > { %3049 = vmatprep.mubr.f32.mxu1 %v2355_v15  ;;  %2998 = vmatprep.subr.mxu0 %v4593_v53 }
 0x48f   : > { %3039 = vmatprep.subr.mxu1 %v4552_v37  ;;  %2999 = vmatpush3.msra.mxu0 %v4593_v53 }
 0x490   : > { %3040 = vmatpush3.msra.mxu1 %v4552_v37  ;;  %3000 = vmatprep.subr.mxu0 %v4610_v33 }
 0x491   : > { %3041 = vmatprep.subr.mxu1 %v4565_v14  ;;  %3001 = vmatpush3.msra.mxu0 %v4610_v33 }
 0x492   : > { %3042 = vmatpush3.msra.mxu1 %v4565_v14  ;;  %3002 = vmatprep.subr.mxu0 %v4616_v3 }
 0x493   : > { %3043 = vmatprep.subr.mxu1 %v4580_v45  ;;  %3003 = vmatpush3.msra.mxu0 %v4616_v3 }
 0x494   : > { %3044 = vmatpush3.msra.mxu1 %v4580_v45  ;;  %3005 = vmatmul.mubr.f32.vlgmr.msra.gmra.mxu0 %v2366_v17 }
 0x495   : > { %3022 = vmatprep.subr.mxu0 %v4560_v28  ;;  %3045 = vmatprep.subr.mxu1 %v4596_v51 }
 0x496   : > { %3023 = vmatpush3.msra.mxu0 %v4560_v28  ;;  %3034 = vmatprep.mubr.f32.mxu0 %v2355_v15 }
 0x497   : > { %3046 = vmatpush3.msra.mxu1 %v4596_v51  ;;  %3024 = vmatprep.subr.mxu0 %v4575_v52 }
 0x498   : > { %3047 = vmatprep.subr.mxu1 %v4607_v62  ;;  %3025 = vmatpush3.msra.mxu0 %v4575_v52 }
 0x499   : > { %3048 = vmatpush3.msra.mxu1 %v4607_v62  ;;  %3026 = vmatprep.subr.mxu0 %v4590_v49 }
 0x49a   : > { %3050 = vmatmul.mubr.f32.vlgmr.msra.gmra.mxu1 %v4641_v42  ;;  %3027 = vmatpush3.msra.mxu0 %v4590_v49 }
 0x49b   : > { %3028 = vmatprep.subr.mxu0 %v4605_v48 }
 0x49c   : > { %3029 = vmatpush3.msra.mxu0 %v4605_v48 }
 0x49d   : > { %3030 = vmatprep.subr.mxu0 %v4620_v6 }
 0x49e   : > { %3031 = vmatpush3.msra.mxu0 %v4620_v6 }
 0x49f   : > { %3032 = vmatprep.subr.mxu0 %v4624_v12 }
 0x4a0   : > { %3033 = vmatpush3.msra.mxu0 %v4624_v12 }
 0x4a1   : > { %3035 = vmatmul.mubr.f32.vlgmr.msra.gmra.mxu0 %v4641_v42 }
 0x53f   : > { %v2991_v61 = vpop.f32.mrf.mxu1 }
 0x541   : > { %v2472_v30 = vpop.f32.mrf.mxu1 }
 0x547   : > { %v2976_v55 = vpop.f32.mrf.mxu0 }
 0x548   : > { %v2479_v14 = vadd.f32 %v2991_v61, %v2976_v55 }
 0x549   : > { %v2361_v37 = vpop.f32.mrf.mxu0 }
 0x54a   : > { %v2473_v45 = vadd.f32 %v2472_v30, %v2361_v37 }
 0x54c   : > { %v3021_v52 = vpop.f32.mrf.mxu1 }
 0x54e   : > { %v2648_v49 = vpop.f32.mrf.mxu1 }
 0x554   : > { %v3006_v28 = vpop.f32.mrf.mxu0 }
 0x555   : > { %v2570_v24 = vadd.f32 %v3006_v28, %v2479_v14 }
 0x556   : > { %v2562_v2 = vpop.f32.mrf.mxu0 }
 0x557   : > { %v2563_v35 = vadd.f32 %v2562_v2, %v2473_v45  ;;  %v2657_v51 = vadd.f32 %v3021_v52, %v2570_v24 }
 0x559   : > { %v2649_v7 = vadd.f32 %v2648_v49, %v2563_v35 }
 0x55a   : > { %v3051_v53 = vpop.f32.mrf.mxu1 }
 0x55c   : > { %v2828_v33 = vpop.f32.mrf.mxu1 }
 0x561   : > { %v3036_v22 = vpop.f32.mrf.mxu0 }
 0x562   : > { %v2752_v47 = vadd.f32 %v3036_v22, %v2657_v51 }
 0x563   : > { %v2745_v48 = vpop.f32.mrf.mxu0 }
 0x564   : > { %v2746_v62 = vadd.f32 %v2745_v48, %v2649_v7  ;;  %v2835_v57 = vadd.f32 %v3051_v53, %v2752_v47 }
 0x566   : > { %v2829_v0 = vadd.f32 %v2828_v33, %v2746_v62  ;;  %2839 = vst [vmem:[%s280_s12 + $0x8] sm:$0xff] %v2835_v57 }
 0x568   : > { %2838 = vst [vmem:[%s280_s12] sm:$0xff] %v2829_v0 }
 0x569 PF: > { %s17_s24 = sadd.s32 1, %s3095_s24  }
 0x56a   : > { %p14_p4 = scmp.ge.s32.totalorder %s17_s24, 4  }
 0x56c   :  { %16 = sbr.rel (!%p14_p4) target bundleno = 1 (0x1), region = 78 }

</bundles_post_ra>
